<compile_context>
chip_gen: v5e
topology: v5e:2x2
jax: 0.10.0
libtpu: 0.0.40
codegen_flags: <defaults>
</compile_context>

<pallas_src>
import math

import jax
import jax.numpy as jnp
from jax import lax
from jax.experimental import pallas as pl
from jax.experimental.pallas import tpu as pltpu


def _make_attn_kernel(scale2):
    """scale2 = (1/ch**0.25)**2 == 1/sqrt(ch); folded into q only."""

    def attn_kernel(q_ref, k_ref, v_ref, o_ref):
        # q_ref, k_ref, v_ref, o_ref: [G, C, T] tiles (G heads per grid step).
        q = q_ref[...] * scale2          # single scale pass, keeps input dtype
        k = k_ref[...]
        v = v_ref[...]

        # scores[g, t, s] = sum_c q[g, c, t] * k[g, c, s]
        # Batched dot_general (batch g, contract c): no materialized q.T value.
        w = lax.dot_general(
            q, k, (((1,), (1,)), ((0,), (0,))),
            preferred_element_type=jnp.float32)          # [G, T, T] f32

        # Numerically-stable softmax over the last axis, in float32 (as torch).
        w = w - jnp.max(w, axis=-1, keepdims=True)
        w = jnp.exp(w)
        denom = jnp.sum(w, axis=-1, keepdims=True)       # [G, T, 1]
        r = pl.reciprocal(denom, approx=True)            # EUP slot, ~free
        r = r * (2.0 - denom * r)                        # one Newton step -> ~exact
        w = (w * r).astype(v.dtype)                      # cast back like reference

        # out[g, c, t] = sum_s v[g, c, s] * w[g, t, s]
        # NT contraction on the MXU: the [T, T] weight tensor is never transposed.
        a = lax.dot_general(
            v, w, (((2,), (2,)), ((0,), (0,))),
            preferred_element_type=jnp.float32)          # [G, C, T] f32
        o_ref[...] = a.astype(o_ref.dtype)

    return attn_kernel


def _pick_head_group(n_heads, ch, seq, itemsize, budget_bytes):
    """Largest divisor G of n_heads whose per-step VMEM footprint fits budget."""

    def est(g):
        blocks = 2 * 4 * g * ch * seq * itemsize   # 3 inputs + 1 output, double-buffered
        scores = 2 * g * seq * seq * 4             # f32 scores + exp live copies
        return blocks + scores

    g = n_heads
    while g > 1 and (n_heads % g != 0 or est(g) > budget_bytes):
        g -= 1
    return g


def qkv_attention(qkv, n_heads):
    """Pallas equivalent of QKVAttention.forward.

    qkv: [N, 3*H*C, T] -> returns [N, H*C, T]
    """
    N, width, T = qkv.shape
    assert width % (3 * n_heads) == 0
    ch = width // (3 * n_heads)
    scale = 1.0 / math.sqrt(math.sqrt(ch))
    scale2 = scale * scale
    itemsize = jnp.dtype(qkv.dtype).itemsize

    # Free metadata reshape; width axis of this module is ordered (3, H, C).
    qkv_r = qkv.reshape(N, 3, n_heads, ch, T)

    vmem_limit = 32 * 1024 * 1024  # safe on v5e/v6e (128 MiB) and v7x (64 MiB)
    G = _pick_head_group(n_heads, ch, T, itemsize, budget_bytes=vmem_limit // 3)
    # TODO(synk): for very long T (>= ~2048) replace the [G, T, T] score tile
    # with a key-axis-tiled online-softmax (flash-style) accumulator.

    def in_spec(which):
        # Same qkv array for q/k/v; only the qkv-axis index differs.
        return pl.BlockSpec(
            (None, None, G, ch, T),
            lambda n, h, w=which: (n, w, h, 0, 0))

    out_spec = pl.BlockSpec((None, G, ch, T), lambda n, h: (n, h, 0, 0))

    B = N * n_heads
    cost = pl.CostEstimate(
        flops=4 * B * ch * T * T,                 # two matmuls
        transcendentals=B * T * T,                # exp
        bytes_accessed=4 * B * ch * T * itemsize, # read qkv once + write out
    )

    out = pl.pallas_call(
        _make_attn_kernel(scale2),
        out_shape=jax.ShapeDtypeStruct((N, n_heads, ch, T), qkv.dtype),
        grid_spec=pltpu.PrefetchScalarGridSpec(
            num_scalar_prefetch=0,
            grid=(N, n_heads // G),
            in_specs=[in_spec(0), in_spec(1), in_spec(2)],
            out_specs=out_spec,
        ),
        compiler_params=pltpu.CompilerParams(
            dimension_semantics=("parallel", "parallel"),
            vmem_limit_bytes=vmem_limit,
        ),
        cost_estimate=cost,
    )(qkv_r, qkv_r, qkv_r)

    return out.reshape(N, n_heads * ch, T)


def qkv_attention_ref(qkv, n_heads):
    """Pure-JAX reference mirroring the PyTorch forward exactly."""
    N, width, T = qkv.shape
    ch = width // (3 * n_heads)
    scale = 1.0 / math.sqrt(math.sqrt(ch))
    qkv_r = qkv.reshape(N, 3, n_heads, ch, T)
    q = qkv_r[:, 0].reshape(N * n_heads, ch, T)
    k = qkv_r[:, 1].reshape(N * n_heads, ch, T)
    v = qkv_r[:, 2].reshape(N * n_heads, ch, T)
    w = jnp.einsum("bct,bcs->bts", q * scale, k * scale)
    w = jax.nn.softmax(w.astype(jnp.float32), axis=-1).astype(qkv.dtype)
    a = jnp.einsum("bts,bcs->bct", w, v)
    return a.reshape(N, -1, T)


if __name__ == "__main__":
    # Small but lane/sublane-friendly shapes consistent with the classifier's
    # attention blocks: N=2 images, H=4 heads, C=64 channels/head, T=256 (16x16).
    N, H, C, T = 2, 4, 64, 256
    key = jax.random.PRNGKey(0)
    qkv = jax.random.normal(key, (N, 3 * H * C, T), dtype=jnp.float32)

    out = jax.block_until_ready(qkv_attention(qkv, n_heads=H))
    ref = qkv_attention_ref(qkv, n_heads=H)

    assert out.shape == (N, H * C, T)
    assert jnp.allclose(out, ref, atol=1e-4, rtol=1e-4), float(
        jnp.max(jnp.abs(out - ref)))

    print("KERNEL_OK")
</pallas_src>

<mosaic_0001>
module attributes {stable_mosaic.version = 11 : i64} {
  func.func @attn_kernel(%arg0: i32, %arg1: i32, %arg2: memref<1x1x4x64x256xf32, #tpu.memory_space<vmem>>, %arg3: memref<1x1x4x64x256xf32, #tpu.memory_space<vmem>>, %arg4: memref<1x1x4x64x256xf32, #tpu.memory_space<vmem>>, %arg5: memref<1x4x64x256xf32, #tpu.memory_space<vmem>>) attributes {dimension_semantics = [#tpu.dimension_semantics<parallel>, #tpu.dimension_semantics<parallel>], iteration_bounds = array<i64: 2, 1>, scalar_prefetch = 0 : i64, scratch_operands = 0 : i64, tpu.core_type = #tpu.core_type<tc>, window_params = [{transform_indices = @transform_0, window_bounds = array<i64: 1, 1, 4, 64, 256>}, {transform_indices = @transform_1, window_bounds = array<i64: 1, 1, 4, 64, 256>}, {transform_indices = @transform_2, window_bounds = array<i64: 1, 1, 4, 64, 256>}, {transform_indices = @transform_3, window_bounds = array<i64: 1, 4, 64, 256>}]} {
    %c0 = arith.constant 0 : index
    %c0_0 = arith.constant 0 : index
    %c0_1 = arith.constant 0 : index
    %c0_2 = arith.constant 0 : index
    %c0_3 = arith.constant 0 : index
    %0 = vector.load %arg2[%c0, %c0_0, %c0_1, %c0_2, %c0_3] : memref<1x1x4x64x256xf32, #tpu.memory_space<vmem>>, vector<1x1x4x64x256xf32>
    %1 = vector.shape_cast %0 : vector<1x1x4x64x256xf32> to vector<4x64x256xf32>
    %cst = arith.constant 1.250000e-01 : f32
    %2 = vector.broadcast %cst : f32 to vector<4x64x256xf32>
    %3 = arith.mulf %1, %2 : vector<4x64x256xf32>
    %c0_4 = arith.constant 0 : index
    %c0_5 = arith.constant 0 : index
    %c0_6 = arith.constant 0 : index
    %c0_7 = arith.constant 0 : index
    %c0_8 = arith.constant 0 : index
    %4 = vector.load %arg3[%c0_4, %c0_5, %c0_6, %c0_7, %c0_8] : memref<1x1x4x64x256xf32, #tpu.memory_space<vmem>>, vector<1x1x4x64x256xf32>
    %5 = vector.shape_cast %4 : vector<1x1x4x64x256xf32> to vector<4x64x256xf32>
    %c0_9 = arith.constant 0 : index
    %c0_10 = arith.constant 0 : index
    %c0_11 = arith.constant 0 : index
    %c0_12 = arith.constant 0 : index
    %c0_13 = arith.constant 0 : index
    %6 = vector.load %arg4[%c0_9, %c0_10, %c0_11, %c0_12, %c0_13] : memref<1x1x4x64x256xf32, #tpu.memory_space<vmem>>, vector<1x1x4x64x256xf32>
    %7 = vector.shape_cast %6 : vector<1x1x4x64x256xf32> to vector<4x64x256xf32>
    %cst_14 = arith.constant dense<0.000000e+00> : vector<4x256x256xf32>
    %8 = tpu.matmul %3, %5, %cst_14 {dimension_numbers = #tpu.dot_dimension_numbers<[1], [1], [2], [2], [0, 0, 0, 2, 1, 2], [0], [0]>} : vector<4x64x256xf32>, vector<4x64x256xf32>, vector<4x256x256xf32> -> vector<4x256x256xf32>
    %cst_15 = arith.constant dense<0xFF800000> : vector<4x256xf32>
    %9 = vector.multi_reduction <maximumf>, %8, %cst_15 [2] : vector<4x256x256xf32> to vector<4x256xf32>
    %10 = vector.shape_cast %9 : vector<4x256xf32> to vector<4x256x1xf32>
    %11 = vector.broadcast %10 : vector<4x256x1xf32> to vector<4x256x256xf32>
    %12 = arith.subf %8, %11 : vector<4x256x256xf32>
    %13 = math.exp %12 : vector<4x256x256xf32>
    %cst_16 = arith.constant dense<0.000000e+00> : vector<4x256xf32>
    %14 = vector.multi_reduction <add>, %13, %cst_16 [2] : vector<4x256x256xf32> to vector<4x256xf32>
    %15 = vector.shape_cast %14 : vector<4x256xf32> to vector<4x256x1xf32>
    %16 = tpu.reciprocal %15 {approx = true} : vector<4x256x1xf32> -> vector<4x256x1xf32>
    %17 = arith.mulf %15, %16 : vector<4x256x1xf32>
    %cst_17 = arith.constant 2.000000e+00 : f32
    %18 = vector.broadcast %cst_17 : f32 to vector<4x256x1xf32>
    %19 = arith.subf %18, %17 : vector<4x256x1xf32>
    %20 = arith.mulf %16, %19 : vector<4x256x1xf32>
    %21 = vector.broadcast %20 : vector<4x256x1xf32> to vector<4x256x256xf32>
    %22 = arith.mulf %13, %21 : vector<4x256x256xf32>
    %cst_18 = arith.constant dense<0.000000e+00> : vector<4x64x256xf32>
    %23 = tpu.matmul %7, %22, %cst_18 {dimension_numbers = #tpu.dot_dimension_numbers<[2], [2], [1], [1], [0, 0, 0, 1, 1, 1], [0], [0]>} : vector<4x64x256xf32>, vector<4x256x256xf32>, vector<4x64x256xf32> -> vector<4x64x256xf32>
    %c0_19 = arith.constant 0 : index
    %c0_20 = arith.constant 0 : index
    %c0_21 = arith.constant 0 : index
    %c0_22 = arith.constant 0 : index
    %24 = vector.load %arg5[%c0_19, %c0_20, %c0_21, %c0_22] : memref<1x4x64x256xf32, #tpu.memory_space<vmem>>, vector<1x4x64x256xf32>
    %25 = vector.shape_cast %24 : vector<1x4x64x256xf32> to vector<4x64x256xf32>
    %26 = vector.shape_cast %23 : vector<4x64x256xf32> to vector<1x4x64x256xf32>
    tpu.vector_store %arg5[%c0_19, %c0_20, %c0_21, %c0_22], %26 {strides = array<i32>} : memref<1x4x64x256xf32, #tpu.memory_space<vmem>>, vector<1x4x64x256xf32>,
    return
  }
  func.func @transform_0(%arg0: i32, %arg1: i32) -> (i32, i32, i32, i32, i32) {
    %c0_i32 = arith.constant 0 : i32
    %c0_i32_0 = arith.constant 0 : i32
    %c0_i32_1 = arith.constant 0 : i32
    %c0_i32_2 = arith.constant 0 : i32
    return %arg0, %c0_i32, %arg1, %c0_i32_0, %c0_i32_1 : i32, i32, i32, i32, i32
  }
  func.func @transform_1(%arg0: i32, %arg1: i32) -> (i32, i32, i32, i32, i32) {
    %c1_i32 = arith.constant 1 : i32
    %c0_i32 = arith.constant 0 : i32
    %c0_i32_0 = arith.constant 0 : i32
    %c0_i32_1 = arith.constant 0 : i32
    return %arg0, %c1_i32, %arg1, %c0_i32, %c0_i32_0 : i32, i32, i32, i32, i32
  }
  func.func @transform_2(%arg0: i32, %arg1: i32) -> (i32, i32, i32, i32, i32) {
    %c2_i32 = arith.constant 2 : i32
    %c0_i32 = arith.constant 0 : i32
    %c0_i32_0 = arith.constant 0 : i32
    %c0_i32_1 = arith.constant 0 : i32
    return %arg0, %c2_i32, %arg1, %c0_i32, %c0_i32_0 : i32, i32, i32, i32, i32
  }
  func.func @transform_3(%arg0: i32, %arg1: i32) -> (i32, i32, i32, i32) {
    %c0_i32 = arith.constant 0 : i32
    %c0_i32_0 = arith.constant 0 : i32
    %c0_i32_1 = arith.constant 0 : i32
    return %arg0, %arg1, %c0_i32, %c0_i32_0 : i32, i32, i32, i32
  }
}

</mosaic_0001>

<bundles_post_ra>
// kernel: tpu_custom_call.1
= control target key start
LH: loop header
LB: loop body
LE: loop exit
PB: predicated region body
PF: predicated region fallthrough
CT: control target
= control target key end

     0   :  { %s9995_s0 = inlined_call_operand.hbm [shape: f32[2,3,4,64,256], index: 0, kind: input, shape index: {}]   ;;  %s9996_s1 = inlined_call_operand.hbm [shape: f32[2,3,4,64,256], index: 1, kind: input, shape index: {}]   ;;  %s9997_s2 = inlined_call_operand.hbm [shape: f32[2,3,4,64,256], index: 2, kind: input, shape index: {}]   ;;  %s9998_s3 = inlined_call_operand.hbm [shape: f32[2,4,64,256], index: 3, kind: output, shape index: {}]  }
   0x1   :  { %10460 = sst [smem:[#allocation261_spill]] %s9996_s1 }
   0x2   :  { %8 = vsyncpa [#allocation3], 0 }
   0x3   :  { %10 = vsyncpa [#allocation3 + $0x1], 0 }
   0x4   :  { %11 = vsyncpa [#allocation6], 0 }
   0x5   :  { %13 = vsyncpa [#allocation6 + $0x1], 0 }
   0x6   :  { %14 = vsyncpa [#allocation4], 0 }
   0x7   :  { %16 = vsyncpa [#allocation4 + $0x1], 0  ;;  %s6614_s12 = smov 0   ;;  %s6616_s13 = smov 0  }
   0x8   :  { %s6618_s14 = smov 0   ;;  %s6620_s15 = smov 0  }
   0x9   :  { %s6622_s16 = smov 0   ;;  %s6624_s17 = smov 0  }
   0xa LB: > { %10461 = sst [smem:[#allocation12_spill]] %s6576_s14  ;;  %s6645_s18 = sadd.s32 4294967295, %s6588_s17   ;;  %s6588_s17 = sphi %s6624_s17, %s22_s17   ;;  %s6584_s16 = sphi %s6622_s16, %s11422_s16   ;;  %s6580_s15 = sphi %s6620_s15, %s11421_s15   ;;  %s6576_s14 = sphi %s6618_s14, %s11425_s14   ;;  %s6572_s13 = sphi %s6616_s13, %s11424_s13   ;;  %s6568_s12 = sphi %s6614_s12, %s11423_s12  }
   0xb   : > { %10462 = sst [smem:[#allocation13_spill]] %s6584_s16  ;;  %s5290_s19 = sadd.s32 4294967294, %s6588_s17  }
   0xc   : > { %10463 = sst [smem:[#allocation14_spill]] %s6588_s17  ;;  %s34_s20 = sadd.s32 1, %s6584_s16 }
   0xd   : > { %s43_s21 = sadd.s32 1, %s6576_s14  ;;  %p36_p0 = scmp.ge.s32.totalorder %s34_s20, 2 }
   0xe   : > { %p50_p1 = scmp.ne.s32.totalorder %s6576_s14, %s6572_s13  ;;  %p51_p2 = scmp.eq.s32.totalorder %s6588_s17, 0 }
   0xf   : > { %p56_p3 = scmp.ne.s32.totalorder %s6572_s13, %s6568_s12  ;;  %s11427_s20 = smov (%p36_p0, %s34_s20), 0 }
  0x10   : > { %10464 = sst [smem:[#allocation15_spill]] %s11427_s20  ;;  %p6657_p4 = por %p51_p2, %p50_p1 }
  0x11   : > { %p57_p5 = scmp.eq.s32.totalorder %s6645_s18, 0  ;;  %s38_s23 = ssub.s32 %s6584_s16, %s11427_s20 }
  0x12   : > { %p138_p6 = scmp.eq.s32.totalorder %s6645_s18, 1  ;;  %p41_p7 = scmp.eq.s32.totalorder %s38_s23, 0 }
  0x13   : > { %p6665_p8 = por %p57_p5, %p56_p3  ;;  %p144_p10 = scmp.eq.s32.totalorder %s5290_s19, 1 }
  0x14   : > { %p6669_p9 = por %p138_p6, %p50_p1  ;;  %p5292_p12 = scmp.ge.s32.totalorder %s6588_s17, 2 }
  0x15   : > { %s6674_s26 = scalar_select %p41_p7, %s6576_s14, %s43_s21  }
  0x16   : > { %p6676_p11 = por %p144_p10, %p56_p3  ;;  %p5589_p13 = scmp.lt.s32.totalorder %s6588_s17, 2 }
  0x17   : > { %10468 = sst [smem:[#allocation16_spill]] %s6674_s26  ;;  %s164_s28 = sand.u32 1, %s6576_s14  }
  0x18   : > { %s10469_s27 = scalar_select %p6676_p11, 1, 0 }
  0x19   : > { %s6683_s29 = sshll.u32 %s164_s28, 9  ;;  %s6686_s30 = smul.u32 1536, %s6584_s16 }
  0x1a   : > { %10470 = sst [smem:[#allocation17_spill]] %s10469_s27  ;;  %p6690_p0 = pnand %p5589_p13, %p6657_p4 }
  0x1b   : > { %s189_s5 = sand.u32 1, %s6588_s17   ;;  %s10472_s1 = sld [smem:[#allocation261_spill]] }
  0x1c   : > { %s193_s10 = scalar_lea.vmem [#allocation5], %s6683_s29  ;;  %p5299_p1 = scmp.ge.s32.totalorder %s6588_s17, 1 }
  0x1d   : > { %s205_s11 = sshll.u32 %s193_s10, 4  ;;  %s190_s21 = scalar_lea.sflag [#allocation6], %s189_s5  ;;  %s206_s11 = int_to_ptr.vmem [resolvable:$true] %s205_s11 }
  0x1e   : > { %s6590_s22 = smov 256   ;;  %s6591_s23 = smov 16  }
  0x1f   : > { %p239_p2 = scmp.lt.s32.totalorder %s6588_s17, 3  ;;  %s168_s10 = scalar_lea.vmem [#allocation2], %s6683_s29 }
  0x20   : > { %s165_s5 = scalar_lea.sflag [#allocation3], %s164_s28  ;;  %s219_s26 = scalar_lea.vmem [#allocation7], %s6683_s29 }
  0x21   : > { %s5196_s8 = scalar_lea.hbm %s10472_s1, %s6686_s30  ;;  %p6704_p3 = pnand %p5299_p1, %p239_p2 }
  0x22   : > { %s5197_s9 = scalar_lea.hbm %s5196_s8, 512  ;;  %s179_s1 = sshll.u32 %s168_s10, 4  ;;  %s180_s1 = int_to_ptr.vmem [resolvable:$true] %s179_s1 }
  0x23   : > { %s203_s19 = sshll.u32 %s5197_s9, 4  ;;  %s176_s9 = scalar_lea.hbm %s9995_s0, %s6686_s30  ;;  %s204_s19 = int_to_ptr.hbm [resolvable:$true] %s203_s19 }
  0x24   : > { %5581 = dma.hbm_to_vmem [thread:$0]  (!%p6690_p0), %s204_s19, 8192, %s206_s11, %s190_s21, %s6590_s22, %s6590_s22, %s6591_s23  }
  0x25   : > { %s177_s20 = sshll.u32 %s176_s9, 4  ;;  %s5205_s19 = scalar_lea.hbm %s9997_s2, %s6686_s30  ;;  %s178_s20 = int_to_ptr.hbm [resolvable:$true] %s177_s20 }
  0x26   : > { %5578 = dma.hbm_to_vmem [thread:$0]  (!%p6690_p0), %s178_s20, 8192, %s180_s1, %s165_s5, %s6590_s22, %s6590_s22, %s6591_s23  }
  0x27   : > { %s231_s14 = sshll.u32 %s219_s26, 4  ;;  %s5206_s17 = scalar_lea.hbm %s5205_s19, 1024  ;;  %s232_s14 = int_to_ptr.vmem [resolvable:$true] %s231_s14 }
  0x28   : > { %s229_s27 = sshll.u32 %s5206_s17, 4  ;;  %243 = sbr.rel (%p6704_p3) target bundleno = 1678 (0x68e), region = 32  ;;  %s230_s27 = int_to_ptr.hbm [resolvable:$true] %s229_s27 }
  0x29   : > { %5584 = dma.hbm_to_vmem [thread:$0]  (!%p6690_p0), %s230_s27, 8192, %s232_s14, %s190_s21, %s6590_s22, %s6590_s22, %s6591_s23  }
  0x2d   : > { %s6725_s28 = sand.u32 1, %s6572_s13  }
  0x2e   : > { %s6728_s1 = sshll.u32 %s6725_s28, 9  ;;  %s246_s16 = scalar_lea.sflag [#allocation3], %s6725_s28 }
  0x2f   : > { %s6732_s20 = scalar_lea.vmem [#allocation2], %s6728_s1 }
  0x30   : > { %6555 = dma.done.wait (%p6665_p8), %s246_s16, 8192  }
  0x31   : > { %6557 = vsyncadd (%p6665_p8), %s246_s16, 4294959104  ;;  %s255_s14 = sand.u32 1, %s6645_s18   ;;  %s6740_s26 = scalar_lea.vmem [#allocation5], %s6728_s1 }
  0x32   : > { %s256_s17 = scalar_lea.sflag [#allocation6], %s255_s14 }
  0x33   : > { %6559 = dma.done.wait (%p6665_p8), %s256_s17, 16384  }
  0x34   : > { %6561 = vsyncadd (%p6665_p8), %s256_s17, 4294950912  ;;  %v323_v0 = vld [vmem:[%s6732_s20 + $0x80] sm:$0xff]  ;;  %v308_v1 = vld [vmem:[%s6732_s20 + $0x8] sm:$0xff]  ;;  %vm627_vm0 = vcmask 523264   ;;  %s9191_s18 = scalar_lea.vmem [#allocation7], %s6728_s1  ;;  %s9828_s24 = scalar_lea.vmem [#allocation8], %s6728_s1 }
  0x35   : > { %v307_v2 = vld [vmem:[%s6732_s20] sm:$0xff]  ;;  %v387_v3 = vmul.f32 0.125, %v323_v0  ;;  %v372_v4 = vmul.f32 0.125, %v308_v1  ;;  %v325_v6 = vld [vmem:[%s6732_s20 + $0x90] sm:$0xff]  ;;  %v310_v7 = vld [vmem:[%s6732_s20 + $0x18] sm:$0xff]  ;;  %s5565_s27 = sshll.u32 %s6580_s15, 9 }
  0x36   : > { %v371_v5 = vmul.f32 0.125, %v307_v2  ;;  %v309_v8 = vld [vmem:[%s6732_s20 + $0x10] sm:$0xff]  ;;  %v389_v9 = vmul.f32 0.125, %v325_v6  ;;  %v374_v10 = vmul.f32 0.125, %v310_v7  ;;  %v327_v12 = vld [vmem:[%s6732_s20 + $0xa0] sm:$0xff]  ;;  %v312_v13 = vld [vmem:[%s6732_s20 + $0x28] sm:$0xff]  ;;  %s5147_s4 = scalar_lea.hbm %s9998_s3, %s5565_s27 }
  0x37   : > { %950 = vxpose.xlu2.b32.start [1/8] (short) %v387_v3, 128  ;;  %595 = vxpose.xlu1.b32.start [1/8] (short) %v372_v4, 128  ;;  %v373_v11 = vmul.f32 0.125, %v309_v8  ;;  %v311_v14 = vld [vmem:[%s6732_s20 + $0x20] sm:$0xff]  ;;  %v391_v15 = vmul.f32 0.125, %v327_v12  ;;  %v376_v16 = vmul.f32 0.125, %v312_v13  ;;  %v329_v18 = vld [vmem:[%s6732_s20 + $0xb0] sm:$0xff]  ;;  %v314_v19 = vld [vmem:[%s6732_s20 + $0x38] sm:$0xff] }
  0x38   : > { %563 = vxpose.xlu0.b32.start [1/8] (short) %v371_v5, 128  ;;  %v375_v17 = vmul.f32 0.125, %v311_v14  ;;  %v313_v20 = vld [vmem:[%s6732_s20 + $0x30] sm:$0xff]  ;;  %v393_v21 = vmul.f32 0.125, %v329_v18  ;;  %v378_v22 = vmul.f32 0.125, %v314_v19  ;;  %v331_v24 = vld [vmem:[%s6732_s20 + $0xc0] sm:$0xff]  ;;  %v316_v25 = vld [vmem:[%s6732_s20 + $0x48] sm:$0xff] }
  0x39   : > { %v377_v23 = vmul.f32 0.125, %v313_v20  ;;  %v315_v26 = vld [vmem:[%s6732_s20 + $0x40] sm:$0xff]  ;;  %v395_v27 = vmul.f32 0.125, %v331_v24  ;;  %v380_v28 = vmul.f32 0.125, %v316_v25  ;;  %v333_v30 = vld [vmem:[%s6732_s20 + $0xd0] sm:$0xff]  ;;  %v318_v31 = vld [vmem:[%s6732_s20 + $0x58] sm:$0xff] }
  0x3a   : > { %v379_v29 = vmul.f32 0.125, %v315_v26  ;;  %v317_v32 = vld [vmem:[%s6732_s20 + $0x50] sm:$0xff]  ;;  %v397_v33 = vmul.f32 0.125, %v333_v30  ;;  %v382_v34 = vmul.f32 0.125, %v318_v31  ;;  %v335_v36 = vld [vmem:[%s6732_s20 + $0xe0] sm:$0xff]  ;;  %v320_v37 = vld [vmem:[%s6732_s20 + $0x68] sm:$0xff] }
  0x3b   : > { %v381_v35 = vmul.f32 0.125, %v317_v32  ;;  %v319_v38 = vld [vmem:[%s6732_s20 + $0x60] sm:$0xff]  ;;  %v399_v39 = vmul.f32 0.125, %v335_v36  ;;  %v384_v40 = vmul.f32 0.125, %v320_v37  ;;  %v337_v42 = vld [vmem:[%s6732_s20 + $0xf0] sm:$0xff]  ;;  %v322_v43 = vld [vmem:[%s6732_s20 + $0x78] sm:$0xff] }
  0x3c   : > { %v383_v41 = vmul.f32 0.125, %v319_v38  ;;  %v321_v44 = vld [vmem:[%s6732_s20 + $0x70] sm:$0xff]  ;;  %v401_v45 = vmul.f32 0.125, %v337_v42  ;;  %v386_v46 = vmul.f32 0.125, %v322_v43  ;;  %v450_v49 = vld [vmem:[%s6740_s26 + $0x78] sm:$0xff]  ;;  %v447_v52 = vld [vmem:[%s6740_s26 + $0x60] sm:$0xff] }
  0x3d   : > { %v385_v47 = vmul.f32 0.125, %v321_v44  ;;  %v449_v48 = vld [vmem:[%s6740_s26 + $0x70] sm:$0xff]  ;;  %845 = vmatpush.msra.mxu1 %v450_v49  ;;  %v466_v51 = vld [vmem:[%s6740_s26 + $0xf8] sm:$0xff]  ;;  %v448_v53 = vld [vmem:[%s6740_s26 + $0x68] sm:$0xff]  ;;  %s5148_s21 = sshll.u32 %s9828_s24, 4  ;;  %s5150_s22 = sshll.u32 %s5147_s4, 4  ;;  %s5149_s21 = int_to_ptr.vmem [resolvable:$true] %s5148_s21  ;;  %s5151_s22 = int_to_ptr.hbm [resolvable:$true] %s5150_s22 }
  0x3e   : > { %v465_v50 = vld [vmem:[%s6740_s26 + $0xf0] sm:$0xff]  ;;  %732 = vmatpush.msra.mxu0 %v449_v48  ;;  %1231 = vmatpush.msra.mxu3 %v466_v51  ;;  %v463_v54 = vld [vmem:[%s6740_s26 + $0xe0] sm:$0xff]  ;;  %v464_v55 = vld [vmem:[%s6740_s26 + $0xe8] sm:$0xff]  ;;  %s5133_s15 = scalar_lea.sflag [#allocation4], %s6725_s28  ;;  %s6516_s23 = sshra.s32 %s5151_s22, 4  ;;  %s6517_s23 = int_to_ptr.hbm [resolvable:$true] %s6516_s23 }
  0x3f   : > { %951 = vxpose.xlu2.b32.cont [2/8] (short) %v389_v9, 128  ;;  %596 = vxpose.xlu1.b32.cont [2/8] (short) %v374_v10, 128  ;;  %v340_v56 = vld [vmem:[%s6732_s20 + $0x108] sm:$0xff]  ;;  %v339_v57 = vld [vmem:[%s6732_s20 + $0x100] sm:$0xff]  ;;  %v445_v59 = vld [vmem:[%s6740_s26 + $0x50] sm:$0xff]  ;;  %s6518_s6 = scalar_lea.hbm %s6517_s23, 512  ;;  %s6522_s9 = scalar_lea.hbm %s9998_s3, 1024 }
  0x40   : > { %564 = vxpose.xlu0.b32.cont [2/8] (short) %v373_v11, 128  ;;  %1118 = vmatpush.msra.mxu2 %v465_v50  ;;  %v324_v58 = vld [vmem:[%s6732_s20 + $0x88] sm:$0xff]  ;;  %v446_v60 = vld [vmem:[%s6740_s26 + $0x58] sm:$0xff]  ;;  %v461_v61 = vld [vmem:[%s6740_s26 + $0xd0] sm:$0xff]  ;;  %v404_v4 = vmul.f32 0.125, %v340_v56  ;;  %v403_v5 = vmul.f32 0.125, %v339_v57  ;;  %p6519_p4 = scmp.ne.s32.totalorder %s6517_s23, %s6518_s6  ;;  %p6523_p7 = scmp.lt.s32.totalorder %s6517_s23, %s9998_s3 }
  0x41   : > { %733 = vmatpush.msra.mxu0 %v447_v52  ;;  %846 = vmatpush.msra.mxu1 %v448_v53  ;;  %v462_v62 = vld [vmem:[%s6740_s26 + $0xd8] sm:$0xff]  ;;  %v443_v63 = vld [vmem:[%s6740_s26 + $0x40] sm:$0xff]  ;;  %v444_v0 = vld [vmem:[%s6740_s26 + $0x48] sm:$0xff]  ;;  %v388_v9 = vmul.f32 0.125, %v324_v58  ;;  %p6524_p8 = scmp.lt.s32.totalorder %s6522_s9, %s6518_s6 }
  0x42   : > { %1119 = vmatpush.msra.mxu2 %v463_v54  ;;  %1232 = vmatpush.msra.mxu3 %v464_v55  ;;  %v459_v1 = vld [vmem:[%s6740_s26 + $0xc0] sm:$0xff]  ;;  %v460_v2 = vld [vmem:[%s6740_s26 + $0xc8] sm:$0xff]  ;;  %v441_v3 = vld [vmem:[%s6740_s26 + $0x30] sm:$0xff]  ;;  %p6520_p5 = pnand %p6519_p4, %p6669_p9 }
  0x43   : > { %734 = vmatpush.msra.mxu0 %v445_v59  ;;  %847 = vmatpush.msra.mxu1 %v446_v60  ;;  %v442_v6 = vld [vmem:[%s6740_s26 + $0x38] sm:$0xff]  ;;  %v457_v7 = vld [vmem:[%s6740_s26 + $0xb0] sm:$0xff]  ;;  %v439_v10 = vld [vmem:[%s6740_s26 + $0x20] sm:$0xff]  ;;  %p6525_p10 = por %p6524_p8, %p6523_p7 }
  0x44   : > { %1120 = vmatpush.msra.mxu2 %v461_v61  ;;  %1233 = vmatpush.msra.mxu3 %v462_v62  ;;  %v458_v8 = vld [vmem:[%s6740_s26 + $0xb8] sm:$0xff]  ;;  %v440_v11 = vld [vmem:[%s6740_s26 + $0x28] sm:$0xff]  ;;  %v455_v12 = vld [vmem:[%s6740_s26 + $0xa0] sm:$0xff]  ;;  %p6521_p6 = pneg %p6520_p5 }
  0x45   : > { %735 = vmatpush.msra.mxu0 %v443_v63  ;;  %848 = vmatpush.msra.mxu1 %v444_v0  ;;  %v342_v13 = vld [vmem:[%s6732_s20 + $0x118] sm:$0xff]  ;;  %v341_v14 = vld [vmem:[%s6732_s20 + $0x110] sm:$0xff]  ;;  %v452_v26 = vld [vmem:[%s6740_s26 + $0x88] sm:$0xff] }
  0x46   : > { %1121 = vmatpush.msra.mxu2 %v459_v1  ;;  %1234 = vmatpush.msra.mxu3 %v460_v2  ;;  %v453_v18 = vld [vmem:[%s6740_s26 + $0x90] sm:$0xff]  ;;  %v326_v19 = vld [vmem:[%s6732_s20 + $0x98] sm:$0xff]  ;;  %v406_v24 = vmul.f32 0.125, %v342_v13  ;;  %v405_v25 = vmul.f32 0.125, %v341_v14  ;;  %v344_v30 = vld [vmem:[%s6732_s20 + $0x128] sm:$0xff]  ;;  %p6526_p13 = pnand %p6525_p10, %p6521_p6 }
  0x47   : > { %952 = vxpose.xlu2.b32.cont [3/8] (short) %v391_v15, 128  ;;  %597 = vxpose.xlu1.b32.cont [3/8] (short) %v376_v16, 128  ;;  %v456_v15 = vld [vmem:[%s6740_s26 + $0xa8] sm:$0xff]  ;;  %v437_v16 = vld [vmem:[%s6740_s26 + $0x10] sm:$0xff]  ;;  %v454_v20 = vld [vmem:[%s6740_s26 + $0x98] sm:$0xff] }
  0x48   : > { %565 = vxpose.xlu0.b32.cont [3/8] (short) %v375_v17, 128  ;;  %736 = vmatpush.msra.mxu0 %v441_v3  ;;  %v438_v17 = vld [vmem:[%s6740_s26 + $0x18] sm:$0xff]  ;;  %v343_v31 = vld [vmem:[%s6732_s20 + $0x120] sm:$0xff]  ;;  %v328_v32 = vld [vmem:[%s6732_s20 + $0xa8] sm:$0xff] }
  0x49   : > { %849 = vmatpush.msra.mxu1 %v442_v6  ;;  %1122 = vmatpush.msra.mxu2 %v457_v7  ;;  %v346_v36 = vld [vmem:[%s6732_s20 + $0x138] sm:$0xff]  ;;  %v345_v37 = vld [vmem:[%s6732_s20 + $0x130] sm:$0xff]  ;;  %v348_v42 = vld [vmem:[%s6732_s20 + $0x148] sm:$0xff] }
  0x4a   : > { %1235 = vmatpush.msra.mxu3 %v458_v8  ;;  %737 = vmatpush.msra.mxu0 %v439_v10  ;;  %v330_v38 = vld [vmem:[%s6732_s20 + $0xb8] sm:$0xff]  ;;  %v347_v43 = vld [vmem:[%s6732_s20 + $0x140] sm:$0xff]  ;;  %v349_v50 = vld [vmem:[%s6732_s20 + $0x150] sm:$0xff] }
  0x4b   : > { %850 = vmatpush.msra.mxu1 %v440_v11  ;;  %1123 = vmatpush.msra.mxu2 %v455_v12  ;;  %v350_v49 = vld [vmem:[%s6732_s20 + $0x158] sm:$0xff]  ;;  %v413_v54 = vmul.f32 0.125, %v349_v50  ;;  %v479_v57 = vld [vmem:[%s6740_s26 + $0x160] sm:$0xff]  ;;  %v480_v58 = vld [vmem:[%s6740_s26 + $0x168] sm:$0xff] }
  0x4c   : > { %1236 = vmatpush.msra.mxu3 %v456_v15  ;;  %738 = vmatpush.msra.mxu0 %v437_v16  ;;  %v334_v52 = vld [vmem:[%s6732_s20 + $0xd8] sm:$0xff]  ;;  %v414_v53 = vmul.f32 0.125, %v350_v49  ;;  %v352_v60 = vld [vmem:[%s6732_s20 + $0x168] sm:$0xff]  ;;  %v351_v61 = vld [vmem:[%s6732_s20 + $0x160] sm:$0xff] }
  0x4d   : > { %851 = vmatpush.msra.mxu1 %v438_v17  ;;  %1124 = vmatpush.msra.mxu2 %v453_v18  ;;  %v398_v56 = vmul.f32 0.125, %v334_v52  ;;  %v336_v63 = vld [vmem:[%s6732_s20 + $0xe8] sm:$0xff]  ;;  %v416_v0 = vmul.f32 0.125, %v352_v60  ;;  %v415_v1 = vmul.f32 0.125, %v351_v61  ;;  %v353_v6 = vld [vmem:[%s6732_s20 + $0x170] sm:$0xff]  ;;  %v338_v8 = vld [vmem:[%s6732_s20 + $0xf8] sm:$0xff] }
  0x4e   : > { %1237 = vmatpush.msra.mxu3 %v454_v20  ;;  %v400_v3 = vmul.f32 0.125, %v336_v63  ;;  %v417_v10 = vmul.f32 0.125, %v353_v6  ;;  %v402_v12 = vmul.f32 0.125, %v338_v8  ;;  %v478_v20 = vld [vmem:[%s6740_s26 + $0x158] sm:$0xff]  ;;  %v357_v50 = vld [vmem:[%s6732_s20 + $0x190] sm:$0xff]  ;;  %v359_v60 = vld [vmem:[%s6732_s20 + $0x1a0] sm:$0xff] }
  0x4f   : > { %953 = vxpose.xlu2.b32.cont [4/8] (short) %v393_v21, 128  ;;  %598 = vxpose.xlu1.b32.cont [4/8] (short) %v378_v22, 128  ;;  %v435_v21 = vld [vmem:[%s6740_s26] sm:$0xff]  ;;  %v436_v22 = vld [vmem:[%s6740_s26 + $0x8] sm:$0xff] }
  0x50   : > { %566 = vxpose.xlu0.b32.cont [4/8] (short) %v377_v23, 128  ;;  %v451_v23 = vld [vmem:[%s6740_s26 + $0x80] sm:$0xff]  ;;  %739 = vmatpush.msra.mxu0 %v435_v21 }
  0x51   : > { %852 = vmatpush.msra.mxu1 %v436_v22  ;;  %1125 = vmatpush.msra.mxu2 %v451_v23 }
  0x52   : > { %1238 = vmatpush.msra.mxu3 %v452_v26 }
  0x57   : > { %954 = vxpose.xlu2.b32.cont [5/8] (short) %v395_v27, 128  ;;  %599 = vxpose.xlu1.b32.cont [5/8] (short) %v380_v28, 128  ;;  %v390_v27 = vmul.f32 0.125, %v326_v19  ;;  %v481_v28 = vld [vmem:[%s6740_s26 + $0x170] sm:$0xff] }
  0x58   : > { %567 = vxpose.xlu0.b32.cont [5/8] (short) %v379_v29, 128  ;;  %v482_v29 = vld [vmem:[%s6740_s26 + $0x178] sm:$0xff]  ;;  %1504 = vmatpush.msrb.mxu0 %v481_v28  ;;  %v477_v19 = vld [vmem:[%s6740_s26 + $0x150] sm:$0xff] }
  0x59   : > { %1617 = vmatpush.msrb.mxu1 %v482_v29 }
  0x5a   : > { %1505 = vmatpush.msrb.mxu0 %v479_v57  ;;  %v360_v57 = vld [vmem:[%s6732_s20 + $0x1a8] sm:$0xff] }
  0x5b   : > { %1618 = vmatpush.msrb.mxu1 %v480_v58 }
  0x5c   : > { %1506 = vmatpush.msrb.mxu0 %v477_v19  ;;  %v366_v19 = vld [vmem:[%s6732_s20 + $0x1d8] sm:$0xff] }
  0x5d   : > { %1619 = vmatpush.msrb.mxu1 %v478_v20  ;;  %v365_v20 = vld [vmem:[%s6732_s20 + $0x1d0] sm:$0xff] }
  0x5f   : > { %955 = vxpose.xlu2.b32.cont [6/8] (short) %v397_v33, 128  ;;  %600 = vxpose.xlu1.b32.cont [6/8] (short) %v382_v34, 128  ;;  %v408_v33 = vmul.f32 0.125, %v344_v30  ;;  %v407_v34 = vmul.f32 0.125, %v343_v31 }
  0x60   : > { %568 = vxpose.xlu0.b32.cont [6/8] (short) %v381_v35, 128  ;;  %v392_v35 = vmul.f32 0.125, %v328_v32 }
  0x67   : > { %956 = vxpose.xlu2.b32.cont [7/8] (short) %v399_v39, 128  ;;  %601 = vxpose.xlu1.b32.cont [7/8] (short) %v384_v40, 128  ;;  %v410_v39 = vmul.f32 0.125, %v346_v36  ;;  %v409_v40 = vmul.f32 0.125, %v345_v37 }
  0x68   : > { %569 = vxpose.xlu0.b32.cont [7/8] (short) %v383_v41, 128  ;;  %v394_v41 = vmul.f32 0.125, %v330_v38 }
  0x6f   : > { %957 = vxpose.xlu2.b32.end [8/8] (short) %v401_v45, 128  ;;  %602 = vxpose.xlu1.b32.end [8/8] (short) %v386_v46, 128  ;;  %v332_v45 = vld [vmem:[%s6732_s20 + $0xc8] sm:$0xff]  ;;  %v412_v46 = vmul.f32 0.125, %v348_v42 }
  0x70   : > { %570 = vxpose.xlu0.b32.end [8/8] (short) %v385_v47, 128  ;;  %v411_v47 = vmul.f32 0.125, %v347_v43  ;;  %v396_v48 = vmul.f32 0.125, %v332_v45 }
  0xb7   : > { %1368 = vxpose.xlu2.b32.start [1/8] (short) %v404_v4, 128  ;;  %1336 = vxpose.xlu1.b32.start [1/8] (short) %v403_v5, 128  ;;  %v354_v5 = vld [vmem:[%s6732_s20 + $0x178] sm:$0xff] }
  0xb8   : > { %982 = vxpose.xlu0.b32.start [1/8] (short) %v388_v9, 128  ;;  %v418_v9 = vmul.f32 0.125, %v354_v5 }
  0xbf   : > { %1369 = vxpose.xlu2.b32.cont [2/8] (short) %v406_v24, 128  ;;  %1337 = vxpose.xlu1.b32.cont [2/8] (short) %v405_v25, 128 }
  0xc0   : > { %983 = vxpose.xlu0.b32.cont [2/8] (short) %v390_v27, 128 }
  0xc7   : > { %1370 = vxpose.xlu2.b32.cont [3/8] (short) %v408_v33, 128  ;;  %1338 = vxpose.xlu1.b32.cont [3/8] (short) %v407_v34, 128  ;;  %v475_v33 = vld [vmem:[%s6740_s26 + $0x140] sm:$0xff]  ;;  %v476_v34 = vld [vmem:[%s6740_s26 + $0x148] sm:$0xff] }
  0xc8   : > { %984 = vxpose.xlu0.b32.cont [3/8] (short) %v392_v35, 128  ;;  %1507 = vmatpush.msrb.mxu0 %v475_v33  ;;  %v471_v33 = vld [vmem:[%s6740_s26 + $0x120] sm:$0xff] }
  0xc9   : > { %1620 = vmatpush.msrb.mxu1 %v476_v34  ;;  %v472_v34 = vld [vmem:[%s6740_s26 + $0x128] sm:$0xff] }
  0xcf   : > { %1371 = vxpose.xlu2.b32.cont [4/8] (short) %v410_v39, 128  ;;  %1339 = vxpose.xlu1.b32.cont [4/8] (short) %v409_v40, 128 }
  0xd0   : > { %985 = vxpose.xlu0.b32.cont [4/8] (short) %v394_v41, 128  ;;  %v966_v44 = vpop.trf.xlu2  ;;  %v356_v41 = vld [vmem:[%s6732_s20 + $0x188] sm:$0xff] }
  0xd1   : > { %5368 = vmatmul.msk.f32.vlgmr.msra.gmra.mxu2 %vm627_vm0, %v966_v44  ;;  %5400 = vmatmul.msk.f32.vlgmr.msra.gmra.mxu3 %vm627_vm0, %v966_v44  ;;  %v355_v44 = vld [vmem:[%s6732_s20 + $0x180] sm:$0xff]  ;;  %v420_v45 = vmul.f32 0.125, %v356_v41 }
  0xd7   : > { %1372 = vxpose.xlu2.b32.cont [5/8] (short) %v412_v46, 128  ;;  %1340 = vxpose.xlu1.b32.cont [5/8] (short) %v411_v47, 128  ;;  %v419_v47 = vmul.f32 0.125, %v355_v44 }
  0xd8   : > { %986 = vxpose.xlu0.b32.cont [5/8] (short) %v396_v48, 128  ;;  %v967_v51 = vpop.trf.xlu2  ;;  %v358_v48 = vld [vmem:[%s6732_s20 + $0x198] sm:$0xff] }
  0xd9   : > { %5369 = vmatmul.msk.f32.gmra.mxu2 %vm627_vm0, %v967_v51  ;;  %5401 = vmatmul.msk.f32.gmra.mxu3 %vm627_vm0, %v967_v51  ;;  %v422_v52 = vmul.f32 0.125, %v358_v48  ;;  %v369_v48 = vld [vmem:[%s6732_s20 + $0x1f0] sm:$0xff] }
  0xdb   : > { %v6830_v59 = vpop.trf.xlu1 }
  0xdc   : > { %v579_v55 = vpop.trf.xlu0 }
  0xdd   : > { %5304 = vmatmul.msk.f32.vlgmr.msra.gmra.mxu0 %vm627_vm0, %v579_v55  ;;  %5336 = vmatmul.msk.f32.vlgmr.msra.gmra.mxu1 %vm627_vm0, %v579_v55  ;;  %v473_v55 = vld [vmem:[%s6740_s26 + $0x130] sm:$0xff] }
  0xde   : > { %1508 = vmatpush.msrb.mxu0 %v473_v55  ;;  %v433_v55 = vmul.f32 0.125, %v369_v48 }
  0xdf   : > { %1373 = vxpose.xlu2.b32.cont [6/8] (short) %v414_v53, 128  ;;  %1341 = vxpose.xlu1.b32.cont [6/8] (short) %v413_v54, 128  ;;  %v421_v54 = vmul.f32 0.125, %v357_v50 }
  0xe0   : > { %987 = vxpose.xlu0.b32.cont [6/8] (short) %v398_v56, 128  ;;  %v968_v62 = vpop.trf.xlu2  ;;  %v474_v56 = vld [vmem:[%s6740_s26 + $0x138] sm:$0xff]  ;;  %1509 = vmatpush.msrb.mxu0 %v471_v33 }
  0xe1   : > { %5370 = vmatmul.msk.f32.gmra.mxu2 %vm627_vm0, %v968_v62  ;;  %5402 = vmatmul.msk.f32.gmra.mxu3 %vm627_vm0, %v968_v62  ;;  %v424_v62 = vmul.f32 0.125, %v360_v57 }
  0xe2   : > { %1621 = vmatpush.msrb.mxu1 %v474_v56 }
  0xe3   : > { %v6839_v4 = vpop.trf.xlu1 }
  0xe4   : > { %v580_v2 = vpop.trf.xlu0  ;;  %1622 = vmatpush.msrb.mxu1 %v472_v34 }
  0xe5   : > { %5305 = vmatmul.msk.f32.gmra.mxu0 %vm627_vm0, %v580_v2  ;;  %5337 = vmatmul.msk.f32.gmra.mxu1 %vm627_vm0, %v580_v2 }
  0xe7   : > { %1374 = vxpose.xlu2.b32.cont [7/8] (short) %v416_v0, 128  ;;  %1342 = vxpose.xlu1.b32.cont [7/8] (short) %v415_v1, 128  ;;  %v423_v0 = vmul.f32 0.125, %v359_v60  ;;  %v362_v1 = vld [vmem:[%s6732_s20 + $0x1b8] sm:$0xff] }
  0xe8   : > { %988 = vxpose.xlu0.b32.cont [7/8] (short) %v400_v3, 128  ;;  %v969_v7 = vpop.trf.xlu2  ;;  %v361_v3 = vld [vmem:[%s6732_s20 + $0x1b0] sm:$0xff]  ;;  %v426_v6 = vmul.f32 0.125, %v362_v1 }
  0xe9   : > { %5371 = vmatmul.msk.f32.gmra.mxu2 %vm627_vm0, %v969_v7  ;;  %5403 = vmatmul.msk.f32.gmra.mxu3 %vm627_vm0, %v969_v7  ;;  %v425_v8 = vmul.f32 0.125, %v361_v3 }
  0xeb   : > { %v6848_v13 = vpop.trf.xlu1 }
  0xec   : > { %v581_v11 = vpop.trf.xlu0 }
  0xed   : > { %5306 = vmatmul.msk.f32.gmra.mxu0 %vm627_vm0, %v581_v11  ;;  %5338 = vmatmul.msk.f32.gmra.mxu1 %vm627_vm0, %v581_v11 }
  0xef   : > { %1375 = vxpose.xlu2.b32.end [8/8] (short) %v418_v9, 128  ;;  %1343 = vxpose.xlu1.b32.end [8/8] (short) %v417_v10, 128  ;;  %v364_v9 = vld [vmem:[%s6732_s20 + $0x1c8] sm:$0xff]  ;;  %v363_v10 = vld [vmem:[%s6732_s20 + $0x1c0] sm:$0xff] }
  0xf0   : > { %989 = vxpose.xlu0.b32.end [8/8] (short) %v402_v12, 128  ;;  %v970_v14 = vpop.trf.xlu2  ;;  %v428_v12 = vmul.f32 0.125, %v364_v9  ;;  %v497_v9 = vld [vmem:[%s6740_s26 + $0x1f0] sm:$0xff] }
  0xf1   : > { %5372 = vmatmul.msk.f32.gmra.mxu2 %vm627_vm0, %v970_v14  ;;  %5404 = vmatmul.msk.f32.gmra.mxu3 %vm627_vm0, %v970_v14 }
  0xf2   : > { %1890 = vmatpush.msrb.mxu2 %v497_v9  ;;  %v495_v9 = vld [vmem:[%s6740_s26 + $0x1e0] sm:$0xff] }
  0xf3   : > { %v6854_v16 = vpop.trf.xlu1 }
  0xf4   : > { %v582_v15 = vpop.trf.xlu0  ;;  %1891 = vmatpush.msrb.mxu2 %v495_v9 }
  0xf5   : > { %5307 = vmatmul.msk.f32.gmra.mxu0 %vm627_vm0, %v582_v15  ;;  %5339 = vmatmul.msk.f32.gmra.mxu1 %vm627_vm0, %v582_v15  ;;  %v427_v15 = vmul.f32 0.125, %v363_v10  ;;  %v498_v10 = vld [vmem:[%s6740_s26 + $0x1f8] sm:$0xff] }
  0xf6   : > { %2003 = vmatpush.msrb.mxu3 %v498_v10 }
  0xf8   : > { %v971_v17 = vpop.trf.xlu2 }
  0xf9   : > { %5373 = vmatmul.msk.f32.gmra.mxu2 %vm627_vm0, %v971_v17  ;;  %5405 = vmatmul.msk.f32.gmra.mxu3 %vm627_vm0, %v971_v17 }
  0xfb   : > { %v6862_v21 = vpop.trf.xlu1 }
  0xfc   : > { %v583_v18 = vpop.trf.xlu0 }
  0xfd   : > { %5308 = vmatmul.msk.f32.gmra.mxu0 %vm627_vm0, %v583_v18  ;;  %5340 = vmatmul.msk.f32.gmra.mxu1 %vm627_vm0, %v583_v18 }
 0x100   : > { %v972_v22 = vpop.trf.xlu2 }
 0x101   : > { %5374 = vmatmul.msk.f32.gmra.mxu2 %vm627_vm0, %v972_v22  ;;  %5406 = vmatmul.msk.f32.gmra.mxu3 %vm627_vm0, %v972_v22 }
 0x103   : > { %v6868_v24 = vpop.trf.xlu1 }
 0x104   : > { %v584_v23 = vpop.trf.xlu0 }
 0x105   : > { %5309 = vmatmul.msk.f32.gmra.mxu0 %vm627_vm0, %v584_v23  ;;  %5341 = vmatmul.msk.f32.gmra.mxu1 %vm627_vm0, %v584_v23 }
 0x108   : > { %v973_v25 = vpop.trf.xlu2 }
 0x109   : > { %5375 = vmatmul.msk.f32.gmra.mxu2 %vm627_vm0, %v973_v25  ;;  %5407 = vmatmul.msk.f32.gmra.mxu3 %vm627_vm0, %v973_v25  ;;  %v430_v25 = vmul.f32 0.125, %v366_v19 }
 0x10b   : > { %v6874_v27 = vpop.trf.xlu1 }
 0x10c   : > { %v585_v26 = vpop.trf.xlu0 }
 0x10d   : > { %5310 = vmatmul.msk.f32.gmra.mxu0 %vm627_vm0, %v585_v26  ;;  %5342 = vmatmul.msk.f32.gmra.mxu1 %vm627_vm0, %v585_v26 }
 0x110   : > { %v974_v28 = vpop.trf.xlu2 }
 0x111   : > { %5376 = vmatmul.msk.f32.gmra.mxu2 %vm627_vm0, %v974_v28  ;;  %5408 = vmatmul.msk.f32.gmra.mxu3 %vm627_vm0, %v974_v28 }
 0x113   : > { %v6880_v31 = vpop.trf.xlu1 }
 0x114   : > { %v586_v29 = vpop.trf.xlu0 }
 0x115   : > { %5311 = vmatmul.msk.f32.gmra.mxu0 %vm627_vm0, %v586_v29  ;;  %5343 = vmatmul.msk.f32.gmra.mxu1 %vm627_vm0, %v586_v29  ;;  %v429_v29 = vmul.f32 0.125, %v365_v20 }
 0x118   : > { %v975_v30 = vpop.trf.xlu2 }
 0x119   : > { %5377 = vmatmul.msk.f32.gmra.mxu2 %vm627_vm0, %v975_v30  ;;  %5409 = vmatmul.msk.f32.gmra.mxu3 %vm627_vm0, %v975_v30 }
 0x11b   : > { %v6888_v36 = vpop.trf.xlu1 }
 0x11c   : > { %v587_v32 = vpop.trf.xlu0 }
 0x11d   : > { %5312 = vmatmul.msk.f32.gmra.mxu0 %vm627_vm0, %v587_v32  ;;  %5344 = vmatmul.msk.f32.gmra.mxu1 %vm627_vm0, %v587_v32 }
 0x120   : > { %v976_v35 = vpop.trf.xlu2 }
 0x121   : > { %5378 = vmatmul.msk.f32.gmra.mxu2 %vm627_vm0, %v976_v35  ;;  %5410 = vmatmul.msk.f32.gmra.mxu3 %vm627_vm0, %v976_v35  ;;  %v368_v35 = vld [vmem:[%s6732_s20 + $0x1e8] sm:$0xff] }
 0x123   : > { %v6894_v39 = vpop.trf.xlu1 }
 0x124   : > { %v588_v37 = vpop.trf.xlu0 }
 0x125   : > { %5313 = vmatmul.msk.f32.gmra.mxu0 %vm627_vm0, %v588_v37  ;;  %5345 = vmatmul.msk.f32.gmra.mxu1 %vm627_vm0, %v588_v37  ;;  %v367_v37 = vld [vmem:[%s6732_s20 + $0x1e0] sm:$0xff] }
 0x126   : > { %v431_v44 = vmul.f32 0.125, %v367_v37 }
 0x128   : > { %v977_v38 = vpop.trf.xlu2 }
 0x129   : > { %5379 = vmatmul.msk.f32.gmra.mxu2 %vm627_vm0, %v977_v38  ;;  %5411 = vmatmul.msk.f32.gmra.mxu3 %vm627_vm0, %v977_v38 }
 0x12b   : > { %v6901_v43 = vpop.trf.xlu1 }
 0x12c   : > { %v589_v40 = vpop.trf.xlu0 }
 0x12d   : > { %5314 = vmatmul.msk.f32.gmra.mxu0 %vm627_vm0, %v589_v40  ;;  %5346 = vmatmul.msk.f32.gmra.mxu1 %vm627_vm0, %v589_v40 }
 0x130   : > { %v978_v42 = vpop.trf.xlu2 }
 0x131   : > { %5380 = vmatmul.msk.f32.gmra.mxu2 %vm627_vm0, %v978_v42  ;;  %5412 = vmatmul.msk.f32.gmra.mxu3 %vm627_vm0, %v978_v42 }
 0x133   : > { %v6912_v51 = vpop.trf.xlu1 }
 0x134   : > { %v590_v46 = vpop.trf.xlu0 }
 0x135   : > { %5315 = vmatmul.msk.f32.gmra.mxu0 %vm627_vm0, %v590_v46  ;;  %5347 = vmatmul.msk.f32.gmra.mxu1 %vm627_vm0, %v590_v46 }
 0x137   : > { %1754 = vxpose.xlu1.b32.start [1/8] (short) %v420_v45, 128 }
 0x138   : > { %1722 = vxpose.xlu0.b32.start [1/8] (short) %v419_v47, 128  ;;  %v979_v49 = vpop.trf.xlu2  ;;  %v370_v47 = vld [vmem:[%s6732_s20 + $0x1f8] sm:$0xff] }
 0x139   : > { %5381 = vmatmul.msk.f32.gmra.mxu2 %vm627_vm0, %v979_v49  ;;  %5413 = vmatmul.msk.f32.gmra.mxu3 %vm627_vm0, %v979_v49 }
 0x13b   : > { %v6922_v61 = vpop.trf.xlu1 }
 0x13c   : > { %v591_v53 = vpop.trf.xlu0 }
 0x13d   : > { %5316 = vmatmul.msk.f32.gmra.mxu0 %vm627_vm0, %v591_v53  ;;  %5348 = vmatmul.msk.f32.gmra.mxu1 %vm627_vm0, %v591_v53 }
 0x13f   : > { %1755 = vxpose.xlu1.b32.cont [2/8] (short) %v422_v52, 128  ;;  %v434_v52 = vmul.f32 0.125, %v370_v47 }
 0x140   : > { %1723 = vxpose.xlu0.b32.cont [2/8] (short) %v421_v54, 128  ;;  %v980_v58 = vpop.trf.xlu2 }
 0x141   : > { %5382 = vmatmul.msk.f32.gmra.mxu2 %vm627_vm0, %v980_v58  ;;  %5414 = vmatmul.msk.f32.gmra.mxu3 %vm627_vm0, %v980_v58 }
 0x143   : > { %v6930_v5 = vpop.trf.xlu1 }
 0x144   : > { %v592_v63 = vpop.trf.xlu0 }
 0x145   : > { %5317 = vmatmul.msk.f32.gmra.mxu0 %vm627_vm0, %v592_v63  ;;  %5349 = vmatmul.msk.f32.gmra.mxu1 %vm627_vm0, %v592_v63 }
 0x147   : > { %1756 = vxpose.xlu1.b32.cont [3/8] (short) %v424_v62, 128 }
 0x148   : > { %1724 = vxpose.xlu0.b32.cont [3/8] (short) %v423_v0, 128  ;;  %v981_v2 = vpop.trf.xlu2 }
 0x149   : > { %5383 = vmatmul.msk.f32.gmra.mxu2 %vm627_vm0, %v981_v2  ;;  %5415 = vmatmul.msk.f32.gmra.mxu3 %vm627_vm0, %v981_v2 }
 0x14b   : > { %v6936_v11 = vpop.trf.xlu1 }
 0x14c   : > { %v593_v7 = vpop.trf.xlu0 }
 0x14d   : > { %5318 = vmatmul.msk.f32.gmra.mxu0 %vm627_vm0, %v593_v7  ;;  %5350 = vmatmul.msk.f32.gmra.mxu1 %vm627_vm0, %v593_v7  ;;  %v469_v7 = vld [vmem:[%s6740_s26 + $0x110] sm:$0xff] }
 0x14e   : > { %1510 = vmatpush.msrb.mxu0 %v469_v7  ;;  %v467_v7 = vld [vmem:[%s6740_s26 + $0x100] sm:$0xff] }
 0x14f   : > { %1757 = vxpose.xlu1.b32.cont [4/8] (short) %v426_v6, 128 }
 0x150   : > { %1725 = vxpose.xlu0.b32.cont [4/8] (short) %v425_v8, 128  ;;  %v7006_v62 = vpop.trf.xlu2  ;;  %v470_v8 = vld [vmem:[%s6740_s26 + $0x118] sm:$0xff]  ;;  %1511 = vmatpush.msrb.mxu0 %v467_v7 }
 0x151   : > { %1623 = vmatpush.msrb.mxu1 %v470_v8  ;;  %v468_v8 = vld [vmem:[%s6740_s26 + $0x108] sm:$0xff] }
 0x153   : > { %v6950_v26 = vpop.trf.xlu1  ;;  %1624 = vmatpush.msrb.mxu1 %v468_v8 }
 0x154   : > { %v594_v14 = vpop.trf.xlu0  ;;  %v6938_v17 = vpop.f32.mrf.mxu2 }
 0x155   : > { %10474 = vst [vmem:[#allocation18_spill] sm:$0xff] %v6938_v17  ;;  %5319 = vmatmul.msk.f32.gmra.mxu0 %vm627_vm0, %v594_v14  ;;  %5351 = vmatmul.msk.f32.gmra.mxu1 %vm627_vm0, %v594_v14  ;;  %v6942_v18 = vpop.f32.mrf.mxu3 }
 0x156   : > { %10475 = vst [vmem:[#allocation19_spill] sm:$0xff] %v6942_v18 }
 0x157   : > { %1758 = vxpose.xlu1.b32.cont [5/8] (short) %v428_v12, 128 }
 0x158   : > { %1726 = vxpose.xlu0.b32.cont [5/8] (short) %v427_v15, 128 }
 0x15a   : > { %v6946_v22 = vpop.f32.mrf.mxu0  ;;  %v6948_v23 = vpop.f32.mrf.mxu1 }
 0x15b   : > { %10476 = vst [vmem:[#allocation20_spill] sm:$0xff] %v6946_v22  ;;  %v6970_v41 = vpop.trf.xlu1 }
 0x15c   : > { %10477 = vst [vmem:[#allocation21_spill] sm:$0xff] %v6948_v23  ;;  %v998_v28 = vpop.trf.xlu0  ;;  %v6952_v30 = vpop.f32.mrf.mxu2 }
 0x15d   : > { %10478 = vst [vmem:[#allocation22_spill] sm:$0xff] %v6952_v30  ;;  %5320 = vmatmul.msk.f32.gmra.mxu0 %vm627_vm0, %v6830_v59  ;;  %5352 = vmatmul.msk.f32.gmra.mxu1 %vm627_vm0, %v6830_v59  ;;  %v6958_v32 = vpop.f32.mrf.mxu3  ;;  %v432_v59 = vmul.f32 0.125, %v368_v35 }
 0x15e   : > { %10479 = vst [vmem:[#allocation23_spill] sm:$0xff] %v6958_v32  ;;  %5384 = vmatmul.msk.f32.gmra.mxu2 %vm627_vm0, %v998_v28  ;;  %5416 = vmatmul.msk.f32.gmra.mxu3 %vm627_vm0, %v998_v28 }
 0x15f   : > { %1759 = vxpose.xlu1.b32.cont [6/8] (short) %v430_v25, 128 }
 0x160   : > { %1727 = vxpose.xlu0.b32.cont [6/8] (short) %v429_v29, 128 }
 0x162   : > { %v6966_v38 = vpop.f32.mrf.mxu0  ;;  %v6968_v40 = vpop.f32.mrf.mxu1 }
 0x163   : > { %10480 = vst [vmem:[#allocation24_spill] sm:$0xff] %v6966_v38  ;;  %v6988_v53 = vpop.trf.xlu1 }
 0x164   : > { %10481 = vst [vmem:[#allocation25_spill] sm:$0xff] %v6968_v40  ;;  %v999_v42 = vpop.trf.xlu0  ;;  %v6972_v45 = vpop.f32.mrf.mxu2 }
 0x165   : > { %10482 = vst [vmem:[#allocation26_spill] sm:$0xff] %v6972_v45  ;;  %5321 = vmatmul.msk.f32.gmra.mxu0 %vm627_vm0, %v6839_v4  ;;  %5353 = vmatmul.msk.f32.gmra.mxu1 %vm627_vm0, %v6839_v4  ;;  %v6978_v46 = vpop.f32.mrf.mxu3 }
 0x166   : > { %10483 = vst [vmem:[#allocation27_spill] sm:$0xff] %v6978_v46  ;;  %5385 = vmatmul.msk.f32.gmra.mxu2 %vm627_vm0, %v999_v42  ;;  %5417 = vmatmul.msk.f32.gmra.mxu3 %vm627_vm0, %v999_v42 }
 0x167   : > { %1760 = vxpose.xlu1.b32.cont [7/8] (short) %v432_v59, 128 }
 0x168   : > { %1728 = vxpose.xlu0.b32.cont [7/8] (short) %v431_v44, 128 }
 0x16a   : > { %v6984_v49 = vpop.f32.mrf.mxu0  ;;  %v6986_v50 = vpop.f32.mrf.mxu1 }
 0x16b   : > { %10484 = vst [vmem:[#allocation28_spill] sm:$0xff] %v6984_v49  ;;  %v7004_v60 = vpop.trf.xlu1 }
 0x16c   : > { %10485 = vst [vmem:[#allocation29_spill] sm:$0xff] %v6986_v50  ;;  %v1000_v54 = vpop.trf.xlu0  ;;  %v6994_v4 = vpop.f32.mrf.mxu2 }
 0x16d   : > { %5322 = vmatmul.msk.f32.gmra.mxu0 %vm627_vm0, %v6848_v13  ;;  %5354 = vmatmul.msk.f32.gmra.mxu1 %vm627_vm0, %v6848_v13  ;;  %10486 = vst [vmem:[#allocation30_spill] sm:$0xff] %v6994_v4  ;;  %v6998_v56 = vpop.f32.mrf.mxu3 }
 0x16e   : > { %5386 = vmatmul.msk.f32.gmra.mxu2 %vm627_vm0, %v1000_v54  ;;  %5418 = vmatmul.msk.f32.gmra.mxu3 %vm627_vm0, %v1000_v54  ;;  %10487 = vst [vmem:[#allocation31_spill] sm:$0xff] %v6998_v56 }
 0x16f   : > { %1761 = vxpose.xlu1.b32.end [8/8] (short) %v434_v52, 128 }
 0x170   : > { %1729 = vxpose.xlu0.b32.end [8/8] (short) %v433_v55, 128 }
 0x172   : > { %v7000_v57 = vpop.f32.mrf.mxu0  ;;  %v7002_v58 = vpop.f32.mrf.mxu1 }
 0x173   : > { %10488 = vst [vmem:[#allocation32_spill] sm:$0xff] %v7000_v57  ;;  %v7022_v3 = vpop.trf.xlu1 }
 0x174   : > { %10489 = vst [vmem:[#allocation33_spill] sm:$0xff] %v7002_v58  ;;  %v1001_v63 = vpop.trf.xlu0  ;;  %v7014_v13 = vpop.f32.mrf.mxu2 }
 0x175   : > { %5323 = vmatmul.msk.f32.gmra.mxu0 %vm627_vm0, %v6854_v16  ;;  %5355 = vmatmul.msk.f32.gmra.mxu1 %vm627_vm0, %v6854_v16  ;;  %10490 = vst [vmem:[#allocation34_spill] sm:$0xff] %v7014_v13  ;;  %v7016_v0 = vpop.f32.mrf.mxu3  ;;  %v7028_v16 = vpop.trf.xlu2 }
 0x176   : > { %5387 = vmatmul.msk.f32.gmra.mxu2 %vm627_vm0, %v1001_v63  ;;  %5419 = vmatmul.msk.f32.gmra.mxu3 %vm627_vm0, %v1001_v63  ;;  %10491 = vst [vmem:[#allocation35_spill] sm:$0xff] %v7016_v0 }
 0x17a   : > { %v7018_v1 = vpop.f32.mrf.mxu0  ;;  %v7020_v2 = vpop.f32.mrf.mxu1 }
 0x17b   : > { %10492 = vst [vmem:[#allocation36_spill] sm:$0xff] %v7018_v1  ;;  %v7044_v19 = vpop.trf.xlu1 }
 0x17c   : > { %10493 = vst [vmem:[#allocation37_spill] sm:$0xff] %v7020_v2  ;;  %v1002_v6 = vpop.trf.xlu0  ;;  %v7036_v12 = vpop.f32.mrf.mxu2 }
 0x17d   : > { %5324 = vmatmul.msk.f32.gmra.mxu0 %vm627_vm0, %v6862_v21  ;;  %5356 = vmatmul.msk.f32.gmra.mxu1 %vm627_vm0, %v6862_v21  ;;  %10494 = vst [vmem:[#allocation38_spill] sm:$0xff] %v7036_v12  ;;  %v7042_v21 = vpop.f32.mrf.mxu3  ;;  %v7052_v25 = vpop.trf.xlu2 }
 0x17e   : > { %5388 = vmatmul.msk.f32.gmra.mxu2 %vm627_vm0, %v1002_v6  ;;  %5420 = vmatmul.msk.f32.gmra.mxu3 %vm627_vm0, %v1002_v6  ;;  %10497 = vst [vmem:[#allocation41_spill] sm:$0xff] %v7042_v21  ;;  %v2108_v6 = vmax.f32 %v6946_v22, %v6948_v23 }
 0x17f   : > { %10498 = vst [vmem:[#allocation42_spill] sm:$0xff] %v7052_v25  ;;  %v487_v25 = vld [vmem:[%s6740_s26 + $0x1a0] sm:$0xff] }
 0x182   : > { %v7038_v14 = vpop.f32.mrf.mxu0  ;;  %v7040_v15 = vpop.f32.mrf.mxu1 }
 0x183   : > { %10495 = vst [vmem:[#allocation39_spill] sm:$0xff] %v7038_v14  ;;  %v7060_v34 = vpop.trf.xlu1 }
 0x184   : > { %10496 = vst [vmem:[#allocation40_spill] sm:$0xff] %v7040_v15  ;;  %v1003_v20 = vpop.trf.xlu0  ;;  %v7058_v33 = vpop.f32.mrf.mxu2 }
 0x185   : > { %5325 = vmatmul.msk.f32.gmra.mxu0 %vm627_vm0, %v6868_v24  ;;  %5357 = vmatmul.msk.f32.gmra.mxu1 %vm627_vm0, %v6868_v24  ;;  %10501 = vst [vmem:[#allocation45_spill] sm:$0xff] %v7058_v33  ;;  %v7066_v24 = vpop.f32.mrf.mxu3  ;;  %v7070_v37 = vpop.trf.xlu2 }
 0x186   : > { %5389 = vmatmul.msk.f32.gmra.mxu2 %vm627_vm0, %v1003_v20  ;;  %5421 = vmatmul.msk.f32.gmra.mxu3 %vm627_vm0, %v1003_v20  ;;  %10502 = vst [vmem:[#allocation46_spill] sm:$0xff] %v7066_v24  ;;  %v496_v20 = vld [vmem:[%s6740_s26 + $0x1e8] sm:$0xff] }
 0x187   : > { %10503 = vst [vmem:[#allocation47_spill] sm:$0xff] %v7070_v37  ;;  %2004 = vmatpush.msrb.mxu3 %v496_v20 }
 0x18a   : > { %v7054_v28 = vpop.f32.mrf.mxu0  ;;  %v7056_v29 = vpop.f32.mrf.mxu1 }
 0x18b   : > { %10499 = vst [vmem:[#allocation43_spill] sm:$0xff] %v7054_v28  ;;  %v7076_v44 = vpop.trf.xlu1 }
 0x18c   : > { %10500 = vst [vmem:[#allocation44_spill] sm:$0xff] %v7056_v29  ;;  %v1004_v35 = vpop.trf.xlu0 }
 0x18d   : > { %5326 = vmatmul.msk.f32.gmra.mxu0 %vm627_vm0, %v6874_v27  ;;  %5358 = vmatmul.msk.f32.gmra.mxu1 %vm627_vm0, %v6874_v27  ;;  %v7082_v27 = vpop.f32.mrf.mxu2  ;;  %v7086_v48 = vpop.f32.mrf.mxu3 }
 0x18e   : > { %5390 = vmatmul.msk.f32.gmra.mxu2 %vm627_vm0, %v1004_v35  ;;  %5422 = vmatmul.msk.f32.gmra.mxu3 %vm627_vm0, %v1004_v35  ;;  %10506 = vst [vmem:[#allocation50_spill] sm:$0xff] %v7082_v27  ;;  %v7092_v55 = vpop.trf.xlu2 }
 0x18f   : > { %10507 = vst [vmem:[#allocation51_spill] sm:$0xff] %v7086_v48 }
 0x190   : > { %10510 = vst [vmem:[#allocation54_spill] sm:$0xff] %v7092_v55  ;;  %v494_v55 = vld [vmem:[%s6740_s26 + $0x1d8] sm:$0xff] }
 0x191   : > { %2005 = vmatpush.msrb.mxu3 %v494_v55  ;;  %v489_v55 = vld [vmem:[%s6740_s26 + $0x1b0] sm:$0xff] }
 0x192   : > { %v7072_v59 = vpop.f32.mrf.mxu0  ;;  %v7074_v42 = vpop.f32.mrf.mxu1 }
 0x193   : > { %10504 = vst [vmem:[#allocation48_spill] sm:$0xff] %v7072_v59 }
 0x194   : > { %10505 = vst [vmem:[#allocation49_spill] sm:$0xff] %v7074_v42  ;;  %v1005_v47 = vpop.trf.xlu0 }
 0x195   : > { %5327 = vmatmul.msk.f32.gmra.mxu0 %vm627_vm0, %v6880_v31  ;;  %5359 = vmatmul.msk.f32.gmra.mxu1 %vm627_vm0, %v6880_v31  ;;  %v7098_v31 = vpop.trf.xlu1  ;;  %v7107_v10 = vpop.f32.mrf.mxu2 }
 0x196   : > { %5391 = vmatmul.msk.f32.gmra.mxu2 %vm627_vm0, %v1005_v47  ;;  %5423 = vmatmul.msk.f32.gmra.mxu3 %vm627_vm0, %v1005_v47  ;;  %10511 = vst [vmem:[#allocation55_spill] sm:$0xff] %v7107_v10  ;;  %v7120_v23 = vpop.trf.xlu2  ;;  %v488_v10 = vld [vmem:[%s6740_s26 + $0x1a8] sm:$0xff] }
 0x197   : > { %10515 = vst [vmem:[#allocation59_spill] sm:$0xff] %v7120_v23 }
 0x19a   : > { %v7088_v52 = vpop.f32.mrf.mxu0  ;;  %v7090_v54 = vpop.f32.mrf.mxu1 }
 0x19b   : > { %10508 = vst [vmem:[#allocation52_spill] sm:$0xff] %v7088_v52 }
 0x19c   : > { %10509 = vst [vmem:[#allocation53_spill] sm:$0xff] %v7090_v54  ;;  %v1006_v63 = vpop.trf.xlu0 }
 0x19d   : > { %5328 = vmatmul.msk.f32.gmra.mxu0 %vm627_vm0, %v6888_v36  ;;  %5360 = vmatmul.msk.f32.gmra.mxu1 %vm627_vm0, %v6888_v36  ;;  %v7110_v36 = vpop.f32.mrf.mxu3  ;;  %v7126_v7 = vpop.trf.xlu1 }
 0x19e   : > { %5392 = vmatmul.msk.f32.gmra.mxu2 %vm627_vm0, %v1006_v63  ;;  %5424 = vmatmul.msk.f32.gmra.mxu3 %vm627_vm0, %v1006_v63  ;;  %10512 = vst [vmem:[#allocation56_spill] sm:$0xff] %v7110_v36  ;;  %v7128_v8 = vpop.f32.mrf.mxu2 }
 0x19f   : > { %10516 = vst [vmem:[#allocation60_spill] sm:$0xff] %v7128_v8 }
 0x1a0   : > { %2109 = vmax.xlane.f32.xlu2 %v2108_v6  ;;  %v2117_v6 = vmax.f32 %v7000_v57, %v7002_v58 }
 0x1a2   : > { %v7112_v35 = vpop.f32.mrf.mxu0  ;;  %v7114_v47 = vpop.f32.mrf.mxu1 }
 0x1a3   : > { %10513 = vst [vmem:[#allocation57_spill] sm:$0xff] %v7112_v35 }
 0x1a4   : > { %10514 = vst [vmem:[#allocation58_spill] sm:$0xff] %v7114_v47  ;;  %v1007_v63 = vpop.trf.xlu0 }
 0x1a5   : > { %5329 = vmatmul.msk.f32.gmra.mxu0 %vm627_vm0, %v6894_v39  ;;  %5361 = vmatmul.msk.f32.gmra.mxu1 %vm627_vm0, %v6894_v39  ;;  %v7134_v39 = vpop.f32.mrf.mxu3  ;;  %v7146_v58 = vpop.trf.xlu1 }
 0x1a6   : > { %5393 = vmatmul.msk.f32.gmra.mxu2 %vm627_vm0, %v1007_v63  ;;  %5425 = vmatmul.msk.f32.gmra.mxu3 %vm627_vm0, %v1007_v63  ;;  %10519 = vst [vmem:[#allocation63_spill] sm:$0xff] %v7134_v39  ;;  %v2120_v63 = vmax.f32 %v7018_v1, %v7020_v2  ;;  %v7154_v37 = vpop.f32.mrf.mxu2  ;;  %v491_v2 = vld [vmem:[%s6740_s26 + $0x1c0] sm:$0xff]  ;;  %v492_v1 = vld [vmem:[%s6740_s26 + $0x1c8] sm:$0xff] }
 0x1a7   : > { %10523 = vst [vmem:[#allocation67_spill] sm:$0xff] %v7154_v37  ;;  %2006 = vmatpush.msrb.mxu3 %v492_v1  ;;  %v486_v1 = vld [vmem:[%s6740_s26 + $0x198] sm:$0xff] }
 0x1a8   : > { %2118 = vmax.xlane.f32.xlu2 %v2117_v6  ;;  %v7144_v6 = vpop.trf.xlu2 }
 0x1a9   : > { %10520 = vst [vmem:[#allocation64_spill] sm:$0xff] %v7144_v6  ;;  %v490_v6 = vld [vmem:[%s6740_s26 + $0x1b8] sm:$0xff] }
 0x1aa   : > { %v7130_v9 = vpop.f32.mrf.mxu0  ;;  %v7132_v20 = vpop.f32.mrf.mxu1  ;;  %2007 = vmatpush.msrb.mxu3 %v490_v6  ;;  %v2126_v6 = vmax.f32 %v7054_v28, %v7056_v29 }
 0x1ab   : > { %10517 = vst [vmem:[#allocation61_spill] sm:$0xff] %v7130_v9 }
 0x1ac   : > { %10518 = vst [vmem:[#allocation62_spill] sm:$0xff] %v7132_v20  ;;  %v1008_v22 = vpop.trf.xlu0  ;;  %2008 = vmatpush.msrb.mxu3 %v488_v10  ;;  %v484_v10 = vld [vmem:[%s6740_s26 + $0x188] sm:$0xff] }
 0x1ad   : > { %5330 = vmatmul.msk.f32.gmra.mxu0 %vm627_vm0, %v6901_v43  ;;  %5362 = vmatmul.msk.f32.gmra.mxu1 %vm627_vm0, %v6901_v43  ;;  %v493_v43 = vld [vmem:[%s6740_s26 + $0x1d0] sm:$0xff] }
 0x1ae   : > { %5394 = vmatmul.msk.f32.gmra.mxu2 %vm627_vm0, %v1008_v22  ;;  %5426 = vmatmul.msk.f32.gmra.mxu3 %vm627_vm0, %v1008_v22 }
 0x1af   : > { %1892 = vmatpush.msrb.mxu2 %v493_v43  ;;  %v2123_v43 = vmax.f32 %v7038_v14, %v7040_v15  ;;  %v7178_v15 = vpop.trf.xlu1  ;;  %2009 = vmatpush.msrb.mxu3 %v486_v1 }
 0x1b0   : > { %2121 = vmax.xlane.f32.xlu2 %v2120_v63  ;;  %v7158_v63 = vpop.f32.mrf.mxu3  ;;  %v7172_v36 = vpop.trf.xlu2 }
 0x1b1   : > { %10524 = vst [vmem:[#allocation68_spill] sm:$0xff] %v7158_v63  ;;  %1893 = vmatpush.msrb.mxu2 %v491_v2  ;;  %v485_v2 = vld [vmem:[%s6740_s26 + $0x190] sm:$0xff]  ;;  %2010 = vmatpush.msrb.mxu3 %v484_v10 }
 0x1b2   : > { %v7148_v57 = vpop.f32.mrf.mxu0  ;;  %v7150_v23 = vpop.f32.mrf.mxu1  ;;  %10525 = vst [vmem:[#allocation69_spill] sm:$0xff] %v7172_v36 }
 0x1b3   : > { %10521 = vst [vmem:[#allocation65_spill] sm:$0xff] %v7148_v57  ;;  %1894 = vmatpush.msrb.mxu2 %v489_v55 }
 0x1b4   : > { %10522 = vst [vmem:[#allocation66_spill] sm:$0xff] %v7150_v23  ;;  %v1009_v22 = vpop.trf.xlu0 }
 0x1b5   : > { %5331 = vmatmul.msk.f32.gmra.mxu0 %vm627_vm0, %v6912_v51  ;;  %5363 = vmatmul.msk.f32.gmra.mxu1 %vm627_vm0, %v6912_v51 }
 0x1b6   : > { %5395 = vmatmul.msk.f32.gmra.mxu2 %vm627_vm0, %v1009_v22  ;;  %5427 = vmatmul.msk.f32.gmra.mxu3 %vm627_vm0, %v1009_v22 }
 0x1b7   : > { %1895 = vmatpush.msrb.mxu2 %v487_v25  ;;  %v483_v25 = vld [vmem:[%s6740_s26 + $0x180] sm:$0xff] }
 0x1b8   : > { %2124 = vmax.xlane.f32.xlu2 %v2123_v43  ;;  %v7182_v43 = vpop.f32.mrf.mxu2  ;;  %v7194_v55 = vpop.f32.mrf.mxu3 }
 0x1b9   : > { %10528 = vst [vmem:[#allocation72_spill] sm:$0xff] %v7182_v43  ;;  %1896 = vmatpush.msrb.mxu2 %v485_v2  ;;  %v2129_v2 = vmax.f32 %v7072_v59, %v7074_v42 }
 0x1ba   : > { %v7174_v51 = vpop.f32.mrf.mxu0  ;;  %v7176_v22 = vpop.f32.mrf.mxu1  ;;  %10529 = vst [vmem:[#allocation73_spill] sm:$0xff] %v7194_v55 }
 0x1bb   : > { %10526 = vst [vmem:[#allocation70_spill] sm:$0xff] %v7174_v51  ;;  %1897 = vmatpush.msrb.mxu2 %v483_v25 }
 0x1bc   : > { %10527 = vst [vmem:[#allocation71_spill] sm:$0xff] %v7176_v22  ;;  %v1010_v14 = vpop.trf.xlu0 }
 0x1bd   : > { %5332 = vmatmul.msk.f32.gmra.mxu0 %vm627_vm0, %v6922_v61  ;;  %5364 = vmatmul.msk.f32.gmra.mxu1 %vm627_vm0, %v6922_v61  ;;  %v7200_v61 = vpop.trf.xlu2 }
 0x1be   : > { %5396 = vmatmul.msk.f32.gmra.mxu2 %vm627_vm0, %v1010_v14  ;;  %5428 = vmatmul.msk.f32.gmra.mxu3 %vm627_vm0, %v1010_v14  ;;  %10532 = vst [vmem:[#allocation76_spill] sm:$0xff] %v7200_v61  ;;  %v7206_v14 = vpop.trf.xlu1 }
 0x1c0   : > { %2127 = vmax.xlane.f32.xlu2 %v2126_v6  ;;  %v7212_v1 = vpop.f32.mrf.mxu2  ;;  %v7214_v6 = vpop.f32.mrf.mxu3 }
 0x1c1   : > { %10533 = vst [vmem:[#allocation77_spill] sm:$0xff] %v7212_v1 }
 0x1c2   : > { %v7196_v36 = vpop.f32.mrf.mxu0  ;;  %v7198_v43 = vpop.f32.mrf.mxu1  ;;  %10534 = vst [vmem:[#allocation78_spill] sm:$0xff] %v7214_v6 }
 0x1c3   : > { %10530 = vst [vmem:[#allocation74_spill] sm:$0xff] %v7196_v36 }
 0x1c4   : > { %10531 = vst [vmem:[#allocation75_spill] sm:$0xff] %v7198_v43  ;;  %v1011_v37 = vpop.trf.xlu0 }
 0x1c5   : > { %5333 = vmatmul.msk.f32.gmra.mxu0 %vm627_vm0, %v6930_v5  ;;  %5365 = vmatmul.msk.f32.gmra.mxu1 %vm627_vm0, %v6930_v5  ;;  %v7224_v5 = vpop.trf.xlu2 }
 0x1c6   : > { %5397 = vmatmul.msk.f32.gmra.mxu2 %vm627_vm0, %v1011_v37  ;;  %5429 = vmatmul.msk.f32.gmra.mxu3 %vm627_vm0, %v1011_v37  ;;  %10537 = vst [vmem:[#allocation81_spill] sm:$0xff] %v7224_v5  ;;  %v2132_v37 = vmax.f32 %v7088_v52, %v7090_v54 }
 0x1c8   : > { %2130 = vmax.xlane.f32.xlu2 %v2129_v2  ;;  %v7230_v2 = vpop.trf.xlu1  ;;  %v7232_v42 = vpop.f32.mrf.mxu2 }
 0x1c9   : > { %10538 = vst [vmem:[#allocation82_spill] sm:$0xff] %v7232_v42  ;;  %v7238_v61 = vpop.f32.mrf.mxu3 }
 0x1ca   : > { %v7216_v25 = vpop.f32.mrf.mxu0  ;;  %v7218_v10 = vpop.f32.mrf.mxu1  ;;  %10541 = vst [vmem:[#allocation85_spill] sm:$0xff] %v7238_v61 }
 0x1cb   : > { %10535 = vst [vmem:[#allocation79_spill] sm:$0xff] %v7216_v25 }
 0x1cc   : > { %10536 = vst [vmem:[#allocation80_spill] sm:$0xff] %v7218_v10  ;;  %v1012_v29 = vpop.trf.xlu0 }
 0x1cd   : > { %5334 = vmatmul.msk.f32.gmra.mxu0 %vm627_vm0, %v6936_v11  ;;  %5366 = vmatmul.msk.f32.gmra.mxu1 %vm627_vm0, %v6936_v11 }
 0x1ce   : > { %5398 = vmatmul.msk.f32.gmra.mxu2 %vm627_vm0, %v1012_v29  ;;  %5430 = vmatmul.msk.f32.gmra.mxu3 %vm627_vm0, %v1012_v29  ;;  %v2135_v29 = vmax.f32 %v7112_v35, %v7114_v47 }
 0x1d0   : > { %2133 = vmax.xlane.f32.xlu2 %v2132_v37  ;;  %v7248_v37 = vpop.trf.xlu2  ;;  %v7250_v54 = vpop.trf.xlu1 }
 0x1d1   : > { %10542 = vst [vmem:[#allocation86_spill] sm:$0xff] %v7248_v37  ;;  %v7256_v55 = vpop.f32.mrf.mxu2 }
 0x1d2   : > { %v7234_v59 = vpop.f32.mrf.mxu0  ;;  %v7236_v28 = vpop.f32.mrf.mxu1  ;;  %10545 = vst [vmem:[#allocation89_spill] sm:$0xff] %v7256_v55 }
 0x1d3   : > { %10539 = vst [vmem:[#allocation83_spill] sm:$0xff] %v7234_v59 }
 0x1d4   : > { %10540 = vst [vmem:[#allocation84_spill] sm:$0xff] %v7236_v28  ;;  %v1013_v11 = vpop.trf.xlu0 }
 0x1d5   : > { %5335 = vmatmul.msk.f32.gmra.mxu0 %vm627_vm0, %v6950_v26  ;;  %5367 = vmatmul.msk.f32.gmra.mxu1 %vm627_vm0, %v6950_v26  ;;  %v7258_v26 = vpop.f32.mrf.mxu3 }
 0x1d6   : > { %5399 = vmatmul.msk.f32.gmra.mxu2 %vm627_vm0, %v1013_v11  ;;  %5431 = vmatmul.msk.f32.gmra.mxu3 %vm627_vm0, %v1013_v11  ;;  %10546 = vst [vmem:[#allocation90_spill] sm:$0xff] %v7258_v26  ;;  %v2138_v11 = vmax.f32 %v7130_v9, %v7132_v20 }
 0x1d8   : > { %2136 = vmax.xlane.f32.xlu2 %v2135_v29  ;;  %v7268_v29 = vpop.trf.xlu2  ;;  %v7274_v37 = vpop.trf.xlu1 }
 0x1d9   : > { %10547 = vst [vmem:[#allocation91_spill] sm:$0xff] %v7268_v29  ;;  %v7276_v26 = vpop.f32.mrf.mxu2 }
 0x1da   : > { %v7252_v52 = vpop.f32.mrf.mxu0  ;;  %v7254_v5 = vpop.f32.mrf.mxu1  ;;  %10550 = vst [vmem:[#allocation94_spill] sm:$0xff] %v7276_v26 }
 0x1db   : > { %10543 = vst [vmem:[#allocation87_spill] sm:$0xff] %v7252_v52 }
 0x1dc   : > { %10544 = vst [vmem:[#allocation88_spill] sm:$0xff] %v7254_v5  ;;  %v1738_v42 = vpop.trf.xlu0 }
 0x1dd   : > { %5432 = vmatmul.msk.f32.vlgmr.msrb.gmra.mxu0 %vm627_vm0, %v6970_v41  ;;  %5464 = vmatmul.msk.f32.vlgmr.msrb.gmra.mxu1 %vm627_vm0, %v6970_v41  ;;  %v2141_v41 = vmax.f32 %v7148_v57, %v7150_v23 }
 0x1de   : > { %5496 = vmatmul.msk.f32.vlgmr.msrb.gmra.mxu2 %vm627_vm0, %v1738_v42  ;;  %5528 = vmatmul.msk.f32.vlgmr.msrb.gmra.mxu3 %vm627_vm0, %v1738_v42  ;;  %v7286_v42 = vpop.f32.mrf.mxu3 }
 0x1df   : > { %10551 = vst [vmem:[#allocation95_spill] sm:$0xff] %v7286_v42 }
 0x1e0   : > { %2139 = vmax.xlane.f32.xlu2 %v2138_v11  ;;  %v7292_v9 = vpop.trf.xlu2 }
 0x1e1   : > { %10554 = vst [vmem:[#allocation98_spill] sm:$0xff] %v7292_v9 }
 0x1e2   : > { %v7270_v47 = vpop.f32.mrf.mxu0  ;;  %v7272_v35 = vpop.f32.mrf.mxu1 }
 0x1e3   : > { %10548 = vst [vmem:[#allocation92_spill] sm:$0xff] %v7270_v47 }
 0x1e4   : > { %10549 = vst [vmem:[#allocation93_spill] sm:$0xff] %v7272_v35  ;;  %v1739_v55 = vpop.trf.xlu0 }
 0x1e5   : > { %5433 = vmatmul.msk.f32.gmra.mxu0 %vm627_vm0, %v6988_v53  ;;  %5465 = vmatmul.msk.f32.gmra.mxu1 %vm627_vm0, %v6988_v53  ;;  %v7298_v53 = vpop.trf.xlu1 }
 0x1e6   : > { %5497 = vmatmul.msk.f32.gmra.mxu2 %vm627_vm0, %v1739_v55  ;;  %5529 = vmatmul.msk.f32.gmra.mxu3 %vm627_vm0, %v1739_v55  ;;  %v2144_v55 = vmax.f32 %v7174_v51, %v7176_v22  ;;  %v7306_v23 = vpop.f32.mrf.mxu3 }
 0x1e7   : > { %10556 = vst [vmem:[#allocation100_spill] sm:$0xff] %v7306_v23 }
 0x1e8   : > { %2142 = vmax.xlane.f32.xlu2 %v2141_v41  ;;  %v7304_v41 = vpop.f32.mrf.mxu2 }
 0x1e9   : > { %10555 = vst [vmem:[#allocation99_spill] sm:$0xff] %v7304_v41 }
 0x1ea   : > { %v7288_v11 = vpop.f32.mrf.mxu0  ;;  %v7290_v20 = vpop.f32.mrf.mxu1 }
 0x1eb   : > { %10552 = vst [vmem:[#allocation96_spill] sm:$0xff] %v7288_v11 }
 0x1ec   : > { %10553 = vst [vmem:[#allocation97_spill] sm:$0xff] %v7290_v20  ;;  %v1740_v29 = vpop.trf.xlu0 }
 0x1ed   : > { %5434 = vmatmul.msk.f32.gmra.mxu0 %vm627_vm0, %v7004_v60  ;;  %5466 = vmatmul.msk.f32.gmra.mxu1 %vm627_vm0, %v7004_v60  ;;  %v7316_v60 = vpop.trf.xlu2 }
 0x1ee   : > { %5498 = vmatmul.msk.f32.gmra.mxu2 %vm627_vm0, %v1740_v29  ;;  %5530 = vmatmul.msk.f32.gmra.mxu3 %vm627_vm0, %v1740_v29  ;;  %10559 = vst [vmem:[#allocation103_spill] sm:$0xff] %v7316_v60  ;;  %v2147_v29 = vmax.f32 %v7196_v36, %v7198_v43  ;;  %v7330_v23 = vpop.f32.mrf.mxu3 }
 0x1ef   : > { %10563 = vst [vmem:[#allocation107_spill] sm:$0xff] %v7330_v23 }
 0x1f0   : > { %2145 = vmax.xlane.f32.xlu2 %v2144_v55  ;;  %v7322_v55 = vpop.trf.xlu1  ;;  %v7324_v22 = vpop.f32.mrf.mxu2 }
 0x1f1   : > { %10560 = vst [vmem:[#allocation104_spill] sm:$0xff] %v7324_v22 }
 0x1f2   : > { %v7308_v57 = vpop.f32.mrf.mxu0  ;;  %v7310_v9 = vpop.f32.mrf.mxu1 }
 0x1f3   : > { %10557 = vst [vmem:[#allocation101_spill] sm:$0xff] %v7308_v57 }
 0x1f4   : > { %10558 = vst [vmem:[#allocation102_spill] sm:$0xff] %v7310_v9  ;;  %v1741_v26 = vpop.trf.xlu0 }
 0x1f5   : > { %5435 = vmatmul.msk.f32.gmra.mxu0 %vm627_vm0, %v7022_v3  ;;  %5467 = vmatmul.msk.f32.gmra.mxu1 %vm627_vm0, %v7022_v3 }
 0x1f6   : > { %5499 = vmatmul.msk.f32.gmra.mxu2 %vm627_vm0, %v1741_v26  ;;  %5531 = vmatmul.msk.f32.gmra.mxu3 %vm627_vm0, %v1741_v26  ;;  %v2150_v26 = vmax.f32 %v7216_v25, %v7218_v10 }
 0x1f8   : > { %2148 = vmax.xlane.f32.xlu2 %v2147_v29  ;;  %v7340_v29 = vpop.trf.xlu2  ;;  %v7342_v43 = vpop.trf.xlu1 }
 0x1f9   : > { %10564 = vst [vmem:[#allocation108_spill] sm:$0xff] %v7340_v29  ;;  %v7348_v22 = vpop.f32.mrf.mxu2 }
 0x1fa   : > { %v7326_v51 = vpop.f32.mrf.mxu0  ;;  %v7328_v41 = vpop.f32.mrf.mxu1  ;;  %10567 = vst [vmem:[#allocation111_spill] sm:$0xff] %v7348_v22 }
 0x1fb   : > { %10561 = vst [vmem:[#allocation105_spill] sm:$0xff] %v7326_v51 }
 0x1fc   : > { %10562 = vst [vmem:[#allocation106_spill] sm:$0xff] %v7328_v41  ;;  %v1742_v3 = vpop.trf.xlu0 }
 0x1fd   : > { %5436 = vmatmul.msk.f32.gmra.mxu0 %vm627_vm0, %v7044_v19  ;;  %5468 = vmatmul.msk.f32.gmra.mxu1 %vm627_vm0, %v7044_v19  ;;  %v7350_v19 = vpop.f32.mrf.mxu3 }
 0x1fe   : > { %5500 = vmatmul.msk.f32.gmra.mxu2 %vm627_vm0, %v1742_v3  ;;  %5532 = vmatmul.msk.f32.gmra.mxu3 %vm627_vm0, %v1742_v3  ;;  %10568 = vst [vmem:[#allocation112_spill] sm:$0xff] %v7350_v19  ;;  %v2153_v3 = vmax.f32 %v7234_v59, %v7236_v28 }
 0x200   : > { %2151 = vmax.xlane.f32.xlu2 %v2150_v26  ;;  %v7360_v26 = vpop.trf.xlu2  ;;  %v7366_v29 = vpop.trf.xlu1 }
 0x201   : > { %10569 = vst [vmem:[#allocation113_spill] sm:$0xff] %v7360_v26  ;;  %v7368_v19 = vpop.f32.mrf.mxu2 }
 0x202   : > { %v7344_v36 = vpop.f32.mrf.mxu0  ;;  %v7346_v60 = vpop.f32.mrf.mxu1  ;;  %10572 = vst [vmem:[#allocation116_spill] sm:$0xff] %v7368_v19 }
 0x203   : > { %10565 = vst [vmem:[#allocation109_spill] sm:$0xff] %v7344_v36 }
 0x204   : > { %10566 = vst [vmem:[#allocation110_spill] sm:$0xff] %v7346_v60  ;;  %v1743_v23 = vpop.trf.xlu0 }
 0x205   : > { %5437 = vmatmul.msk.f32.gmra.mxu0 %vm627_vm0, %v7060_v34  ;;  %5469 = vmatmul.msk.f32.gmra.mxu1 %vm627_vm0, %v7060_v34  ;;  %v2156_v34 = vmax.f32 %v7252_v52, %v7254_v5  ;;  %v2165_v52 = vmax.f32 %v7308_v57, %v7310_v9 }
 0x206   : > { %5501 = vmatmul.msk.f32.gmra.mxu2 %vm627_vm0, %v1743_v23  ;;  %5533 = vmatmul.msk.f32.gmra.mxu3 %vm627_vm0, %v1743_v23  ;;  %v2114_v23 = vmax.f32 %v6984_v49, %v6986_v50  ;;  %v2159_v50 = vmax.f32 %v7270_v47, %v7272_v35 }
 0x208   : > { %2154 = vmax.xlane.f32.xlu2 %v2153_v3  ;;  %v7380_v3 = vpop.f32.mrf.mxu3 }
 0x209   : > { %10573 = vst [vmem:[#allocation117_spill] sm:$0xff] %v7380_v3 }
 0x20a   : > { %v7362_v10 = vpop.f32.mrf.mxu0  ;;  %v7364_v25 = vpop.f32.mrf.mxu1 }
 0x20b   : > { %10570 = vst [vmem:[#allocation114_spill] sm:$0xff] %v7362_v10 }
 0x20c   : > { %10571 = vst [vmem:[#allocation115_spill] sm:$0xff] %v7364_v25  ;;  %v1744_v22 = vpop.trf.xlu0 }
 0x20d   : > { %5438 = vmatmul.msk.f32.gmra.mxu0 %vm627_vm0, %v7076_v44  ;;  %5470 = vmatmul.msk.f32.gmra.mxu1 %vm627_vm0, %v7076_v44 }
 0x20e   : > { %5502 = vmatmul.msk.f32.gmra.mxu2 %vm627_vm0, %v1744_v22  ;;  %5534 = vmatmul.msk.f32.gmra.mxu3 %vm627_vm0, %v1744_v22  ;;  %v7394_v22 = vpop.trf.xlu1 }
 0x20f   : > { %2115 = vmax.xlane.f32.xlu1 %v2114_v23  ;;  %v2162_v23 = vmax.f32 %v7288_v11, %v7290_v20 }
 0x210   : > { %2157 = vmax.xlane.f32.xlu2 %v2156_v34  ;;  %v7400_v34 = vpop.f32.mrf.mxu2 }
 0x211   : > { %10577 = vst [vmem:[#allocation121_spill] sm:$0xff] %v7400_v34 }
 0x212   : > { %v7382_v28 = vpop.f32.mrf.mxu0  ;;  %v7384_v59 = vpop.f32.mrf.mxu1 }
 0x213   : > { %10574 = vst [vmem:[#allocation118_spill] sm:$0xff] %v7382_v28  ;;  %v7386_v26 = vpop.xlane.xlu2 %2109 }
 0x214   : > { %10575 = vst [vmem:[#allocation119_spill] sm:$0xff] %v7384_v59  ;;  %v1745_v44 = vpop.trf.xlu0 }
 0x215   : > { %10576 = vst [vmem:[#allocation120_spill] sm:$0xff] %v7386_v26  ;;  %5439 = vmatmul.msk.f32.gmra.mxu0 %vm627_vm0, %v7098_v31  ;;  %5471 = vmatmul.msk.f32.gmra.mxu1 %vm627_vm0, %v7098_v31  ;;  %v7402_v26 = vpop.f32.mrf.mxu3 }
 0x216   : > { %5503 = vmatmul.msk.f32.gmra.mxu2 %vm627_vm0, %v1745_v44  ;;  %5535 = vmatmul.msk.f32.gmra.mxu3 %vm627_vm0, %v1745_v44  ;;  %10578 = vst [vmem:[#allocation122_spill] sm:$0xff] %v7402_v26  ;;  %v2111_v44 = vmax.f32 %v6966_v38, %v6968_v40 }
 0x217   : > { %2160 = vmax.xlane.f32.xlu1 %v2159_v50  ;;  %v2168_v50 = vmax.f32 %v7326_v51, %v7328_v41 }
 0x218   : > { %2163 = vmax.xlane.f32.xlu2 %v2162_v23  ;;  %v7422_v23 = vpop.trf.xlu1  ;;  %v7424_v49 = vpop.f32.mrf.mxu2 }
 0x219   : > { %10582 = vst [vmem:[#allocation126_spill] sm:$0xff] %v7424_v49 }
 0x21a   : > { %v7404_v5 = vpop.f32.mrf.mxu0  ;;  %v7406_v35 = vpop.f32.mrf.mxu1 }
 0x21b   : > { %10579 = vst [vmem:[#allocation123_spill] sm:$0xff] %v7404_v5  ;;  %v7408_v31 = vpop.xlane.xlu2 %2118 }
 0x21c   : > { %10580 = vst [vmem:[#allocation124_spill] sm:$0xff] %v7406_v35  ;;  %v1746_v47 = vpop.trf.xlu0 }
 0x21d   : > { %10581 = vst [vmem:[#allocation125_spill] sm:$0xff] %v7408_v31  ;;  %5440 = vmatmul.msk.f32.gmra.mxu0 %vm627_vm0, %v7126_v7  ;;  %5472 = vmatmul.msk.f32.gmra.mxu1 %vm627_vm0, %v7126_v7  ;;  %v7430_v11 = vpop.f32.mrf.mxu3 }
 0x21e   : > { %5504 = vmatmul.msk.f32.gmra.mxu2 %vm627_vm0, %v1746_v47  ;;  %5536 = vmatmul.msk.f32.gmra.mxu3 %vm627_vm0, %v1746_v47  ;;  %10585 = vst [vmem:[#allocation129_spill] sm:$0xff] %v7430_v11 }
 0x21f   : > { %2166 = vmax.xlane.f32.xlu1 %v2165_v52  ;;  %v2171_v52 = vmax.f32 %v7344_v36, %v7346_v60 }
 0x220   : > { %2169 = vmax.xlane.f32.xlu2 %v2168_v50  ;;  %v2177_v50 = vmax.f32 %v7382_v28, %v7384_v59  ;;  %v7446_v40 = vpop.trf.xlu1  ;;  %v7454_v41 = vpop.f32.mrf.mxu2 }
 0x221   : > { %2112 = vmax.xlane.f32.xlu0 %v2111_v44  ;;  %v2174_v44 = vmax.f32 %v7362_v10, %v7364_v25  ;;  %10590 = vst [vmem:[#allocation134_spill] sm:$0xff] %v7454_v41 }
 0x222   : > { %v7426_v20 = vpop.f32.mrf.mxu0  ;;  %v7428_v7 = vpop.f32.mrf.mxu1 }
 0x223   : > { %10583 = vst [vmem:[#allocation127_spill] sm:$0xff] %v7426_v20  ;;  %v7432_v47 = vpop.xlane.xlu2 %2121 }
 0x224   : > { %10584 = vst [vmem:[#allocation128_spill] sm:$0xff] %v7428_v7  ;;  %v1747_v31 = vpop.trf.xlu0 }
 0x225   : > { %10586 = vst [vmem:[#allocation130_spill] sm:$0xff] %v7432_v47  ;;  %5441 = vmatmul.msk.f32.gmra.mxu0 %vm627_vm0, %v7146_v58  ;;  %5473 = vmatmul.msk.f32.gmra.mxu1 %vm627_vm0, %v7146_v58  ;;  %v7456_v51 = vpop.f32.mrf.mxu3 }
 0x226   : > { %5505 = vmatmul.msk.f32.gmra.mxu2 %vm627_vm0, %v1747_v31  ;;  %5537 = vmatmul.msk.f32.gmra.mxu3 %vm627_vm0, %v1747_v31  ;;  %10591 = vst [vmem:[#allocation135_spill] sm:$0xff] %v7456_v51  ;;  %v2180_v31 = vmax.f32 %v7404_v5, %v7406_v35 }
 0x227   : > { %2172 = vmax.xlane.f32.xlu1 %v2171_v52 }
 0x228   : > { %2178 = vmax.xlane.f32.xlu2 %v2177_v50  ;;  %v2183_v50 = vmax.f32 %v7426_v20, %v7428_v7 }
 0x229   : > { %2175 = vmax.xlane.f32.xlu0 %v2174_v44 }
 0x22a   : > { %v7448_v38 = vpop.f32.mrf.mxu0  ;;  %v7450_v47 = vpop.f32.mrf.mxu1 }
 0x22b   : > { %10587 = vst [vmem:[#allocation131_spill] sm:$0xff] %v7448_v38  ;;  %v7452_v58 = vpop.xlane.xlu2 %2124  ;;  %v2186_v52 = vmax.f32 %v7448_v38, %v7450_v47 }
 0x22c   : > { %10588 = vst [vmem:[#allocation132_spill] sm:$0xff] %v7450_v47  ;;  %v1748_v9 = vpop.trf.xlu0 }
 0x22d   : > { %10589 = vst [vmem:[#allocation133_spill] sm:$0xff] %v7452_v58  ;;  %5442 = vmatmul.msk.f32.gmra.mxu0 %vm627_vm0, %v7178_v15  ;;  %5474 = vmatmul.msk.f32.gmra.mxu1 %vm627_vm0, %v7178_v15  ;;  %v7474_v58 = vpop.trf.xlu1 }
 0x22e   : > { %5506 = vmatmul.msk.f32.gmra.mxu2 %vm627_vm0, %v1748_v9  ;;  %5538 = vmatmul.msk.f32.gmra.mxu3 %vm627_vm0, %v1748_v9  ;;  %v7486_v9 = vpop.f32.mrf.mxu2 }
 0x22f   : > { %2181 = vmax.xlane.f32.xlu1 %v2180_v31  ;;  %10595 = vst [vmem:[#allocation139_spill] sm:$0xff] %v7486_v9  ;;  %v7488_v31 = vpop.f32.mrf.mxu3 }
 0x230   : > { %2187 = vmax.xlane.f32.xlu2 %v2186_v52  ;;  %10596 = vst [vmem:[#allocation140_spill] sm:$0xff] %v7488_v31 }
 0x231   : > { %2184 = vmax.xlane.f32.xlu0 %v2183_v50 }
 0x232   : > { %v7470_v44 = vpop.f32.mrf.mxu0  ;;  %v7472_v57 = vpop.f32.mrf.mxu1 }
 0x233   : > { %10592 = vst [vmem:[#allocation136_spill] sm:$0xff] %v7470_v44  ;;  %v7476_v15 = vpop.xlane.xlu2 %2127  ;;  %v2189_v36 = vmax.f32 %v7470_v44, %v7472_v57  ;;  %v10630_v44 = vld [vmem:[#allocation54_spill] sm:$0xff] }
 0x234   : > { %10593 = vst [vmem:[#allocation137_spill] sm:$0xff] %v7472_v57  ;;  %v1749_v60 = vpop.trf.xlu0 }
 0x235   : > { %10594 = vst [vmem:[#allocation138_spill] sm:$0xff] %v7476_v15  ;;  %5443 = vmatmul.msk.f32.gmra.mxu0 %vm627_vm0, %v7206_v14  ;;  %5475 = vmatmul.msk.f32.gmra.mxu1 %vm627_vm0, %v7206_v14  ;;  %v7496_v10 = vpop.trf.xlu1 }
 0x236   : > { %5507 = vmatmul.msk.f32.gmra.mxu2 %vm627_vm0, %v1749_v60  ;;  %5539 = vmatmul.msk.f32.gmra.mxu3 %vm627_vm0, %v1749_v60 }
 0x237   : > { %2190 = vmax.xlane.f32.xlu1 %v2189_v36  ;;  %v7506_v36 = vpop.f32.mrf.mxu2  ;;  %v7508_v60 = vpop.f32.mrf.mxu3 }
 0x238   : > { %10598 = vst [vmem:[#allocation142_spill] sm:$0xff] %v7506_v36 }
 0x239   : > { %10599 = vst [vmem:[#allocation143_spill] sm:$0xff] %v7508_v60 }
 0x23a   : > { %v7490_v52 = vpop.f32.mrf.mxu0  ;;  %v7492_v50 = vpop.f32.mrf.mxu1 }
 0x23b   : > { %v2192_v15 = vmax.f32 %v7490_v52, %v7492_v50  ;;  %v7498_v14 = vpop.xlane.xlu2 %2130 }
 0x23c   : > { %v1750_v25 = vpop.trf.xlu0  ;;  %10597 = vst [vmem:[#allocation141_spill] sm:$0xff] %v7498_v14 }
 0x23d   : > { %5444 = vmatmul.msk.f32.gmra.mxu0 %vm627_vm0, %v7230_v2  ;;  %5476 = vmatmul.msk.f32.gmra.mxu1 %vm627_vm0, %v7230_v2 }
 0x23e   : > { %2193 = vmax.xlane.f32.xlu0 %v2192_v15  ;;  %5508 = vmatmul.msk.f32.gmra.mxu2 %vm627_vm0, %v1750_v25 }
 0x23f   : > { %5540 = vmatmul.msk.f32.gmra.mxu3 %vm627_vm0, %v1750_v25  ;;  %v7521_v25 = vpop.trf.xlu1  ;;  %v7530_v7 = vpop.f32.mrf.mxu2 }
 0x240   : > { %v7532_v20 = vpop.f32.mrf.mxu3 }
 0x242   : > { %v7510_v59 = vpop.f32.mrf.mxu0  ;;  %v7512_v28 = vpop.f32.mrf.mxu1 }
 0x243   : > { %v2195_v14 = vmax.f32 %v7510_v59, %v7512_v28  ;;  %v7523_v2 = vpop.xlane.xlu2 %2133 }
 0x244   : > { %v1751_v35 = vpop.trf.xlu0  ;;  %10600 = vst [vmem:[#allocation144_spill] sm:$0xff] %v7523_v2 }
 0x245   : > { %5445 = vmatmul.msk.f32.gmra.mxu0 %vm627_vm0, %v7250_v54  ;;  %5477 = vmatmul.msk.f32.gmra.mxu1 %vm627_vm0, %v7250_v54 }
 0x246   : > { %2196 = vmax.xlane.f32.xlu2 %v2195_v14  ;;  %5509 = vmatmul.msk.f32.gmra.mxu2 %vm627_vm0, %v1751_v35  ;;  %v2204_v14 = vmax.f32 %v6938_v17, %v6942_v18 }
 0x247   : > { %5541 = vmatmul.msk.f32.gmra.mxu3 %vm627_vm0, %v1751_v35  ;;  %v7544_v35 = vpop.trf.xlu1  ;;  %v7558_v57 = vpop.f32.mrf.mxu2 }
 0x24a   : > { %v7526_v15 = vpop.f32.mrf.mxu0  ;;  %v7528_v5 = vpop.f32.mrf.mxu1 }
 0x24b   : > { %v2198_v54 = vmax.f32 %v7526_v15, %v7528_v5  ;;  %v7546_v2 = vpop.xlane.xlu2 %2136 }
 0x24c   : > { %v1752_v47 = vpop.trf.xlu0  ;;  %10601 = vst [vmem:[#allocation145_spill] sm:$0xff] %v7546_v2  ;;  %v2216_v2 = vmax.f32 %v7014_v13, %v7016_v0  ;;  %v10618_v13 = vld [vmem:[#allocation73_spill] sm:$0xff] }
 0x24d   : > { %5446 = vmatmul.msk.f32.gmra.mxu0 %vm627_vm0, %v7274_v37  ;;  %5478 = vmatmul.msk.f32.gmra.mxu1 %vm627_vm0, %v7274_v37  ;;  %v2207_v37 = vmax.f32 %v6952_v30, %v6958_v32 }
 0x24e   : > { %2205 = vmax.xlane.f32.xlu2 %v2204_v14  ;;  %2199 = vmax.xlane.f32.xlu1 %v2198_v54  ;;  %v2213_v54 = vmax.f32 %v6994_v4, %v6998_v56 }
 0x24f   : > { %5510 = vmatmul.msk.f32.gmra.mxu2 %vm627_vm0, %v1752_v47  ;;  %5542 = vmatmul.msk.f32.gmra.mxu3 %vm627_vm0, %v1752_v47  ;;  %v7560_v47 = vpop.f32.mrf.mxu3  ;;  %v7572_v56 = vpop.trf.xlu1 }
 0x252   : > { %v7548_v38 = vpop.f32.mrf.mxu0  ;;  %v7550_v18 = vpop.f32.mrf.mxu1 }
 0x253   : > { %v2201_v17 = vmax.f32 %v7548_v38, %v7550_v18  ;;  %v7574_v4 = vpop.xlane.xlu2 %2139 }
 0x254   : > { %v1753_v14 = vpop.trf.xlu0  ;;  %10604 = vst [vmem:[#allocation148_spill] sm:$0xff] %v7574_v4 }
 0x255   : > { %5447 = vmatmul.msk.f32.gmra.mxu0 %vm627_vm0, %v7298_v53  ;;  %5479 = vmatmul.msk.f32.gmra.mxu1 %vm627_vm0, %v7298_v53  ;;  %v2222_v53 = vmax.f32 %v7058_v33, %v7066_v24  ;;  %v10619_v24 = vld [vmem:[#allocation72_spill] sm:$0xff] }
 0x256   : > { %2214 = vmax.xlane.f32.xlu2 %v2213_v54  ;;  %2208 = vmax.xlane.f32.xlu1 %v2207_v37  ;;  %v7586_v37 = vpop.f32.mrf.mxu2  ;;  %v2237_v33 = vmax.f32 %v10619_v24, %v10618_v13 }
 0x257   : > { %2202 = vmax.xlane.f32.xlu0 %v2201_v17  ;;  %5511 = vmatmul.msk.f32.gmra.mxu2 %vm627_vm0, %v1753_v14  ;;  %v2210_v17 = vmax.f32 %v6972_v45, %v6978_v46  ;;  %v7588_v54 = vpop.f32.mrf.mxu3 }
 0x258   : > { %5543 = vmatmul.msk.f32.gmra.mxu3 %vm627_vm0, %v1753_v14 }
 0x25a   : > { %v7568_v32 = vpop.f32.mrf.mxu0  ;;  %v7570_v30 = vpop.f32.mrf.mxu1 }
 0x25b   : > { %10602 = vst [vmem:[#allocation146_spill] sm:$0xff] %v7568_v32  ;;  %v7606_v45 = vpop.xlane.xlu2 %2142 }
 0x25c   : > { %10603 = vst [vmem:[#allocation147_spill] sm:$0xff] %v7570_v30 }
 0x25d   : > { %5448 = vmatmul.msk.f32.gmra.mxu0 %vm627_vm0, %v7006_v62  ;;  %5480 = vmatmul.msk.f32.gmra.mxu1 %vm627_vm0, %v7006_v62  ;;  %v2225_v62 = vmax.f32 %v7082_v27, %v7086_v48  ;;  %10607 = vst [vmem:[#allocation151_spill] sm:$0xff] %v7606_v45  ;;  %v10610_v27 = vld [vmem:[#allocation67_spill] sm:$0xff] }
 0x25e   : > { %2223 = vmax.xlane.f32.xlu2 %v2222_v53  ;;  %2217 = vmax.xlane.f32.xlu1 %v2216_v2  ;;  %v2231_v2 = vmax.f32 %v7128_v8, %v7134_v39  ;;  %v2219_v53 = vmax.f32 %v7036_v12, %v7042_v21  ;;  %v10613_v8 = vld [vmem:[#allocation42_spill] sm:$0xff] }
 0x25f   : > { %2211 = vmax.xlane.f32.xlu0 %v2210_v17  ;;  %5512 = vmatmul.msk.f32.gmra.mxu2 %vm627_vm0, %v7322_v55  ;;  %v7604_v17 = vpop.trf.xlu1  ;;  %v7618_v21 = vpop.f32.mrf.mxu3 }
 0x260   : > { %5544 = vmatmul.msk.f32.gmra.mxu3 %vm627_vm0, %v7322_v55  ;;  %v7616_v55 = vpop.f32.mrf.mxu2 }
 0x262   : > { %v7594_v14 = vpop.f32.mrf.mxu0  ;;  %v7596_v46 = vpop.f32.mrf.mxu1 }
 0x263   : > { %10605 = vst [vmem:[#allocation149_spill] sm:$0xff] %v7594_v14  ;;  %v7636_v0 = vpop.xlane.xlu2 %2145 }
 0x264   : > { %10606 = vst [vmem:[#allocation150_spill] sm:$0xff] %v7596_v46 }
 0x265   : > { %5449 = vmatmul.msk.f32.gmra.mxu0 %vm627_vm0, %v7028_v16  ;;  %5481 = vmatmul.msk.f32.gmra.mxu1 %vm627_vm0, %v7028_v16  ;;  %v2234_v16 = vmax.f32 %v10610_v27, %v7158_v63  ;;  %v10617_v27 = vld [vmem:[#allocation94_spill] sm:$0xff] }
 0x266   : > { %2232 = vmax.xlane.f32.xlu2 %v2231_v2  ;;  %2226 = vmax.xlane.f32.xlu1 %v2225_v62  ;;  %v2240_v62 = vmax.f32 %v7212_v1, %v7214_v6  ;;  %v10611_v2 = vld [vmem:[#allocation56_spill] sm:$0xff]  ;;  %v10620_v6 = vld [vmem:[#allocation47_spill] sm:$0xff] }
 0x267   : > { %2220 = vmax.xlane.f32.xlu0 %v2219_v53  ;;  %5513 = vmatmul.msk.f32.gmra.mxu2 %vm627_vm0, %v7342_v43  ;;  %v10612_v53 = vld [vmem:[#allocation55_spill] sm:$0xff] }
 0x268   : > { %5545 = vmatmul.msk.f32.gmra.mxu3 %vm627_vm0, %v7342_v43  ;;  %v2228_v39 = vmax.f32 %v10612_v53, %v10611_v2  ;;  %v7634_v43 = vpop.trf.xlu1  ;;  %v7646_v63 = vpop.f32.mrf.mxu2 }
 0x26a   : > { %v7620_v12 = vpop.f32.mrf.mxu0  ;;  %v7622_v48 = vpop.f32.mrf.mxu1 }
 0x26b   : > { %10608 = vst [vmem:[#allocation152_spill] sm:$0xff] %v7620_v12  ;;  %v7666_v1 = vpop.xlane.xlu2 %2148 }
 0x26c   : > { %10609 = vst [vmem:[#allocation153_spill] sm:$0xff] %v7622_v48 }
 0x26d   : > { %5450 = vmatmul.msk.f32.gmra.mxu0 %vm627_vm0, %v10613_v8  ;;  %5482 = vmatmul.msk.f32.gmra.mxu1 %vm627_vm0, %v10613_v8  ;;  %v7648_v8 = vpop.f32.mrf.mxu3  ;;  %10621 = vst [vmem:[#allocation47_spill] sm:$0xff] %v7666_v1 }
 0x26e   : > { %2241 = vmax.xlane.f32.xlu2 %v2240_v62  ;;  %2235 = vmax.xlane.f32.xlu1 %v2234_v16  ;;  %v10616_v16 = vld [vmem:[#allocation82_spill] sm:$0xff] }
 0x26f   : > { %2229 = vmax.xlane.f32.xlu0 %v2228_v39  ;;  %5514 = vmatmul.msk.f32.gmra.mxu2 %vm627_vm0, %v7366_v29  ;;  %v2243_v62 = vmax.f32 %v10616_v16, %v7238_v61  ;;  %v2249_v39 = vmax.f32 %v10617_v27, %v7286_v42  ;;  %v10624_v61 = vld [vmem:[#allocation100_spill] sm:$0xff]  ;;  %v10625_v16 = vld [vmem:[#allocation99_spill] sm:$0xff]  ;;  %v10628_v42 = vld [vmem:[#allocation90_spill] sm:$0xff] }
 0x270   : > { %5546 = vmatmul.msk.f32.gmra.mxu3 %vm627_vm0, %v7366_v29  ;;  %v7664_v29 = vpop.trf.xlu1  ;;  %v10629_v27 = vld [vmem:[#allocation89_spill] sm:$0xff]  ;;  %v7678_v45 = vpop.f32.mrf.mxu2 }
 0x271   : > { %v2246_v4 = vmax.f32 %v10629_v27, %v10628_v42  ;;  %v10635_v27 = vld [vmem:[#allocation59_spill] sm:$0xff] }
 0x272   : > { %v7642_v2 = vpop.f32.mrf.mxu0  ;;  %v7644_v53 = vpop.f32.mrf.mxu1 }
 0x273   : > { %10614 = vst [vmem:[#allocation42_spill] sm:$0xff] %v7642_v2 }
 0x274   : > { %10615 = vst [vmem:[#allocation154_spill] sm:$0xff] %v7644_v53 }
 0x275   : > { %5451 = vmatmul.msk.f32.gmra.mxu0 %vm627_vm0, %v10620_v6  ;;  %5483 = vmatmul.msk.f32.gmra.mxu1 %vm627_vm0, %v10620_v6  ;;  %v2252_v6 = vmax.f32 %v10625_v16, %v10624_v61 }
 0x276   : > { %2250 = vmax.xlane.f32.xlu2 %v2249_v39  ;;  %2244 = vmax.xlane.f32.xlu1 %v2243_v62  ;;  %v10626_v39 = vld [vmem:[#allocation112_spill] sm:$0xff]  ;;  %v10627_v62 = vld [vmem:[#allocation111_spill] sm:$0xff] }
 0x277   : > { %2238 = vmax.xlane.f32.xlu0 %v2237_v33  ;;  %5515 = vmatmul.msk.f32.gmra.mxu2 %vm627_vm0, %v7394_v22  ;;  %v2258_v33 = vmax.f32 %v10627_v62, %v10626_v39  ;;  %v7696_v62 = vpop.xlane.xlu2 %2151 }
 0x278   : > { %5547 = vmatmul.msk.f32.gmra.mxu3 %vm627_vm0, %v7394_v22  ;;  %v7680_v22 = vpop.f32.mrf.mxu3  ;;  %v7694_v39 = vpop.trf.xlu1 }
 0x27a   : > { %v7668_v13 = vpop.f32.mrf.mxu0  ;;  %v7670_v24 = vpop.f32.mrf.mxu1 }
 0x27b   : > { %10622 = vst [vmem:[#allocation155_spill] sm:$0xff] %v7668_v13 }
 0x27c   : > { %10623 = vst [vmem:[#allocation156_spill] sm:$0xff] %v7670_v24 }
 0x27d   : > { %5452 = vmatmul.msk.f32.gmra.mxu0 %vm627_vm0, %v10630_v44  ;;  %5484 = vmatmul.msk.f32.gmra.mxu1 %vm627_vm0, %v10630_v44  ;;  %v2261_v44 = vmax.f32 %v7368_v19, %v7380_v3  ;;  %v10638_v19 = vld [vmem:[#allocation64_spill] sm:$0xff] }
 0x27e   : > { %2253 = vmax.xlane.f32.xlu1 %v2252_v6  ;;  %2259 = vmax.xlane.f32.xlu2 %v2258_v33  ;;  %v10633_v6 = vld [vmem:[#allocation107_spill] sm:$0xff]  ;;  %v10634_v33 = vld [vmem:[#allocation104_spill] sm:$0xff] }
 0x27f   : > { %2247 = vmax.xlane.f32.xlu0 %v2246_v4  ;;  %5516 = vmatmul.msk.f32.gmra.mxu2 %vm627_vm0, %v7422_v23  ;;  %v2267_v4 = vmax.f32 %v7424_v49, %v7430_v11  ;;  %v2255_v42 = vmax.f32 %v10634_v33, %v10633_v6  ;;  %v2276_v6 = vmax.f32 %v7506_v36, %v7508_v60 }
 0x280   : > { %5548 = vmatmul.msk.f32.gmra.mxu3 %vm627_vm0, %v7422_v23  ;;  %v7708_v23 = vpop.f32.mrf.mxu2  ;;  %v7710_v1 = vpop.f32.mrf.mxu3  ;;  %v2285_v11 = vmax.f32 %v7586_v37, %v7588_v54  ;;  %v2294_v49 = vmax.f32 %v7678_v45, %v7680_v22 }
 0x282   : > { %v7690_v61 = vpop.f32.mrf.mxu0  ;;  %v7692_v16 = vpop.f32.mrf.mxu1 }
 0x283   : > { %10631 = vst [vmem:[#allocation54_spill] sm:$0xff] %v7690_v61 }
 0x284   : > { %10632 = vst [vmem:[#allocation157_spill] sm:$0xff] %v7692_v16 }
 0x285   : > { %5453 = vmatmul.msk.f32.gmra.mxu0 %vm627_vm0, %v10635_v27  ;;  %5485 = vmatmul.msk.f32.gmra.mxu1 %vm627_vm0, %v10635_v27  ;;  %v2270_v27 = vmax.f32 %v7454_v41, %v7456_v51  ;;  %v10648_v41 = vld [vmem:[#allocation76_spill] sm:$0xff] }
 0x286   : > { %2262 = vmax.xlane.f32.xlu1 %v2261_v44  ;;  %2268 = vmax.xlane.f32.xlu2 %v2267_v4  ;;  %v2264_v44 = vmax.f32 %v7400_v34, %v7402_v26  ;;  %v7728_v4 = vpop.xlane.xlu2 %2154  ;;  %v2279_v34 = vmax.f32 %v7530_v7, %v7532_v20 }
 0x287   : > { %2256 = vmax.xlane.f32.xlu0 %v2255_v42  ;;  %5517 = vmatmul.msk.f32.gmra.mxu2 %vm627_vm0, %v7446_v40  ;;  %v7726_v42 = vpop.trf.xlu1 }
 0x288   : > { %5549 = vmatmul.msk.f32.gmra.mxu3 %vm627_vm0, %v7446_v40  ;;  %v7738_v40 = vpop.f32.mrf.mxu2  ;;  %v7740_v26 = vpop.f32.mrf.mxu3 }
 0x289   : > { %10639 = vst [vmem:[#allocation64_spill] sm:$0xff] %v7738_v40 }
 0x28a   : > { %v7718_v33 = vpop.f32.mrf.mxu0  ;;  %v7720_v3 = vpop.f32.mrf.mxu1  ;;  %10640 = vst [vmem:[#allocation159_spill] sm:$0xff] %v7740_v26  ;;  %v2288_v26 = vmax.f32 %v7616_v55, %v7618_v21 }
 0x28b   : > { %10636 = vst [vmem:[#allocation59_spill] sm:$0xff] %v7718_v33 }
 0x28c   : > { %10637 = vst [vmem:[#allocation158_spill] sm:$0xff] %v7720_v3 }
 0x28d   : > { %5454 = vmatmul.msk.f32.gmra.mxu0 %vm627_vm0, %v10638_v19  ;;  %5486 = vmatmul.msk.f32.gmra.mxu1 %vm627_vm0, %v10638_v19 }
 0x28e   : > { %2271 = vmax.xlane.f32.xlu1 %v2270_v27  ;;  %2277 = vmax.xlane.f32.xlu2 %v2276_v6  ;;  %v2273_v27 = vmax.f32 %v7486_v9, %v7488_v31  ;;  %v7758_v40 = vpop.xlane.xlu2 %2157 }
 0x28f   : > { %2265 = vmax.xlane.f32.xlu0 %v2264_v44  ;;  %5518 = vmatmul.msk.f32.gmra.mxu2 %vm627_vm0, %v7474_v58  ;;  %v10643_v44 = vld [vmem:[#allocation69_spill] sm:$0xff] }
 0x290   : > { %5550 = vmatmul.msk.f32.gmra.mxu3 %vm627_vm0, %v7474_v58  ;;  %v7756_v58 = vpop.xlane.xlu1 %2115  ;;  %v7776_v51 = vpop.f32.mrf.mxu3 }
 0x291   : > { %10647 = vst [vmem:[#allocation164_spill] sm:$0xff] %v7776_v51  ;;  %v2297_v51 = vmax.f32 %v7708_v23, %v7710_v1 }
 0x292   : > { %v7746_v19 = vpop.f32.mrf.mxu0  ;;  %v7748_v6 = vpop.f32.mrf.mxu1 }
 0x293   : > { %10641 = vst [vmem:[#allocation160_spill] sm:$0xff] %v7746_v19 }
 0x294   : > { %10642 = vst [vmem:[#allocation161_spill] sm:$0xff] %v7748_v6  ;;  %v7808_v60 = vpop.xlane.xlu0 %2112 }
 0x295   : > { %5455 = vmatmul.msk.f32.gmra.mxu0 %vm627_vm0, %v10643_v44  ;;  %5487 = vmatmul.msk.f32.gmra.mxu1 %vm627_vm0, %v10643_v44 }
 0x296   : > { %2280 = vmax.xlane.f32.xlu1 %v2279_v34  ;;  %2286 = vmax.xlane.f32.xlu2 %v2285_v11  ;;  %v2282_v34 = vmax.f32 %v7558_v57, %v7560_v47 }
 0x297   : > { %2274 = vmax.xlane.f32.xlu0 %v2273_v27  ;;  %5519 = vmatmul.msk.f32.gmra.mxu2 %vm627_vm0, %v7496_v10  ;;  %v7774_v27 = vpop.f32.mrf.mxu2 }
 0x298   : > { %5551 = vmatmul.msk.f32.gmra.mxu3 %vm627_vm0, %v7496_v10  ;;  %10646 = vst [vmem:[#allocation163_spill] sm:$0xff] %v7774_v27  ;;  %v7786_v10 = vpop.xlane.xlu1 %2160  ;;  %v7788_v27 = vpop.xlane.xlu2 %2163 }
 0x29a   : > { %v7768_v44 = vpop.f32.mrf.mxu0  ;;  %v7770_v11 = vpop.f32.mrf.mxu1 }
 0x29b   : > { %10644 = vst [vmem:[#allocation69_spill] sm:$0xff] %v7768_v44 }
 0x29c   : > { %10645 = vst [vmem:[#allocation162_spill] sm:$0xff] %v7770_v11 }
 0x29d   : > { %5456 = vmatmul.msk.f32.gmra.mxu0 %vm627_vm0, %v10648_v41  ;;  %5488 = vmatmul.msk.f32.gmra.mxu1 %vm627_vm0, %v10648_v41  ;;  %v2303_v41 = vmax.f32 %v7594_v14, %v7596_v46  ;;  %v10656_v14 = vld [vmem:[#allocation86_spill] sm:$0xff] }
 0x29e   : > { %2289 = vmax.xlane.f32.xlu1 %v2288_v26  ;;  %2295 = vmax.xlane.f32.xlu2 %v2294_v49  ;;  %v2291_v49 = vmax.f32 %v7646_v63, %v7648_v8 }
 0x29f   : > { %2283 = vmax.xlane.f32.xlu0 %v2282_v34  ;;  %5520 = vmatmul.msk.f32.gmra.mxu2 %vm627_vm0, %v7521_v25  ;;  %v7800_v26 = vpop.f32.mrf.mxu2  ;;  %v10653_v34 = vld [vmem:[#allocation81_spill] sm:$0xff] }
 0x2a0   : > { %5552 = vmatmul.msk.f32.gmra.mxu3 %vm627_vm0, %v7521_v25  ;;  %10651 = vst [vmem:[#allocation166_spill] sm:$0xff] %v7800_v26  ;;  %v7802_v25 = vpop.f32.mrf.mxu3  ;;  %v7818_v46 = vpop.xlane.xlu1 %2166 }
 0x2a1   : > { %10652 = vst [vmem:[#allocation167_spill] sm:$0xff] %v7802_v25 }
 0x2a2   : > { %v7792_v31 = vpop.f32.mrf.mxu0  ;;  %v7794_v9 = vpop.f32.mrf.mxu1 }
 0x2a3   : > { %10649 = vst [vmem:[#allocation76_spill] sm:$0xff] %v7792_v31 }
 0x2a4   : > { %10650 = vst [vmem:[#allocation165_spill] sm:$0xff] %v7794_v9 }
 0x2a5   : > { %5457 = vmatmul.msk.f32.gmra.mxu0 %vm627_vm0, %v10653_v34  ;;  %5489 = vmatmul.msk.f32.gmra.mxu1 %vm627_vm0, %v10653_v34  ;;  %v2306_v34 = vmax.f32 %v7620_v12, %v7622_v48  ;;  %v7838_v48 = vpop.xlane.xlu0 %2175 }
 0x2a6   : > { %2304 = vmax.xlane.f32.xlu2 %v2303_v41  ;;  %2298 = vmax.xlane.f32.xlu1 %v2297_v51  ;;  %v2312_v41 = vmax.f32 %v7668_v13, %v7670_v24  ;;  %v7824_v51 = vpop.xlane.xlu2 %2169 }
 0x2a7   : > { %2292 = vmax.xlane.f32.xlu0 %v2291_v49  ;;  %5521 = vmatmul.msk.f32.gmra.mxu2 %vm627_vm0, %v7544_v35  ;;  %v2300_v49 = vmax.f32 %v7568_v32, %v7570_v30 }
 0x2a8   : > { %5553 = vmatmul.msk.f32.gmra.mxu3 %vm627_vm0, %v7544_v35  ;;  %v7832_v35 = vpop.f32.mrf.mxu2  ;;  %v7834_v36 = vpop.f32.mrf.mxu3 }
 0x2a9   : > { %10657 = vst [vmem:[#allocation86_spill] sm:$0xff] %v7832_v35  ;;  %v10661_v35 = vld [vmem:[#allocation91_spill] sm:$0xff] }
 0x2aa   : > { %v7814_v26 = vpop.f32.mrf.mxu0  ;;  %v7816_v25 = vpop.f32.mrf.mxu1  ;;  %10658 = vst [vmem:[#allocation169_spill] sm:$0xff] %v7834_v36 }
 0x2ab   : > { %10654 = vst [vmem:[#allocation81_spill] sm:$0xff] %v7814_v26 }
 0x2ac   : > { %10655 = vst [vmem:[#allocation168_spill] sm:$0xff] %v7816_v25 }
 0x2ad   : > { %5458 = vmatmul.msk.f32.gmra.mxu0 %vm627_vm0, %v10656_v14  ;;  %5490 = vmatmul.msk.f32.gmra.mxu1 %vm627_vm0, %v10656_v14  ;;  %v2315_v14 = vmax.f32 %v7690_v61, %v7692_v16  ;;  %v2327_v61 = vmax.f32 %v7792_v31, %v7794_v9 }
 0x2ae   : > { %2313 = vmax.xlane.f32.xlu2 %v2312_v41  ;;  %2307 = vmax.xlane.f32.xlu1 %v2306_v34  ;;  %v2321_v34 = vmax.f32 %v7746_v19, %v7748_v6  ;;  %v2309_v41 = vmax.f32 %v7642_v2, %v7644_v53  ;;  %v7868_v53 = vpop.xlane.xlu0 %2184 }
 0x2af   : > { %2301 = vmax.xlane.f32.xlu0 %v2300_v49  ;;  %5522 = vmatmul.msk.f32.gmra.mxu2 %vm627_vm0, %v7572_v56  ;;  %v7852_v49 = vpop.xlane.xlu1 %2172 }
 0x2b0   : > { %5554 = vmatmul.msk.f32.gmra.mxu3 %vm627_vm0, %v7572_v56  ;;  %v7858_v56 = vpop.xlane.xlu2 %2178  ;;  %v7864_v36 = vpop.f32.mrf.mxu2 }
 0x2b1   : > { %10662 = vst [vmem:[#allocation91_spill] sm:$0xff] %v7864_v36  ;;  %v7866_v12 = vpop.f32.mrf.mxu3 }
 0x2b2   : > { %v7842_v30 = vpop.f32.mrf.mxu0  ;;  %v7844_v32 = vpop.f32.mrf.mxu1  ;;  %10663 = vst [vmem:[#allocation172_spill] sm:$0xff] %v7866_v12 }
 0x2b3   : > { %10659 = vst [vmem:[#allocation170_spill] sm:$0xff] %v7842_v30 }
 0x2b4   : > { %10660 = vst [vmem:[#allocation171_spill] sm:$0xff] %v7844_v32 }
 0x2b5   : > { %5459 = vmatmul.msk.f32.gmra.mxu0 %vm627_vm0, %v10661_v35  ;;  %5491 = vmatmul.msk.f32.gmra.mxu1 %vm627_vm0, %v10661_v35 }
 0x2b6   : > { %2322 = vmax.xlane.f32.xlu2 %v2321_v34  ;;  %2316 = vmax.xlane.f32.xlu1 %v2315_v14  ;;  %v2324_v14 = vmax.f32 %v7768_v44, %v7770_v11  ;;  %v2330_v34 = vmax.f32 %v7814_v26, %v7816_v25  ;;  %v7892_v24 = vpop.xlane.xlu0 %2193 }
 0x2b7   : > { %2310 = vmax.xlane.f32.xlu0 %v2309_v41  ;;  %5523 = vmatmul.msk.f32.gmra.mxu2 %vm627_vm0, %v7604_v17  ;;  %v2318_v41 = vmax.f32 %v7718_v33, %v7720_v3  ;;  %v7884_v36 = vpop.xlane.xlu1 %2181 }
 0x2b8   : > { %5555 = vmatmul.msk.f32.gmra.mxu3 %vm627_vm0, %v7604_v17  ;;  %v10666_v17 = vld [vmem:[#allocation98_spill] sm:$0xff]  ;;  %v7888_v12 = vpop.xlane.xlu2 %2187 }
 0x2ba   : > { %v7870_v2 = vpop.f32.mrf.mxu0  ;;  %v7872_v35 = vpop.f32.mrf.mxu1 }
 0x2bb   : > { %10664 = vst [vmem:[#allocation173_spill] sm:$0xff] %v7870_v2 }
 0x2bc   : > { %10665 = vst [vmem:[#allocation174_spill] sm:$0xff] %v7872_v35 }
 0x2bd   : > { %5460 = vmatmul.msk.f32.gmra.mxu0 %vm627_vm0, %v10666_v17  ;;  %5492 = vmatmul.msk.f32.gmra.mxu1 %vm627_vm0, %v10666_v17  ;;  %v7898_v17 = vpop.f32.mrf.mxu2 }
 0x2be   : > { %2331 = vmax.xlane.f32.xlu2 %v2330_v34  ;;  %2325 = vmax.xlane.f32.xlu1 %v2324_v14  ;;  %10669 = vst [vmem:[#allocation176_spill] sm:$0xff] %v7898_v17  ;;  %v7900_v14 = vpop.f32.mrf.mxu3  ;;  %v2333_v34 = vmax.f32 %v7842_v30, %v7844_v32 }
 0x2bf   : > { %2319 = vmax.xlane.f32.xlu0 %v2318_v41  ;;  %5524 = vmatmul.msk.f32.gmra.mxu2 %vm627_vm0, %v7634_v43  ;;  %10670 = vst [vmem:[#allocation177_spill] sm:$0xff] %v7900_v14  ;;  %v7918_v14 = vpop.xlane.xlu1 %2190 }
 0x2c0   : > { %5556 = vmatmul.msk.f32.gmra.mxu3 %vm627_vm0, %v7634_v43  ;;  %v10671_v43 = vld [vmem:[#allocation103_spill] sm:$0xff]  ;;  %v7914_v17 = vpop.xlane.xlu2 %2196 }
 0x2c2   : > { %v7894_v13 = vpop.f32.mrf.mxu0  ;;  %v7896_v16 = vpop.f32.mrf.mxu1 }
 0x2c3   : > { %10667 = vst [vmem:[#allocation98_spill] sm:$0xff] %v7894_v13  ;;  %v2339_v41 = vmax.f32 %v7894_v13, %v7896_v16 }
 0x2c4   : > { %10668 = vst [vmem:[#allocation175_spill] sm:$0xff] %v7896_v16 }
 0x2c5   : > { %5461 = vmatmul.msk.f32.gmra.mxu0 %vm627_vm0, %v10671_v43  ;;  %5493 = vmatmul.msk.f32.gmra.mxu1 %vm627_vm0, %v10671_v43 }
 0x2c6   : > { %2340 = vmax.xlane.f32.xlu2 %v2339_v41  ;;  %2334 = vmax.xlane.f32.xlu1 %v2333_v34  ;;  %v2336_v34 = vmax.f32 %v7870_v2, %v7872_v35  ;;  %v10674_v41 = vld [vmem:[#allocation108_spill] sm:$0xff]  ;;  %v7936_v43 = vpop.f32.mrf.mxu3 }
 0x2c7   : > { %2328 = vmax.xlane.f32.xlu0 %v2327_v61  ;;  %5525 = vmatmul.msk.f32.gmra.mxu2 %vm627_vm0, %v7664_v29  ;;  %10676 = vst [vmem:[#allocation179_spill] sm:$0xff] %v7936_v43  ;;  %v2200_v19 = vpop.xlane.xlu1 %2199 }
 0x2c8   : > { %5557 = vmatmul.msk.f32.gmra.mxu3 %vm627_vm0, %v7664_v29  ;;  %v7934_v29 = vpop.f32.mrf.mxu2  ;;  %v7942_v11 = vpop.xlane.xlu2 %2205 }
 0x2c9   : > { %10675 = vst [vmem:[#allocation108_spill] sm:$0xff] %v7934_v29 }
 0x2ca   : > { %v7920_v3 = vpop.xlane.xlu0 %2202  ;;  %v7922_v33 = vpop.f32.mrf.mxu0  ;;  %10677 = vst [vmem:[#allocation180_spill] sm:$0xff] %v7942_v11 }
 0x2cb   : > { %10672 = vst [vmem:[#allocation103_spill] sm:$0xff] %v7922_v33  ;;  %v7924_v6 = vpop.f32.mrf.mxu1 }
 0x2cc   : > { %10673 = vst [vmem:[#allocation178_spill] sm:$0xff] %v7924_v6  ;;  %v2342_v61 = vmax.f32 %v7922_v33, %v7924_v6  ;;  %v2552_v33 = vsub.f32 %v7526_v15, %v2200_v19  ;;  %v2554_v15 = vsub.f32 %v7548_v38, %v7920_v3 }
 0x2cd   : > { %5462 = vmatmul.msk.f32.gmra.mxu0 %vm627_vm0, %v10674_v41  ;;  %5494 = vmatmul.msk.f32.gmra.mxu1 %vm627_vm0, %v10674_v41 }
 0x2ce   : > { %2343 = vmax.xlane.f32.xlu1 %v2342_v61  ;;  %v7958_v61 = vpop.f32.mrf.mxu3 }
 0x2cf   : > { %2337 = vmax.xlane.f32.xlu0 %v2336_v34  ;;  %5526 = vmatmul.msk.f32.gmra.mxu2 %vm627_vm0, %v7694_v39  ;;  %v10681_v34 = vld [vmem:[#allocation113_spill] sm:$0xff]  ;;  %10683 = vst [vmem:[#allocation184_spill] sm:$0xff] %v7958_v61  ;;  %v7964_v43 = vpop.xlane.xlu1 %2208 }
 0x2d0   : > { %5558 = vmatmul.msk.f32.gmra.mxu3 %vm627_vm0, %v7694_v39  ;;  %v7956_v39 = vpop.f32.mrf.mxu2  ;;  %v7970_v26 = vpop.xlane.xlu2 %2214 }
 0x2d1   : > { %10682 = vst [vmem:[#allocation113_spill] sm:$0xff] %v7956_v39 }
 0x2d2   : > { %v7944_v44 = vpop.xlane.xlu0 %2211  ;;  %v7946_v9 = vpop.f32.mrf.mxu0 }
 0x2d3   : > { %10678 = vst [vmem:[#allocation181_spill] sm:$0xff] %v7944_v44  ;;  %v7948_v41 = vpop.f32.mrf.mxu1 }
 0x2d4   : > { %10679 = vst [vmem:[#allocation182_spill] sm:$0xff] %v7946_v9  ;;  %v2345_v29 = vmax.f32 %v7946_v9, %v7948_v41 }
 0x2d5   : > { %10680 = vst [vmem:[#allocation183_spill] sm:$0xff] %v7948_v41  ;;  %5463 = vmatmul.msk.f32.gmra.mxu0 %vm627_vm0, %v10681_v34  ;;  %5495 = vmatmul.msk.f32.gmra.mxu1 %vm627_vm0, %v10681_v34 }
 0x2d7   : > { %2346 = vmax.xlane.f32.xlu0 %v2345_v29  ;;  %5527 = vmatmul.msk.f32.gmra.mxu2 %vm627_vm0, %v7726_v42  ;;  %v7980_v32 = vpop.xlane.xlu1 %2217 }
 0x2d8   : > { %5559 = vmatmul.msk.f32.gmra.mxu3 %vm627_vm0, %v7726_v42  ;;  %v7984_v30 = vpop.xlane.xlu2 %2223 }
 0x2da   : > { %v7966_v31 = vpop.f32.mrf.mxu0  ;;  %v7972_v34 = vpop.xlane.xlu0 %2220 }
 0x2db   : > { %10684 = vst [vmem:[#allocation185_spill] sm:$0xff] %v7966_v31  ;;  %v7968_v25 = vpop.f32.mrf.mxu1 }
 0x2dc   : > { %10685 = vst [vmem:[#allocation186_spill] sm:$0xff] %v7968_v25  ;;  %v2348_v29 = vmax.f32 %v7966_v31, %v7968_v25 }
 0x2dd   : > { %10686 = vst [vmem:[#allocation187_spill] sm:$0xff] %v7972_v34  ;;  %v2868_v34 = vmul.f32 1.442695, %v2552_v33 }
 0x2de   : > { %2349 = vmax.xlane.f32.xlu2 %v2348_v29 }
 0x2df   : > { %v7994_v25 = vpop.xlane.xlu1 %2226  ;;  %5644 = vpow2.f32 %v2868_v34 }
 0x2e0   : > { %10692 = vst [vmem:[#allocation193_spill] sm:$0xff] %v7994_v25  ;;  %v7996_v31 = vpop.xlane.xlu2 %2232 }
 0x2e1   : > { %10693 = vst [vmem:[#allocation194_spill] sm:$0xff] %v7996_v31 }
 0x2e2   : > { %v7976_v39 = vpop.f32.mrf.mxu0  ;;  %v7986_v35 = vpop.xlane.xlu0 %2229 }
 0x2e3   : > { %10687 = vst [vmem:[#allocation188_spill] sm:$0xff] %v7976_v39  ;;  %v7978_v61 = vpop.f32.mrf.mxu1 }
 0x2e4   : > { %10688 = vst [vmem:[#allocation189_spill] sm:$0xff] %v7978_v61  ;;  %v2351_v42 = vmax.f32 %v7976_v39, %v7978_v61 }
 0x2e5   : > { %10689 = vst [vmem:[#allocation190_spill] sm:$0xff] %v7986_v35  ;;  %v8036_v34 = vpop.eup %5644 }
 0x2e6   : > { %2352 = vmax.xlane.f32.xlu1 %v2351_v42  ;;  %10701 = vst [vmem:[#allocation202_spill] sm:$0xff] %v8036_v34 }
 0x2e7   : > { %v8006_v6 = vpop.xlane.xlu1 %2235 }
 0x2ea   : > { %v7988_v2 = vpop.f32.mrf.mxu0  ;;  %v7998_v13 = vpop.xlane.xlu0 %2238 }
 0x2eb   : > { %10690 = vst [vmem:[#allocation191_spill] sm:$0xff] %v7988_v2  ;;  %v7990_v16 = vpop.f32.mrf.mxu1 }
 0x2ec   : > { %10691 = vst [vmem:[#allocation192_spill] sm:$0xff] %v7990_v16  ;;  %v2354_v29 = vmax.f32 %v7988_v2, %v7990_v16  ;;  %v8009_v16 = vpop.xlane.xlu2 %2241 }
 0x2ee   : > { %2355 = vmax.xlane.f32.xlu0 %v2354_v29  ;;  %v2553_v29 = vsub.f32 %v7528_v5, %v2200_v19  ;;  %v2555_v5 = vsub.f32 %v7550_v18, %v7920_v3  ;;  %v10703_v18 = vld [vmem:[#allocation83_spill] sm:$0xff] }
 0x2ef   : > { %v2522_v3 = vsub.f32 %v10703_v18, %v7728_v4 }
 0x2f0   : > { %v2874_v38 = vmul.f32 1.442695, %v2555_v5  ;;  %v10706_v5 = vld [vmem:[#allocation84_spill] sm:$0xff] }
 0x2f2   : > { %v8000_v61 = vpop.f32.mrf.mxu0  ;;  %v8011_v2 = vpop.xlane.xlu0 %2247 }
 0x2f3   : > { %10694 = vst [vmem:[#allocation195_spill] sm:$0xff] %v8000_v61  ;;  %v8002_v39 = vpop.f32.mrf.mxu1 }
 0x2f4   : > { %10695 = vst [vmem:[#allocation196_spill] sm:$0xff] %v8002_v39  ;;  %v2357_v42 = vmax.f32 %v8000_v61, %v8002_v39  ;;  %v8022_v39 = vpop.xlane.xlu1 %2244  ;;  %v8030_v11 = vpop.xlane.xlu2 %2250 }
 0x2f6   : > { %2358 = vmax.xlane.f32.xlu2 %v2357_v42  ;;  %v2870_v42 = vmul.f32 1.442695, %v2553_v29 }
 0x2f8   : > { %5646 = vpow2.f32 %v2870_v42  ;;  %v2550_v42 = vsub.f32 %v7510_v59, %v7914_v17 }
 0x2fa   : > { %v8014_v41 = vpop.f32.mrf.mxu0 }
 0x2fb   : > { %10696 = vst [vmem:[#allocation197_spill] sm:$0xff] %v8014_v41  ;;  %v8016_v9 = vpop.f32.mrf.mxu1 }
 0x2fc   : > { %10697 = vst [vmem:[#allocation198_spill] sm:$0xff] %v8016_v9  ;;  %v2360_v44 = vmax.f32 %v8014_v41, %v8016_v9  ;;  %v8032_v9 = vpop.xlane.xlu0 %2256  ;;  %v2551_v41 = vsub.f32 %v7512_v28, %v7914_v17  ;;  %v8058_v35 = vpop.xlane.xlu2 %2259 }
 0x2fd   : > { %10700 = vst [vmem:[#allocation201_spill] sm:$0xff] %v8032_v9 }
 0x2fe   : > { %2361 = vmax.xlane.f32.xlu1 %v2360_v44  ;;  %v2872_v44 = vmul.f32 1.442695, %v2554_v15  ;;  %v8038_v29 = vpop.eup %5646  ;;  %10708 = vst [vmem:[#allocation205_spill] sm:$0xff] %v8058_v35  ;;  %v2866_v17 = vmul.f32 1.442695, %v2551_v41 }
 0x2ff   : > { %10702 = vst [vmem:[#allocation203_spill] sm:$0xff] %v8038_v29  ;;  %v3350_v59 = vadd.f32 %v8038_v29, %v8036_v34  ;;  %v10730_v34 = vld [vmem:[#allocation137_spill] sm:$0xff] }
 0x300   : > { %5648 = vpow2.f32 %v2872_v44  ;;  %v2808_v44 = vmul.f32 1.442695, %v2522_v3 }
 0x301   : > { %5650 = vpow2.f32 %v2874_v38 }
 0x302   : > { %v8026_v19 = vpop.f32.mrf.mxu0  ;;  %5652 = vpow2.f32 %v2808_v44  ;;  %v10718_v44 = vld [vmem:[#allocation70_spill] sm:$0xff] }
 0x303   : > { %10698 = vst [vmem:[#allocation199_spill] sm:$0xff] %v8026_v19  ;;  %v8028_v61 = vpop.f32.mrf.mxu1 }
 0x304   : > { %10699 = vst [vmem:[#allocation200_spill] sm:$0xff] %v8028_v61  ;;  %v2363_v33 = vmax.f32 %v8026_v19, %v8028_v61  ;;  %v8052_v61 = vpop.xlane.xlu1 %2253  ;;  %v2864_v19 = vmul.f32 1.442695, %v2550_v42  ;;  %v8060_v28 = vpop.xlane.xlu0 %2265  ;;  %v2548_v42 = vsub.f32 %v7490_v52, %v7892_v24 }
 0x305   : > { %10707 = vst [vmem:[#allocation84_spill] sm:$0xff] %v8052_v61  ;;  %v10712_v61 = vld [vmem:[#allocation79_spill] sm:$0xff] }
 0x306   : > { %2364 = vmax.xlane.f32.xlu0 %v2363_v33  ;;  %v2523_v33 = vsub.f32 %v10706_v5, %v7728_v4  ;;  %10709 = vst [vmem:[#allocation206_spill] sm:$0xff] %v8060_v28  ;;  %v8062_v38 = vpop.eup %5648  ;;  %5654 = vpow2.f32 %v2864_v19  ;;  %v8092_v28 = vpop.xlane.xlu2 %2268 }
 0x307   : > { %10710 = vst [vmem:[#allocation207_spill] sm:$0xff] %v8062_v38  ;;  %v8064_v5 = vpop.eup %5650  ;;  %5656 = vpow2.f32 %v2866_v17  ;;  %v2516_v17 = vsub.f32 %v10718_v44, %v7636_v0  ;;  %v10728_v44 = vld [vmem:[#allocation136_spill] sm:$0xff] }
 0x308   : > { %v2810_v4 = vmul.f32 1.442695, %v2523_v33  ;;  %10711 = vst [vmem:[#allocation208_spill] sm:$0xff] %v8064_v5  ;;  %v2549_v33 = vsub.f32 %v7492_v50, %v7892_v24  ;;  %v8084_v52 = vpop.eup %5652  ;;  %v10720_v24 = vld [vmem:[#allocation47_spill] sm:$0xff]  ;;  %v10721_v50 = vld [vmem:[#allocation74_spill] sm:$0xff]  ;;  %v2546_v29 = vsub.f32 %v10728_v44, %v7918_v14 }
 0x309   : > { %10717 = vst [vmem:[#allocation210_spill] sm:$0xff] %v8084_v52 }
 0x30a   : > { %v8046_v9 = vpop.f32.mrf.mxu0  ;;  %5658 = vpow2.f32 %v2810_v4  ;;  %v2860_v4 = vmul.f32 1.442695, %v2548_v42  ;;  %10722 = vst [vmem:[#allocation47_spill] sm:$0xff] %v8092_v28  ;;  %v8102_v42 = vpop.f32.mrf.mxu2  ;;  %v2796_v28 = vmul.f32 1.442695, %v2516_v17 }
 0x30b   : > { %10704 = vst [vmem:[#allocation83_spill] sm:$0xff] %v8046_v9  ;;  %v8048_v15 = vpop.f32.mrf.mxu1 }
 0x30c   : > { %10705 = vst [vmem:[#allocation204_spill] sm:$0xff] %v8048_v15  ;;  %v2366_v18 = vmax.f32 %v8046_v9, %v8048_v15  ;;  %v2520_v15 = vsub.f32 %v10712_v61, %v7696_v62  ;;  %v10713_v9 = vld [vmem:[#allocation80_spill] sm:$0xff]  ;;  %v8082_v19 = vpop.xlane.xlu1 %2262  ;;  %v8088_v35 = vpop.eup %5654 }
 0x30d   : > { %v2521_v3 = vsub.f32 %v10713_v9, %v7696_v62  ;;  %10716 = vst [vmem:[#allocation209_spill] sm:$0xff] %v8082_v19 }
 0x30e   : > { %3351 = vadd.xlane.f32.xlu0 %v3350_v59  ;;  %2367 = vmax.xlane.f32.xlu2 %v2366_v18  ;;  %v3353_v18 = vadd.f32 %v8064_v5, %v8062_v38  ;;  %v2804_v9 = vmul.f32 1.442695, %v2520_v15  ;;  %10719 = vst [vmem:[#allocation70_spill] sm:$0xff] %v8088_v35  ;;  %v8094_v15 = vpop.xlane.xlu0 %2274  ;;  %v2547_v5 = vsub.f32 %v10730_v34, %v7918_v14  ;;  %v2856_v14 = vmul.f32 1.442695, %v2546_v29 }
 0x30f   : > { %v2806_v62 = vmul.f32 1.442695, %v2521_v3  ;;  %10723 = vst [vmem:[#allocation74_spill] sm:$0xff] %v8094_v15  ;;  %v8096_v3 = vpop.eup %5656 }
 0x310   : > { %10724 = vst [vmem:[#allocation211_spill] sm:$0xff] %v8096_v3  ;;  %5660 = vpow2.f32 %v2804_v9  ;;  %v8100_v19 = vpop.eup %5658  ;;  %v3347_v44 = vadd.f32 %v8096_v3, %v8088_v35 }
 0x311   : > { %5662 = vpow2.f32 %v2806_v62  ;;  %10727 = vst [vmem:[#allocation212_spill] sm:$0xff] %v8102_v42  ;;  %v3305_v17 = vadd.f32 %v8100_v19, %v8084_v52 }
 0x312   : > { %v8072_v59 = vpop.f32.mrf.mxu0  ;;  %5664 = vpow2.f32 %v2860_v4  ;;  %v10735_v4 = vld [vmem:[#allocation151_spill] sm:$0xff] }
 0x313   : > { %10714 = vst [vmem:[#allocation79_spill] sm:$0xff] %v8072_v59  ;;  %v8074_v41 = vpop.f32.mrf.mxu1 }
 0x314   : > { %10715 = vst [vmem:[#allocation80_spill] sm:$0xff] %v8074_v41  ;;  %v2369_v61 = vmax.f32 %v8072_v59, %v8074_v41  ;;  %v2518_v41 = vsub.f32 %v10721_v50, %v10720_v24  ;;  %v2862_v59 = vmul.f32 1.442695, %v2549_v33  ;;  %v10729_v33 = vld [vmem:[#allocation71_spill] sm:$0xff] }
 0x315   : > { %v2517_v50 = vsub.f32 %v10729_v33, %v7636_v0 }
 0x316   : > { %2370 = vmax.xlane.f32.xlu1 %v2369_v61  ;;  %3354 = vadd.xlane.f32.xlu2 %v3353_v18  ;;  %v10725_v61 = vld [vmem:[#allocation75_spill] sm:$0xff]  ;;  %v2800_v9 = vmul.f32 1.442695, %v2518_v41  ;;  %5666 = vpow2.f32 %v2862_v59  ;;  %v8122_v34 = vpop.eup %5660  ;;  %v10736_v41 = vld [vmem:[#allocation65_spill] sm:$0xff]  ;;  %v10737_v59 = vld [vmem:[#allocation66_spill] sm:$0xff] }
 0x317   : > { %v2519_v18 = vsub.f32 %v10725_v61, %v10720_v24  ;;  %10726 = vst [vmem:[#allocation75_spill] sm:$0xff] %v8100_v19  ;;  %v8114_v61 = vpop.f32.mrf.mxu3  ;;  %v2514_v33 = vsub.f32 %v10736_v41, %v10735_v4  ;;  %v2515_v42 = vsub.f32 %v10737_v59, %v10735_v4  ;;  %5668 = vpow2.f32 %v2796_v28  ;;  %v10743_v41 = vld [vmem:[#allocation132_spill] sm:$0xff]  ;;  %v8140_v28 = vpop.xlane.xlu2 %2277 }
 0x318   : > { %10733 = vst [vmem:[#allocation137_spill] sm:$0xff] %v8114_v61  ;;  %v2858_v61 = vmul.f32 1.442695, %v2547_v5  ;;  %5670 = vpow2.f32 %v2800_v9  ;;  %v2545_v4 = vsub.f32 %v10743_v41, %v7888_v12  ;;  %v8142_v5 = vpop.xlane.xlu0 %2283 }
 0x319   : > { %v2802_v0 = vmul.f32 1.442695, %v2519_v18  ;;  %10734 = vst [vmem:[#allocation213_spill] sm:$0xff] %v8122_v34  ;;  %v2798_v18 = vmul.f32 1.442695, %v2517_v50 }
 0x31a   : > { %v8110_v38 = vpop.f32.mrf.mxu0  ;;  %v2792_v50 = vmul.f32 1.442695, %v2514_v33  ;;  %v2794_v9 = vmul.f32 1.442695, %v2515_v42 }
 0x31b   : > { %10731 = vst [vmem:[#allocation136_spill] sm:$0xff] %v8110_v38  ;;  %v8112_v24 = vpop.f32.mrf.mxu1  ;;  %5672 = vpow2.f32 %v2802_v0 }
 0x31c   : > { %10732 = vst [vmem:[#allocation71_spill] sm:$0xff] %v8112_v24  ;;  %v2372_v62 = vmax.f32 %v8110_v38, %v8112_v24  ;;  %v8128_v24 = vpop.eup %5662  ;;  %v8130_v38 = vpop.xlane.xlu1 %2271  ;;  %5674 = vpow2.f32 %v2856_v14 }
 0x31d   : > { %10738 = vst [vmem:[#allocation151_spill] sm:$0xff] %v8128_v24  ;;  %v8132_v29 = vpop.eup %5664  ;;  %5676 = vpow2.f32 %v2858_v61  ;;  %v3302_v42 = vadd.f32 %v8128_v24, %v8122_v34  ;;  %v10757_v34 = vld [vmem:[#allocation61_spill] sm:$0xff] }
 0x31e   : > { %2373 = vmax.xlane.f32.xlu0 %v2372_v62  ;;  %3348 = vadd.xlane.f32.xlu1 %v3347_v44  ;;  %10739 = vst [vmem:[#allocation65_spill] sm:$0xff] %v8130_v38  ;;  %v10741_v62 = vld [vmem:[#allocation131_spill] sm:$0xff]  ;;  %v8136_v19 = vpop.eup %5666  ;;  %5678 = vpow2.f32 %v2798_v18  ;;  %v2854_v18 = vmul.f32 1.442695, %v2545_v4 }
 0x31f   : > { %3306 = vadd.xlane.f32.xlu2 %v3305_v17  ;;  %10740 = vst [vmem:[#allocation66_spill] sm:$0xff] %v8132_v29  ;;  %v2544_v44 = vsub.f32 %v10741_v62, %v7888_v12  ;;  %v10744_v17 = vld [vmem:[#allocation127_spill] sm:$0xff]  ;;  %v10747_v62 = vld [vmem:[#allocation128_spill] sm:$0xff]  ;;  %v8152_v12 = vpop.f32.mrf.mxu2  ;;  %v8158_v33 = vpop.eup %5668  ;;  %v3344_v61 = vadd.f32 %v8136_v19, %v8132_v29  ;;  %5680 = vpow2.f32 %v2792_v50 }
 0x320   : > { %10742 = vst [vmem:[#allocation131_spill] sm:$0xff] %v8136_v19  ;;  %v2542_v59 = vsub.f32 %v10744_v17, %v7868_v53  ;;  %v2543_v3 = vsub.f32 %v10747_v62, %v7868_v53  ;;  %v8162_v17 = vpop.eup %5670  ;;  %v8164_v35 = vpop.f32.mrf.mxu3  ;;  %v10753_v62 = vld [vmem:[#allocation145_spill] sm:$0xff]  ;;  %5682 = vpow2.f32 %v2794_v9 }
 0x321   : > { %10748 = vst [vmem:[#allocation128_spill] sm:$0xff] %v8152_v12  ;;  %v2852_v41 = vmul.f32 1.442695, %v2544_v44  ;;  %v8166_v53 = vpop.eup %5672  ;;  %v10754_v12 = vld [vmem:[#allocation57_spill] sm:$0xff]  ;;  %v10756_v44 = vld [vmem:[#allocation148_spill] sm:$0xff]  ;;  %v8196_v25 = vpop.xlane.xlu0 %2292 }
 0x322   : > { %v8146_v0 = vpop.f32.mrf.mxu0  ;;  %10749 = vst [vmem:[#allocation214_spill] sm:$0xff] %v8158_v33  ;;  %v8170_v24 = vpop.eup %5674  ;;  %v2512_v19 = vsub.f32 %v10757_v34, %v10756_v44  ;;  %v2850_v29 = vmul.f32 1.442695, %v2543_v3  ;;  %v10763_v3 = vld [vmem:[#allocation124_spill] sm:$0xff] }
 0x323   : > { %10745 = vst [vmem:[#allocation132_spill] sm:$0xff] %v8146_v0  ;;  %v8148_v52 = vpop.f32.mrf.mxu1  ;;  %v8174_v4 = vpop.eup %5676  ;;  %5684 = vpow2.f32 %v2852_v41  ;;  %v2541_v9 = vsub.f32 %v10763_v3, %v7884_v36 }
 0x324   : > { %10746 = vst [vmem:[#allocation127_spill] sm:$0xff] %v8148_v52  ;;  %v2375_v14 = vmax.f32 %v8146_v0, %v8148_v52  ;;  %v2510_v52 = vsub.f32 %v10754_v12, %v10753_v62  ;;  %v2848_v0 = vmul.f32 1.442695, %v2542_v59  ;;  %v10761_v12 = vld [vmem:[#allocation123_spill] sm:$0xff]  ;;  %5686 = vpow2.f32 %v2854_v18  ;;  %v8182_v59 = vpop.xlane.xlu1 %2280 }
 0x325   : > { %10750 = vst [vmem:[#allocation215_spill] sm:$0xff] %v8162_v17  ;;  %v2540_v50 = vsub.f32 %v10761_v12, %v7884_v36  ;;  %v2788_v15 = vmul.f32 1.442695, %v2512_v19  ;;  %v3341_v41 = vadd.f32 %v8174_v4, %v8170_v24  ;;  %v8194_v12 = vpop.xlane.xlu2 %2286 }
 0x326   : > { %10751 = vst [vmem:[#allocation216_spill] sm:$0xff] %v8164_v35  ;;  %3303 = vadd.xlane.f32.xlu0 %v3302_v42  ;;  %2376 = vmax.xlane.f32.xlu1 %v2375_v14  ;;  %v10759_v42 = vld [vmem:[#allocation62_spill] sm:$0xff]  ;;  %v8178_v35 = vpop.eup %5678  ;;  %v2784_v34 = vmul.f32 1.442695, %v2510_v52  ;;  %5688 = vpow2.f32 %v2848_v0 }
 0x327   : > { %10752 = vst [vmem:[#allocation217_spill] sm:$0xff] %v8166_v53  ;;  %3345 = vadd.xlane.f32.xlu2 %v3344_v61  ;;  %v2513_v14 = vsub.f32 %v10759_v42, %v10756_v44  ;;  %v10762_v61 = vld [vmem:[#allocation58_spill] sm:$0xff]  ;;  %5690 = vpow2.f32 %v2850_v29  ;;  %v3299_v44 = vadd.f32 %v8166_v53, %v8162_v17  ;;  %v8192_v42 = vpop.eup %5680  ;;  %v3296_v52 = vadd.f32 %v8178_v35, %v8158_v33  ;;  %v8202_v29 = vpop.f32.mrf.mxu2 }
 0x328   : > { %10755 = vst [vmem:[#allocation145_spill] sm:$0xff] %v8170_v24  ;;  %v2511_v38 = vsub.f32 %v10762_v61, %v10753_v62  ;;  %v8200_v36 = vpop.eup %5682  ;;  %v2844_v19 = vmul.f32 1.442695, %v2540_v50  ;;  %v10768_v62 = vld [vmem:[#allocation144_spill] sm:$0xff]  ;;  %5692 = vpow2.f32 %v2784_v34  ;;  %v2846_v24 = vmul.f32 1.442695, %v2541_v9  ;;  %v8212_v50 = vpop.f32.mrf.mxu3 }
 0x329   : > { %10758 = vst [vmem:[#allocation57_spill] sm:$0xff] %v8174_v4  ;;  %v2790_v18 = vmul.f32 1.442695, %v2513_v14  ;;  %v8204_v0 = vpop.eup %5684  ;;  %v10769_v61 = vld [vmem:[#allocation52_spill] sm:$0xff]  ;;  %v10770_v14 = vld [vmem:[#allocation53_spill] sm:$0xff]  ;;  %5694 = vpow2.f32 %v2788_v15  ;;  %v10778_v15 = vld [vmem:[#allocation115_spill] sm:$0xff] }
 0x32a   : > { %10760 = vst [vmem:[#allocation148_spill] sm:$0xff] %v8178_v35  ;;  %v2508_v3 = vsub.f32 %v10769_v61, %v10768_v62  ;;  %v2509_v4 = vsub.f32 %v10770_v14, %v10768_v62  ;;  %v8210_v53 = vpop.eup %5686  ;;  %v2786_v35 = vmul.f32 1.442695, %v2511_v38  ;;  %v10776_v61 = vld [vmem:[#allocation119_spill] sm:$0xff]  ;;  %v2537_v14 = vsub.f32 %v10778_v15, %v7838_v48 }
 0x32b   : > { %10764 = vst [vmem:[#allocation61_spill] sm:$0xff] %v8192_v42  ;;  %5696 = vpow2.f32 %v2790_v18  ;;  %v2539_v62 = vsub.f32 %v10776_v61, %v7858_v56  ;;  %v10783_v61 = vld [vmem:[#allocation43_spill] sm:$0xff] }
 0x32c   : > { %10765 = vst [vmem:[#allocation62_spill] sm:$0xff] %v8200_v36  ;;  %5698 = vpow2.f32 %v2844_v19  ;;  %v2780_v34 = vmul.f32 1.442695, %v2508_v3  ;;  %v2782_v9 = vmul.f32 1.442695, %v2509_v4  ;;  %v8226_v18 = vpop.xlane.xlu1 %2289 }
 0x32d   : > { %10766 = vst [vmem:[#allocation123_spill] sm:$0xff] %v8202_v29  ;;  %v8214_v29 = vpop.eup %5688  ;;  %5700 = vpow2.f32 %v2846_v24  ;;  %v10782_v24 = vld [vmem:[#allocation138_spill] sm:$0xff] }
 0x32e   : > { %3342 = vadd.xlane.f32.xlu0 %v3341_v41  ;;  %3300 = vadd.xlane.f32.xlu1 %v3299_v44  ;;  %10767 = vst [vmem:[#allocation58_spill] sm:$0xff] %v8204_v0  ;;  %v10774_v41 = vld [vmem:[#allocation118_spill] sm:$0xff]  ;;  %v8218_v33 = vpop.eup %5690  ;;  %5702 = vpow2.f32 %v2786_v35  ;;  %v2842_v35 = vmul.f32 1.442695, %v2539_v62  ;;  %v2838_v62 = vmul.f32 1.442695, %v2537_v14 }
 0x32f   : > { %3297 = vadd.xlane.f32.xlu2 %v3296_v52  ;;  %10771 = vst [vmem:[#allocation124_spill] sm:$0xff] %v8210_v53  ;;  %v2538_v44 = vsub.f32 %v10774_v41, %v7858_v56  ;;  %v10777_v52 = vld [vmem:[#allocation114_spill] sm:$0xff]  ;;  %v3293_v41 = vadd.f32 %v8200_v36, %v8192_v42  ;;  %v8232_v56 = vpop.eup %5692  ;;  %v3335_v4 = vadd.f32 %v8218_v33, %v8214_v29  ;;  %5704 = vpow2.f32 %v2780_v34  ;;  %v8242_v36 = vpop.xlane.xlu2 %2295 }
 0x330   : > { %10772 = vst [vmem:[#allocation144_spill] sm:$0xff] %v8212_v50  ;;  %v2536_v38 = vsub.f32 %v10777_v52, %v7838_v48  ;;  %v3338_v50 = vadd.f32 %v8210_v53, %v8204_v0  ;;  %v8236_v3 = vpop.eup %5694  ;;  %v2504_v52 = vsub.f32 %v10783_v61, %v10782_v24  ;;  %v8244_v42 = vpop.xlane.xlu0 %2301  ;;  %5706 = vpow2.f32 %v2782_v9  ;;  %v10790_v61 = vld [vmem:[#allocation49_spill] sm:$0xff] }
 0x331   : > { %10773 = vst [vmem:[#allocation52_spill] sm:$0xff] %v8214_v29  ;;  %v2840_v19 = vmul.f32 1.442695, %v2538_v44  ;;  %v8238_v48 = vpop.eup %5696  ;;  %v10787_v29 = vld [vmem:[#allocation48_spill] sm:$0xff]  ;;  %v8260_v0 = vpop.f32.mrf.mxu3 }
 0x332   : > { %10775 = vst [vmem:[#allocation53_spill] sm:$0xff] %v8218_v33  ;;  %v2836_v15 = vmul.f32 1.442695, %v2536_v38  ;;  %v8246_v44 = vpop.eup %5698  ;;  %v10786_v33 = vld [vmem:[#allocation141_spill] sm:$0xff]  ;;  %v2772_v14 = vmul.f32 1.442695, %v2504_v52 }
 0x333   : > { %10779 = vst [vmem:[#allocation118_spill] sm:$0xff] %v8232_v56  ;;  %v2506_v53 = vsub.f32 %v10787_v29, %v10786_v33  ;;  %v2507_v34 = vsub.f32 %v10790_v61, %v10786_v33  ;;  %5708 = vpow2.f32 %v2840_v19  ;;  %v10794_v29 = vld [vmem:[#allocation44_spill] sm:$0xff]  ;;  %v3290_v19 = vadd.f32 %v8238_v48, %v8236_v3 }
 0x334   : > { %10780 = vst [vmem:[#allocation119_spill] sm:$0xff] %v8236_v3  ;;  %5710 = vpow2.f32 %v2842_v35  ;;  %v2505_v9 = vsub.f32 %v10794_v29, %v10782_v24  ;;  %v8276_v29 = vpop.xlane.xlu1 %2298 }
 0x335   : > { %10781 = vst [vmem:[#allocation114_spill] sm:$0xff] %v8238_v48  ;;  %5712 = vpow2.f32 %v2836_v15  ;;  %v2776_v31 = vmul.f32 1.442695, %v2506_v53  ;;  %v2778_v35 = vmul.f32 1.442695, %v2507_v34  ;;  %v10799_v53 = vld [vmem:[#allocation133_spill] sm:$0xff] }
 0x336   : > { %3294 = vadd.xlane.f32.xlu0 %v3293_v41  ;;  %3339 = vadd.xlane.f32.xlu1 %v3338_v50  ;;  %10784 = vst [vmem:[#allocation115_spill] sm:$0xff] %v8244_v42  ;;  %v8250_v50 = vpop.f32.mrf.mxu2  ;;  %v8252_v41 = vpop.eup %5700  ;;  %v10792_v42 = vld [vmem:[#allocation109_spill] sm:$0xff]  ;;  %5714 = vpow2.f32 %v2838_v62  ;;  %v10800_v15 = vld [vmem:[#allocation39_spill] sm:$0xff] }
 0x337   : > { %3336 = vadd.xlane.f32.xlu2 %v3335_v4  ;;  %10785 = vst [vmem:[#allocation138_spill] sm:$0xff] %v8246_v44  ;;  %v8256_v38 = vpop.eup %5702  ;;  %v2534_v4 = vsub.f32 %v10792_v42, %v7852_v49  ;;  %v3332_v33 = vadd.f32 %v8252_v41, %v8246_v44  ;;  %v2502_v62 = vsub.f32 %v10800_v15, %v10799_v53  ;;  %5716 = vpow2.f32 %v2772_v14  ;;  %v10808_v14 = vld [vmem:[#allocation105_spill] sm:$0xff] }
 0x338   : > { %10788 = vst [vmem:[#allocation43_spill] sm:$0xff] %v8250_v50  ;;  %v10795_v50 = vld [vmem:[#allocation110_spill] sm:$0xff]  ;;  %v8270_v42 = vpop.eup %5704  ;;  %v3287_v61 = vadd.f32 %v8256_v38, %v8232_v56  ;;  %5718 = vpow2.f32 %v2776_v31  ;;  %v8290_v56 = vpop.xlane.xlu2 %2304 }
 0x339   : > { %10789 = vst [vmem:[#allocation141_spill] sm:$0xff] %v8252_v41  ;;  %v2535_v17 = vsub.f32 %v10795_v50, %v7852_v49  ;;  %v8274_v24 = vpop.eup %5706  ;;  %v2832_v52 = vmul.f32 1.442695, %v2534_v4  ;;  %v10801_v50 = vld [vmem:[#allocation40_spill] sm:$0xff]  ;;  %5720 = vpow2.f32 %v2778_v35  ;;  %v8292_v44 = vpop.xlane.xlu0 %2310 }
 0x33a   : > { %10791 = vst [vmem:[#allocation48_spill] sm:$0xff] %v8256_v38  ;;  %v8278_v49 = vpop.eup %5708  ;;  %v2774_v38 = vmul.f32 1.442695, %v2505_v9  ;;  %v2768_v9 = vmul.f32 1.442695, %v2502_v62 }
 0x33b   : > { %10793 = vst [vmem:[#allocation49_spill] sm:$0xff] %v8260_v0  ;;  %v2503_v0 = vsub.f32 %v10801_v50, %v10799_v53  ;;  %v2834_v34 = vmul.f32 1.442695, %v2535_v17  ;;  %v8284_v41 = vpop.eup %5710  ;;  %v2532_v17 = vsub.f32 %v10808_v14, %v7824_v51  ;;  %5722 = vpow2.f32 %v2832_v52  ;;  %v10810_v53 = vld [vmem:[#allocation106_spill] sm:$0xff] }
 0x33c   : > { %10796 = vst [vmem:[#allocation109_spill] sm:$0xff] %v8270_v42  ;;  %v8286_v4 = vpop.eup %5712  ;;  %v2533_v35 = vsub.f32 %v10810_v53, %v7824_v51  ;;  %v10811_v50 = vld [vmem:[#allocation102_spill] sm:$0xff]  ;;  %v3329_v52 = vadd.f32 %v8284_v41, %v8278_v49 }
 0x33d   : > { %10797 = vst [vmem:[#allocation44_spill] sm:$0xff] %v8274_v24  ;;  %v8294_v15 = vpop.eup %5714  ;;  %v2770_v31 = vmul.f32 1.442695, %v2503_v0  ;;  %5724 = vpow2.f32 %v2834_v34  ;;  %v8312_v0 = vpop.f32.mrf.mxu0  ;;  %v10815_v34 = vld [vmem:[#allocation125_spill] sm:$0xff] }
 0x33e   : > { %3333 = vadd.xlane.f32.xlu0 %v3332_v33  ;;  %3291 = vadd.xlane.f32.xlu1 %v3290_v19  ;;  %10798 = vst [vmem:[#allocation110_spill] sm:$0xff] %v8278_v49  ;;  %v10804_v33 = vld [vmem:[#allocation101_spill] sm:$0xff]  ;;  %5726 = vpow2.f32 %v2774_v38  ;;  %v8310_v14 = vpop.eup %5716  ;;  %v3326_v51 = vadd.f32 %v8294_v15, %v8286_v4 }
 0x33f   : > { %3288 = vadd.xlane.f32.xlu2 %v3287_v61  ;;  %10802 = vst [vmem:[#allocation133_spill] sm:$0xff] %v8284_v41  ;;  %v2530_v19 = vsub.f32 %v10804_v33, %v7818_v46  ;;  %v8298_v61 = vpop.f32.mrf.mxu2  ;;  %v2531_v33 = vsub.f32 %v10811_v50, %v7818_v46  ;;  %v8316_v38 = vpop.eup %5718  ;;  %v10816_v46 = vld [vmem:[#allocation32_spill] sm:$0xff]  ;;  %v2828_v50 = vmul.f32 1.442695, %v2532_v17  ;;  %5728 = vpow2.f32 %v2768_v9 }
 0x340   : > { %10803 = vst [vmem:[#allocation39_spill] sm:$0xff] %v8286_v4  ;;  %v2498_v53 = vsub.f32 %v10816_v46, %v10815_v34  ;;  %v10821_v4 = vld [vmem:[#allocation36_spill] sm:$0xff]  ;;  %5730 = vpow2.f32 %v2770_v31  ;;  %v8330_v17 = vpop.xlane.xlu1 %2307 }
 0x341   : > { %10805 = vst [vmem:[#allocation40_spill] sm:$0xff] %v8290_v56  ;;  %v8304_v56 = vpop.f32.mrf.mxu3  ;;  %v2824_v62 = vmul.f32 1.442695, %v2530_v19  ;;  %v2826_v46 = vmul.f32 1.442695, %v2531_v33  ;;  %v10826_v9 = vld [vmem:[#allocation96_spill] sm:$0xff]  ;;  %v8342_v33 = vpop.xlane.xlu2 %2313 }
 0x342   : > { %10806 = vst [vmem:[#allocation101_spill] sm:$0xff] %v8292_v44  ;;  %v3284_v44 = vadd.f32 %v8274_v24, %v8270_v42  ;;  %v10818_v24 = vld [vmem:[#allocation33_spill] sm:$0xff]  ;;  %v2830_v42 = vmul.f32 1.442695, %v2533_v35  ;;  %v2528_v35 = vsub.f32 %v10826_v9, %v7788_v27  ;;  %v10835_v9 = vld [vmem:[#allocation28_spill] sm:$0xff] }
 0x343   : > { %10807 = vst [vmem:[#allocation218_spill] sm:$0xff] %v8294_v15  ;;  %v2499_v19 = vsub.f32 %v10818_v24, %v10815_v34  ;;  %v10820_v15 = vld [vmem:[#allocation130_spill] sm:$0xff]  ;;  %5732 = vpow2.f32 %v2824_v62  ;;  %v2760_v24 = vmul.f32 1.442695, %v2498_v53  ;;  %v8344_v34 = vpop.xlane.xlu0 %2319 }
 0x344   : > { %10809 = vst [vmem:[#allocation105_spill] sm:$0xff] %v8298_v61  ;;  %v8320_v61 = vpop.f32.mrf.mxu1  ;;  %v2500_v49 = vsub.f32 %v10821_v4, %v10820_v15  ;;  %5734 = vpow2.f32 %v2828_v50  ;;  %v10827_v4 = vld [vmem:[#allocation97_spill] sm:$0xff] }
 0x345   : > { %10812 = vst [vmem:[#allocation106_spill] sm:$0xff] %v8304_v56  ;;  %v8322_v56 = vpop.eup %5720  ;;  %v2529_v31 = vsub.f32 %v10827_v4, %v7788_v27  ;;  %5736 = vpow2.f32 %v2830_v42  ;;  %v2496_v4 = vsub.f32 %v10835_v9, %v7756_v58 }
 0x346   : > { %10813 = vst [vmem:[#allocation102_spill] sm:$0xff] %v8310_v14  ;;  %3285 = vadd.xlane.f32.xlu0 %v3284_v44  ;;  %3330 = vadd.xlane.f32.xlu1 %v3329_v52  ;;  %v8326_v41 = vpop.eup %5722  ;;  %v10824_v44 = vld [vmem:[#allocation37_spill] sm:$0xff]  ;;  %5738 = vpow2.f32 %v2826_v46  ;;  %v3281_v53 = vadd.f32 %v8322_v56, %v8316_v38 }
 0x347   : > { %10814 = vst [vmem:[#allocation219_spill] sm:$0xff] %v8312_v0  ;;  %3327 = vadd.xlane.f32.xlu2 %v3326_v51  ;;  %v8332_v48 = vpop.eup %5724  ;;  %v2501_v52 = vsub.f32 %v10824_v44, %v10820_v15  ;;  %v2762_v51 = vmul.f32 1.442695, %v2499_v19  ;;  %v8346_v15 = vpop.f32.mrf.mxu2  ;;  %5740 = vpow2.f32 %v2760_v24  ;;  %v2820_v44 = vmul.f32 1.442695, %v2528_v35  ;;  %v10838_v24 = vld [vmem:[#allocation29_spill] sm:$0xff] }
 0x348   : > { %10817 = vst [vmem:[#allocation125_spill] sm:$0xff] %v8320_v61  ;;  %v8336_v3 = vpop.eup %5726  ;;  %v3323_v62 = vadd.f32 %v8332_v48, %v8326_v41  ;;  %v2497_v35 = vsub.f32 %v10838_v24, %v7756_v58 }
 0x349   : > { %10819 = vst [vmem:[#allocation32_spill] sm:$0xff] %v8326_v41  ;;  %v8352_v50 = vpop.eup %5728  ;;  %v2766_v19 = vmul.f32 1.442695, %v2501_v52  ;;  %v3278_v27 = vadd.f32 %v8336_v3, %v8310_v14  ;;  %5742 = vpow2.f32 %v2762_v51  ;;  %v10841_v51 = vld [vmem:[#allocation87_spill] sm:$0xff] }
 0x34a   : > { %10822 = vst [vmem:[#allocation33_spill] sm:$0xff] %v8330_v17  ;;  %v2764_v17 = vmul.f32 1.442695, %v2500_v49  ;;  %v8356_v42 = vpop.eup %5730  ;;  %v8358_v49 = vpop.f32.mrf.mxu3  ;;  %v2758_v14 = vmul.f32 1.442695, %v2497_v35 }
 0x34b   : > { %10823 = vst [vmem:[#allocation130_spill] sm:$0xff] %v8332_v48  ;;  %v8360_v46 = vpop.eup %5732  ;;  %v8396_v41 = vpop.xlane.xlu0 %2328 }
 0x34c   : > { %10825 = vst [vmem:[#allocation36_spill] sm:$0xff] %v8336_v3  ;;  %v8366_v52 = vpop.eup %5734  ;;  %5744 = vpow2.f32 %v2764_v17  ;;  %v2756_v17 = vmul.f32 1.442695, %v2496_v4  ;;  %v10845_v3 = vld [vmem:[#allocation93_spill] sm:$0xff]  ;;  %v8394_v4 = vpop.xlane.xlu2 %2322 }
 0x34d   : > { %10828 = vst [vmem:[#allocation37_spill] sm:$0xff] %v8342_v33  ;;  %v2822_v33 = vmul.f32 1.442695, %v2529_v31  ;;  %5746 = vpow2.f32 %v2766_v19  ;;  %v10843_v31 = vld [vmem:[#allocation92_spill] sm:$0xff]  ;;  %v2527_v58 = vsub.f32 %v10845_v3, %v7786_v10 }
 0x34e   : > { %10829 = vst [vmem:[#allocation96_spill] sm:$0xff] %v8344_v34  ;;  %3324 = vadd.xlane.f32.xlu0 %v3323_v62  ;;  %3282 = vadd.xlane.f32.xlu1 %v3281_v53  ;;  %v8364_v34 = vpop.f32.mrf.mxu0  ;;  %v8372_v62 = vpop.eup %5736  ;;  %v2524_v53 = vsub.f32 %v10841_v51, %v7758_v40  ;;  %v2526_v9 = vsub.f32 %v10843_v31, %v7786_v10  ;;  %5748 = vpow2.f32 %v2820_v44  ;;  %v10846_v19 = vld [vmem:[#allocation88_spill] sm:$0xff] }
 0x34f   : > { %10830 = vst [vmem:[#allocation97_spill] sm:$0xff] %v8346_v15  ;;  %3279 = vadd.xlane.f32.xlu2 %v3278_v27  ;;  %v8370_v15 = vpop.f32.mrf.mxu1  ;;  %v8380_v27 = vpop.xlane.xlu1 %2316  ;;  %5750 = vpow2.f32 %v2822_v33  ;;  %v2525_v48 = vsub.f32 %v10846_v19, %v7758_v40  ;;  %v3275_v51 = vadd.f32 %v8356_v42, %v8352_v50  ;;  %v3320_v31 = vadd.f32 %v8372_v62, %v8366_v52  ;;  %v10849_v33 = vld [vmem:[#allocation120_spill] sm:$0xff] }
 0x350   : > { %10831 = vst [vmem:[#allocation220_spill] sm:$0xff] %v8352_v50  ;;  %v10850_v40 = vld [vmem:[#allocation20_spill] sm:$0xff]  ;;  %v2816_v19 = vmul.f32 1.442695, %v2526_v9  ;;  %5752 = vpow2.f32 %v2756_v17 }
 0x351   : > { %10832 = vst [vmem:[#allocation221_spill] sm:$0xff] %v8356_v42  ;;  %v2492_v35 = vsub.f32 %v10850_v40, %v10849_v33  ;;  %v8404_v42 = vpop.f32.mrf.mxu2  ;;  %5754 = vpow2.f32 %v2758_v14 }
 0x352   : > { %10833 = vst [vmem:[#allocation222_spill] sm:$0xff] %v8358_v49  ;;  %v8376_v49 = vpop.eup %5738  ;;  %v8414_v9 = vpop.f32.mrf.mxu3 }
 0x353   : > { %10834 = vst [vmem:[#allocation223_spill] sm:$0xff] %v8360_v46  ;;  %v8384_v24 = vpop.eup %5740  ;;  %v3317_v10 = vadd.f32 %v8376_v49, %v8360_v46  ;;  %v10853_v46 = vld [vmem:[#allocation24_spill] sm:$0xff]  ;;  %v2748_v17 = vmul.f32 1.442695, %v2492_v35 }
 0x354   : > { %10836 = vst [vmem:[#allocation28_spill] sm:$0xff] %v8364_v34  ;;  %v8392_v44 = vpop.eup %5742  ;;  %v2494_v40 = vsub.f32 %v10853_v46, %v7808_v60  ;;  %v2619_v46 = vsub.f32 %v7710_v1, %v8276_v29 }
 0x355   : > { %10837 = vst [vmem:[#allocation224_spill] sm:$0xff] %v8366_v52  ;;  %v8400_v3 = vpop.eup %5744 }
 0x356   : > { %10839 = vst [vmem:[#allocation29_spill] sm:$0xff] %v8370_v15  ;;  %3276 = vadd.xlane.f32.xlu0 %v3275_v51  ;;  %3321 = vadd.xlane.f32.xlu1 %v3320_v31  ;;  %v8406_v50 = vpop.eup %5746  ;;  %v10855_v51 = vld [vmem:[#allocation25_spill] sm:$0xff]  ;;  %v8420_v52 = vpop.f32.mrf.mxu0 }
 0x357   : > { %10840 = vst [vmem:[#allocation225_spill] sm:$0xff] %v8372_v62  ;;  %3318 = vadd.xlane.f32.xlu2 %v3317_v10  ;;  %v8410_v62 = vpop.eup %5748  ;;  %v2495_v31 = vsub.f32 %v10855_v51, %v7808_v60  ;;  %v8424_v14 = vpop.f32.mrf.mxu1  ;;  %v2752_v10 = vmul.f32 1.442695, %v2494_v40  ;;  %v3272_v60 = vadd.f32 %v8406_v50, %v8400_v3 }
 0x358   : > { %10842 = vst [vmem:[#allocation87_spill] sm:$0xff] %v8376_v49  ;;  %v2814_v49 = vmul.f32 1.442695, %v2525_v48  ;;  %v8444_v40 = vpop.xlane.xlu2 %2331  ;;  %v8446_v51 = vpop.xlane.xlu0 %2337 }
 0x359   : > { %10844 = vst [vmem:[#allocation92_spill] sm:$0xff] %v8380_v27  ;;  %v2812_v27 = vmul.f32 1.442695, %v2524_v53  ;;  %v10852_v53 = vld [vmem:[#allocation21_spill] sm:$0xff] }
 0x35a   : > { %10847 = vst [vmem:[#allocation93_spill] sm:$0xff] %v8394_v4  ;;  %v2493_v4 = vsub.f32 %v10852_v53, %v10849_v33  ;;  %v3002_v53 = vmul.f32 1.442695, %v2619_v46 }
 0x35b   : > { %10848 = vst [vmem:[#allocation88_spill] sm:$0xff] %v8396_v41  ;;  %v2818_v41 = vmul.f32 1.442695, %v2527_v58  ;;  %5756 = vpow2.f32 %v2812_v27  ;;  %v2618_v58 = vsub.f32 %v7708_v23, %v8276_v29  ;;  %v8428_v27 = vpop.xlane.xlu1 %2325  ;;  %v2754_v23 = vmul.f32 1.442695, %v2495_v31 }
 0x35c   : > { %10851 = vst [vmem:[#allocation120_spill] sm:$0xff] %v8404_v42  ;;  %v8416_v42 = vpop.eup %5750  ;;  %5758 = vpow2.f32 %v2816_v19  ;;  %v2750_v48 = vmul.f32 1.442695, %v2493_v4  ;;  %v3269_v4 = vadd.f32 %v8392_v44, %v8384_v24 }
 0x35d   : > { %10854 = vst [vmem:[#allocation20_spill] sm:$0xff] %v8414_v9  ;;  %5760 = vpow2.f32 %v2818_v41  ;;  %v3314_v33 = vadd.f32 %v8416_v42, %v8410_v62  ;;  %v8434_v35 = vpop.eup %5752  ;;  %v3000_v1 = vmul.f32 1.442695, %v2618_v58 }
 0x35e   : > { %10856 = vst [vmem:[#allocation21_spill] sm:$0xff] %v8420_v52  ;;  %5762 = vpow2.f32 %v2814_v49  ;;  %v8438_v41 = vpop.eup %5754  ;;  %3273 = vadd.xlane.f32.xlu1 %v3272_v60  ;;  %v10859_v49 = vld [vmem:[#allocation94_spill] sm:$0xff] }
 0x35f   : > { %10857 = vst [vmem:[#allocation24_spill] sm:$0xff] %v8424_v14  ;;  %5764 = vpow2.f32 %v2748_v17  ;;  %3315 = vadd.xlane.f32.xlu0 %v3314_v33  ;;  %v2586_v19 = vsub.f32 %v10859_v49, %v8030_v11  ;;  %3270 = vadd.xlane.f32.xlu2 %v3269_v4  ;;  %v10863_v17 = vld [vmem:[#allocation95_spill] sm:$0xff]  ;;  %v8460_v33 = vpop.f32.mrf.mxu3  ;;  %v2617_v4 = vsub.f32 %v7680_v22, %v8242_v36 }
 0x360   : > { %10858 = vst [vmem:[#allocation25_spill] sm:$0xff] %v8428_v27  ;;  %5766 = vpow2.f32 %v2750_v48  ;;  %v8450_v27 = vpop.f32.mrf.mxu2  ;;  %v2587_v58 = vsub.f32 %v10863_v17, %v8030_v11  ;;  %v2616_v48 = vsub.f32 %v7678_v45, %v8242_v36  ;;  %v2614_v49 = vsub.f32 %v7646_v63, %v8196_v25  ;;  %v8466_v11 = vpop.f32.mrf.mxu0 }
 0x361   : > { %v8440_v29 = vpop.eup %5756  ;;  %10860 = vst [vmem:[#allocation94_spill] sm:$0xff] %v8444_v40  ;;  %5768 = vpow2.f32 %v2752_v10  ;;  %v2936_v10 = vmul.f32 1.442695, %v2586_v19  ;;  %v2615_v45 = vsub.f32 %v7648_v8, %v8196_v25  ;;  %v8472_v40 = vpop.f32.mrf.mxu1  ;;  %v3266_v22 = vadd.f32 %v8438_v41, %v8434_v35 }
 0x362   : > { %10861 = vst [vmem:[#allocation226_spill] sm:$0xff] %v8446_v51  ;;  %v8448_v31 = vpop.eup %5758  ;;  %5770 = vpow2.f32 %v2754_v23  ;;  %v2938_v23 = vmul.f32 1.442695, %v2587_v58  ;;  %v2992_v25 = vmul.f32 1.442695, %v2614_v49  ;;  %v10873_v51 = vld [vmem:[#allocation89_spill] sm:$0xff] }
 0x363   : > { %10862 = vst [vmem:[#allocation227_spill] sm:$0xff] %v8450_v27  ;;  %v8454_v60 = vpop.eup %5760  ;;  %5772 = vpow2.f32 %v3000_v1  ;;  %v2996_v1 = vmul.f32 1.442695, %v2616_v48  ;;  %v8484_v58 = vpop.xlane.xlu1 %2334  ;;  %v2994_v9 = vmul.f32 1.442695, %v2615_v45 }
 0x364   : > { %v8458_v46 = vpop.eup %5762  ;;  %10865 = vst [vmem:[#allocation228_spill] sm:$0xff] %v8460_v33  ;;  %5774 = vpow2.f32 %v3002_v53  ;;  %v3311_v27 = vadd.f32 %v8454_v60, %v8448_v31  ;;  %v2998_v53 = vmul.f32 1.442695, %v2617_v4  ;;  %v8494_v4 = vpop.xlane.xlu2 %2340 }
 0x365   : > { %10864 = vst [vmem:[#allocation95_spill] sm:$0xff] %v8458_v46  ;;  %v8468_v17 = vpop.eup %5764  ;;  %v3308_v63 = vadd.f32 %v8458_v46, %v8440_v29  ;;  %5776 = vpow2.f32 %v2936_v10  ;;  %v2584_v46 = vsub.f32 %v10873_v51, %v8011_v2  ;;  %v10876_v10 = vld [vmem:[#allocation90_spill] sm:$0xff]  ;;  %v2613_v51 = vsub.f32 %v7618_v21, %v8226_v18 }
 0x366   : > { %10866 = vst [vmem:[#allocation229_spill] sm:$0xff] %v8466_v11  ;;  %v8478_v36 = vpop.eup %5766  ;;  %3312 = vadd.xlane.f32.xlu1 %v3311_v27  ;;  %5778 = vpow2.f32 %v2938_v23  ;;  %v2585_v49 = vsub.f32 %v10876_v10, %v8011_v2  ;;  %v2612_v23 = vsub.f32 %v7616_v55, %v8226_v18 }
 0x367   : > { %10867 = vst [vmem:[#allocation230_spill] sm:$0xff] %v8468_v17  ;;  %v8482_v19 = vpop.eup %5768  ;;  %3267 = vadd.xlane.f32.xlu0 %v3266_v22  ;;  %3309 = vadd.xlane.f32.xlu2 %v3308_v63  ;;  %5780 = vpow2.f32 %v2996_v1  ;;  %v8504_v45 = vpop.f32.mrf.mxu3  ;;  %v2932_v2 = vmul.f32 1.442695, %v2584_v46  ;;  %v3260_v55 = vadd.f32 %v8478_v36, %v8468_v17 }
 0x368   : > { %10868 = vst [vmem:[#allocation231_spill] sm:$0xff] %v8472_v40  ;;  %v8486_v8 = vpop.eup %5770  ;;  %v8498_v27 = vpop.f32.mrf.mxu2  ;;  %5782 = vpow2.f32 %v2998_v53  ;;  %v2934_v10 = vmul.f32 1.442695, %v2585_v49  ;;  %v2988_v18 = vmul.f32 1.442695, %v2612_v23  ;;  %v10890_v23 = vld [vmem:[#allocation85_spill] sm:$0xff] }
 0x369   : > { %10869 = vst [vmem:[#allocation232_spill] sm:$0xff] %v8478_v36  ;;  %v8488_v33 = vpop.eup %5772  ;;  %5784 = vpow2.f32 %v2992_v25  ;;  %v3263_v1 = vadd.f32 %v8486_v8, %v8482_v19  ;;  %v8514_v53 = vpop.f32.mrf.mxu0  ;;  %v10886_v36 = vld [vmem:[#allocation82_spill] sm:$0xff] }
 0x36a   : > { %10870 = vst [vmem:[#allocation233_spill] sm:$0xff] %v8484_v58  ;;  %v8490_v48 = vpop.eup %5774  ;;  %v8496_v58 = vpop.xlane.xlu0 %2346  ;;  %5786 = vpow2.f32 %v2994_v9 }
 0x36b   : > { %10871 = vst [vmem:[#allocation234_spill] sm:$0xff] %v8488_v33  ;;  %v3449_v22 = vadd.f32 %v8490_v48, %v8488_v33  ;;  %v8512_v63 = vpop.eup %5776  ;;  %v8526_v46 = vpop.xlane.xlu1 %2343  ;;  %5788 = vpow2.f32 %v2932_v2 }
 0x36c   : > { %10872 = vst [vmem:[#allocation235_spill] sm:$0xff] %v8490_v48  ;;  %v8518_v25 = vpop.eup %5778  ;;  %v2582_v48 = vsub.f32 %v10886_v36, %v8022_v39  ;;  %v8532_v49 = vpop.xlane.xlu2 %2349  ;;  %5790 = vpow2.f32 %v2934_v10  ;;  %v2611_v36 = vsub.f32 %v7588_v54, %v8194_v12 }
 0x36d   : > { %10874 = vst [vmem:[#allocation89_spill] sm:$0xff] %v8494_v4  ;;  %v8522_v21 = vpop.eup %5780  ;;  %5792 = vpow2.f32 %v2988_v18  ;;  %v3401_v2 = vadd.f32 %v8518_v25, %v8512_v63  ;;  %v10893_v18 = vld [vmem:[#allocation31_spill] sm:$0xff] }
 0x36e   : > { %10875 = vst [vmem:[#allocation236_spill] sm:$0xff] %v8498_v27  ;;  %v8520_v27 = vpop.f32.mrf.mxu1  ;;  %3264 = vadd.xlane.f32.xlu1 %v3263_v1  ;;  %v8524_v9 = vpop.eup %5782  ;;  %v2583_v1 = vsub.f32 %v10890_v23, %v8022_v39  ;;  %v2928_v10 = vmul.f32 1.442695, %v2582_v48  ;;  %v2563_v23 = vsub.f32 %v10893_v18, %v7970_v26 }
 0x36f   : > { %10877 = vst [vmem:[#allocation90_spill] sm:$0xff] %v8504_v45  ;;  %3450 = vadd.xlane.f32.xlu0 %v3449_v22  ;;  %3261 = vadd.xlane.f32.xlu2 %v3260_v55  ;;  %v2990_v45 = vmul.f32 1.442695, %v2613_v51  ;;  %v8528_v4 = vpop.eup %5784  ;;  %v2610_v51 = vsub.f32 %v7586_v37, %v8194_v12  ;;  %v10896_v12 = vld [vmem:[#allocation22_spill] sm:$0xff] }
 0x370   : > { %10878 = vst [vmem:[#allocation237_spill] sm:$0xff] %v8512_v63  ;;  %v8536_v22 = vpop.eup %5786  ;;  %v8542_v55 = vpop.f32.mrf.mxu2 }
 0x371   : > { %10879 = vst [vmem:[#allocation238_spill] sm:$0xff] %v8514_v53  ;;  %5794 = vpow2.f32 %v2990_v45  ;;  %v3443_v37 = vadd.f32 %v8536_v22, %v8528_v4  ;;  %v8558_v54 = vpop.eup %5788  ;;  %v2558_v45 = vsub.f32 %v10896_v12, %v7964_v43  ;;  %v2984_v48 = vmul.f32 1.442695, %v2610_v51  ;;  %v8564_v63 = vpop.f32.mrf.mxu0 }
 0x372   : > { %10880 = vst [vmem:[#allocation239_spill] sm:$0xff] %v8518_v25  ;;  %v8534_v33 = vpop.xlane.xlu0 %2355  ;;  %v10897_v25 = vld [vmem:[#allocation23_spill] sm:$0xff]  ;;  %5796 = vpow2.f32 %v2928_v10  ;;  %v2890_v51 = vmul.f32 1.442695, %v2563_v23 }
 0x373   : > { %10881 = vst [vmem:[#allocation240_spill] sm:$0xff] %v8520_v27  ;;  %v8570_v18 = vpop.xlane.xlu1 %2352 }
 0x374   : > { %10882 = vst [vmem:[#allocation241_spill] sm:$0xff] %v8522_v21 }
 0x375   : > { %10883 = vst [vmem:[#allocation242_spill] sm:$0xff] %v8524_v9 }
 0x376   : > { %10884 = vst [vmem:[#allocation243_spill] sm:$0xff] %v8526_v46  ;;  %v8556_v46 = vpop.f32.mrf.mxu3 }
 0x377   : > { %10885 = vst [vmem:[#allocation244_spill] sm:$0xff] %v8528_v4  ;;  %3402 = vadd.xlane.f32.xlu0 %v3401_v2  ;;  %3444 = vadd.xlane.f32.xlu2 %v3443_v37  ;;  %v8576_v4 = vpop.xlane.xlu2 %2358 }
 0x378   : > { %10887 = vst [vmem:[#allocation82_spill] sm:$0xff] %v8532_v49  ;;  %v3446_v49 = vadd.f32 %v8524_v9, %v8522_v21  ;;  %v2880_v9 = vmul.f32 1.442695, %v2558_v45  ;;  %v10999_v21 = vld [vmem:[#allocation209_spill] sm:$0xff] }
 0x379   : > { %10888 = vst [vmem:[#allocation245_spill] sm:$0xff] %v8534_v33  ;;  %v10892_v33 = vld [vmem:[#allocation30_spill] sm:$0xff] }
 0x37a   : > { %10889 = vst [vmem:[#allocation246_spill] sm:$0xff] %v8536_v22  ;;  %v2562_v39 = vsub.f32 %v10892_v33, %v7970_v26  ;;  %3447 = vadd.xlane.f32.xlu1 %v3446_v49  ;;  %v2559_v33 = vsub.f32 %v10897_v25, %v7964_v43  ;;  %v8566_v22 = vpop.eup %5790  ;;  %v2986_v26 = vmul.f32 1.442695, %v2611_v36  ;;  %v8578_v43 = vpop.xlane.xlu0 %2364  ;;  %v10907_v36 = vld [vmem:[#allocation78_spill] sm:$0xff] }
 0x37b   : > { %10891 = vst [vmem:[#allocation85_spill] sm:$0xff] %v8542_v55  ;;  %v2930_v55 = vmul.f32 1.442695, %v2583_v1  ;;  %v8568_v1 = vpop.f32.mrf.mxu1  ;;  %v8572_v49 = vpop.eup %5792  ;;  %v2581_v37 = vsub.f32 %v10907_v36, %v8009_v16  ;;  %v3398_v23 = vadd.f32 %v8566_v22, %v8558_v54 }
 0x37c   : > { %10894 = vst [vmem:[#allocation30_spill] sm:$0xff] %v8556_v46  ;;  %v2888_v2 = vmul.f32 1.442695, %v2562_v39  ;;  %v10903_v46 = vld [vmem:[#allocation77_spill] sm:$0xff]  ;;  %v8580_v25 = vpop.eup %5794  ;;  %v2608_v39 = vsub.f32 %v7558_v57, %v8142_v5  ;;  %v2393_v10 = vmax.f32 %v8564_v63, %v8568_v1 }
 0x37d   : > { %10895 = vst [vmem:[#allocation31_spill] sm:$0xff] %v8558_v54  ;;  %v2580_v12 = vsub.f32 %v10903_v46, %v8009_v16  ;;  %5798 = vpow2.f32 %v2930_v55  ;;  %v2609_v46 = vsub.f32 %v7560_v47, %v8142_v5  ;;  %v10908_v16 = vld [vmem:[#allocation45_spill] sm:$0xff]  ;;  %v2926_v57 = vmul.f32 1.442695, %v2581_v37  ;;  %v8598_v47 = vpop.eup %5796  ;;  %v10911_v5 = vld [vmem:[#allocation46_spill] sm:$0xff] }
 0x37e   : > { %10898 = vst [vmem:[#allocation22_spill] sm:$0xff] %v8564_v63  ;;  %5800 = vpow2.f32 %v2984_v48  ;;  %v2568_v55 = vsub.f32 %v10908_v16, %v7984_v30  ;;  %v8596_v48 = vpop.f32.mrf.mxu2  ;;  %v2980_v16 = vmul.f32 1.442695, %v2608_v39  ;;  %v11006_v63 = vld [vmem:[#allocation111_spill] sm:$0xff] }
 0x37f   : > { %10899 = vst [vmem:[#allocation23_spill] sm:$0xff] %v8566_v22  ;;  %5802 = vpow2.f32 %v2986_v26  ;;  %v2924_v45 = vmul.f32 1.442695, %v2580_v12  ;;  %2394 = vmax.xlane.f32.xlu0 %v2393_v10  ;;  %v2569_v26 = vsub.f32 %v10911_v5, %v7984_v30  ;;  %v2982_v37 = vmul.f32 1.442695, %v2609_v46 }
 0x380   : > { %10900 = vst [vmem:[#allocation247_spill] sm:$0xff] %v8568_v1  ;;  %5804 = vpow2.f32 %v2888_v2  ;;  %v10912_v2 = vld [vmem:[#allocation72_spill] sm:$0xff]  ;;  %v2900_v10 = vmul.f32 1.442695, %v2568_v55  ;;  %v2606_v46 = vsub.f32 %v7530_v7, %v8182_v59 }
 0x381   : > { %10901 = vst [vmem:[#allocation248_spill] sm:$0xff] %v8570_v18  ;;  %v2882_v18 = vmul.f32 1.442695, %v2559_v33  ;;  %v3440_v33 = vadd.f32 %v8580_v25, %v8572_v49  ;;  %5806 = vpow2.f32 %v2890_v51  ;;  %v2578_v36 = vsub.f32 %v10912_v2, %v7998_v13  ;;  %v8606_v51 = vpop.f32.mrf.mxu3  ;;  %v8614_v30 = vpop.xlane.xlu2 %2367 }
 0x382   : > { %10902 = vst [vmem:[#allocation249_spill] sm:$0xff] %v8572_v49  ;;  %3399 = vadd.xlane.f32.xlu1 %v3398_v23  ;;  %5808 = vpow2.f32 %v2880_v9  ;;  %v10916_v9 = vld [vmem:[#allocation73_spill] sm:$0xff]  ;;  %v3352_v55 = vpop.xlane.xlu0 %3351  ;;  %v2390_v2 = vmax.f32 %v8514_v53, %v8520_v27 }
 0x383   : > { %10904 = vst [vmem:[#allocation77_spill] sm:$0xff] %v8576_v4  ;;  %3441 = vadd.xlane.f32.xlu2 %v3440_v33  ;;  %v8604_v12 = vpop.eup %5798  ;;  %5810 = vpow2.f32 %v2882_v18  ;;  %v2579_v23 = vsub.f32 %v10916_v9, %v7998_v13  ;;  %v8612_v4 = vpop.xlane.xlu1 %2361  ;;  %v2902_v18 = vmul.f32 1.442695, %v2569_v26  ;;  %v2920_v33 = vmul.f32 1.442695, %v2578_v36  ;;  %v10921_v26 = vld [vmem:[#allocation34_spill] sm:$0xff] }
 0x384   : > { %10905 = vst [vmem:[#allocation250_spill] sm:$0xff] %v8578_v43  ;;  %5812 = vpow2.f32 %v2924_v45  ;;  %v2607_v13 = vsub.f32 %v7532_v20, %v8182_v59  ;;  %v2564_v7 = vsub.f32 %v10921_v26, %v7980_v32  ;;  %v10923_v20 = vld [vmem:[#allocation35_spill] sm:$0xff]  ;;  %v10926_v26 = vld [vmem:[#allocation68_spill] sm:$0xff]  ;;  %v2976_v43 = vmul.f32 1.442695, %v2606_v46 }
 0x385   : > { %10906 = vst [vmem:[#allocation251_spill] sm:$0xff] %v8580_v25  ;;  %5814 = vpow2.f32 %v2926_v57  ;;  %v3395_v57 = vadd.f32 %v8604_v12, %v8598_v47  ;;  %v2922_v36 = vmul.f32 1.442695, %v2579_v23  ;;  %v2565_v59 = vsub.f32 %v10923_v20, %v7980_v32 }
 0x386   : > { %10909 = vst [vmem:[#allocation78_spill] sm:$0xff] %v8596_v48  ;;  %v8608_v48 = vpop.eup %5800  ;;  %5816 = vpow2.f32 %v2980_v16  ;;  %v2577_v23 = vsub.f32 %v10926_v26, %v8006_v6  ;;  %v2978_v32 = vmul.f32 1.442695, %v2607_v13 }
 0x387   : > { %10910 = vst [vmem:[#allocation45_spill] sm:$0xff] %v8598_v47  ;;  %v8616_v5 = vpop.eup %5802  ;;  %5818 = vpow2.f32 %v2982_v37  ;;  %2391 = vmax.xlane.f32.xlu0 %v2390_v2  ;;  %v2892_v2 = vmul.f32 1.442695, %v2564_v7  ;;  %v10935_v7 = vld [vmem:[#allocation143_spill] sm:$0xff] }
 0x388   : > { %10913 = vst [vmem:[#allocation46_spill] sm:$0xff] %v8604_v12  ;;  %v8618_v39 = vpop.eup %5804  ;;  %5820 = vpow2.f32 %v2900_v10  ;;  %v3437_v16 = vadd.f32 %v8616_v5, %v8608_v48  ;;  %v10925_v10 = vld [vmem:[#allocation67_spill] sm:$0xff]  ;;  %v2918_v13 = vmul.f32 1.442695, %v2577_v23 }
 0x389   : > { %10914 = vst [vmem:[#allocation72_spill] sm:$0xff] %v8606_v51  ;;  %v8622_v45 = vpop.eup %5806  ;;  %5822 = vrcp.f32 %v3352_v55  ;;  %v8658_v46 = vpop.f32.mrf.mxu3 }
 0x38a   : > { %10915 = vst [vmem:[#allocation252_spill] sm:$0xff] %v8608_v48  ;;  %v8630_v9 = vpop.eup %5808  ;;  %3396 = vadd.xlane.f32.xlu1 %v3395_v57  ;;  %5824 = vpow2.f32 %v2902_v18  ;;  %v10930_v18 = vld [vmem:[#allocation142_spill] sm:$0xff] }
 0x38b   : > { %10917 = vst [vmem:[#allocation73_spill] sm:$0xff] %v8612_v4  ;;  %v8636_v51 = vpop.eup %5810  ;;  %v2576_v4 = vsub.f32 %v10925_v10, %v8006_v6  ;;  %3438 = vadd.xlane.f32.xlu2 %v3437_v16  ;;  %5826 = vpow2.f32 %v2920_v33  ;;  %v2604_v57 = vsub.f32 %v10930_v18, %v8140_v28  ;;  %v8654_v48 = vpop.xlane.xlu1 %2370  ;;  %v2894_v6 = vmul.f32 1.442695, %v2565_v59 }
 0x38c   : > { %10918 = vst [vmem:[#allocation253_spill] sm:$0xff] %v8614_v30  ;;  %v8640_v37 = vpop.eup %5812  ;;  %5828 = vpow2.f32 %v2922_v36  ;;  %v3355_v10 = vpop.xlane.xlu2 %3354  ;;  %v2605_v36 = vsub.f32 %v10935_v7, %v8140_v28  ;;  %v2387_v18 = vmax.f32 %v8466_v11, %v8472_v40  ;;  %v10946_v40 = vld [vmem:[#allocation139_spill] sm:$0xff] }
 0x38d   : > { %10919 = vst [vmem:[#allocation254_spill] sm:$0xff] %v8616_v5  ;;  %v8646_v30 = vpop.eup %5814  ;;  %v8648_v5 = vpop.f32.mrf.mxu2  ;;  %5830 = vrcp.f32 %v3355_v10  ;;  %v2916_v16 = vmul.f32 1.442695, %v2576_v4 }
 0x38e   : > { %10920 = vst [vmem:[#allocation255_spill] sm:$0xff] %v8630_v9  ;;  %v8650_v20 = vpop.eup %5816  ;;  %5832 = vpow2.f32 %v2976_v43  ;;  %v10938_v43 = vld [vmem:[#allocation194_spill] sm:$0xff] }
 0x38f   : > { %10922 = vst [vmem:[#allocation34_spill] sm:$0xff] %v8636_v51  ;;  %v8656_v12 = vpop.eup %5818  ;;  %5834 = vpow2.f32 %v2978_v32  ;;  %v10940_v32 = vld [vmem:[#allocation63_spill] sm:$0xff]  ;;  %2388 = vmax.xlane.f32.xlu0 %v2387_v18 }
 0x390   : > { %10924 = vst [vmem:[#allocation35_spill] sm:$0xff] %v8640_v37  ;;  %v8660_v33 = vpop.eup %5820  ;;  %5836 = vpow2.f32 %v2892_v2  ;;  %v3434_v4 = vadd.f32 %v8656_v12, %v8650_v20  ;;  %v2575_v7 = vsub.f32 %v10940_v32, %v10938_v43 }
 0x391   : > { %10927 = vst [vmem:[#allocation67_spill] sm:$0xff] %v8646_v30  ;;  %v5823_v26 = vpop.eup %5822  ;;  %5838 = vpow2.f32 %v2894_v6 }
 0x392   : > { %10928 = vst [vmem:[#allocation68_spill] sm:$0xff] %v8648_v5  ;;  %v3392_v5 = vadd.f32 %v8646_v30, %v8640_v37  ;;  %v8668_v59 = vpop.eup %5824  ;;  %v10942_v30 = vld [vmem:[#allocation193_spill] sm:$0xff]  ;;  %v10943_v37 = vld [vmem:[#allocation50_spill] sm:$0xff]  ;;  %5840 = vpow2.f32 %v2916_v16 }
 0x393   : > { %10929 = vst [vmem:[#allocation256_spill] sm:$0xff] %v8650_v20  ;;  %v8672_v23 = vpop.eup %5826  ;;  %v2570_v2 = vsub.f32 %v10943_v37, %v10942_v30  ;;  %3435 = vadd.xlane.f32.xlu2 %v3434_v4  ;;  %5842 = vpow2.f32 %v2918_v13  ;;  %v2974_v20 = vmul.f32 1.442695, %v2605_v36  ;;  %v3349_v18 = vpop.xlane.xlu1 %3348  ;;  %v2914_v37 = vmul.f32 1.442695, %v2575_v7 }
 0x394   : > { %10931 = vst [vmem:[#allocation142_spill] sm:$0xff] %v8654_v48  ;;  %v10939_v48 = vld [vmem:[#allocation60_spill] sm:$0xff]  ;;  %3393 = vadd.xlane.f32.xlu1 %v3392_v5  ;;  %v8678_v47 = vpop.eup %5828  ;;  %v8686_v5 = vpop.xlane.xlu0 %2373 }
 0x395   : > { %10932 = vst [vmem:[#allocation257_spill] sm:$0xff] %v8656_v12  ;;  %v2574_v28 = vsub.f32 %v10939_v48, %v10938_v43  ;;  %v5831_v12 = vpop.eup %5830  ;;  %v10945_v48 = vld [vmem:[#allocation74_spill] sm:$0xff]  ;;  %v8692_v4 = vpop.f32.mrf.mxu2 }
 0x396   : > { %10933 = vst [vmem:[#allocation258_spill] sm:$0xff] %v8658_v46  ;;  %v2972_v46 = vmul.f32 1.442695, %v2604_v57  ;;  %v3802_v57 = vmul.f32 %v5823_v26, %v3352_v55  ;;  %v8682_v6 = vpop.eup %5832  ;;  %v2602_v11 = vsub.f32 %v10946_v40, %v10945_v48  ;;  %v3803_v43 = vmul.f32 %v5831_v12, %v3355_v10  ;;  %v10949_v55 = vld [vmem:[#allocation51_spill] sm:$0xff]  ;;  %v3307_v13 = vpop.xlane.xlu2 %3306 }
 0x397   : > { %10934 = vst [vmem:[#allocation259_spill] sm:$0xff] %v8660_v33  ;;  %v8688_v32 = vpop.eup %5834  ;;  %v2912_v25 = vmul.f32 1.442695, %v2574_v28  ;;  %v2571_v16 = vsub.f32 %v10949_v55, %v10942_v30  ;;  %v10953_v28 = vld [vmem:[#allocation140_spill] sm:$0xff]  ;;  %v2384_v30 = vmax.f32 %v8420_v52, %v8424_v14  ;;  %v3389_v55 = vadd.f32 %v8678_v47, %v8672_v23  ;;  %v10963_v52 = vld [vmem:[#allocation134_spill] sm:$0xff] }
 0x398   : > { %10936 = vst [vmem:[#allocation143_spill] sm:$0xff] %v8668_v59  ;;  %5844 = vpow2.f32 %v2972_v46  ;;  %v8694_v36 = vpop.eup %5836  ;;  %v2904_v46 = vmul.f32 1.442695, %v2570_v2  ;;  %v3930_v49 = vsub.f32 2.0, %v3802_v57  ;;  %v3931_v40 = vsub.f32 2.0, %v3803_v43  ;;  %v10955_v2 = vld [vmem:[#allocation190_spill] sm:$0xff] }
 0x399   : > { %10937 = vst [vmem:[#allocation260_spill] sm:$0xff] %v8672_v23  ;;  %5846 = vrcp.f32 %v3349_v18  ;;  %v8696_v10 = vpop.eup %5838  ;;  %v2603_v7 = vsub.f32 %v10953_v28, %v10945_v48  ;;  %v10956_v57 = vld [vmem:[#allocation55_spill] sm:$0xff]  ;;  %v2968_v22 = vmul.f32 1.442695, %v2602_v11  ;;  %v10958_v48 = vld [vmem:[#allocation56_spill] sm:$0xff]  ;;  %2385 = vmax.xlane.f32.xlu0 %v2384_v30 }
 0x39a   : > { %10941 = vst [vmem:[#allocation194_spill] sm:$0xff] %v8678_v47  ;;  %5848 = vrcp.f32 %v3307_v13  ;;  %v2572_v43 = vsub.f32 %v10956_v57, %v10955_v2  ;;  %v4059_v54 = vmul.f32 %v5831_v12, %v3931_v40  ;;  %v2573_v28 = vsub.f32 %v10958_v48, %v10955_v2  ;;  %v10960_v47 = vld [vmem:[#allocation207_spill] sm:$0xff]  ;;  %v10961_v57 = vld [vmem:[#allocation208_spill] sm:$0xff] }
 0x39b   : > { %10944 = vst [vmem:[#allocation60_spill] sm:$0xff] %v8682_v6  ;;  %5850 = vpow2.f32 %v2974_v20  ;;  %v3431_v20 = vadd.f32 %v8688_v32, %v8682_v6  ;;  %v4058_v12 = vmul.f32 %v5823_v26, %v3930_v49  ;;  %v10962_v6 = vld [vmem:[#allocation65_spill] sm:$0xff]  ;;  %v2970_v27 = vmul.f32 1.442695, %v2603_v7  ;;  %v10964_v30 = vld [vmem:[#allocation135_spill] sm:$0xff]  ;;  %v10967_v7 = vld [vmem:[#allocation202_spill] sm:$0xff] }
 0x39c   : > { %10947 = vst [vmem:[#allocation63_spill] sm:$0xff] %v8686_v5  ;;  %v8698_v5 = vpop.f32.mrf.mxu3  ;;  %5852 = vpow2.f32 %v2912_v25  ;;  %3390 = vadd.xlane.f32.xlu1 %v3389_v55  ;;  %v4218_v23 = vmul.f32 %v10960_v47, %v4059_v54  ;;  %v4219_v11 = vmul.f32 %v10961_v57, %v4059_v54  ;;  %v2600_v25 = vsub.f32 %v10963_v52, %v10962_v6  ;;  %v3304_v54 = vpop.xlane.xlu0 %3303 }
 0x39d   : > { %10948 = vst [vmem:[#allocation193_spill] sm:$0xff] %v8688_v32  ;;  %5854 = vpow2.f32 %v2914_v37  ;;  %3432 = vadd.xlane.f32.xlu2 %v3431_v20  ;;  %v2906_v32 = vmul.f32 1.442695, %v2571_v16  ;;  %v2908_v2 = vmul.f32 1.442695, %v2572_v43  ;;  %v2601_v55 = vsub.f32 %v10964_v30, %v10962_v6  ;;  %v8724_v20 = vpop.xlane.xlu1 %2376  ;;  %v8734_v48 = vpop.f32.mrf.mxu2 }
 0x39e   : > { %10950 = vst [vmem:[#allocation50_spill] sm:$0xff] %v8692_v4  ;;  %v8706_v4 = vpop.eup %5840  ;;  %5856 = vpow2.f32 %v2904_v46  ;;  %4494 = vmatpush.xpose.msra.mxu2 %v4218_v23  ;;  %4535 = vmatpush.xpose.msra.mxu3 %v4219_v11  ;;  %v2910_v47 = vmul.f32 1.442695, %v2573_v28  ;;  %v3346_v16 = vpop.xlane.xlu2 %3345  ;;  %v4216_v6 = vmul.f32 %v10967_v7, %v4058_v12  ;;  %v2964_v23 = vmul.f32 1.442695, %v2600_v25  ;;  %v10973_v25 = vld [vmem:[#allocation47_spill] sm:$0xff] }
 0x39f   : > { %10951 = vst [vmem:[#allocation74_spill] sm:$0xff] %v8696_v10  ;;  %5858 = vpow2.f32 %v2968_v22  ;;  %v10968_v22 = vld [vmem:[#allocation203_spill] sm:$0xff]  ;;  %v2966_v11 = vmul.f32 1.442695, %v2601_v55  ;;  %v10974_v7 = vld [vmem:[#allocation126_spill] sm:$0xff] }
 0x3a0   : > { %10952 = vst [vmem:[#allocation139_spill] sm:$0xff] %v8698_v5  ;;  %v8712_v5 = vpop.eup %5842  ;;  %5860 = vrcp.f32 %v3304_v54 }
 0x3a1   : > { %10954 = vst [vmem:[#allocation51_spill] sm:$0xff] %v8706_v4  ;;  %v8716_v14 = vpop.eup %5844  ;;  %v3386_v52 = vadd.f32 %v8712_v5, %v8706_v4  ;;  %5862 = vrcp.f32 %v3346_v16 }
 0x3a2   : > { %10957 = vst [vmem:[#allocation140_spill] sm:$0xff] %v8712_v5  ;;  %v5847_v40 = vpop.eup %5846  ;;  %5864 = vpow2.f32 %v2970_v27  ;;  %4495 = vmatpush.xpose.msra.mxu2 %v4216_v6  ;;  %v2598_v27 = vsub.f32 %v10974_v7, %v10973_v25  ;;  %v10978_v6 = vld [vmem:[#allocation70_spill] sm:$0xff]  ;;  %v10981_v7 = vld [vmem:[#allocation121_spill] sm:$0xff] }
 0x3a3   : > { %10959 = vst [vmem:[#allocation190_spill] sm:$0xff] %v8716_v14  ;;  %v5849_v53 = vpop.eup %5848  ;;  %v3801_v37 = vmul.f32 %v5847_v40, %v3349_v18  ;;  %v4217_v18 = vmul.f32 %v10968_v22, %v4058_v12  ;;  %5866 = vpow2.f32 %v2906_v32  ;;  %v10977_v32 = vld [vmem:[#allocation129_spill] sm:$0xff] }
 0x3a4   : > { %10965 = vst [vmem:[#allocation55_spill] sm:$0xff] %v8724_v20  ;;  %v8726_v49 = vpop.eup %5850  ;;  %v3787_v26 = vmul.f32 %v5849_v53, %v3307_v13  ;;  %v2381_v13 = vmax.f32 %v8364_v34, %v8370_v15  ;;  %5868 = vpow2.f32 %v2908_v2  ;;  %v8746_v22 = vpop.f32.mrf.mxu3  ;;  %3387 = vadd.xlane.f32.xlu1 %v3386_v52  ;;  %v2599_v55 = vsub.f32 %v10977_v32, %v10973_v25  ;;  %v10993_v15 = vld [vmem:[#allocation41_spill] sm:$0xff] }
 0x3a5   : > { %10966 = vst [vmem:[#allocation56_spill] sm:$0xff] %v8726_v49  ;;  %v3929_v46 = vsub.f32 2.0, %v3801_v37  ;;  %v8732_v43 = vpop.eup %5852  ;;  %4536 = vmatpush.xpose.msra.mxu3 %v4217_v18  ;;  %v3428_v30 = vadd.f32 %v8726_v49, %v8716_v14  ;;  %5870 = vpow2.f32 %v2910_v47  ;;  %v10980_v49 = vld [vmem:[#allocation206_spill] sm:$0xff]  ;;  %v3343_v32 = vpop.xlane.xlu0 %3342 }
 0x3a6   : > { %10969 = vst [vmem:[#allocation207_spill] sm:$0xff] %v8732_v43  ;;  %v3915_v28 = vsub.f32 2.0, %v3787_v26  ;;  %v8738_v57 = vpop.eup %5854  ;;  %2382 = vmax.xlane.f32.xlu0 %v2381_v13  ;;  %5872 = vpow2.f32 %v2964_v23  ;;  %v2596_v14 = vsub.f32 %v10981_v7, %v10980_v49  ;;  %v10983_v13 = vld [vmem:[#allocation75_spill] sm:$0xff]  ;;  %v10984_v47 = vld [vmem:[#allocation122_spill] sm:$0xff]  ;;  %v10986_v23 = vld [vmem:[#allocation180_spill] sm:$0xff] }
 0x3a7   : > { %10970 = vst [vmem:[#allocation208_spill] sm:$0xff] %v8734_v48  ;;  %v4057_v12 = vmul.f32 %v5847_v40, %v3929_v46  ;;  %v8742_v37 = vpop.eup %5856  ;;  %3429 = vadd.xlane.f32.xlu2 %v3428_v30  ;;  %v10979_v46 = vld [vmem:[#allocation211_spill] sm:$0xff]  ;;  %5874 = vpow2.f32 %v2966_v11  ;;  %v2597_v5 = vsub.f32 %v10984_v47, %v10980_v49  ;;  %v3301_v30 = vpop.xlane.xlu1 %3300  ;;  %v2960_v7 = vmul.f32 1.442695, %v2598_v27 }
 0x3a8   : > { %10971 = vst [vmem:[#allocation65_spill] sm:$0xff] %v8738_v57  ;;  %v4043_v48 = vmul.f32 %v5849_v53, %v3915_v28  ;;  %v8748_v26 = vpop.eup %5858  ;;  %5876 = vrcp.f32 %v3301_v30 }
 0x3a9   : > { %10972 = vst [vmem:[#allocation134_spill] sm:$0xff] %v8742_v37  ;;  %v4214_v40 = vmul.f32 %v10978_v6, %v4057_v12  ;;  %v4215_v18 = vmul.f32 %v10979_v46, %v4057_v12  ;;  %v5861_v2 = vpop.eup %5860  ;;  %v10987_v6 = vld [vmem:[#allocation18_spill] sm:$0xff]  ;;  %v2958_v46 = vmul.f32 1.442695, %v2597_v5  ;;  %v10996_v5 = vld [vmem:[#allocation27_spill] sm:$0xff] }
 0x3aa   : > { %10975 = vst [vmem:[#allocation135_spill] sm:$0xff] %v8746_v22  ;;  %v10982_v22 = vld [vmem:[#allocation210_spill] sm:$0xff]  ;;  %v4187_v52 = vmul.f32 %v10983_v13, %v4043_v48  ;;  %v5863_v28 = vpop.eup %5862  ;;  %v3786_v25 = vmul.f32 %v5861_v2, %v3304_v54  ;;  %v3383_v54 = vadd.f32 %v8738_v57, %v8732_v43  ;;  %v2378_v13 = vmax.f32 %v8312_v0, %v8320_v61  ;;  %v10991_v57 = vld [vmem:[#allocation181_spill] sm:$0xff] }
 0x3ab   : > { %10976 = vst [vmem:[#allocation202_spill] sm:$0xff] %v8748_v26  ;;  %v4186_v53 = vmul.f32 %v10982_v22, %v4043_v48  ;;  %4496 = vmatpush.xpose.msra.mxu2 %v4214_v40  ;;  %4537 = vmatpush.xpose.msra.mxu3 %v4215_v18  ;;  %v8760_v12 = vpop.eup %5864  ;;  %v3800_v4 = vmul.f32 %v5863_v28, %v3346_v16  ;;  %v3298_v48 = vpop.xlane.xlu2 %3297  ;;  %v2962_v22 = vmul.f32 1.442695, %v2599_v55  ;;  %v2956_v18 = vmul.f32 1.442695, %v2596_v14  ;;  %v10992_v43 = vld [vmem:[#allocation26_spill] sm:$0xff] }
 0x3ac   : > { %10985 = vst [vmem:[#allocation203_spill] sm:$0xff] %v8760_v12  ;;  %4453 = vmatpush.xpose.msra.mxu1 %v4187_v52  ;;  %v8764_v11 = vpop.eup %5866  ;;  %v3914_v49 = vsub.f32 2.0, %v3786_v25  ;;  %5878 = vrcp.f32 %v3298_v48  ;;  %v10990_v52 = vld [vmem:[#allocation38_spill] sm:$0xff]  ;;  %v3425_v55 = vadd.f32 %v8760_v12, %v8748_v26  ;;  %3384 = vadd.xlane.f32.xlu1 %v3383_v54  ;;  %v10998_v26 = vld [vmem:[#allocation151_spill] sm:$0xff] }
 0x3ad   : > { %4412 = vmatpush.xpose.msra.mxu0 %v4186_v53  ;;  %10988 = vst [vmem:[#allocation47_spill] sm:$0xff] %v8764_v11  ;;  %v8768_v40 = vpop.eup %5868  ;;  %v3928_v27 = vsub.f32 2.0, %v3800_v4  ;;  %5880 = vrcp.f32 %v3343_v32  ;;  %v10989_v53 = vld [vmem:[#allocation187_spill] sm:$0xff]  ;;  %v8784_v4 = vpop.f32.mrf.mxu2  ;;  %v11002_v54 = vld [vmem:[#allocation66_spill] sm:$0xff] }
 0x3ae   : > { %v8772_v16 = vpop.eup %5870  ;;  %v2566_v47 = vsub.f32 %v10990_v52, %v10989_v53  ;;  %v4042_v25 = vmul.f32 %v5861_v2, %v3914_v49  ;;  %v2567_v61 = vsub.f32 %v10993_v15, %v10989_v53  ;;  %5882 = vpow2.f32 %v2960_v7  ;;  %10994 = vst [vmem:[#allocation126_spill] sm:$0xff] %v8784_v4  ;;  %2379 = vmax.xlane.f32.xlu0 %v2378_v13  ;;  %v10997_v2 = vld [vmem:[#allocation213_spill] sm:$0xff]  ;;  %v11000_v15 = vld [vmem:[#allocation116_spill] sm:$0xff]  ;;  %v8794_v53 = vpop.f32.mrf.mxu3  ;;  %v11003_v13 = vld [vmem:[#allocation131_spill] sm:$0xff] }
 0x3af   : > { %v8778_v20 = vpop.eup %5872  ;;  %v4056_v0 = vmul.f32 %v5863_v28, %v3928_v27  ;;  %5884 = vpow2.f32 %v2962_v22  ;;  %3426 = vadd.xlane.f32.xlu2 %v3425_v55  ;;  %v2594_v7 = vsub.f32 %v11000_v15, %v10999_v21  ;;  %11001 = vst [vmem:[#allocation70_spill] sm:$0xff] %v8794_v53  ;;  %v11004_v22 = vld [vmem:[#allocation117_spill] sm:$0xff]  ;;  %v3340_v12 = vpop.xlane.xlu1 %3339 }
 0x3b0   : > { %v8786_v52 = vpop.eup %5874  ;;  %v4184_v49 = vmul.f32 %v10997_v2, %v4042_v25  ;;  %v4185_v14 = vmul.f32 %v10998_v26, %v4042_v25  ;;  %5886 = vpow2.f32 %v2956_v18  ;;  %v2896_v1 = vmul.f32 1.442695, %v2566_v47  ;;  %v3295_v26 = vpop.xlane.xlu0 %3294  ;;  %v11005_v18 = vld [vmem:[#allocation205_spill] sm:$0xff] }
 0x3b1   : > { %10995 = vst [vmem:[#allocation129_spill] sm:$0xff] %v8786_v52  ;;  %v5877_v34 = vpop.eup %5876  ;;  %v4212_v28 = vmul.f32 %v11002_v54, %v4056_v0  ;;  %v4213_v27 = vmul.f32 %v11003_v13, %v4056_v0  ;;  %v2595_v55 = vsub.f32 %v11004_v22, %v10999_v21  ;;  %5888 = vpow2.f32 %v2958_v46 }
 0x3b2   : > { %v5879_v4 = vpop.eup %5878  ;;  %v3785_v2 = vmul.f32 %v5877_v34, %v3301_v30  ;;  %4413 = vmatpush.xpose.msra.mxu0 %v4184_v49  ;;  %4454 = vmatpush.xpose.msra.mxu1 %v4185_v14  ;;  %v2898_v15 = vmul.f32 1.442695, %v2567_v61  ;;  %v2592_v53 = vsub.f32 %v11006_v63, %v11005_v18  ;;  %5890 = vrcp.f32 %v3340_v12 }
 0x3b3   : > { %v5881_v25 = vpop.eup %5880  ;;  %v3784_v17 = vmul.f32 %v5879_v4, %v3298_v48  ;;  %v3337_v54 = vpop.xlane.xlu2 %3336  ;;  %4497 = vmatpush.xpose.msra.mxu2 %v4212_v28  ;;  %4538 = vmatpush.xpose.msra.mxu3 %v4213_v27  ;;  %v3380_v21 = vadd.f32 %v8772_v16, %v8768_v40  ;;  %v2952_v46 = vmul.f32 1.442695, %v2594_v7  ;;  %v3422_v61 = vadd.f32 %v8786_v52, %v8778_v20  ;;  %v11007_v27 = vld [vmem:[#allocation112_spill] sm:$0xff]  ;;  %v11011_v52 = vld [vmem:[#allocation201_spill] sm:$0xff] }
 0x3b4   : > { %v3913_v0 = vsub.f32 2.0, %v3785_v2  ;;  %v3799_v47 = vmul.f32 %v5881_v25, %v3343_v32  ;;  %5892 = vrcp.f32 %v3337_v54  ;;  %v8804_v30 = vpop.eup %5882  ;;  %v2954_v48 = vmul.f32 1.442695, %v2595_v55  ;;  %v11009_v55 = vld [vmem:[#allocation215_spill] sm:$0xff] }
 0x3b5   : > { %v3912_v14 = vsub.f32 2.0, %v3784_v17  ;;  %5894 = vrcp.f32 %v3295_v26  ;;  %v8808_v63 = vpop.eup %5884  ;;  %v3377_v28 = vadd.f32 %v8764_v11, %v8742_v37  ;;  %v2593_v22 = vsub.f32 %v11007_v27, %v11005_v18  ;;  %3381 = vadd.xlane.f32.xlu1 %v3380_v21  ;;  %v11010_v11 = vld [vmem:[#allocation217_spill] sm:$0xff]  ;;  %v11012_v18 = vld [vmem:[#allocation104_spill] sm:$0xff] }
 0x3b6   : > { %v3927_v49 = vsub.f32 2.0, %v3799_v47  ;;  %v4041_v32 = vmul.f32 %v5877_v34, %v3913_v0  ;;  %v8812_v13 = vpop.eup %5886  ;;  %5896 = vpow2.f32 %v2896_v1  ;;  %3423 = vadd.xlane.f32.xlu0 %v3422_v61  ;;  %v3374_v7 = vadd.f32 %v8668_v59, %v8660_v33  ;;  %v8830_v59 = vpop.f32.mrf.mxu3 }
 0x3b7   : > { %v4040_v17 = vmul.f32 %v5879_v4, %v3912_v14  ;;  %v8818_v2 = vpop.eup %5888  ;;  %5898 = vpow2.f32 %v2898_v15  ;;  %3378 = vadd.xlane.f32.xlu2 %v3377_v28  ;;  %v2948_v1 = vmul.f32 1.442695, %v2592_v53  ;;  %v2590_v61 = vsub.f32 %v11012_v18, %v11011_v52  ;;  %v11013_v4 = vld [vmem:[#allocation107_spill] sm:$0xff]  ;;  %v8826_v14 = vpop.f32.mrf.mxu2  ;;  %11017 = vst [vmem:[#allocation121_spill] sm:$0xff] %v8830_v59 }
 0x3b8   : > { %11008 = vst [vmem:[#allocation211_spill] sm:$0xff] %v8818_v2  ;;  %v4182_v47 = vmul.f32 %v11009_v55, %v4041_v32  ;;  %v4183_v34 = vmul.f32 %v11010_v11, %v4041_v32  ;;  %v4055_v0 = vmul.f32 %v5881_v25, %v3927_v49  ;;  %v5891_v37 = vpop.eup %5890  ;;  %5900 = vpow2.f32 %v2952_v46  ;;  %v3292_v28 = vpop.xlane.xlu1 %3291  ;;  %v11015_v55 = vld [vmem:[#allocation145_spill] sm:$0xff] }
 0x3b9   : > { %v2591_v21 = vsub.f32 %v11013_v4, %v11011_v52  ;;  %11014 = vst [vmem:[#allocation206_spill] sm:$0xff] %v8826_v14  ;;  %5902 = vpow2.f32 %v2954_v48  ;;  %v3798_v15 = vmul.f32 %v5891_v37, %v3340_v12  ;;  %v11016_v25 = vld [vmem:[#allocation57_spill] sm:$0xff]  ;;  %v3334_v53 = vpop.xlane.xlu0 %3333  ;;  %v2950_v32 = vmul.f32 1.442695, %v2593_v22  ;;  %v11018_v4 = vld [vmem:[#allocation214_spill] sm:$0xff]  ;;  %v11019_v12 = vld [vmem:[#allocation148_spill] sm:$0xff] }
 0x3ba   : > { %v5893_v27 = vpop.eup %5892  ;;  %4414 = vmatpush.xpose.msra.mxu0 %v4182_v47  ;;  %4455 = vmatpush.xpose.msra.mxu1 %v4183_v34  ;;  %v4210_v11 = vmul.f32 %v11015_v55, %v4055_v0  ;;  %v4211_v49 = vmul.f32 %v11016_v25, %v4055_v0  ;;  %5904 = vrcp.f32 %v3292_v28  ;;  %v4180_v14 = vmul.f32 %v11018_v4, %v4040_v17 }
 0x3bb   : > { %v5895_v46 = vpop.eup %5894  ;;  %v3797_v18 = vmul.f32 %v5893_v27, %v3337_v54  ;;  %v3289_v52 = vpop.xlane.xlu2 %3288  ;;  %v3926_v33 = vsub.f32 2.0, %v3798_v15  ;;  %v4181_v47 = vmul.f32 %v11019_v12, %v4040_v17  ;;  %v2944_v0 = vmul.f32 1.442695, %v2590_v61  ;;  %v11020_v17 = vld [vmem:[#allocation19_spill] sm:$0xff] }
 0x3bc   : > { %v3783_v48 = vmul.f32 %v5895_v46, %v3295_v26  ;;  %5906 = vrcp.f32 %v3289_v52  ;;  %4498 = vmatpush.xpose.msra.mxu2 %v4210_v11  ;;  %4539 = vmatpush.xpose.msra.mxu3 %v4211_v49  ;;  %v8834_v34 = vpop.eup %5896  ;;  %v3419_v22 = vadd.f32 %v8808_v63, %v8804_v30  ;;  %v2946_v25 = vmul.f32 1.442695, %v2591_v21 }
 0x3bd   : > { %v3925_v55 = vsub.f32 2.0, %v3797_v18  ;;  %5908 = vrcp.f32 %v3334_v53  ;;  %v8838_v54 = vpop.eup %5898  ;;  %v3416_v26 = vadd.f32 %v8818_v2, %v8812_v13  ;;  %v4054_v15 = vmul.f32 %v5891_v37, %v3926_v33  ;;  %v11023_v37 = vld [vmem:[#allocation124_spill] sm:$0xff] }
 0x3be   : > { %v3911_v59 = vsub.f32 2.0, %v3783_v48  ;;  %4415 = vmatpush.xpose.msra.mxu0 %v4180_v14  ;;  %4456 = vmatpush.xpose.msra.mxu1 %v4181_v47  ;;  %v8842_v11 = vpop.eup %5900  ;;  %v11021_v49 = vsub.f32 %v10992_v43, %v10991_v57  ;;  %5910 = vpow2.f32 %v2948_v1  ;;  %v11022_v48 = vld [vmem:[#allocation58_spill] sm:$0xff]  ;;  %v11024_v61 = vsub.f32 %v10996_v5, %v10991_v57  ;;  %v11025_v43 = vld [vmem:[#allocation84_spill] sm:$0xff] }
 0x3bf   : > { %3375 = vadd.xlane.f32.xlu0 %v3374_v7  ;;  %3420 = vadd.xlane.f32.xlu1 %v3419_v22  ;;  %v4053_v21 = vmul.f32 %v5893_v27, %v3925_v55  ;;  %v8849_v4 = vpop.eup %5902  ;;  %5912 = vpow2.f32 %v2950_v32  ;;  %v4208_v33 = vmul.f32 %v11022_v48, %v4054_v15  ;;  %v4209_v12 = vmul.f32 %v11023_v37, %v4054_v15  ;;  %v11027_v7 = vld [vmem:[#allocation100_spill] sm:$0xff]  ;;  %v8862_v5 = vpop.f32.mrf.mxu2 }
 0x3c0   : > { %v2884_v18 = vmul.f32 1.442695, %v11021_v49  ;;  %3417 = vadd.xlane.f32.xlu2 %v3416_v26  ;;  %v4039_v14 = vmul.f32 %v5895_v46, %v3911_v59  ;;  %v5905_v47 = vpop.eup %5904  ;;  %v2886_v2 = vmul.f32 1.442695, %v11024_v61  ;;  %v11026_v49 = vld [vmem:[#allocation99_spill] sm:$0xff]  ;;  %v2589_v27 = vsub.f32 %v11027_v7, %v11025_v43  ;;  %v3331_v59 = vpop.xlane.xlu1 %3330  ;;  %v11028_v46 = vld [vmem:[#allocation61_spill] sm:$0xff] }
 0x3c1   : > { %v2588_v1 = vsub.f32 %v11026_v49, %v11025_v43  ;;  %5914 = vpow2.f32 %v2944_v0  ;;  %v3782_v32 = vmul.f32 %v5905_v47, %v3292_v28  ;;  %v11029_v26 = vld [vmem:[#allocation62_spill] sm:$0xff]  ;;  %4499 = vmatpush.xpose.msra.mxu2 %v4208_v33  ;;  %4540 = vmatpush.xpose.msra.mxu3 %v4209_v12  ;;  %v3286_v48 = vpop.xlane.xlu0 %3285  ;;  %11030 = vst [vmem:[#allocation210_spill] sm:$0xff] %v8862_v5  ;;  %v11031_v49 = vld [vmem:[#allocation52_spill] sm:$0xff] }
 0x3c2   : > { %v5907_v55 = vpop.eup %5906  ;;  %5916 = vpow2.f32 %v2946_v25  ;;  %v4178_v22 = vmul.f32 %v11028_v46, %v4039_v14  ;;  %v4179_v15 = vmul.f32 %v11029_v26, %v4039_v14  ;;  %v4206_v43 = vmul.f32 %v11031_v49, %v4053_v21  ;;  %v11032_v14 = vld [vmem:[#allocation53_spill] sm:$0xff]  ;;  %v8870_v46 = vpop.f32.mrf.mxu3 }
 0x3c3   : > { %v5909_v57 = vpop.eup %5908  ;;  %v3781_v61 = vmul.f32 %v5907_v55, %v3289_v52  ;;  %5918 = vrcp.f32 %v3331_v59  ;;  %v3328_v37 = vpop.xlane.xlu2 %3327  ;;  %v3371_v0 = vadd.f32 %v8838_v54, %v8834_v34  ;;  %v3910_v28 = vsub.f32 2.0, %v3782_v32  ;;  %11033 = vst [vmem:[#allocation75_spill] sm:$0xff] %v8870_v46 }
 0x3c4   : > { %v3796_v25 = vmul.f32 %v5909_v57, %v3334_v53  ;;  %5920 = vrcp.f32 %v3328_v37  ;;  %4416 = vmatpush.xpose.msra.mxu0 %v4178_v22  ;;  %4457 = vmatpush.xpose.msra.mxu1 %v4179_v15  ;;  %v4207_v33 = vmul.f32 %v11032_v14, %v4053_v21  ;;  %v8868_v12 = vpop.eup %5910  ;;  %v2940_v7 = vmul.f32 1.442695, %v2588_v1 }
 0x3c5   : > { %v3909_v52 = vsub.f32 2.0, %v3781_v61  ;;  %5922 = vrcp.f32 %v3286_v48  ;;  %v3413_v26 = vadd.f32 %v8849_v4, %v8842_v11  ;;  %v8874_v49 = vpop.eup %5912  ;;  %v2942_v5 = vmul.f32 1.442695, %v2589_v27  ;;  %4500 = vmatpush.xpose.msra.mxu2 %v4206_v43  ;;  %v11035_v27 = vld [vmem:[#allocation119_spill] sm:$0xff] }
 0x3c6   : > { %v3924_v32 = vsub.f32 2.0, %v3796_v25  ;;  %4541 = vmatpush.xpose.msra.mxu3 %v4207_v33  ;;  %v3368_v53 = vadd.f32 %v8696_v10, %v8694_v36  ;;  %v4038_v21 = vmul.f32 %v5905_v47, %v3910_v28  ;;  %v11034_v1 = vsub.f32 %v10987_v6, %v10986_v23  ;;  %v11036_v25 = vld [vmem:[#allocation114_spill] sm:$0xff] }
 0x3c7   : > { %v8878_v22 = vpop.eup %5914  ;;  %5924 = vpow2.f32 %v2884_v18  ;;  %3414 = vadd.xlane.f32.xlu0 %v3413_v26  ;;  %3372 = vadd.xlane.f32.xlu1 %v3371_v0  ;;  %v4037_v61 = vmul.f32 %v5907_v55, %v3909_v52  ;;  %v11037_v28 = vsub.f32 %v11020_v17, %v10986_v23  ;;  %v11038_v6 = vld [vmem:[#allocation182_spill] sm:$0xff]  ;;  %v11039_v55 = vld [vmem:[#allocation183_spill] sm:$0xff] }
 0x3c8   : > { %v2876_v15 = vmul.f32 1.442695, %v11034_v1  ;;  %v8883_v14 = vpop.eup %5916  ;;  %5926 = vpow2.f32 %v2886_v2  ;;  %3369 = vadd.xlane.f32.xlu2 %v3368_v53  ;;  %v4176_v43 = vmul.f32 %v11035_v27, %v4038_v21  ;;  %v4177_v33 = vmul.f32 %v11036_v25, %v4038_v21  ;;  %v3283_v26 = vpop.xlane.xlu1 %3282  ;;  %v11040_v53 = vld [vmem:[#allocation138_spill] sm:$0xff] }
 0x3c9   : > { %v4052_v46 = vmul.f32 %v5909_v57, %v3924_v32  ;;  %v5919_v47 = vpop.eup %5918  ;;  %v2878_v10 = vmul.f32 1.442695, %v11037_v28  ;;  %5928 = vpow2.f32 %v2940_v7  ;;  %v2650_v18 = vsub.f32 %v11038_v6, %v8496_v58  ;;  %v11041_v32 = vld [vmem:[#allocation141_spill] sm:$0xff]  ;;  %v3325_v1 = vpop.xlane.xlu0 %3324  ;;  %v11042_v27 = vld [vmem:[#allocation118_spill] sm:$0xff] }
 0x3ca   : > { %v2651_v0 = vsub.f32 %v11039_v55, %v8496_v58  ;;  %v5921_v52 = vpop.eup %5920  ;;  %5930 = vpow2.f32 %v2942_v5  ;;  %v3795_v2 = vmul.f32 %v5919_v47, %v3331_v59  ;;  %4417 = vmatpush.xpose.msra.mxu0 %v4176_v43  ;;  %4458 = vmatpush.xpose.msra.mxu1 %v4177_v33  ;;  %v4174_v25 = vmul.f32 %v11042_v27, %v4037_v61  ;;  %v11043_v59 = vld [vmem:[#allocation48_spill] sm:$0xff]  ;;  %v11047_v27 = vld [vmem:[#allocation110_spill] sm:$0xff] }
 0x3cb   : > { %v4204_v57 = vmul.f32 %v11040_v53, %v4052_v46  ;;  %v4205_v21 = vmul.f32 %v11041_v32, %v4052_v46  ;;  %v5923_v23 = vpop.eup %5922  ;;  %v3794_v17 = vmul.f32 %v5921_v52, %v3328_v37  ;;  %5932 = vrcp.f32 %v3283_v26  ;;  %v3280_v7 = vpop.xlane.xlu2 %3279 }
 0x3cc   : > { %v3365_v58 = vadd.f32 %v8622_v45, %v8618_v39  ;;  %v3923_v28 = vsub.f32 2.0, %v3795_v2  ;;  %v3780_v5 = vmul.f32 %v5923_v23, %v3286_v48  ;;  %5934 = vrcp.f32 %v3280_v7  ;;  %v8902_v46 = vpop.f32.mrf.mxu2 }
 0x3cd   : > { %4501 = vmatpush.xpose.msra.mxu2 %v4204_v57  ;;  %4542 = vmatpush.xpose.msra.mxu3 %v4205_v21  ;;  %v4175_v43 = vmul.f32 %v11043_v59, %v4037_v61  ;;  %v8900_v33 = vpop.eup %5924  ;;  %11044 = vst [vmem:[#allocation122_spill] sm:$0xff] %v8902_v46  ;;  %v3064_v6 = vmul.f32 1.442695, %v2650_v18  ;;  %v3922_v37 = vsub.f32 2.0, %v3794_v17  ;;  %5936 = vrcp.f32 %v3325_v1  ;;  %v8912_v21 = vpop.f32.mrf.mxu3  ;;  %v11049_v46 = vld [vmem:[#allocation109_spill] sm:$0xff] }
 0x3ce   : > { %v3410_v55 = vadd.f32 %v8874_v49, %v8868_v12  ;;  %v8906_v53 = vpop.eup %5926  ;;  %v3066_v32 = vmul.f32 1.442695, %v2651_v0  ;;  %v3908_v2 = vsub.f32 2.0, %v3780_v5  ;;  %4418 = vmatpush.xpose.msra.mxu0 %v4174_v25  ;;  %v3407_v48 = vadd.f32 %v8883_v14, %v8878_v22  ;;  %11045 = vst [vmem:[#allocation180_spill] sm:$0xff] %v8912_v21  ;;  %v11048_v5 = vld [vmem:[#allocation133_spill] sm:$0xff] }
 0x3cf   : > { %4459 = vmatpush.xpose.msra.mxu1 %v4175_v43  ;;  %v4051_v61 = vmul.f32 %v5919_v47, %v3923_v28  ;;  %v8910_v57 = vpop.eup %5928  ;;  %5938 = vpow2.f32 %v2876_v15  ;;  %3366 = vadd.xlane.f32.xlu0 %v3365_v58  ;;  %v4050_v18 = vmul.f32 %v5921_v52, %v3922_v37  ;;  %v11050_v58 = vld [vmem:[#allocation44_spill] sm:$0xff] }
 0x3d0   : > { %3411 = vadd.xlane.f32.xlu1 %v3410_v55  ;;  %v8914_v17 = vpop.eup %5930  ;;  %5940 = vpow2.f32 %v2878_v10  ;;  %3408 = vadd.xlane.f32.xlu2 %v3407_v48  ;;  %v4036_v0 = vmul.f32 %v5923_v23, %v3908_v2  ;;  %v3322_v15 = vpop.xlane.xlu1 %3321  ;;  %v11051_v2 = vld [vmem:[#allocation39_spill] sm:$0xff] }
 0x3d1   : > { %11046 = vst [vmem:[#allocation18_spill] sm:$0xff] %v8914_v17  ;;  %v4202_v25 = vmul.f32 %v11047_v27, %v4051_v61  ;;  %v4203_v59 = vmul.f32 %v11048_v5, %v4051_v61  ;;  %v5933_v43 = vpop.eup %5932  ;;  %5942 = vpow2.f32 %v3064_v6  ;;  %v3277_v52 = vpop.xlane.xlu0 %3276  ;;  %v4200_v48 = vmul.f32 %v11051_v2, %v4050_v18 }
 0x3d2   : > { %v5935_v47 = vpop.eup %5934  ;;  %5944 = vpow2.f32 %v3066_v32  ;;  %v3779_v28 = vmul.f32 %v5933_v43, %v3283_v26  ;;  %v4172_v21 = vmul.f32 %v11049_v46, %v4036_v0  ;;  %v4173_v55 = vmul.f32 %v11050_v58, %v4036_v0  ;;  %v11052_v26 = vld [vmem:[#allocation218_spill] sm:$0xff] }
 0x3d3   : > { %4502 = vmatpush.xpose.msra.mxu2 %v4202_v25  ;;  %4543 = vmatpush.xpose.msra.mxu3 %v4203_v59  ;;  %v5937_v10 = vpop.eup %5936  ;;  %v3778_v37 = vmul.f32 %v5935_v47, %v3280_v7  ;;  %5946 = vrcp.f32 %v3322_v15  ;;  %v3319_v23 = vpop.xlane.xlu2 %3318  ;;  %v4201_v6 = vmul.f32 %v11052_v26, %v4050_v18  ;;  %v3404_v0 = vadd.f32 %v8914_v17, %v8910_v57  ;;  %v11063_v17 = vld [vmem:[#allocation220_spill] sm:$0xff] }
 0x3d4   : > { %v3907_v61 = vsub.f32 2.0, %v3779_v28  ;;  %v3793_v27 = vmul.f32 %v5937_v10, %v3325_v1  ;;  %5948 = vrcp.f32 %v3319_v23  ;;  %4419 = vmatpush.xpose.msra.mxu0 %v4172_v21  ;;  %4460 = vmatpush.xpose.msra.mxu1 %v4173_v55  ;;  %v3362_v7 = vadd.f32 %v8906_v53, %v8900_v33  ;;  %v8934_v59 = vpop.f32.mrf.mxu2 }
 0x3d5   : > { %v8922_v32 = vpop.eup %5938  ;;  %v3906_v46 = vsub.f32 2.0, %v3778_v37  ;;  %5950 = vrcp.f32 %v3277_v52  ;;  %v3359_v1 = vadd.f32 %v8636_v51, %v8630_v9 }
 0x3d6   : > { %11053 = vst [vmem:[#allocation187_spill] sm:$0xff] %v8922_v32  ;;  %v8928_v25 = vpop.eup %5940  ;;  %v3921_v5 = vsub.f32 2.0, %v3793_v27  ;;  %v4035_v21 = vmul.f32 %v5933_v43, %v3907_v61  ;;  %v8940_v27 = vpop.f32.mrf.mxu3 }
 0x3d7   : > { %11054 = vst [vmem:[#allocation38_spill] sm:$0xff] %v8928_v25  ;;  %4503 = vmatpush.xpose.msra.mxu2 %v4200_v48  ;;  %4544 = vmatpush.xpose.msra.mxu3 %v4201_v6  ;;  %v8932_v18 = vpop.eup %5942  ;;  %v4034_v28 = vmul.f32 %v5935_v47, %v3906_v46  ;;  %v11056_v6 = vld [vmem:[#allocation32_spill] sm:$0xff]  ;;  %v11057_v46 = vld [vmem:[#allocation130_spill] sm:$0xff] }
 0x3d8   : > { %3405 = vadd.xlane.f32.xlu0 %v3404_v0  ;;  %3363 = vadd.xlane.f32.xlu1 %v3362_v7  ;;  %v8936_v58 = vpop.eup %5944  ;;  %v4049_v55 = vmul.f32 %v5937_v10, %v3921_v5  ;;  %v4170_v37 = vmul.f32 %v8316_v38, %v4035_v21  ;;  %v4171_v2 = vmul.f32 %v8322_v56, %v4035_v21  ;;  %v3274_v61 = vpop.xlane.xlu1 %3273  ;;  %v11058_v38 = vld [vmem:[#allocation102_spill] sm:$0xff] }
 0x3d9   : > { %11055 = vst [vmem:[#allocation181_spill] sm:$0xff] %v8936_v58  ;;  %3360 = vadd.xlane.f32.xlu2 %v3359_v1  ;;  %v5947_v48 = vpop.eup %5946  ;;  %v3316_v7 = vpop.xlane.xlu0 %3315  ;;  %5952 = vrcp.f32 %v3274_v61  ;;  %v4168_v1 = vmul.f32 %v11058_v38, %v4034_v28 }
 0x3da   : > { %v5949_v26 = vpop.eup %5948  ;;  %v3792_v43 = vmul.f32 %v5947_v48, %v3322_v15  ;;  %4420 = vmatpush.xpose.msra.mxu0 %v4170_v37  ;;  %4461 = vmatpush.xpose.msra.mxu1 %v4171_v2  ;;  %v4198_v47 = vmul.f32 %v11056_v6, %v4049_v55  ;;  %v4199_v0 = vmul.f32 %v11057_v46, %v4049_v55  ;;  %v11059_v15 = vld [vmem:[#allocation36_spill] sm:$0xff] }
 0x3db   : > { %v5951_v51 = vpop.eup %5950  ;;  %v3791_v10 = vmul.f32 %v5949_v26, %v3319_v23  ;;  %v3271_v5 = vpop.xlane.xlu2 %3270  ;;  %v4169_v9 = vmul.f32 %v11059_v15, %v4034_v28  ;;  %v3356_v2 = vadd.f32 %v8928_v25, %v8922_v32  ;;  %v3497_v55 = vadd.f32 %v8936_v58, %v8932_v18 }
 0x3dc   : > { %v3920_v56 = vsub.f32 2.0, %v3792_v43  ;;  %v3777_v21 = vmul.f32 %v5951_v51, %v3277_v52  ;;  %5954 = vrcp.f32 %v3271_v5  ;;  %4504 = vmatpush.xpose.msra.mxu2 %v4198_v47  ;;  %4545 = vmatpush.xpose.msra.mxu3 %v4199_v0  ;;  %v11060_v43 = vld [vmem:[#allocation224_spill] sm:$0xff]  ;;  %v11061_v0 = vld [vmem:[#allocation225_spill] sm:$0xff]  ;;  %v8952_v38 = vpop.f32.mrf.mxu2 }
 0x3dd   : > { %v3919_v37 = vsub.f32 2.0, %v3791_v10  ;;  %5956 = vrcp.f32 %v3316_v7  ;;  %11062 = vst [vmem:[#allocation26_spill] sm:$0xff] %v8952_v38 }
 0x3de   : > { %v4048_v23 = vmul.f32 %v5947_v48, %v3920_v56  ;;  %v3905_v6 = vsub.f32 2.0, %v3777_v21  ;;  %4421 = vmatpush.xpose.msra.mxu0 %v4168_v1  ;;  %4462 = vmatpush.xpose.msra.mxu1 %v4169_v9  ;;  %v11064_v48 = vld [vmem:[#allocation221_spill] sm:$0xff]  ;;  %v8956_v1 = vpop.f32.mrf.mxu3 }
 0x3df   : > { %v4047_v46 = vmul.f32 %v5949_v26, %v3919_v37  ;;  %v5953_v10 = vpop.eup %5952  ;;  %11065 = vst [vmem:[#allocation41_spill] sm:$0xff] %v8956_v1  ;;  %v11066_v37 = vld [vmem:[#allocation223_spill] sm:$0xff] }
 0x3e0   : > { %3357 = vadd.xlane.f32.xlu0 %v3356_v2  ;;  %3498 = vadd.xlane.f32.xlu1 %v3497_v55  ;;  %v4033_v52 = vmul.f32 %v5951_v51, %v3905_v6  ;;  %v4196_v47 = vmul.f32 %v11060_v43, %v4048_v23  ;;  %v4197_v28 = vmul.f32 %v11061_v0, %v4048_v23  ;;  %v3313_v32 = vpop.xlane.xlu1 %3312 }
 0x3e1   : > { %v3776_v25 = vmul.f32 %v5953_v10, %v3274_v61  ;;  %v3268_v9 = vpop.xlane.xlu0 %3267  ;;  %5958 = vrcp.f32 %v3313_v32  ;;  %v4194_v2 = vmul.f32 %v11066_v37, %v4047_v46  ;;  %v11067_v61 = vld [vmem:[#allocation87_spill] sm:$0xff] }
 0x3e2   : > { %v5955_v15 = vpop.eup %5954  ;;  %v4166_v58 = vmul.f32 %v11063_v17, %v4033_v52  ;;  %v4167_v56 = vmul.f32 %v11064_v48, %v4033_v52  ;;  %4505 = vmatpush.xpose.msra.mxu2 %v4196_v47  ;;  %4546 = vmatpush.xpose.msra.mxu3 %v4197_v28  ;;  %v4195_v17 = vmul.f32 %v11067_v61, %v4047_v46 }
 0x3e3   : > { %v5957_v26 = vpop.eup %5956  ;;  %v3775_v51 = vmul.f32 %v5955_v15, %v3271_v5  ;;  %v3310_v21 = vpop.xlane.xlu2 %3309  ;;  %v3904_v55 = vsub.f32 2.0, %v3776_v25 }
 0x3e4   : > { %v3790_v23 = vmul.f32 %v5957_v26, %v3316_v7  ;;  %5960 = vrcp.f32 %v3310_v21  ;;  %4422 = vmatpush.xpose.msra.mxu0 %v4166_v58  ;;  %4463 = vmatpush.xpose.msra.mxu1 %v4167_v56 }
 0x3e5   : > { %v3903_v6 = vsub.f32 2.0, %v3775_v51  ;;  %5962 = vrcp.f32 %v3268_v9  ;;  %v4032_v52 = vmul.f32 %v5953_v10, %v3904_v55 }
 0x3e6   : > { %v3918_v43 = vsub.f32 2.0, %v3790_v23  ;;  %4506 = vmatpush.xpose.msra.mxu2 %v4194_v2  ;;  %4547 = vmatpush.xpose.msra.mxu3 %v4195_v17  ;;  %v8968_v55 = vpop.f32.mrf.mxu3 }
 0x3e7   : > { %v4031_v47 = vmul.f32 %v5955_v15, %v3903_v6  ;;  %v4164_v5 = vmul.f32 %v8400_v3, %v4032_v52  ;;  %v4165_v28 = vmul.f32 %v8406_v50, %v4032_v52  ;;  %v5959_v48 = vpop.eup %5958  ;;  %11069 = vst [vmem:[#allocation213_spill] sm:$0xff] %v8968_v55 }
 0x3e8   : > { %v4046_v0 = vmul.f32 %v5957_v26, %v3918_v43  ;;  %v3789_v7 = vmul.f32 %v5959_v48, %v3313_v32  ;;  %v3265_v37 = vpop.xlane.xlu1 %3264  ;;  %v8966_v32 = vpop.f32.mrf.mxu2 }
 0x3e9   : > { %4423 = vmatpush.xpose.msra.mxu0 %v4164_v5  ;;  %4464 = vmatpush.xpose.msra.mxu1 %v4165_v28  ;;  %v3451_v10 = vpop.xlane.xlu0 %3450  ;;  %5964 = vrcp.f32 %v3265_v37  ;;  %v4162_v26 = vmul.f32 %v8384_v24, %v4031_v47  ;;  %v4163_v50 = vmul.f32 %v8392_v44, %v4031_v47  ;;  %11068 = vst [vmem:[#allocation27_spill] sm:$0xff] %v8966_v32 }
 0x3ea   : > { %v5961_v25 = vpop.eup %5960  ;;  %v4192_v58 = vmul.f32 %v8410_v62, %v4046_v0  ;;  %v4193_v46 = vmul.f32 %v8416_v42, %v4046_v0  ;;  %v3917_v3 = vsub.f32 2.0, %v3789_v7 }
 0x3eb   : > { %v5963_v56 = vpop.eup %5962  ;;  %v3788_v51 = vmul.f32 %v5961_v25, %v3310_v21  ;;  %v3262_v15 = vpop.xlane.xlu2 %3261 }
 0x3ec   : > { %v3774_v2 = vmul.f32 %v5963_v56, %v3268_v9  ;;  %5966 = vrcp.f32 %v3262_v15  ;;  %4507 = vmatpush.xpose.msra.mxu2 %v4192_v58  ;;  %4548 = vmatpush.xpose.msra.mxu3 %v4193_v46  ;;  %v4045_v42 = vmul.f32 %v5959_v48, %v3917_v3  ;;  %v11071_v3 = vld [vmem:[#allocation230_spill] sm:$0xff] }
 0x3ed   : > { %v3916_v62 = vsub.f32 2.0, %v3788_v51  ;;  %5968 = vrcp.f32 %v3451_v10  ;;  %4424 = vmatpush.xpose.msra.mxu0 %v4162_v26  ;;  %4465 = vmatpush.xpose.msra.mxu1 %v4163_v50 }
 0x3ee   : > { %v3902_v23 = vsub.f32 2.0, %v3774_v2  ;;  %v4190_v24 = vmul.f32 %v8448_v31, %v4045_v42  ;;  %v4191_v9 = vmul.f32 %v8454_v60, %v4045_v42  ;;  %v11070_v60 = vld [vmem:[#allocation95_spill] sm:$0xff] }
 0x3ef   : > { %v4044_v21 = vmul.f32 %v5961_v25, %v3916_v62  ;;  %v5965_v17 = vpop.eup %5964  ;;  %v11072_v62 = vld [vmem:[#allocation234_spill] sm:$0xff] }
 0x3f0   : > { %v4030_v61 = vmul.f32 %v5963_v56, %v3902_v23  ;;  %v3773_v52 = vmul.f32 %v5965_v17, %v3265_v37  ;;  %v3448_v44 = vpop.xlane.xlu1 %3447  ;;  %4508 = vmatpush.xpose.msra.mxu2 %v4190_v24  ;;  %4549 = vmatpush.xpose.msra.mxu3 %v4191_v9  ;;  %v8976_v46 = vpop.f32.mrf.mxu2  ;;  %v11073_v23 = vld [vmem:[#allocation235_spill] sm:$0xff] }
 0x3f1   : > { %v3403_v0 = vpop.xlane.xlu0 %3402  ;;  %5970 = vrcp.f32 %v3448_v44  ;;  %v4188_v25 = vmul.f32 %v8440_v29, %v4044_v21  ;;  %v4189_v37 = vmul.f32 %v11070_v60, %v4044_v21  ;;  %v8978_v56 = vpop.f32.mrf.mxu3 }
 0x3f2   : > { %v5967_v6 = vpop.eup %5966  ;;  %v4160_v43 = vmul.f32 %v8434_v35, %v4030_v61  ;;  %v4161_v47 = vmul.f32 %v8438_v41, %v4030_v61  ;;  %v3901_v31 = vsub.f32 2.0, %v3773_v52 }
 0x3f3   : > { %v5969_v5 = vpop.eup %5968  ;;  %v3772_v28 = vmul.f32 %v5967_v6, %v3262_v15  ;;  %v3445_v48 = vpop.xlane.xlu2 %3444 }
 0x3f4   : > { %v3835_v7 = vmul.f32 %v5969_v5, %v3451_v10  ;;  %5972 = vrcp.f32 %v3445_v48  ;;  %4425 = vmatpush.xpose.msra.mxu0 %v4160_v43  ;;  %4466 = vmatpush.xpose.msra.mxu1 %v4161_v47  ;;  %v4029_v35 = vmul.f32 %v5965_v17, %v3901_v31 }
 0x3f5   : > { %v3900_v58 = vsub.f32 2.0, %v3772_v28  ;;  %5974 = vrcp.f32 %v3403_v0  ;;  %4509 = vmatpush.xpose.msra.mxu2 %v4188_v25  ;;  %4550 = vmatpush.xpose.msra.mxu3 %v4189_v37  ;;  %v11076_v25 = vld [vmem:[#allocation232_spill] sm:$0xff] }
 0x3f6   : > { %v3963_v41 = vsub.f32 2.0, %v3835_v7  ;;  %v4158_v29 = vmul.f32 %v8482_v19, %v4029_v35  ;;  %v4159_v10 = vmul.f32 %v8486_v8, %v4029_v35  ;;  %v11074_v19 = vld [vmem:[#allocation22_spill] sm:$0xff]  ;;  %v11075_v8 = vld [vmem:[#allocation247_spill] sm:$0xff] }
 0x3f7   : > { %v4028_v51 = vmul.f32 %v5967_v6, %v3900_v58  ;;  %v5971_v26 = vpop.eup %5970 }
 0x3f8   : > { %v4091_v15 = vmul.f32 %v5969_v5, %v3963_v41  ;;  %v3834_v61 = vmul.f32 %v5971_v26, %v3448_v44  ;;  %v3400_v24 = vpop.xlane.xlu1 %3399  ;;  %4426 = vmatpush.xpose.msra.mxu0 %v4158_v29  ;;  %4467 = vmatpush.xpose.msra.mxu1 %v4159_v10  ;;  %v11077_v41 = vld [vmem:[#allocation241_spill] sm:$0xff]  ;;  %v11078_v29 = vld [vmem:[#allocation242_spill] sm:$0xff] }
 0x3f9   : > { %v4156_v2 = vmul.f32 %v11071_v3, %v4028_v51  ;;  %v2395_v9 = vpop.xlane.xlu0 %2394  ;;  %5976 = vrcp.f32 %v3400_v24  ;;  %v4157_v31 = vmul.f32 %v11076_v25, %v4028_v51  ;;  %v11079_v3 = vld [vmem:[#allocation243_spill] sm:$0xff]  ;;  %v8992_v51 = vpop.f32.mrf.mxu2 }
 0x3fa   : > { %v5973_v50 = vpop.eup %5972  ;;  %v4282_v42 = vmul.f32 %v11072_v62, %v4091_v15  ;;  %v4283_v21 = vmul.f32 %v11073_v23, %v4091_v15  ;;  %v2682_v43 = vsub.f32 %v11074_v19, %v2395_v9  ;;  %v2683_v47 = vsub.f32 %v11075_v8, %v2395_v9  ;;  %v11080_v62 = vld [vmem:[#allocation103_spill] sm:$0xff]  ;;  %11081 = vst [vmem:[#allocation151_spill] sm:$0xff] %v8992_v51  ;;  %v8994_v23 = vpop.f32.mrf.mxu3  ;;  %v11085_v8 = vld [vmem:[#allocation238_spill] sm:$0xff] }
 0x3fb   : > { %v5975_v17 = vpop.eup %5974  ;;  %v3833_v6 = vmul.f32 %v5973_v50, %v3445_v48  ;;  %v3442_v52 = vpop.xlane.xlu2 %3441  ;;  %v3962_v5 = vsub.f32 2.0, %v3834_v61  ;;  %11082 = vst [vmem:[#allocation209_spill] sm:$0xff] %v8994_v23  ;;  %v11084_v61 = vld [vmem:[#allocation239_spill] sm:$0xff] }
 0x3fc   : > { %v3819_v28 = vmul.f32 %v5975_v17, %v3403_v0  ;;  %5978 = vrcp.f32 %v3442_v52  ;;  %4658 = vmatpush.xpose.msrb.mxu2 %v4282_v42  ;;  %4699 = vmatpush.xpose.msrb.mxu3 %v4283_v21  ;;  %v3128_v7 = vmul.f32 1.442695, %v2682_v43  ;;  %v3130_v60 = vmul.f32 1.442695, %v2683_v47  ;;  %v11083_v21 = vld [vmem:[#allocation237_spill] sm:$0xff] }
 0x3fd   : > { %v3961_v44 = vsub.f32 2.0, %v3833_v6  ;;  %v4090_v37 = vmul.f32 %v5971_v26, %v3962_v5  ;;  %4427 = vmatpush.xpose.msra.mxu0 %v4156_v2  ;;  %4468 = vmatpush.xpose.msra.mxu1 %v4157_v31  ;;  %v2648_v42 = vsub.f32 %v11080_v62, %v11079_v3  ;;  %v11086_v5 = vld [vmem:[#allocation240_spill] sm:$0xff] }
 0x3fe   : > { %v3947_v58 = vsub.f32 2.0, %v3819_v28  ;;  %5980 = vpow2.f32 %v3128_v7  ;;  %v11087_v31 = vld [vmem:[#allocation244_spill] sm:$0xff]  ;;  %v11088_v7 = vld [vmem:[#allocation246_spill] sm:$0xff] }
 0x3ff   : > { %v4089_v48 = vmul.f32 %v5973_v50, %v3961_v44  ;;  %5982 = vpow2.f32 %v3130_v60  ;;  %v4280_v15 = vmul.f32 %v11077_v41, %v4090_v37  ;;  %v4281_v0 = vmul.f32 %v11078_v29, %v4090_v37  ;;  %v5977_v10 = vpop.eup %5976  ;;  %v11089_v37 = vld [vmem:[#allocation178_spill] sm:$0xff] }
 0x400   : > { %v4075_v35 = vmul.f32 %v5975_v17, %v3947_v58  ;;  %v3818_v9 = vmul.f32 %v5977_v10, %v3400_v24  ;;  %v3397_v17 = vpop.xlane.xlu1 %3396  ;;  %v2649_v58 = vsub.f32 %v11089_v37, %v11079_v3  ;;  %v3060_v29 = vmul.f32 1.442695, %v2648_v42  ;;  %v11094_v42 = vld [vmem:[#allocation249_spill] sm:$0xff] }
 0x401   : > { %4659 = vmatpush.xpose.msrb.mxu2 %v4280_v15  ;;  %4700 = vmatpush.xpose.msrb.mxu3 %v4281_v0  ;;  %v2392_v6 = vpop.xlane.xlu0 %2391  ;;  %5984 = vrcp.f32 %v3397_v17  ;;  %v4278_v44 = vmul.f32 %v11087_v31, %v4089_v48  ;;  %v4279_v60 = vmul.f32 %v11088_v7, %v4089_v48  ;;  %v11090_v48 = vld [vmem:[#allocation89_spill] sm:$0xff] }
 0x402   : > { %v5979_v26 = vpop.eup %5978  ;;  %v4250_v2 = vmul.f32 %v11083_v21, %v4075_v35  ;;  %v4251_v50 = vmul.f32 %v11084_v61, %v4075_v35  ;;  %v2680_v47 = vsub.f32 %v11085_v8, %v2392_v6  ;;  %v2681_v28 = vsub.f32 %v11086_v5, %v2392_v6 }
 0x403   : > { %v3832_v19 = vmul.f32 %v5979_v26, %v3442_v52  ;;  %v3439_v43 = vpop.xlane.xlu2 %3438  ;;  %v3946_v25 = vsub.f32 2.0, %v3818_v9  ;;  %v11093_v9 = vld [vmem:[#allocation23_spill] sm:$0xff]  ;;  %v3062_v8 = vmul.f32 1.442695, %v2649_v58  ;;  %v11097_v58 = vld [vmem:[#allocation229_spill] sm:$0xff] }
 0x404   : > { %5986 = vrcp.f32 %v3439_v43  ;;  %4576 = vmatpush.xpose.msrb.mxu0 %v4250_v2  ;;  %4617 = vmatpush.xpose.msrb.mxu1 %v4251_v50  ;;  %v9002_v24 = vpop.eup %5980  ;;  %v3124_v35 = vmul.f32 1.442695, %v2680_v47  ;;  %v3126_v41 = vmul.f32 1.442695, %v2681_v28  ;;  %v11091_v2 = vld [vmem:[#allocation98_spill] sm:$0xff]  ;;  %v11092_v50 = vld [vmem:[#allocation31_spill] sm:$0xff] }
 0x405   : > { %v3960_v52 = vsub.f32 2.0, %v3832_v19  ;;  %v9006_v15 = vpop.eup %5982  ;;  %v4074_v0 = vmul.f32 %v5977_v10, %v3946_v25  ;;  %4660 = vmatpush.xpose.msrb.mxu2 %v4278_v44  ;;  %4701 = vmatpush.xpose.msrb.mxu3 %v4279_v60  ;;  %v2646_v61 = vsub.f32 %v11091_v2, %v11090_v48  ;;  %v11095_v47 = vld [vmem:[#allocation251_spill] sm:$0xff] }
 0x406   : > { %5988 = vpow2.f32 %v3124_v35  ;;  %v3545_v21 = vadd.f32 %v9006_v15, %v9002_v24  ;;  %v11096_v28 = vld [vmem:[#allocation175_spill] sm:$0xff] }
 0x407   : > { %v4088_v62 = vmul.f32 %v5979_v26, %v3960_v52  ;;  %5990 = vpow2.f32 %v3126_v41  ;;  %v4248_v3 = vmul.f32 %v11092_v50, %v4074_v0  ;;  %v4249_v6 = vmul.f32 %v11093_v9, %v4074_v0  ;;  %v5985_v19 = vpop.eup %5984  ;;  %v11098_v35 = vld [vmem:[#allocation231_spill] sm:$0xff] }
 0x408   : > { %3546 = vadd.xlane.f32.xlu1 %v3545_v21  ;;  %v2647_v25 = vsub.f32 %v11096_v28, %v11090_v48  ;;  %5992 = vpow2.f32 %v3060_v29  ;;  %v3817_v31 = vmul.f32 %v5985_v19, %v3397_v17  ;;  %v3394_v44 = vpop.xlane.xlu1 %3393  ;;  %v3056_v0 = vmul.f32 1.442695, %v2646_v61  ;;  %v11100_v21 = vld [vmem:[#allocation173_spill] sm:$0xff]  ;;  %v9022_v48 = vpop.f32.mrf.mxu2  ;;  %v11102_v61 = vld [vmem:[#allocation174_spill] sm:$0xff] }
 0x409   : > { %v4276_v10 = vmul.f32 %v11094_v42, %v4088_v62  ;;  %v4277_v5 = vmul.f32 %v11095_v47, %v4088_v62  ;;  %4577 = vmatpush.xpose.msrb.mxu0 %v4248_v3  ;;  %4618 = vmatpush.xpose.msrb.mxu1 %v4249_v6  ;;  %v2389_v7 = vpop.xlane.xlu0 %2388  ;;  %5994 = vrcp.f32 %v3394_v44  ;;  %v11099_v62 = vld [vmem:[#allocation226_spill] sm:$0xff]  ;;  %v9024_v17 = vpop.f32.mrf.mxu3 }
 0x40a   : > { %v5987_v26 = vpop.eup %5986  ;;  %v2678_v52 = vsub.f32 %v11097_v58, %v2389_v7  ;;  %v2679_v41 = vsub.f32 %v11098_v35, %v2389_v7  ;;  %v2644_v2 = vsub.f32 %v11100_v21, %v11099_v62  ;;  %11101 = vst [vmem:[#allocation116_spill] sm:$0xff] %v9024_v17  ;;  %v3945_v29 = vsub.f32 2.0, %v3817_v31  ;;  %v11105_v58 = vld [vmem:[#allocation46_spill] sm:$0xff] }
 0x40b   : > { %v3831_v60 = vmul.f32 %v5987_v26, %v3439_v43  ;;  %v3436_v37 = vpop.xlane.xlu2 %3435  ;;  %4661 = vmatpush.xpose.msrb.mxu2 %v4276_v10  ;;  %4702 = vmatpush.xpose.msrb.mxu3 %v4277_v5  ;;  %v3058_v42 = vmul.f32 1.442695, %v2647_v25  ;;  %v2645_v10 = vsub.f32 %v11102_v61, %v11099_v62  ;;  %v2489_v5 = vmax.f32 %v9022_v48, %v9024_v17  ;;  %v11107_v62 = vld [vmem:[#allocation254_spill] sm:$0xff] }
 0x40c   : > { %5996 = vrcp.f32 %v3436_v37  ;;  %v9026_v50 = vpop.eup %5988  ;;  %v3120_v3 = vmul.f32 1.442695, %v2678_v52  ;;  %v3122_v9 = vmul.f32 1.442695, %v2679_v41  ;;  %v4073_v47 = vmul.f32 %v5985_v19, %v3945_v29  ;;  %v11106_v19 = vld [vmem:[#allocation252_spill] sm:$0xff] }
 0x40d   : > { %5998 = vpow2.f32 %v3062_v8  ;;  %v3959_v43 = vsub.f32 2.0, %v3831_v60  ;;  %v9028_v6 = vpop.eup %5990  ;;  %v11104_v8 = vld [vmem:[#allocation45_spill] sm:$0xff]  ;;  %v3052_v35 = vmul.f32 1.442695, %v2644_v2  ;;  %v3054_v29 = vmul.f32 1.442695, %v2645_v10 }
 0x40e   : > { %6000 = vpow2.f32 %v3120_v3  ;;  %v3542_v31 = vadd.f32 %v9028_v6, %v9026_v50  ;;  %v9036_v7 = vpop.eup %5992  ;;  %v4246_v60 = vmul.f32 %v11104_v8, %v4073_v47  ;;  %v4247_v52 = vmul.f32 %v11105_v58, %v4073_v47  ;;  %v11109_v2 = vld [vmem:[#allocation21_spill] sm:$0xff] }
 0x40f   : > { %v4087_v28 = vmul.f32 %v5987_v26, %v3959_v43  ;;  %11103 = vst [vmem:[#allocation66_spill] sm:$0xff] %v9036_v7  ;;  %6002 = vpow2.f32 %v3122_v9  ;;  %v5995_v25 = vpop.eup %5994 }
 0x410   : > { %6004 = vpow2.f32 %v3056_v0  ;;  %2490 = vmax.xlane.f32.xlu1 %v2489_v5  ;;  %3543 = vadd.xlane.f32.xlu2 %v3542_v31  ;;  %v3816_v43 = vmul.f32 %v5995_v25, %v3394_v44  ;;  %v3391_v3 = vpop.xlane.xlu1 %3390  ;;  %v11110_v31 = vld [vmem:[#allocation24_spill] sm:$0xff] }
 0x411   : > { %v4274_v41 = vmul.f32 %v11106_v19, %v4087_v28  ;;  %v4275_v26 = vmul.f32 %v11107_v62, %v4087_v28  ;;  %6006 = vpow2.f32 %v3058_v42  ;;  %4578 = vmatpush.xpose.msrb.mxu0 %v4246_v60  ;;  %4619 = vmatpush.xpose.msrb.mxu1 %v4247_v52  ;;  %v2386_v9 = vpop.xlane.xlu0 %2385 }
 0x412   : > { %v5997_v21 = vpop.eup %5996  ;;  %6008 = vrcp.f32 %v3391_v3  ;;  %v2676_v5 = vsub.f32 %v11109_v2, %v2386_v9  ;;  %v2677_v8 = vsub.f32 %v11110_v31, %v2386_v9  ;;  %v3944_v28 = vsub.f32 2.0, %v3816_v43  ;;  %v11115_v43 = vld [vmem:[#allocation35_spill] sm:$0xff]  ;;  %v11117_v2 = vld [vmem:[#allocation256_spill] sm:$0xff]  ;;  %v11118_v31 = vld [vmem:[#allocation257_spill] sm:$0xff] }
 0x413   : > { %v9042_v61 = vpop.eup %5998  ;;  %v3830_v47 = vmul.f32 %v5997_v21, %v3436_v37  ;;  %v3433_v0 = vpop.xlane.xlu2 %3432  ;;  %4662 = vmatpush.xpose.msrb.mxu2 %v4274_v41  ;;  %4703 = vmatpush.xpose.msrb.mxu3 %v4275_v26  ;;  %v2486_v41 = vmax.f32 %v8992_v51, %v8994_v23 }
 0x414   : > { %11108 = vst [vmem:[#allocation131_spill] sm:$0xff] %v9042_v61  ;;  %6010 = vrcp.f32 %v3433_v0  ;;  %v9046_v42 = vpop.eup %6000  ;;  %v3116_v10 = vmul.f32 1.442695, %v2676_v5  ;;  %v3118_v60 = vmul.f32 1.442695, %v2677_v8  ;;  %v4072_v37 = vmul.f32 %v5995_v25, %v3944_v28 }
 0x415   : > { %11111 = vst [vmem:[#allocation117_spill] sm:$0xff] %v9046_v42  ;;  %6012 = vpow2.f32 %v3052_v35  ;;  %v3958_v44 = vsub.f32 2.0, %v3830_v47  ;;  %v9048_v58 = vpop.eup %6002  ;;  %v3494_v52 = vadd.f32 %v9042_v61, %v9036_v7 }
 0x416   : > { %11112 = vst [vmem:[#allocation205_spill] sm:$0xff] %v9048_v58  ;;  %6014 = vpow2.f32 %v3054_v29  ;;  %v9052_v19 = vpop.eup %6004  ;;  %v3539_v35 = vadd.f32 %v9048_v58, %v9046_v42  ;;  %v4244_v9 = vmul.f32 %v11115_v43, %v4072_v37  ;;  %v11116_v29 = vld [vmem:[#allocation67_spill] sm:$0xff] }
 0x417   : > { %11113 = vst [vmem:[#allocation111_spill] sm:$0xff] %v9052_v19  ;;  %v4086_v62 = vmul.f32 %v5997_v21, %v3958_v44  ;;  %6016 = vpow2.f32 %v3116_v10  ;;  %v9058_v26 = vpop.eup %6006  ;;  %v4245_v25 = vmul.f32 %v11116_v29, %v4072_v37  ;;  %v11120_v37 = vld [vmem:[#allocation28_spill] sm:$0xff] }
 0x418   : > { %11114 = vst [vmem:[#allocation112_spill] sm:$0xff] %v9058_v26  ;;  %6018 = vpow2.f32 %v3118_v60  ;;  %v6009_v47 = vpop.eup %6008  ;;  %2487 = vmax.xlane.f32.xlu1 %v2486_v41  ;;  %3495 = vadd.xlane.f32.xlu2 %v3494_v52  ;;  %v3388_v44 = vpop.xlane.xlu1 %3387  ;;  %v11121_v52 = vld [vmem:[#allocation29_spill] sm:$0xff] }
 0x419   : > { %v4272_v5 = vmul.f32 %v11117_v2, %v4086_v62  ;;  %v4273_v8 = vmul.f32 %v11118_v31, %v4086_v62  ;;  %v3815_v21 = vmul.f32 %v6009_v47, %v3391_v3  ;;  %3540 = vadd.xlane.f32.xlu0 %v3539_v35  ;;  %4579 = vmatpush.xpose.msrb.mxu0 %v4244_v9  ;;  %v2383_v10 = vpop.xlane.xlu0 %2382  ;;  %6020 = vrcp.f32 %v3388_v44  ;;  %v11124_v35 = vld [vmem:[#allocation55_spill] sm:$0xff]  ;;  %v11125_v9 = vld [vmem:[#allocation132_spill] sm:$0xff] }
 0x41a   : > { %v6011_v28 = vpop.eup %6010  ;;  %4620 = vmatpush.xpose.msrb.mxu1 %v4245_v25  ;;  %v2674_v41 = vsub.f32 %v11120_v37, %v2383_v10  ;;  %v2675_v29 = vsub.f32 %v11121_v52, %v2383_v10  ;;  %v2670_v31 = vsub.f32 %v11125_v9, %v11124_v35  ;;  %v11127_v25 = vld [vmem:[#allocation127_spill] sm:$0xff]  ;;  %v3491_v10 = vadd.f32 %v9058_v26, %v9052_v19  ;;  %v11146_v19 = vld [vmem:[#allocation140_spill] sm:$0xff] }
 0x41b   : > { %v9064_v23 = vpop.eup %6012  ;;  %v3829_v60 = vmul.f32 %v6011_v28, %v3433_v0  ;;  %v3430_v43 = vpop.xlane.xlu2 %3429  ;;  %4663 = vmatpush.xpose.msrb.mxu2 %v4272_v5  ;;  %v3943_v62 = vsub.f32 2.0, %v3815_v21  ;;  %4704 = vmatpush.xpose.msrb.mxu3 %v4273_v8  ;;  %v2671_v5 = vsub.f32 %v11127_v25, %v11124_v35  ;;  %v11131_v35 = vld [vmem:[#allocation193_spill] sm:$0xff]  ;;  %v11133_v25 = vld [vmem:[#allocation170_spill] sm:$0xff] }
 0x41c   : > { %11119 = vst [vmem:[#allocation215_spill] sm:$0xff] %v9064_v23  ;;  %v9068_v2 = vpop.eup %6014  ;;  %6022 = vrcp.f32 %v3430_v43  ;;  %v3112_v0 = vmul.f32 1.442695, %v2674_v41  ;;  %v3114_v58 = vmul.f32 1.442695, %v2675_v29  ;;  %v11129_v29 = vld [vmem:[#allocation194_spill] sm:$0xff] }
 0x41d   : > { %11122 = vst [vmem:[#allocation217_spill] sm:$0xff] %v9068_v2  ;;  %v9070_v3 = vpop.eup %6016  ;;  %v3957_v51 = vsub.f32 2.0, %v3829_v60  ;;  %v4071_v37 = vmul.f32 %v6009_v47, %v3943_v62  ;;  %v3488_v8 = vadd.f32 %v9068_v2, %v9064_v23  ;;  %v11128_v60 = vld [vmem:[#allocation260_spill] sm:$0xff]  ;;  %v3104_v7 = vmul.f32 1.442695, %v2670_v31  ;;  %v11134_v31 = vld [vmem:[#allocation219_spill] sm:$0xff] }
 0x41e   : > { %11123 = vst [vmem:[#allocation201_spill] sm:$0xff] %v9070_v3  ;;  %v9074_v42 = vpop.eup %6018  ;;  %6024 = vpow2.f32 %v3112_v0  ;;  %v11130_v47 = vld [vmem:[#allocation60_spill] sm:$0xff]  ;;  %v11132_v0 = vld [vmem:[#allocation233_spill] sm:$0xff]  ;;  %v3106_v23 = vmul.f32 1.442695, %v2671_v5 }
 0x41f   : > { %11126 = vst [vmem:[#allocation104_spill] sm:$0xff] %v9074_v42  ;;  %v4085_v21 = vmul.f32 %v6011_v28, %v3957_v51  ;;  %v3536_v52 = vadd.f32 %v9074_v42, %v9070_v3  ;;  %6026 = vpow2.f32 %v3114_v58  ;;  %v4242_v41 = vmul.f32 %v11128_v60, %v4071_v37  ;;  %v6021_v61 = vpop.eup %6020 }
 0x420   : > { %v4243_v9 = vmul.f32 %v11129_v29, %v4071_v37  ;;  %3489 = vadd.xlane.f32.xlu1 %v3488_v8  ;;  %3492 = vadd.xlane.f32.xlu2 %v3491_v10  ;;  %v2642_v2 = vsub.f32 %v11133_v25, %v11132_v0  ;;  %v3814_v26 = vmul.f32 %v6021_v61, %v3388_v44  ;;  %v3385_v58 = vpop.xlane.xlu1 %3384  ;;  %v11135_v8 = vld [vmem:[#allocation125_spill] sm:$0xff] }
 0x421   : > { %v4270_v62 = vmul.f32 %v11130_v47, %v4085_v21  ;;  %v4271_v51 = vmul.f32 %v11131_v35, %v4085_v21  ;;  %3537 = vadd.xlane.f32.xlu0 %v3536_v52  ;;  %4580 = vmatpush.xpose.msrb.mxu0 %v4242_v41  ;;  %v2380_v60 = vpop.xlane.xlu0 %2379  ;;  %6028 = vrcp.f32 %v3385_v58  ;;  %v11136_v21 = vld [vmem:[#allocation20_spill] sm:$0xff] }
 0x422   : > { %v6023_v28 = vpop.eup %6022  ;;  %4621 = vmatpush.xpose.msrb.mxu1 %v4243_v9  ;;  %v2672_v10 = vsub.f32 %v11134_v31, %v2380_v60  ;;  %v2673_v29 = vsub.f32 %v11135_v8, %v2380_v60  ;;  %v11137_v47 = vld [vmem:[#allocation120_spill] sm:$0xff]  ;;  %v3942_v3 = vsub.f32 2.0, %v3814_v26  ;;  %v11140_v9 = vld [vmem:[#allocation171_spill] sm:$0xff]  ;;  %v3048_v25 = vmul.f32 1.442695, %v2642_v2  ;;  %v11148_v2 = vld [vmem:[#allocation190_spill] sm:$0xff] }
 0x423   : > { %v3828_v42 = vmul.f32 %v6023_v28, %v3430_v43  ;;  %v3427_v37 = vpop.xlane.xlu2 %3426  ;;  %4664 = vmatpush.xpose.msrb.mxu2 %v4270_v62  ;;  %v2438_v35 = vmax.f32 %v11137_v47, %v11136_v21  ;;  %4705 = vmatpush.xpose.msrb.mxu3 %v4271_v51  ;;  %v2643_v62 = vsub.f32 %v11140_v9, %v11132_v0  ;;  %v11141_v31 = vld [vmem:[#allocation228_spill] sm:$0xff]  ;;  %v11142_v8 = vld [vmem:[#allocation227_spill] sm:$0xff] }
 0x424   : > { %6030 = vrcp.f32 %v3427_v37  ;;  %v9094_v44 = vpop.eup %6024  ;;  %v3108_v52 = vmul.f32 1.442695, %v2672_v10  ;;  %v3110_v43 = vmul.f32 1.442695, %v2673_v29  ;;  %v4070_v60 = vmul.f32 %v6021_v61, %v3942_v3  ;;  %v11145_v29 = vld [vmem:[#allocation51_spill] sm:$0xff] }
 0x425   : > { %11138 = vst [vmem:[#allocation107_spill] sm:$0xff] %v9094_v44  ;;  %6032 = vpow2.f32 %v3104_v7  ;;  %v3956_v5 = vsub.f32 2.0, %v3828_v42  ;;  %v9096_v41 = vpop.eup %6026  ;;  %v2441_v21 = vmax.f32 %v11142_v8, %v11141_v31  ;;  %v11143_v7 = vld [vmem:[#allocation94_spill] sm:$0xff]  ;;  %v11144_v42 = vld [vmem:[#allocation81_spill] sm:$0xff]  ;;  %v3050_v9 = vmul.f32 1.442695, %v2643_v62 }
 0x426   : > { %11139 = vst [vmem:[#allocation145_spill] sm:$0xff] %v9096_v41  ;;  %6034 = vpow2.f32 %v3106_v23  ;;  %v3533_v51 = vadd.f32 %v9096_v41, %v9094_v44  ;;  %v2640_v10 = vsub.f32 %v11144_v42, %v11143_v7  ;;  %v4240_v47 = vmul.f32 %v11145_v29, %v4070_v60  ;;  %v11147_v23 = vld [vmem:[#allocation168_spill] sm:$0xff] }
 0x427   : > { %v4084_v26 = vmul.f32 %v6023_v28, %v3956_v5  ;;  %6036 = vpow2.f32 %v3108_v52  ;;  %v4241_v17 = vmul.f32 %v11146_v19, %v4070_v60  ;;  %v6029_v0 = vpop.eup %6028  ;;  %v2641_v61 = vsub.f32 %v11147_v23, %v11143_v7  ;;  %v11149_v28 = vld [vmem:[#allocation56_spill] sm:$0xff] }
 0x428   : > { %6038 = vpow2.f32 %v3110_v43  ;;  %2439 = vmax.xlane.f32.xlu1 %v2438_v35  ;;  %2442 = vmax.xlane.f32.xlu2 %v2441_v21  ;;  %v11150_v41 = vld [vmem:[#allocation88_spill] sm:$0xff]  ;;  %v3813_v44 = vmul.f32 %v6029_v0, %v3385_v58  ;;  %v3382_v29 = vpop.xlane.xlu1 %3381 }
 0x429   : > { %v4268_v3 = vmul.f32 %v11148_v2, %v4084_v26  ;;  %v4269_v5 = vmul.f32 %v11149_v28, %v4084_v26  ;;  %6040 = vpow2.f32 %v3048_v25  ;;  %v11151_v42 = vld [vmem:[#allocation76_spill] sm:$0xff]  ;;  %3534 = vadd.xlane.f32.xlu0 %v3533_v51  ;;  %4581 = vmatpush.xpose.msrb.mxu0 %v4240_v47  ;;  %v3424_v19 = vpop.xlane.xlu0 %3423  ;;  %v3044_v26 = vmul.f32 1.442695, %v2640_v10 }
 0x42a   : > { %v6031_v52 = vpop.eup %6030  ;;  %v2638_v43 = vsub.f32 %v11151_v42, %v11150_v41  ;;  %6042 = vrcp.f32 %v3382_v29  ;;  %4622 = vmatpush.xpose.msrb.mxu1 %v4241_v17  ;;  %v3941_v25 = vsub.f32 2.0, %v3813_v44  ;;  %v3046_v58 = vmul.f32 1.442695, %v2641_v61  ;;  %v11158_v42 = vld [vmem:[#allocation65_spill] sm:$0xff] }
 0x42b   : > { %v9114_v60 = vpop.eup %6032  ;;  %v3827_v7 = vmul.f32 %v6031_v52, %v3427_v37  ;;  %v3379_v21 = vpop.xlane.xlu2 %3378  ;;  %4665 = vmatpush.xpose.msrb.mxu2 %v4268_v3  ;;  %4706 = vmatpush.xpose.msrb.mxu3 %v4269_v5  ;;  %v11156_v37 = vld [vmem:[#allocation165_spill] sm:$0xff]  ;;  %v2483_v61 = vmax.f32 %v8976_v46, %v8978_v56  ;;  %v11157_v5 = vld [vmem:[#allocation207_spill] sm:$0xff] }
 0x42c   : > { %11152 = vst [vmem:[#allocation57_spill] sm:$0xff] %v9114_v60  ;;  %v9116_v35 = vpop.eup %6034  ;;  %6044 = vrcp.f32 %v3379_v21  ;;  %v2639_v23 = vsub.f32 %v11156_v37, %v11150_v41  ;;  %v3040_v2 = vmul.f32 1.442695, %v2638_v43  ;;  %v4069_v17 = vmul.f32 %v6029_v0, %v3941_v25  ;;  %v11159_v0 = vld [vmem:[#allocation202_spill] sm:$0xff]  ;;  %v11160_v43 = vld [vmem:[#allocation203_spill] sm:$0xff] }
 0x42d   : > { %11153 = vst [vmem:[#allocation214_spill] sm:$0xff] %v9116_v35  ;;  %v9118_v62 = vpop.eup %6036  ;;  %v3955_v51 = vsub.f32 2.0, %v3827_v7  ;;  %6046 = vrcp.f32 %v3424_v19  ;;  %v3527_v10 = vadd.f32 %v9116_v35, %v9114_v60  ;;  %v11161_v35 = vld [vmem:[#allocation63_spill] sm:$0xff] }
 0x42e   : > { %11154 = vst [vmem:[#allocation148_spill] sm:$0xff] %v9118_v62  ;;  %v9120_v47 = vpop.eup %6038  ;;  %6048 = vpow2.f32 %v3050_v9  ;;  %v4238_v9 = vmul.f32 %v11157_v5, %v4069_v17  ;;  %v4239_v7 = vmul.f32 %v11158_v42, %v4069_v17  ;;  %v3042_v37 = vmul.f32 1.442695, %v2639_v23 }
 0x42f   : > { %11155 = vst [vmem:[#allocation19_spill] sm:$0xff] %v9120_v47  ;;  %v4083_v3 = vmul.f32 %v6031_v52, %v3955_v51  ;;  %v3530_v44 = vadd.f32 %v9120_v47, %v9118_v62  ;;  %v9128_v28 = vpop.eup %6040  ;;  %6050 = vpow2.f32 %v3044_v26  ;;  %v11162_v26 = vld [vmem:[#allocation136_spill] sm:$0xff]  ;;  %v2477_v23 = vmax.f32 %v8952_v38, %v8956_v1  ;;  %v11172_v38 = vld [vmem:[#allocation79_spill] sm:$0xff] }
 0x430   : > { %v6043_v41 = vpop.eup %6042  ;;  %6052 = vpow2.f32 %v3046_v58  ;;  %3528 = vadd.xlane.f32.xlu1 %v3527_v10  ;;  %v2668_v60 = vsub.f32 %v11162_v26, %v11161_v35  ;;  %4582 = vmatpush.xpose.msrb.mxu0 %v4238_v9  ;;  %v11169_v26 = vld [vmem:[#allocation204_spill] sm:$0xff] }
 0x431   : > { %3531 = vadd.xlane.f32.xlu2 %v3530_v44  ;;  %v4266_v52 = vmul.f32 %v11159_v0, %v4083_v3  ;;  %v4267_v25 = vmul.f32 %v11160_v43, %v4083_v3  ;;  %6054 = vpow2.f32 %v3040_v2  ;;  %v3812_v47 = vmul.f32 %v6043_v41, %v3382_v29  ;;  %2484 = vmax.xlane.f32.xlu0 %v2483_v61  ;;  %v11164_v29 = vld [vmem:[#allocation71_spill] sm:$0xff] }
 0x432   : > { %v6045_v51 = vpop.eup %6044  ;;  %v3421_v62 = vpop.xlane.xlu1 %3420  ;;  %4623 = vmatpush.xpose.msrb.mxu1 %v4239_v7  ;;  %v2669_v2 = vsub.f32 %v11164_v29, %v11161_v35  ;;  %v11168_v43 = vld [vmem:[#allocation83_spill] sm:$0xff]  ;;  %v11171_v29 = vld [vmem:[#allocation142_spill] sm:$0xff] }
 0x433   : > { %v3376_v5 = vpop.xlane.xlu0 %3375  ;;  %v6047_v17 = vpop.eup %6046  ;;  %v3811_v42 = vmul.f32 %v6045_v51, %v3379_v21  ;;  %6056 = vrcp.f32 %v3421_v62  ;;  %4666 = vmatpush.xpose.msrb.mxu2 %v4266_v52  ;;  %v3940_v3 = vsub.f32 2.0, %v3812_v47  ;;  %4707 = vmatpush.xpose.msrb.mxu3 %v4267_v25  ;;  %v3100_v21 = vmul.f32 1.442695, %v2668_v60  ;;  %v11167_v47 = vld [vmem:[#allocation253_spill] sm:$0xff] }
 0x434   : > { %v3418_v58 = vpop.xlane.xlu2 %3417  ;;  %v9138_v10 = vpop.eup %6048  ;;  %v3826_v44 = vmul.f32 %v6047_v17, %v3424_v19  ;;  %v2480_v19 = vmax.f32 %v8966_v32, %v8968_v55  ;;  %v2664_v25 = vsub.f32 %v11168_v43, %v11167_v47  ;;  %v2665_v1 = vsub.f32 %v11169_v26, %v11167_v47 }
 0x435   : > { %11163 = vst [vmem:[#allocation58_spill] sm:$0xff] %v9138_v10  ;;  %6058 = vrcp.f32 %v3418_v58  ;;  %v3939_v61 = vsub.f32 2.0, %v3811_v42  ;;  %v9144_v9 = vpop.eup %6050  ;;  %v4068_v7 = vmul.f32 %v6043_v41, %v3940_v3  ;;  %v3485_v35 = vadd.f32 %v9138_v10, %v9128_v28 }
 0x436   : > { %6060 = vrcp.f32 %v3376_v5  ;;  %11165 = vst [vmem:[#allocation124_spill] sm:$0xff] %v9144_v9  ;;  %v3954_v0 = vsub.f32 2.0, %v3826_v44  ;;  %v9146_v52 = vpop.eup %6052  ;;  %v2666_v55 = vsub.f32 %v11172_v38, %v11171_v29  ;;  %v3102_v32 = vmul.f32 1.442695, %v2669_v2 }
 0x437   : > { %6062 = vpow2.f32 %v3042_v37  ;;  %11166 = vst [vmem:[#allocation84_spill] sm:$0xff] %v9146_v52  ;;  %v9156_v42 = vpop.eup %6054  ;;  %v4067_v37 = vmul.f32 %v6045_v51, %v3939_v61  ;;  %v4236_v41 = vmul.f32 %v8768_v40, %v4068_v7  ;;  %v4237_v3 = vmul.f32 %v8772_v16, %v4068_v7 }
 0x438   : > { %11170 = vst [vmem:[#allocation99_spill] sm:$0xff] %v9156_v42  ;;  %v4082_v60 = vmul.f32 %v6047_v17, %v3954_v0  ;;  %2478 = vmax.xlane.f32.xlu1 %v2477_v23  ;;  %6064 = vpow2.f32 %v3100_v21  ;;  %v11173_v17 = vld [vmem:[#allocation129_spill] sm:$0xff]  ;;  %v3092_v16 = vmul.f32 1.442695, %v2664_v25  ;;  %v3094_v7 = vmul.f32 1.442695, %v2665_v1 }
 0x439   : > { %v6057_v44 = vpop.eup %6056  ;;  %2481 = vmax.xlane.f32.xlu2 %v2480_v19  ;;  %3486 = vadd.xlane.f32.xlu0 %v3485_v35  ;;  %v11177_v25 = vld [vmem:[#allocation47_spill] sm:$0xff] }
 0x43a   : > { %v3825_v47 = vmul.f32 %v6057_v44, %v3421_v62  ;;  %v3373_v26 = vpop.xlane.xlu1 %3372  ;;  %4583 = vmatpush.xpose.msrb.mxu0 %v4236_v41  ;;  %v4264_v51 = vmul.f32 %v8778_v20, %v4082_v60  ;;  %v4265_v61 = vmul.f32 %v11173_v17, %v4082_v60  ;;  %4624 = vmatpush.xpose.msrb.mxu1 %v4237_v3  ;;  %v11175_v62 = vld [vmem:[#allocation134_spill] sm:$0xff]  ;;  %v11176_v20 = vld [vmem:[#allocation80_spill] sm:$0xff] }
 0x43b   : > { %v6059_v43 = vpop.eup %6058  ;;  %v3415_v40 = vpop.xlane.xlu0 %3414  ;;  %6066 = vrcp.f32 %v3373_v26  ;;  %v4234_v19 = vmul.f32 %v11175_v62, %v4067_v37  ;;  %v2667_v35 = vsub.f32 %v11176_v20, %v11171_v29  ;;  %v4235_v1 = vmul.f32 %v11177_v25, %v4067_v37  ;;  %v11178_v17 = vld [vmem:[#allocation222_spill] sm:$0xff] }
 0x43c   : > { %v6061_v0 = vpop.eup %6060  ;;  %v3824_v10 = vmul.f32 %v6059_v43, %v3418_v58  ;;  %v3370_v38 = vpop.xlane.xlu2 %3369  ;;  %v3953_v2 = vsub.f32 2.0, %v3825_v47  ;;  %4667 = vmatpush.xpose.msrb.mxu2 %v4264_v51  ;;  %4708 = vmatpush.xpose.msrb.mxu3 %v4265_v61  ;;  %v3096_v58 = vmul.f32 1.442695, %v2666_v55  ;;  %v11179_v47 = vld [vmem:[#allocation97_spill] sm:$0xff]  ;;  %v3482_v29 = vadd.f32 %v9146_v52, %v9144_v9  ;;  %v11189_v52 = vld [vmem:[#allocation211_spill] sm:$0xff] }
 0x43d   : > { %v9164_v23 = vpop.eup %6062  ;;  %v3810_v21 = vmul.f32 %v6061_v0, %v3376_v5  ;;  %6068 = vrcp.f32 %v3370_v38  ;;  %v2435_v5 = vmax.f32 %v11179_v47, %v11178_v17 }
 0x43e   : > { %11174 = vst [vmem:[#allocation100_spill] sm:$0xff] %v9164_v23  ;;  %v3952_v60 = vsub.f32 2.0, %v3824_v10  ;;  %6070 = vrcp.f32 %v3415_v40  ;;  %v4081_v41 = vmul.f32 %v6057_v44, %v3953_v2  ;;  %4584 = vmatpush.xpose.msrb.mxu0 %v4234_v19  ;;  %4625 = vmatpush.xpose.msrb.mxu1 %v4235_v1  ;;  %v3479_v51 = vadd.f32 %v9164_v23, %v9156_v42  ;;  %v9176_v10 = vpop.eup %6064  ;;  %v11180_v2 = vld [vmem:[#allocation25_spill] sm:$0xff] }
 0x43f   : > { %6072 = vpow2.f32 %v3102_v32  ;;  %v3938_v3 = vsub.f32 2.0, %v3810_v21  ;;  %v11181_v21 = vld [vmem:[#allocation69_spill] sm:$0xff] }
 0x440   : > { %6074 = vpow2.f32 %v3092_v16  ;;  %v4080_v61 = vmul.f32 %v6059_v43, %v3952_v60  ;;  %v4262_v32 = vmul.f32 %v8804_v30, %v4081_v41  ;;  %v4263_v55 = vmul.f32 %v8808_v63, %v4081_v41  ;;  %3480 = vadd.xlane.f32.xlu1 %v3479_v51  ;;  %v11182_v43 = vld [vmem:[#allocation259_spill] sm:$0xff]  ;;  %v11184_v41 = vld [vmem:[#allocation49_spill] sm:$0xff] }
 0x441   : > { %v4066_v37 = vmul.f32 %v6061_v0, %v3938_v3  ;;  %v6067_v44 = vpop.eup %6066  ;;  %v2636_v62 = vsub.f32 %v11181_v21, %v11180_v2  ;;  %6076 = vpow2.f32 %v3094_v7  ;;  %v3098_v16 = vmul.f32 1.442695, %v2667_v35  ;;  %3483 = vadd.xlane.f32.xlu2 %v3482_v29  ;;  %2436 = vmax.xlane.f32.xlu0 %v2435_v5  ;;  %v11183_v60 = vld [vmem:[#allocation143_spill] sm:$0xff]  ;;  %v11186_v35 = vld [vmem:[#allocation106_spill] sm:$0xff]  ;;  %v11187_v51 = vld [vmem:[#allocation105_spill] sm:$0xff] }
 0x442   : > { %6078 = vpow2.f32 %v3096_v58  ;;  %v3809_v20 = vmul.f32 %v6067_v44, %v3373_v26  ;;  %4668 = vmatpush.xpose.msrb.mxu2 %v4262_v32  ;;  %v11185_v3 = vld [vmem:[#allocation43_spill] sm:$0xff]  ;;  %v2432_v29 = vmax.f32 %v11187_v51, %v11186_v35  ;;  %4709 = vmatpush.xpose.msrb.mxu3 %v4263_v55  ;;  %v499_v26 = vld [vmem:[%s9191_s18] sm:$0xff]  ;;  %v4261_v9 = vmul.f32 %v11189_v52, %v4080_v61 }
 0x443   : > { %v6069_v19 = vpop.eup %6068  ;;  %v3412_v25 = vpop.xlane.xlu1 %3411  ;;  %v4232_v0 = vmul.f32 %v11182_v43, %v4066_v37  ;;  %v4233_v30 = vmul.f32 %v11183_v60, %v4066_v37  ;;  %v2429_v7 = vmax.f32 %v11185_v3, %v11184_v41  ;;  %v500_v5 = vld [vmem:[%s9191_s18 + $0x8] sm:$0xff]  ;;  %v4260_v60 = vmul.f32 %v8812_v13, %v4080_v61  ;;  %4428 = vmatmul.f32.vlgmr.msra.gmra.mxu0 %v499_v26  ;;  %v11190_v13 = vld [vmem:[#allocation93_spill] sm:$0xff] }
 0x444   : > { %v9184_v63 = vpop.xlane.xlu0 %3366  ;;  %v6071_v1 = vpop.eup %6070  ;;  %v3808_v21 = vmul.f32 %v6069_v19, %v3370_v38  ;;  %6080 = vrcp.f32 %v3412_v25  ;;  %v3937_v32 = vsub.f32 2.0, %v3809_v20  ;;  %v11188_v38 = vld [vmem:[#allocation162_spill] sm:$0xff]  ;;  %4469 = vmatmul.f32.vlgmr.msra.gmra.mxu1 %v500_v5  ;;  %v3036_v35 = vmul.f32 1.442695, %v2636_v62  ;;  %4551 = vmatmul.f32.vlgmr.msra.gmra.mxu3 %v500_v5 }
 0x445   : > { %v3409_v58 = vpop.xlane.xlu2 %3408  ;;  %v9195_v37 = vpop.eup %6072  ;;  %v3823_v43 = vmul.f32 %v6071_v1, %v3415_v40  ;;  %4585 = vmatpush.xpose.msrb.mxu0 %v4232_v0  ;;  %4626 = vmatpush.xpose.msrb.mxu1 %v4233_v30  ;;  %v2637_v55 = vsub.f32 %v11188_v38, %v11180_v2  ;;  %v11191_v30 = vld [vmem:[#allocation160_spill] sm:$0xff]  ;;  %v11192_v2 = vld [vmem:[#allocation161_spill] sm:$0xff] }
 0x446   : > { %6082 = vrcp.f32 %v3409_v58  ;;  %v9198_v23 = vpop.eup %6074  ;;  %v3936_v42 = vsub.f32 2.0, %v3808_v21  ;;  %v4065_v40 = vmul.f32 %v6067_v44, %v3937_v32  ;;  %4669 = vmatpush.xpose.msrb.mxu2 %v4260_v60  ;;  %v2634_v51 = vsub.f32 %v11191_v30, %v11190_v13  ;;  %4710 = vmatpush.xpose.msrb.mxu3 %v4261_v9  ;;  %v11196_v30 = vld [vmem:[#allocation158_spill] sm:$0xff] }
 0x447   : > { %6084 = vrcp.f32 %v9184_v63  ;;  %v3951_v20 = vsub.f32 2.0, %v3823_v43  ;;  %v9204_v0 = vpop.eup %6076  ;;  %v2635_v21 = vsub.f32 %v11192_v2, %v11190_v13  ;;  %v3524_v52 = vadd.f32 %v9195_v37, %v9176_v10  ;;  %4510 = vmatmul.f32.vlgmr.msra.gmra.mxu2 %v499_v26 }
 0x448   : > { %6086 = vpow2.f32 %v3098_v16  ;;  %v9212_v61 = vpop.eup %6078  ;;  %v4064_v62 = vmul.f32 %v6069_v19, %v3936_v42  ;;  %v4230_v16 = vmul.f32 %v8834_v34, %v4065_v40  ;;  %v4231_v5 = vmul.f32 %v8838_v54, %v4065_v40  ;;  %2430 = vmax.xlane.f32.xlu1 %v2429_v7 }
 0x449   : > { %v4079_v44 = vmul.f32 %v6071_v1, %v3951_v20  ;;  %v3038_v43 = vmul.f32 1.442695, %v2637_v55  ;;  %2433 = vmax.xlane.f32.xlu2 %v2432_v29  ;;  %6088 = vpow2.f32 %v3036_v35  ;;  %3525 = vadd.xlane.f32.xlu0 %v3524_v52  ;;  %v3032_v1 = vmul.f32 1.442695, %v2634_v51  ;;  %v11193_v35 = vld [vmem:[#allocation96_spill] sm:$0xff]  ;;  %v11195_v51 = vld [vmem:[#allocation74_spill] sm:$0xff] }
 0x44a   : > { %v6081_v32 = vpop.eup %6080  ;;  %4586 = vmatpush.xpose.msrb.mxu0 %v4230_v16  ;;  %v3034_v34 = vmul.f32 1.442695, %v2635_v21  ;;  %4627 = vmatpush.xpose.msrb.mxu1 %v4231_v5  ;;  %v2633_v2 = vsub.f32 %v11196_v30, %v11193_v35 }
 0x44b   : > { %v3822_v38 = vmul.f32 %v6081_v32, %v3412_v25  ;;  %v3364_v9 = vpop.xlane.xlu1 %3363  ;;  %v4258_v26 = vmul.f32 %v8842_v11, %v4079_v44  ;;  %v4259_v13 = vmul.f32 %v8849_v4, %v4079_v44  ;;  %v4228_v11 = vmul.f32 %v8694_v36, %v4064_v62  ;;  %v11194_v4 = vld [vmem:[#allocation59_spill] sm:$0xff] }
 0x44c   : > { %v6083_v60 = vpop.eup %6082  ;;  %v3406_v42 = vpop.xlane.xlu0 %3405  ;;  %6090 = vrcp.f32 %v3364_v9  ;;  %v2632_v55 = vsub.f32 %v11194_v4, %v11193_v35  ;;  %v3518_v36 = vadd.f32 %v9204_v0, %v9198_v23 }
 0x44d   : > { %v6085_v19 = vpop.eup %6084  ;;  %v3821_v20 = vmul.f32 %v6083_v60, %v3409_v58  ;;  %v3361_v54 = vpop.xlane.xlu2 %3360  ;;  %v3950_v29 = vsub.f32 2.0, %v3822_v38  ;;  %4670 = vmatpush.xpose.msrb.mxu2 %v4258_v26  ;;  %4711 = vmatpush.xpose.msrb.mxu3 %v4259_v13  ;;  %v4229_v58 = vmul.f32 %v11195_v51, %v4064_v62 }
 0x44e   : > { %v9218_v7 = vpop.eup %6086  ;;  %v3807_v25 = vmul.f32 %v6085_v19, %v9184_v63  ;;  %6092 = vrcp.f32 %v3361_v54  ;;  %4587 = vmatpush.xpose.msrb.mxu0 %v4228_v11  ;;  %v2474_v63 = vmax.f32 %v8934_v59, %v8940_v27  ;;  %v3028_v26 = vmul.f32 1.442695, %v2632_v55  ;;  %v11197_v55 = vld [vmem:[#allocation250_spill] sm:$0xff] }
 0x44f   : > { %v3949_v40 = vsub.f32 2.0, %v3821_v20  ;;  %6094 = vrcp.f32 %v3406_v42  ;;  %v4078_v21 = vmul.f32 %v6081_v32, %v3950_v29  ;;  %4628 = vmatpush.xpose.msrb.mxu1 %v4229_v58  ;;  %v3521_v44 = vadd.f32 %v9218_v7, %v9212_v61  ;;  %v9233_v16 = vpop.eup %6088 }
 0x450   : > { %6096 = vpow2.f32 %v3038_v43  ;;  %v3935_v52 = vsub.f32 2.0, %v3807_v25  ;;  %3519 = vadd.xlane.f32.xlu1 %v3518_v36  ;;  %v11203_v36 = vld [vmem:[#allocation200_spill] sm:$0xff] }
 0x451   : > { %6098 = vpow2.f32 %v3032_v1  ;;  %v4077_v62 = vmul.f32 %v6083_v60, %v3949_v40  ;;  %v4256_v43 = vmul.f32 %v8868_v12, %v4078_v21  ;;  %v4257_v32 = vmul.f32 %v8874_v49, %v4078_v21  ;;  %3522 = vadd.xlane.f32.xlu2 %v3521_v44  ;;  %2475 = vmax.xlane.f32.xlu0 %v2474_v63 }
 0x452   : > { %v4063_v5 = vmul.f32 %v6085_v19, %v3935_v52  ;;  %v6091_v38 = vpop.eup %6090  ;;  %6100 = vpow2.f32 %v3034_v34  ;;  %v3030_v1 = vmul.f32 1.442695, %v2633_v2  ;;  %v11200_v2 = vld [vmem:[#allocation210_spill] sm:$0xff]  ;;  %v11201_v52 = vld [vmem:[#allocation180_spill] sm:$0xff]  ;;  %v2663_v44 = vsub.f32 %v11203_v36, %v11197_v55 }
 0x453   : > { %v3806_v20 = vmul.f32 %v6091_v38, %v3364_v9  ;;  %v3499_v29 = vpop.xlane.xlu1 %3498  ;;  %4671 = vmatpush.xpose.msrb.mxu2 %v4256_v43  ;;  %4712 = vmatpush.xpose.msrb.mxu3 %v4257_v32  ;;  %v4254_v9 = vmul.f32 %v8878_v22, %v4077_v62  ;;  %v11202_v22 = vld [vmem:[#allocation122_spill] sm:$0xff] }
 0x454   : > { %v6093_v13 = vpop.eup %6092  ;;  %v4226_v25 = vmul.f32 %v8618_v39, %v4063_v5  ;;  %v4227_v11 = vmul.f32 %v8622_v45, %v4063_v5  ;;  %v3358_v60 = vpop.xlane.xlu0 %3357  ;;  %6102 = vrcp.f32 %v3499_v29  ;;  %v4255_v45 = vmul.f32 %v8883_v14, %v4077_v62  ;;  %v11213_v36 = vld [vmem:[#allocation198_spill] sm:$0xff] }
 0x455   : > { %v6095_v19 = vpop.eup %6094  ;;  %v3805_v12 = vmul.f32 %v6093_v13, %v3361_v54  ;;  %v3934_v34 = vsub.f32 2.0, %v3806_v20  ;;  %6104 = vrcp.f32 %v3358_v60  ;;  %v11198_v54 = vld [vmem:[#allocation199_spill] sm:$0xff]  ;;  %v2471_v63 = vmax.f32 %v11202_v22, %v11201_v52 }
 0x456   : > { %v9239_v49 = vpop.eup %6096  ;;  %v3820_v35 = vmul.f32 %v6095_v19, %v3406_v42  ;;  %4588 = vmatpush.xpose.msrb.mxu0 %v4226_v25  ;;  %4629 = vmatpush.xpose.msrb.mxu1 %v4227_v11  ;;  %6106 = vpow2.f32 %v3028_v26  ;;  %v2662_v40 = vsub.f32 %v11198_v54, %v11197_v55  ;;  %v11199_v42 = vld [vmem:[#allocation75_spill] sm:$0xff]  ;;  %v11204_v11 = vld [vmem:[#allocation18_spill] sm:$0xff]  ;;  %v11210_v54 = vld [vmem:[#allocation73_spill] sm:$0xff] }
 0x457   : > { %v9242_v4 = vpop.eup %6098  ;;  %v3933_v39 = vsub.f32 2.0, %v3805_v12  ;;  %6108 = vpow2.f32 %v3030_v1  ;;  %v4062_v51 = vmul.f32 %v6091_v38, %v3934_v34  ;;  %4672 = vmatpush.xpose.msrb.mxu2 %v4254_v9  ;;  %v2468_v21 = vmax.f32 %v11200_v2, %v11199_v42  ;;  %4713 = vmatpush.xpose.msrb.mxu3 %v4255_v45  ;;  %v11209_v55 = vld [vmem:[#allocation255_spill] sm:$0xff] }
 0x458   : > { %v3948_v58 = vsub.f32 2.0, %v3820_v35  ;;  %v9247_v30 = vpop.eup %6100  ;;  %v3476_v14 = vadd.f32 %v9239_v49, %v9233_v16  ;;  %v3088_v1 = vmul.f32 1.442695, %v2662_v40  ;;  %v11211_v40 = vld [vmem:[#allocation197_spill] sm:$0xff] }
 0x459   : > { %v4061_v62 = vmul.f32 %v6093_v13, %v3933_v39  ;;  %v4224_v43 = vmul.f32 %v8900_v33, %v4062_v51  ;;  %v4225_v32 = vmul.f32 %v8906_v53, %v4062_v51  ;;  %2469 = vmax.xlane.f32.xlu1 %v2468_v21  ;;  %2472 = vmax.xlane.f32.xlu2 %v2471_v63  ;;  %v11205_v13 = vld [vmem:[#allocation77_spill] sm:$0xff]  ;;  %v3090_v33 = vmul.f32 1.442695, %v2663_v44  ;;  %v11208_v39 = vld [vmem:[#allocation196_spill] sm:$0xff]  ;;  %v11212_v21 = vld [vmem:[#allocation34_spill] sm:$0xff] }
 0x45a   : > { %v4076_v5 = vmul.f32 %v6095_v19, %v3948_v58  ;;  %v6103_v38 = vpop.eup %6102  ;;  %3477 = vadd.xlane.f32.xlu0 %v3476_v14  ;;  %v11206_v19 = vld [vmem:[#allocation195_spill] sm:$0xff]  ;;  %v2659_v45 = vsub.f32 %v11208_v39, %v11205_v13  ;;  %v2660_v51 = vsub.f32 %v11211_v40, %v11210_v54  ;;  %6110 = vpow2.f32 %v3088_v1 }
 0x45b   : > { %v6105_v26 = vpop.eup %6104  ;;  %v3851_v20 = vmul.f32 %v6103_v38, %v3499_v29  ;;  %4589 = vmatpush.xpose.msrb.mxu0 %v4224_v43  ;;  %v2658_v35 = vsub.f32 %v11206_v19, %v11205_v13  ;;  %4630 = vmatpush.xpose.msrb.mxu1 %v4225_v32  ;;  %v4223_v63 = vmul.f32 %v11212_v21, %v4061_v62  ;;  %6112 = vpow2.f32 %v3090_v33  ;;  %v11216_v13 = vld [vmem:[#allocation181_spill] sm:$0xff]  ;;  %v11217_v19 = vld [vmem:[#allocation187_spill] sm:$0xff] }
 0x45c   : > { %v4252_v25 = vmul.f32 %v8910_v57, %v4076_v5  ;;  %v4253_v12 = vmul.f32 %v11204_v11, %v4076_v5  ;;  %v9261_v34 = vpop.eup %6106  ;;  %v3804_v9 = vmul.f32 %v6105_v26, %v3358_v60  ;;  %v4222_v57 = vmul.f32 %v11209_v55, %v4061_v62 }
 0x45d   : > { %v9265_v53 = vpop.eup %6108  ;;  %v3979_v29 = vsub.f32 2.0, %v3851_v20  ;;  %v2661_v60 = vsub.f32 %v11213_v36, %v11210_v54  ;;  %v3473_v14 = vadd.f32 %v9247_v30, %v9242_v4  ;;  %v3080_v5 = vmul.f32 1.442695, %v2658_v35  ;;  %v11214_v20 = vld [vmem:[#allocation144_spill] sm:$0xff]  ;;  %v11218_v35 = vld [vmem:[#allocation38_spill] sm:$0xff] }
 0x45e   : > { %11207 = vst [vmem:[#allocation61_spill] sm:$0xff] %v9265_v53  ;;  %4673 = vmatpush.xpose.msrb.mxu2 %v4252_v25  ;;  %4714 = vmatpush.xpose.msrb.mxu3 %v4253_v12  ;;  %v3932_v58 = vsub.f32 2.0, %v3804_v9  ;;  %v3470_v32 = vadd.f32 %v9265_v53, %v9261_v34  ;;  %v11215_v25 = vld [vmem:[#allocation123_spill] sm:$0xff]  ;;  %v3082_v62 = vmul.f32 1.442695, %v2659_v45  ;;  %v11221_v45 = vld [vmem:[#allocation92_spill] sm:$0xff] }
 0x45f   : > { %v4107_v44 = vmul.f32 %v6103_v38, %v3979_v29  ;;  %4590 = vmatpush.xpose.msrb.mxu0 %v4222_v57  ;;  %4631 = vmatpush.xpose.msrb.mxu1 %v4223_v63  ;;  %v2426_v11 = vmax.f32 %v11215_v25, %v11214_v20  ;;  %v3084_v38 = vmul.f32 1.442695, %v2660_v51  ;;  %6114 = vpow2.f32 %v3080_v5  ;;  %v11222_v29 = vld [vmem:[#allocation54_spill] sm:$0xff]  ;;  %v11223_v57 = vld [vmem:[#allocation137_spill] sm:$0xff]  ;;  %v11224_v54 = vld [vmem:[#allocation212_spill] sm:$0xff] }
 0x460   : > { %v4060_v43 = vmul.f32 %v6105_v26, %v3932_v58  ;;  %v3086_v26 = vmul.f32 1.442695, %v2661_v60  ;;  %v9285_v39 = vpop.eup %6110  ;;  %6116 = vpow2.f32 %v3082_v62  ;;  %v2630_v55 = vsub.f32 %v11222_v29, %v11221_v45  ;;  %v11225_v51 = vld [vmem:[#allocation216_spill] sm:$0xff]  ;;  %v11227_v63 = vld [vmem:[#allocation157_spill] sm:$0xff] }
 0x461   : > { %v4314_v12 = vmul.f32 %v8932_v18, %v4107_v44  ;;  %v4315_v1 = vmul.f32 %v11216_v13, %v4107_v44  ;;  %3471 = vadd.xlane.f32.xlu1 %v3470_v32  ;;  %3474 = vadd.xlane.f32.xlu2 %v3473_v14  ;;  %11219 = vst [vmem:[#allocation62_spill] sm:$0xff] %v9285_v39  ;;  %v9287_v18 = vpop.eup %6112  ;;  %6118 = vpow2.f32 %v3084_v38  ;;  %v11226_v58 = vld [vmem:[#allocation128_spill] sm:$0xff]  ;;  %v11231_v32 = vld [vmem:[#allocation37_spill] sm:$0xff] }
 0x462   : > { %v4220_v9 = vmul.f32 %v11217_v19, %v4060_v43  ;;  %v4221_v33 = vmul.f32 %v11218_v35, %v4060_v43  ;;  %2427 = vmax.xlane.f32.xlu0 %v2426_v11  ;;  %11220 = vst [vmem:[#allocation52_spill] sm:$0xff] %v9287_v18  ;;  %6120 = vpow2.f32 %v3086_v26  ;;  %v2420_v40 = vmax.f32 %v11224_v54, %v11223_v57  ;;  %v11232_v11 = vld [vmem:[#allocation155_spill] sm:$0xff]  ;;  %v11235_v19 = vld [vmem:[#allocation101_spill] sm:$0xff] }
 0x463   : > { %v2423_v21 = vmax.f32 %v11226_v58, %v11225_v51  ;;  %v2631_v36 = vsub.f32 %v11227_v63, %v11221_v45  ;;  %v3515_v60 = vadd.f32 %v9287_v18, %v9285_v39  ;;  %v3024_v5 = vmul.f32 1.442695, %v2630_v55 }
 0x464   : > { %4591 = vmatpush.xpose.msrb.mxu0 %v4220_v9  ;;  %4632 = vmatpush.xpose.msrb.mxu1 %v4221_v33  ;;  %v2628_v62 = vsub.f32 %v11232_v11, %v11231_v32  ;;  %v11236_v9 = vld [vmem:[#allocation42_spill] sm:$0xff] }
 0x465   : > { %v9299_v44 = vpop.eup %6114  ;;  %v2626_v35 = vsub.f32 %v11236_v9, %v11235_v19  ;;  %6122 = vpow2.f32 %v3024_v5  ;;  %v11237_v33 = vld [vmem:[#allocation154_spill] sm:$0xff]  ;;  %v11245_v9 = vld [vmem:[#allocation208_spill] sm:$0xff] }
 0x466   : > { %11228 = vst [vmem:[#allocation53_spill] sm:$0xff] %v9299_v44  ;;  %v9301_v14 = vpop.eup %6116  ;;  %v2627_v26 = vsub.f32 %v11237_v33, %v11235_v19  ;;  %v3020_v45 = vmul.f32 1.442695, %v2628_v62  ;;  %v11242_v62 = vld [vmem:[#allocation245_spill] sm:$0xff]  ;;  %v11244_v19 = vld [vmem:[#allocation135_spill] sm:$0xff] }
 0x467   : > { %11229 = vst [vmem:[#allocation119_spill] sm:$0xff] %v9301_v14  ;;  %v9303_v43 = vpop.eup %6118  ;;  %v3509_v29 = vadd.f32 %v9301_v14, %v9299_v44  ;;  %v2459_v33 = vmax.f32 %v11245_v9, %v11244_v19 }
 0x468   : > { %4740 = vmatpush.xpose.msra.mxu0 %v4314_v12  ;;  %4781 = vmatpush.xpose.msra.mxu1 %v4315_v1  ;;  %11230 = vst [vmem:[#allocation114_spill] sm:$0xff] %v9303_v43  ;;  %v3026_v12 = vmul.f32 1.442695, %v2631_v36  ;;  %v9307_v13 = vpop.eup %6120  ;;  %v11234_v1 = vld [vmem:[#allocation156_spill] sm:$0xff] }
 0x469   : > { %2421 = vmax.xlane.f32.xlu1 %v2420_v40  ;;  %2424 = vmax.xlane.f32.xlu2 %v2423_v21  ;;  %11233 = vst [vmem:[#allocation182_spill] sm:$0xff] %v9307_v13  ;;  %v2629_v38 = vsub.f32 %v11234_v1, %v11231_v32  ;;  %v3512_v55 = vadd.f32 %v9307_v13, %v9303_v43  ;;  %v11238_v40 = vld [vmem:[#allocation121_spill] sm:$0xff]  ;;  %v11239_v21 = vld [vmem:[#allocation206_spill] sm:$0xff]  ;;  %v3018_v32 = vmul.f32 1.442695, %v2627_v26  ;;  %v11248_v26 = vld [vmem:[#allocation192_spill] sm:$0xff] }
 0x46a   : > { %3516 = vadd.xlane.f32.xlu0 %v3515_v60  ;;  %6124 = vpow2.f32 %v3026_v12  ;;  %v2465_v63 = vmax.f32 %v11239_v21, %v11238_v40  ;;  %v3016_v60 = vmul.f32 1.442695, %v2626_v35  ;;  %v11243_v12 = vld [vmem:[#allocation191_spill] sm:$0xff]  ;;  %v11247_v35 = vld [vmem:[#allocation126_spill] sm:$0xff] }
 0x46b   : > { %v3022_v36 = vmul.f32 1.442695, %v2629_v38  ;;  %6126 = vpow2.f32 %v3020_v45  ;;  %v9321_v5 = vpop.eup %6122  ;;  %v2656_v1 = vsub.f32 %v11243_v12, %v11242_v62  ;;  %v11246_v38 = vld [vmem:[#allocation70_spill] sm:$0xff] }
 0x46c   : > { %11240 = vst [vmem:[#allocation183_spill] sm:$0xff] %v9321_v5  ;;  %v11254_v13 = vld [vmem:[#allocation186_spill] sm:$0xff] }
 0x46d   : > { %6128 = vpow2.f32 %v3022_v36  ;;  %v3076_v14 = vmul.f32 1.442695, %v2656_v1 }
 0x46e   : > { %6130 = vpow2.f32 %v3016_v60  ;;  %v11251_v60 = vld [vmem:[#allocation82_spill] sm:$0xff] }
 0x46f   : > { %6132 = vpow2.f32 %v3018_v32  ;;  %v11252_v32 = vld [vmem:[#allocation185_spill] sm:$0xff]  ;;  %v2653_v43 = vsub.f32 %v11254_v13, %v11251_v60 }
 0x470   : > { %v9323_v11 = vpop.eup %6124  ;;  %v2652_v12 = vsub.f32 %v11252_v32, %v11251_v60  ;;  %v11260_v60 = vld [vmem:[#allocation113_spill] sm:$0xff] }
 0x471   : > { %3510 = vadd.xlane.f32.xlu1 %v3509_v29  ;;  %3513 = vadd.xlane.f32.xlu2 %v3512_v55  ;;  %11241 = vst [vmem:[#allocation138_spill] sm:$0xff] %v9323_v11  ;;  %v2462_v29 = vmax.f32 %v11247_v35, %v11246_v38  ;;  %v2657_v55 = vsub.f32 %v11248_v26, %v11242_v62  ;;  %v11258_v35 = vld [vmem:[#allocation189_spill] sm:$0xff]  ;;  %v3070_v1 = vmul.f32 1.442695, %v2653_v43 }
 0x472   : > { %2466 = vmax.xlane.f32.xlu0 %v2465_v63  ;;  %v3467_v45 = vadd.f32 %v9323_v11, %v9321_v5  ;;  %v9335_v63 = vpop.eup %6126  ;;  %v11256_v11 = vld [vmem:[#allocation248_spill] sm:$0xff]  ;;  %v11262_v43 = vld [vmem:[#allocation33_spill] sm:$0xff] }
 0x473   : > { %11249 = vst [vmem:[#allocation141_spill] sm:$0xff] %v9335_v63  ;;  %v9337_v36 = vpop.eup %6128  ;;  %v3078_v62 = vmul.f32 1.442695, %v2657_v55  ;;  %v11257_v5 = vld [vmem:[#allocation188_spill] sm:$0xff]  ;;  %v2655_v19 = vsub.f32 %v11258_v35, %v11256_v11 }
 0x474   : > { %11250 = vst [vmem:[#allocation118_spill] sm:$0xff] %v9337_v36  ;;  %v9341_v44 = vpop.eup %6130  ;;  %v2654_v38 = vsub.f32 %v11257_v5, %v11256_v11  ;;  %v3464_v13 = vadd.f32 %v9337_v36, %v9335_v63  ;;  %v11259_v55 = vld [vmem:[#allocation184_spill] sm:$0xff]  ;;  %v11269_v63 = vld [vmem:[#allocation153_spill] sm:$0xff] }
 0x475   : > { %11253 = vst [vmem:[#allocation48_spill] sm:$0xff] %v9341_v44  ;;  %v9345_v26 = vpop.eup %6132  ;;  %v2417_v32 = vmax.f32 %v11260_v60, %v11259_v55  ;;  %v3074_v5 = vmul.f32 1.442695, %v2655_v19  ;;  %v11263_v11 = vld [vmem:[#allocation152_spill] sm:$0xff]  ;;  %v2625_v55 = vsub.f32 %v11269_v63, %v11262_v43 }
 0x476   : > { %11255 = vst [vmem:[#allocation110_spill] sm:$0xff] %v9345_v26  ;;  %v3072_v9 = vmul.f32 1.442695, %v2654_v38  ;;  %v2624_v35 = vsub.f32 %v11263_v11, %v11262_v43  ;;  %v11266_v19 = vld [vmem:[#allocation176_spill] sm:$0xff] }
 0x479   : > { %2460 = vmax.xlane.f32.xlu1 %v2459_v33  ;;  %2463 = vmax.xlane.f32.xlu2 %v2462_v29  ;;  %v3068_v29 = vmul.f32 1.442695, %v2652_v12 }
 0x47a   : > { %3468 = vadd.xlane.f32.xlu0 %v3467_v45  ;;  %v3461_v45 = vadd.f32 %v9345_v26, %v9341_v44 }
 0x47b   : > { %v3547_v33 = vpop.xlane.xlu1 %3546 }
 0x47c   : > { %6134 = vrcp.f32 %v3547_v33 }
 0x47d   : > { %6136 = vpow2.f32 %v3076_v14 }
 0x47e   : > { %6138 = vpow2.f32 %v3078_v62 }
 0x47f   : > { %6140 = vpow2.f32 %v3068_v29  ;;  %v11265_v29 = vld [vmem:[#allocation177_spill] sm:$0xff] }
 0x480   : > { %6142 = vpow2.f32 %v3070_v1  ;;  %v11268_v1 = vld [vmem:[#allocation108_spill] sm:$0xff] }
 0x481   : > { %3462 = vadd.xlane.f32.xlu1 %v3461_v45  ;;  %3465 = vadd.xlane.f32.xlu2 %v3464_v13  ;;  %6144 = vpow2.f32 %v3072_v9  ;;  %v2411_v45 = vmax.f32 %v11266_v19, %v11265_v29  ;;  %v11267_v13 = vld [vmem:[#allocation179_spill] sm:$0xff]  ;;  %v3012_v9 = vmul.f32 1.442695, %v2624_v35  ;;  %v3014_v35 = vmul.f32 1.442695, %v2625_v55 }
 0x482   : > { %2418 = vmax.xlane.f32.xlu0 %v2417_v32  ;;  %v6135_v12 = vpop.eup %6134  ;;  %v2414_v32 = vmax.f32 %v11268_v1, %v11267_v13  ;;  %v11275_v13 = vld [vmem:[#allocation150_spill] sm:$0xff] }
 0x483   : > { %v9357_v14 = vpop.eup %6136  ;;  %v3867_v62 = vmul.f32 %v6135_v12, %v3547_v33  ;;  %v9361_v26 = vpop.xlane.xlu1 %2490 }
 0x484   : > { %11261 = vst [vmem:[#allocation133_spill] sm:$0xff] %v9357_v14  ;;  %v3544_v44 = vpop.xlane.xlu2 %3543  ;;  %v9363_v36 = vpop.eup %6138 }
 0x485   : > { %11264 = vst [vmem:[#allocation109_spill] sm:$0xff] %v9363_v36  ;;  %6146 = vrcp.f32 %v3544_v44  ;;  %v3995_v38 = vsub.f32 2.0, %v3867_v62  ;;  %v9371_v11 = vpop.eup %6140  ;;  %v3506_v60 = vadd.f32 %v9363_v36, %v9357_v14  ;;  %v11273_v62 = vld [vmem:[#allocation149_spill] sm:$0xff]  ;;  %v11277_v36 = vld [vmem:[#allocation146_spill] sm:$0xff] }
 0x486   : > { %6148 = vpow2.f32 %v3074_v5  ;;  %11270 = vst [vmem:[#allocation44_spill] sm:$0xff] %v9371_v11  ;;  %v9375_v18 = vpop.eup %6142  ;;  %v11272_v5 = vld [vmem:[#allocation40_spill] sm:$0xff] }
 0x487   : > { %v4123_v33 = vmul.f32 %v6135_v12, %v3995_v38  ;;  %11271 = vst [vmem:[#allocation39_spill] sm:$0xff] %v9375_v18  ;;  %v2622_v39 = vsub.f32 %v11273_v62, %v11272_v5  ;;  %v9379_v29 = vpop.eup %6144  ;;  %v2623_v1 = vsub.f32 %v11275_v13, %v11272_v5  ;;  %v11276_v38 = vld [vmem:[#allocation115_spill] sm:$0xff]  ;;  %6150 = vpow2.f32 %v3012_v9  ;;  %v11281_v5 = vld [vmem:[#allocation50_spill] sm:$0xff] }
 0x488   : > { %11274 = vst [vmem:[#allocation218_spill] sm:$0xff] %v9379_v29  ;;  %v2620_v14 = vsub.f32 %v11277_v36, %v11276_v38  ;;  %v3500_v9 = vadd.f32 %v9375_v18, %v9371_v11 }
 0x489   : > { %2412 = vmax.xlane.f32.xlu1 %v2411_v45  ;;  %2415 = vmax.xlane.f32.xlu2 %v2414_v32  ;;  %v4346_v63 = vmul.f32 %v9002_v24, %v4123_v33  ;;  %v4347_v43 = vmul.f32 %v9006_v15, %v4123_v33  ;;  %v11279_v45 = vld [vmem:[#allocation147_spill] sm:$0xff]  ;;  %v3008_v24 = vmul.f32 1.442695, %v2622_v39 }
 0x48a   : > { %3507 = vadd.xlane.f32.xlu0 %v3506_v60  ;;  %v2621_v32 = vsub.f32 %v11279_v45, %v11276_v38  ;;  %v3010_v60 = vmul.f32 1.442695, %v2623_v1  ;;  %v3004_v36 = vmul.f32 1.442695, %v2620_v14 }
 0x48b   : > { %v6147_v12 = vpop.eup %6146  ;;  %v9391_v53 = vpop.xlane.xlu1 %2487  ;;  %4822 = vmatpush.xpose.msra.mxu2 %v4346_v63  ;;  %4863 = vmatpush.xpose.msra.mxu3 %v4347_v43 }
 0x48c   : > { %v9387_v19 = vpop.eup %6148  ;;  %v3866_v62 = vmul.f32 %v6147_v12, %v3544_v44  ;;  %v3496_v13 = vpop.xlane.xlu2 %3495  ;;  %v11280_v44 = vld [vmem:[#allocation139_spill] sm:$0xff]  ;;  %v3006_v45 = vmul.f32 1.442695, %v2621_v32  ;;  %v2746_v32 = vsub.f32 %v9022_v48, %v9361_v26 }
 0x48d   : > { %11278 = vst [vmem:[#allocation32_spill] sm:$0xff] %v9387_v19  ;;  %6152 = vrcp.f32 %v3496_v13  ;;  %v3541_v15 = vpop.xlane.xlu0 %3540  ;;  %v3503_v33 = vadd.f32 %v9387_v19, %v9379_v29  ;;  %v2456_v38 = vmax.f32 %v11281_v5, %v11280_v44  ;;  %v9399_v39 = vpop.eup %6150  ;;  %v11295_v44 = vld [vmem:[#allocation117_spill] sm:$0xff] }
 0x48e   : > { %v3994_v55 = vsub.f32 2.0, %v3866_v62  ;;  %6154 = vrcp.f32 %v3541_v15  ;;  %11282 = vst [vmem:[#allocation130_spill] sm:$0xff] %v9399_v39 }
 0x48f   : > { %6156 = vpow2.f32 %v3014_v35 }
 0x490   : > { %v4122_v63 = vmul.f32 %v6147_v12, %v3994_v55  ;;  %6158 = vpow2.f32 %v3008_v24  ;;  %v11285_v55 = vld [vmem:[#allocation78_spill] sm:$0xff] }
 0x491   : > { %3501 = vadd.xlane.f32.xlu1 %v3500_v9  ;;  %3504 = vadd.xlane.f32.xlu2 %v3503_v33  ;;  %6160 = vpow2.f32 %v3010_v60  ;;  %v11288_v33 = vld [vmem:[#allocation68_spill] sm:$0xff] }
 0x492   : > { %2457 = vmax.xlane.f32.xlu0 %v2456_v38  ;;  %v4344_v14 = vmul.f32 %v9026_v50, %v4122_v63  ;;  %v4345_v1 = vmul.f32 %v9028_v6, %v4122_v63  ;;  %6162 = vpow2.f32 %v3004_v36  ;;  %v11284_v50 = vld [vmem:[#allocation72_spill] sm:$0xff] }
 0x493   : > { %v6153_v43 = vpop.eup %6152  ;;  %6164 = vpow2.f32 %v3006_v45  ;;  %v3490_v18 = vpop.xlane.xlu1 %3489  ;;  %v2450_v6 = vmax.f32 %v11285_v55, %v11284_v50  ;;  %v11289_v45 = vld [vmem:[#allocation116_spill] sm:$0xff] }
 0x494   : > { %v6155_v35 = vpop.eup %6154  ;;  %v3850_v62 = vmul.f32 %v6153_v43, %v3496_v13  ;;  %v3493_v11 = vpop.xlane.xlu2 %3492  ;;  %4823 = vmatpush.xpose.msra.mxu2 %v4344_v14  ;;  %4864 = vmatpush.xpose.msra.mxu3 %v4345_v1  ;;  %6166 = vrcp.f32 %v3490_v18  ;;  %v11287_v13 = vld [vmem:[#allocation258_spill] sm:$0xff]  ;;  %v2747_v63 = vsub.f32 %v11289_v45, %v9361_v26  ;;  %v11294_v26 = vld [vmem:[#allocation131_spill] sm:$0xff] }
 0x495   : > { %v9403_v12 = vpop.eup %6156  ;;  %v3865_v24 = vmul.f32 %v6155_v35, %v3541_v15  ;;  %v3538_v60 = vpop.xlane.xlu0 %3537  ;;  %6168 = vrcp.f32 %v3493_v11  ;;  %v2453_v38 = vmax.f32 %v11288_v33, %v11287_v13  ;;  %v11293_v13 = vld [vmem:[#allocation66_spill] sm:$0xff] }
 0x496   : > { %11283 = vst [vmem:[#allocation102_spill] sm:$0xff] %v9403_v12  ;;  %v3978_v9 = vsub.f32 2.0, %v3850_v62  ;;  %v9409_v36 = vpop.eup %6158  ;;  %6170 = vrcp.f32 %v3538_v60  ;;  %v3458_v15 = vadd.f32 %v9403_v12, %v9399_v39  ;;  %v3256_v62 = vmul.f32 1.442695, %v2746_v32  ;;  %v11297_v39 = vld [vmem:[#allocation151_spill] sm:$0xff] }
 0x497   : > { %11286 = vst [vmem:[#allocation36_spill] sm:$0xff] %v9409_v36  ;;  %v3993_v14 = vsub.f32 2.0, %v3865_v24  ;;  %v9415_v1 = vpop.eup %6160  ;;  %v3258_v55 = vmul.f32 1.442695, %v2747_v63  ;;  %v2744_v32 = vsub.f32 %v11297_v39, %v9391_v53 }
 0x498   : > { %11290 = vst [vmem:[#allocation224_spill] sm:$0xff] %v9415_v1  ;;  %v4106_v48 = vmul.f32 %v6153_v43, %v3978_v9  ;;  %v9419_v19 = vpop.eup %6162  ;;  %v11296_v9 = vld [vmem:[#allocation205_spill] sm:$0xff]  ;;  %6172 = vpow2.f32 %v3256_v62 }
 0x499   : > { %11291 = vst [vmem:[#allocation225_spill] sm:$0xff] %v9419_v19  ;;  %v4121_v29 = vmul.f32 %v6155_v35, %v3993_v14  ;;  %2451 = vmax.xlane.f32.xlu1 %v2450_v6  ;;  %2454 = vmax.xlane.f32.xlu2 %v2453_v38  ;;  %v9421_v50 = vpop.eup %6164  ;;  %v11300_v62 = vld [vmem:[#allocation209_spill] sm:$0xff] }
 0x49a   : > { %11292 = vst [vmem:[#allocation220_spill] sm:$0xff] %v9421_v50  ;;  %3459 = vadd.xlane.f32.xlu0 %v3458_v15  ;;  %v4312_v33 = vmul.f32 %v11293_v13, %v4106_v48  ;;  %v4313_v24 = vmul.f32 %v11294_v26, %v4106_v48  ;;  %v6167_v45 = vpop.eup %6166  ;;  %v3452_v39 = vadd.f32 %v9421_v50, %v9419_v19  ;;  %v11298_v15 = vld [vmem:[#allocation172_spill] sm:$0xff] }
 0x49b   : > { %v4342_v43 = vmul.f32 %v11295_v44, %v4121_v29  ;;  %v4343_v5 = vmul.f32 %v11296_v9, %v4121_v29  ;;  %v6169_v12 = vpop.eup %6168  ;;  %v3848_v35 = vmul.f32 %v6167_v45, %v3490_v18  ;;  %v9429_v6 = vpop.xlane.xlu1 %2439  ;;  %v3455_v29 = vadd.f32 %v9415_v1, %v9409_v36  ;;  %v11303_v1 = vld [vmem:[#allocation112_spill] sm:$0xff] }
 0x49c   : > { %v9431_v38 = vpop.xlane.xlu2 %2442  ;;  %4741 = vmatpush.xpose.msra.mxu0 %v4312_v33  ;;  %4782 = vmatpush.xpose.msra.mxu1 %v4313_v24  ;;  %v6171_v13 = vpop.eup %6170  ;;  %v3849_v14 = vmul.f32 %v6169_v12, %v3493_v11  ;;  %v11299_v33 = vld [vmem:[#allocation91_spill] sm:$0xff]  ;;  %v2745_v11 = vsub.f32 %v11300_v62, %v9391_v53  ;;  %v3252_v24 = vmul.f32 1.442695, %v2744_v32  ;;  %v11304_v53 = vld [vmem:[#allocation201_spill] sm:$0xff] }
 0x49d   : > { %4824 = vmatpush.xpose.msra.mxu2 %v4342_v43  ;;  %v3535_v63 = vpop.xlane.xlu0 %3534  ;;  %v3864_v48 = vmul.f32 %v6171_v13, %v3538_v60  ;;  %4865 = vmatpush.xpose.msra.mxu3 %v4343_v5  ;;  %v3976_v44 = vsub.f32 2.0, %v3848_v35  ;;  %v2408_v26 = vmax.f32 %v11299_v33, %v11298_v15  ;;  %v11302_v35 = vld [vmem:[#allocation111_spill] sm:$0xff] }
 0x49e   : > { %6174 = vrcp.f32 %v3535_v63  ;;  %v3977_v18 = vsub.f32 2.0, %v3849_v14  ;;  %v9441_v9 = vpop.eup %6172  ;;  %v3254_v36 = vmul.f32 1.442695, %v2745_v11  ;;  %v2715_v11 = vsub.f32 %v11141_v31, %v9431_v38  ;;  %v11313_v31 = vld [vmem:[#allocation120_spill] sm:$0xff] }
 0x49f   : > { %6176 = vpow2.f32 %v3258_v55  ;;  %v3992_v43 = vsub.f32 2.0, %v3864_v48  ;;  %11301 = vst [vmem:[#allocation221_spill] sm:$0xff] %v9441_v9  ;;  %v4104_v55 = vmul.f32 %v6167_v45, %v3976_v44  ;;  %v11305_v48 = vld [vmem:[#allocation104_spill] sm:$0xff]  ;;  %v11308_v44 = vld [vmem:[#allocation166_spill] sm:$0xff] }
 0x4a0   : > { %v4105_v60 = vmul.f32 %v6169_v12, %v3977_v18  ;;  %6178 = vpow2.f32 %v3252_v24 }
 0x4a1   : > { %3453 = vadd.xlane.f32.xlu1 %v3452_v39  ;;  %3456 = vadd.xlane.f32.xlu2 %v3455_v29  ;;  %v4120_v5 = vmul.f32 %v6171_v13, %v3992_v43  ;;  %v2714_v13 = vsub.f32 %v11142_v8, %v9431_v38  ;;  %v11309_v8 = vld [vmem:[#allocation215_spill] sm:$0xff]  ;;  %v11310_v43 = vld [vmem:[#allocation217_spill] sm:$0xff]  ;;  %v2712_v38 = vsub.f32 %v11313_v31, %v9429_v6 }
 0x4a2   : > { %2409 = vmax.xlane.f32.xlu0 %v2408_v26  ;;  %v4310_v14 = vmul.f32 %v11302_v35, %v4105_v60  ;;  %v4311_v50 = vmul.f32 %v11303_v1, %v4105_v60  ;;  %v11307_v1 = vld [vmem:[#allocation167_spill] sm:$0xff]  ;;  %v4309_v60 = vmul.f32 %v11310_v43, %v4104_v55 }
 0x4a3   : > { %v3529_v15 = vpop.xlane.xlu1 %3528  ;;  %v4340_v32 = vmul.f32 %v11304_v53, %v4120_v5  ;;  %v4341_v12 = vmul.f32 %v11305_v48, %v4120_v5  ;;  %v2402_v39 = vmax.f32 %v11308_v44, %v11307_v1  ;;  %v11312_v53 = vld [vmem:[#allocation86_spill] sm:$0xff] }
 0x4a4   : > { %v6175_v19 = vpop.eup %6174  ;;  %v3532_v33 = vpop.xlane.xlu2 %3531  ;;  %6180 = vrcp.f32 %v3529_v15  ;;  %4742 = vmatpush.xpose.msra.mxu0 %v4310_v14  ;;  %4783 = vmatpush.xpose.msra.mxu1 %v4311_v50  ;;  %v11311_v14 = vld [vmem:[#allocation169_spill] sm:$0xff] }
 0x4a5   : > { %v9447_v18 = vpop.eup %6176  ;;  %v3863_v29 = vmul.f32 %v6175_v19, %v3535_v63  ;;  %v2485_v45 = vpop.xlane.xlu0 %2484  ;;  %6182 = vrcp.f32 %v3532_v33  ;;  %4825 = vmatpush.xpose.msra.mxu2 %v4340_v32  ;;  %4866 = vmatpush.xpose.msra.mxu3 %v4341_v12  ;;  %v4308_v63 = vmul.f32 %v11309_v8, %v4104_v55  ;;  %v2405_v32 = vmax.f32 %v11312_v53, %v11311_v14  ;;  %v11314_v12 = vld [vmem:[#allocation107_spill] sm:$0xff] }
 0x4a6   : > { %11306 = vst [vmem:[#allocation223_spill] sm:$0xff] %v9447_v18  ;;  %v2742_v26 = vsub.f32 %v8976_v46, %v2485_v45  ;;  %v2743_v62 = vsub.f32 %v8978_v56, %v2485_v45  ;;  %6184 = vpow2.f32 %v3254_v36  ;;  %v3641_v35 = vadd.f32 %v9447_v18, %v9441_v9  ;;  %v9463_v56 = vpop.eup %6178  ;;  %v11315_v45 = vld [vmem:[#allocation145_spill] sm:$0xff] }
 0x4a7   : > { %v3991_v24 = vsub.f32 2.0, %v3863_v29  ;;  %v3192_v46 = vmul.f32 1.442695, %v2714_v13  ;;  %v3194_v55 = vmul.f32 1.442695, %v2715_v11  ;;  %v11317_v11 = vld [vmem:[#allocation20_spill] sm:$0xff] }
 0x4a8   : > { %v3248_v50 = vmul.f32 1.442695, %v2742_v26  ;;  %v3250_v5 = vmul.f32 1.442695, %v2743_v62  ;;  %4743 = vmatpush.xpose.msra.mxu0 %v4308_v63  ;;  %4784 = vmatpush.xpose.msra.mxu1 %v4309_v60  ;;  %v11316_v63 = vld [vmem:[#allocation27_spill] sm:$0xff] }
 0x4a9   : > { %v4119_v48 = vmul.f32 %v6175_v19, %v3991_v24  ;;  %2403 = vmax.xlane.f32.xlu1 %v2402_v39  ;;  %2406 = vmax.xlane.f32.xlu2 %v2405_v32 }
 0x4aa   : > { %6186 = vpow2.f32 %v3248_v50  ;;  %3642 = vadd.xlane.f32.xlu0 %v3641_v35  ;;  %v6181_v36 = vpop.eup %6180  ;;  %v2713_v50 = vsub.f32 %v11317_v11, %v9429_v6  ;;  %v11318_v35 = vld [vmem:[#allocation213_spill] sm:$0xff] }
 0x4ab   : > { %6188 = vpow2.f32 %v3250_v5  ;;  %v4338_v29 = vmul.f32 %v11314_v12, %v4119_v48  ;;  %v4339_v26 = vmul.f32 %v11315_v45, %v4119_v48  ;;  %v6183_v13 = vpop.eup %6182  ;;  %v3861_v19 = vmul.f32 %v6181_v36, %v3529_v15  ;;  %v2479_v62 = vpop.xlane.xlu1 %2478 }
 0x4ac   : > { %v2482_v24 = vpop.xlane.xlu2 %2481  ;;  %6190 = vpow2.f32 %v3192_v46  ;;  %v3862_v8 = vmul.f32 %v6183_v13, %v3532_v33  ;;  %v9470_v39 = vpop.eup %6184  ;;  %v3188_v5 = vmul.f32 1.442695, %v2712_v38  ;;  %v11319_v33 = vld [vmem:[#allocation30_spill] sm:$0xff]  ;;  %v11320_v46 = vld [vmem:[#allocation85_spill] sm:$0xff] }
 0x4ad   : > { %v2740_v43 = vsub.f32 %v11316_v63, %v2482_v24  ;;  %4826 = vmatpush.xpose.msra.mxu2 %v4338_v29  ;;  %v3487_v60 = vpop.xlane.xlu0 %3486  ;;  %v2741_v32 = vsub.f32 %v11318_v35, %v2482_v24  ;;  %4867 = vmatpush.xpose.msra.mxu3 %v4339_v26  ;;  %v3989_v15 = vsub.f32 2.0, %v3861_v19  ;;  %v2447_v12 = vmax.f32 %v11320_v46, %v11319_v33  ;;  %v11321_v29 = vld [vmem:[#allocation26_spill] sm:$0xff]  ;;  %v11323_v38 = vld [vmem:[#allocation41_spill] sm:$0xff] }
 0x4ae   : > { %6192 = vrcp.f32 %v3487_v60  ;;  %v3990_v48 = vsub.f32 2.0, %v3862_v8  ;;  %v2738_v45 = vsub.f32 %v11321_v29, %v2479_v62  ;;  %v2739_v11 = vsub.f32 %v11323_v38, %v2479_v62 }
 0x4af   : > { %6194 = vpow2.f32 %v3194_v55  ;;  %v3244_v63 = vmul.f32 1.442695, %v2740_v43  ;;  %v3246_v18 = vmul.f32 1.442695, %v2741_v32  ;;  %v3638_v26 = vadd.f32 %v9470_v39, %v9463_v56  ;;  %v11325_v43 = vld [vmem:[#allocation148_spill] sm:$0xff]  ;;  %v11326_v32 = vld [vmem:[#allocation19_spill] sm:$0xff] }
 0x4b0   : > { %v9475_v31 = vpop.eup %6186  ;;  %v4118_v6 = vmul.f32 %v6183_v13, %v3990_v48  ;;  %6196 = vpow2.f32 %v3188_v5  ;;  %v3190_v55 = vmul.f32 1.442695, %v2713_v50  ;;  %v4117_v8 = vmul.f32 %v6181_v36, %v3989_v15 }
 0x4b1   : > { %v9480_v9 = vpop.eup %6188  ;;  %6198 = vpow2.f32 %v3244_v63  ;;  %3639 = vadd.xlane.f32.xlu2 %v3638_v26  ;;  %v3240_v62 = vmul.f32 1.442695, %v2738_v45  ;;  %v11329_v45 = vld [vmem:[#allocation214_spill] sm:$0xff] }
 0x4b2   : > { %11322 = vst [vmem:[#allocation87_spill] sm:$0xff] %v9480_v9  ;;  %2448 = vmax.xlane.f32.xlu0 %v2447_v12  ;;  %v3635_v19 = vadd.f32 %v9480_v9, %v9475_v31  ;;  %v9487_v24 = vpop.eup %6190  ;;  %v4336_v35 = vmul.f32 %v11325_v43, %v4118_v6  ;;  %v4337_v13 = vmul.f32 %v11326_v32, %v4118_v6  ;;  %6200 = vpow2.f32 %v3246_v18  ;;  %v11328_v6 = vld [vmem:[#allocation57_spill] sm:$0xff]  ;;  %v11331_v32 = vld [vmem:[#allocation90_spill] sm:$0xff] }
 0x4b3   : > { %11324 = vst [vmem:[#allocation95_spill] sm:$0xff] %v9487_v24  ;;  %v3481_v29 = vpop.xlane.xlu1 %3480  ;;  %v3242_v12 = vmul.f32 1.442695, %v2739_v11  ;;  %v4334_v26 = vmul.f32 %v11328_v6, %v4117_v8  ;;  %v4335_v18 = vmul.f32 %v11329_v45, %v4117_v8 }
 0x4b4   : > { %v6193_v48 = vpop.eup %6192  ;;  %3636 = vadd.xlane.f32.xlu1 %v3635_v19  ;;  %v3484_v5 = vpop.xlane.xlu2 %3483  ;;  %6202 = vrcp.f32 %v3481_v29  ;;  %4827 = vmatpush.xpose.msra.mxu2 %v4336_v35 }
 0x4b5   : > { %v9491_v50 = vpop.eup %6194  ;;  %v3847_v38 = vmul.f32 %v6193_v48, %v3487_v60  ;;  %4868 = vmatpush.xpose.msra.mxu3 %v4337_v13  ;;  %v2437_v36 = vpop.xlane.xlu0 %2436  ;;  %6204 = vrcp.f32 %v3484_v5  ;;  %v11332_v13 = vld [vmem:[#allocation236_spill] sm:$0xff] }
 0x4b6   : > { %11327 = vst [vmem:[#allocation230_spill] sm:$0xff] %v9491_v50  ;;  %v2710_v15 = vsub.f32 %v11179_v47, %v2437_v36  ;;  %6206 = vpow2.f32 %v3190_v55  ;;  %v9496_v19 = vpop.eup %6196  ;;  %v2711_v43 = vsub.f32 %v11178_v17, %v2437_v36  ;;  %v3593_v60 = vadd.f32 %v9491_v50, %v9487_v24  ;;  %v11334_v36 = vld [vmem:[#allocation58_spill] sm:$0xff]  ;;  %v11339_v24 = vld [vmem:[#allocation164_spill] sm:$0xff] }
 0x4b7   : > { %v3975_v63 = vsub.f32 2.0, %v3847_v38  ;;  %6208 = vpow2.f32 %v3240_v62  ;;  %v9501_v35 = vpop.eup %6198  ;;  %v2444_v47 = vmax.f32 %v11332_v13, %v11331_v32 }
 0x4b8   : > { %v3184_v11 = vmul.f32 1.442695, %v2710_v15  ;;  %11330 = vst [vmem:[#allocation234_spill] sm:$0xff] %v9501_v35  ;;  %6210 = vpow2.f32 %v3242_v12  ;;  %4828 = vmatpush.xpose.msra.mxu2 %v4334_v26  ;;  %v9505_v38 = vpop.eup %6200  ;;  %v3186_v50 = vmul.f32 1.442695, %v2711_v43 }
 0x4b9   : > { %v4103_v55 = vmul.f32 %v6193_v48, %v3975_v63  ;;  %4869 = vmatpush.xpose.msra.mxu3 %v4335_v18  ;;  %11333 = vst [vmem:[#allocation235_spill] sm:$0xff] %v9505_v38  ;;  %2445 = vmax.xlane.f32.xlu2 %v2444_v47  ;;  %v3632_v17 = vadd.f32 %v9505_v38, %v9501_v35  ;;  %v11335_v47 = vld [vmem:[#allocation105_spill] sm:$0xff] }
 0x4ba   : > { %3594 = vadd.xlane.f32.xlu0 %v3593_v60  ;;  %v6203_v8 = vpop.eup %6202  ;;  %6212 = vpow2.f32 %v3184_v11 }
 0x4bb   : > { %v4306_v62 = vmul.f32 %v9128_v28, %v4103_v55  ;;  %v4307_v15 = vmul.f32 %v11334_v36, %v4103_v55  ;;  %v6205_v6 = vpop.eup %6204  ;;  %v3845_v45 = vmul.f32 %v6203_v8, %v3481_v29  ;;  %v2431_v12 = vpop.xlane.xlu1 %2430 }
 0x4bc   : > { %v2434_v48 = vpop.xlane.xlu2 %2433  ;;  %v9511_v63 = vpop.eup %6206  ;;  %v3846_v26 = vmul.f32 %v6205_v6, %v3484_v5  ;;  %3633 = vadd.xlane.f32.xlu1 %v3632_v17  ;;  %v2706_v18 = vsub.f32 %v11185_v3, %v2431_v12  ;;  %v2707_v60 = vsub.f32 %v11184_v41, %v2431_v12  ;;  %v11338_v5 = vld [vmem:[#allocation106_spill] sm:$0xff]  ;;  %v11340_v3 = vld [vmem:[#allocation163_spill] sm:$0xff] }
 0x4bd   : > { %v2708_v38 = vsub.f32 %v11335_v47, %v2434_v48  ;;  %v3526_v35 = vpop.xlane.xlu0 %3525  ;;  %v9516_v28 = vpop.eup %6208  ;;  %v3973_v55 = vsub.f32 2.0, %v3845_v45  ;;  %4744 = vmatpush.xpose.msra.mxu0 %v4306_v62  ;;  %4785 = vmatpush.xpose.msra.mxu1 %v4307_v15  ;;  %v2709_v17 = vsub.f32 %v11338_v5, %v2434_v48  ;;  %v2399_v9 = vmax.f32 %v11340_v3, %v11339_v24  ;;  %v11341_v48 = vld [vmem:[#allocation124_spill] sm:$0xff] }
 0x4be   : > { %11336 = vst [vmem:[#allocation22_spill] sm:$0xff] %v9516_v28  ;;  %6214 = vrcp.f32 %v3526_v35  ;;  %v9518_v29 = vpop.eup %6210  ;;  %v3974_v43 = vsub.f32 2.0, %v3846_v26  ;;  %v3176_v11 = vmul.f32 1.442695, %v2706_v18  ;;  %v3178_v36 = vmul.f32 1.442695, %v2707_v60 }
 0x4bf   : > { %11337 = vst [vmem:[#allocation247_spill] sm:$0xff] %v9518_v29  ;;  %6216 = vpow2.f32 %v3186_v50  ;;  %v3180_v41 = vmul.f32 1.442695, %v2708_v38  ;;  %v3590_v45 = vadd.f32 %v9511_v63, %v9496_v19  ;;  %v3629_v15 = vadd.f32 %v9518_v29, %v9516_v28  ;;  %v11342_v47 = vld [vmem:[#allocation84_spill] sm:$0xff] }
 0x4c0   : > { %v4102_v12 = vmul.f32 %v6205_v6, %v3974_v43  ;;  %6218 = vpow2.f32 %v3176_v11  ;;  %v9525_v62 = vpop.eup %6212  ;;  %v4101_v26 = vmul.f32 %v6203_v8, %v3973_v55  ;;  %v3182_v18 = vmul.f32 1.442695, %v2709_v17  ;;  %v11346_v29 = vld [vmem:[#allocation100_spill] sm:$0xff] }
 0x4c1   : > { %6220 = vpow2.f32 %v3178_v36  ;;  %3591 = vadd.xlane.f32.xlu2 %v3590_v45 }
 0x4c2   : > { %2400 = vmax.xlane.f32.xlu0 %v2399_v9  ;;  %v4304_v60 = vmul.f32 %v11341_v48, %v4102_v12  ;;  %v4305_v50 = vmul.f32 %v11342_v47, %v4102_v12  ;;  %6222 = vpow2.f32 %v3180_v41  ;;  %v11343_v41 = vld [vmem:[#allocation99_spill] sm:$0xff]  ;;  %v4303_v28 = vmul.f32 %v11346_v29, %v4101_v26 }
 0x4c3   : > { %v3520_v6 = vpop.xlane.xlu1 %3519  ;;  %v4302_v12 = vmul.f32 %v11343_v41, %v4101_v26 }
 0x4c4   : > { %v6215_v38 = vpop.eup %6214  ;;  %v3523_v43 = vpop.xlane.xlu2 %3522  ;;  %3630 = vadd.xlane.f32.xlu1 %v3629_v15  ;;  %6224 = vrcp.f32 %v3520_v6  ;;  %4745 = vmatpush.xpose.msra.mxu0 %v4304_v60  ;;  %v11345_v15 = vld [vmem:[#allocation64_spill] sm:$0xff] }
 0x4c5   : > { %v3860_v11 = vmul.f32 %v6215_v38, %v3526_v35  ;;  %v2476_v36 = vpop.xlane.xlu0 %2475  ;;  %v9531_v9 = vpop.eup %6216  ;;  %6226 = vrcp.f32 %v3523_v43  ;;  %4786 = vmatpush.xpose.msra.mxu1 %v4305_v50  ;;  %v11344_v35 = vld [vmem:[#allocation159_spill] sm:$0xff] }
 0x4c6   : > { %v2736_v8 = vsub.f32 %v8934_v59, %v2476_v36  ;;  %v2737_v55 = vsub.f32 %v8940_v27, %v2476_v36  ;;  %v9535_v5 = vpop.eup %6218  ;;  %6228 = vpow2.f32 %v3182_v18  ;;  %v2396_v48 = vmax.f32 %v11345_v15, %v11344_v35 }
 0x4c7   : > { %v3988_v17 = vsub.f32 2.0, %v3860_v11  ;;  %v9538_v45 = vpop.eup %6220  ;;  %v3587_v59 = vadd.f32 %v9531_v9, %v9525_v62 }
 0x4c8   : > { %v3236_v60 = vmul.f32 1.442695, %v2736_v8  ;;  %v3238_v47 = vmul.f32 1.442695, %v2737_v55  ;;  %4746 = vmatpush.xpose.msra.mxu0 %v4302_v12  ;;  %v3581_v27 = vadd.f32 %v9538_v45, %v9535_v5  ;;  %v9547_v18 = vpop.eup %6222 }
 0x4c9   : > { %v4116_v50 = vmul.f32 %v6215_v38, %v3988_v17  ;;  %4787 = vmatpush.xpose.msra.mxu1 %v4303_v28  ;;  %3588 = vadd.xlane.f32.xlu2 %v3587_v59 }
 0x4ca   : > { %6230 = vpow2.f32 %v3236_v60  ;;  %2397 = vmax.xlane.f32.xlu0 %v2396_v48  ;;  %v6225_v11 = vpop.eup %6224 }
 0x4cb   : > { %6232 = vpow2.f32 %v3238_v47  ;;  %v4332_v36 = vmul.f32 %v9176_v10, %v4116_v50  ;;  %v4333_v29 = vmul.f32 %v9195_v37, %v4116_v50  ;;  %v6227_v26 = vpop.eup %6226  ;;  %v3858_v38 = vmul.f32 %v6225_v11, %v3520_v6 }
 0x4cc   : > { %v2470_v8 = vpop.xlane.xlu1 %2469  ;;  %v2473_v55 = vpop.xlane.xlu2 %2472  ;;  %v3859_v41 = vmul.f32 %v6227_v26, %v3523_v43  ;;  %3582 = vadd.xlane.f32.xlu1 %v3581_v27 }
 0x4cd   : > { %v9551_v17 = vpop.eup %6228  ;;  %v2732_v12 = vsub.f32 %v11200_v2, %v2470_v8  ;;  %v2733_v28 = vsub.f32 %v11199_v42, %v2470_v8  ;;  %v2734_v48 = vsub.f32 %v11202_v22, %v2473_v55  ;;  %v3478_v60 = vpop.xlane.xlu0 %3477  ;;  %v2735_v47 = vsub.f32 %v11201_v52, %v2473_v55  ;;  %4829 = vmatpush.xpose.msra.mxu2 %v4332_v36 }
 0x4ce   : > { %4870 = vmatpush.xpose.msra.mxu3 %v4333_v29  ;;  %6234 = vrcp.f32 %v3478_v60  ;;  %v3986_v10 = vsub.f32 2.0, %v3858_v38  ;;  %v3987_v37 = vsub.f32 2.0, %v3859_v41  ;;  %v3584_v2 = vadd.f32 %v9551_v17, %v9547_v18 }
 0x4cf   : > { %v3228_v6 = vmul.f32 1.442695, %v2732_v12  ;;  %v3230_v50 = vmul.f32 1.442695, %v2733_v28  ;;  %v3232_v43 = vmul.f32 1.442695, %v2734_v48 }
 0x4d0   : > { %v9557_v59 = vpop.eup %6230  ;;  %v3234_v27 = vmul.f32 1.442695, %v2735_v47  ;;  %v4115_v22 = vmul.f32 %v6227_v26, %v3987_v37  ;;  %v4114_v36 = vmul.f32 %v6225_v11, %v3986_v10  ;;  %v501_v10 = vld [vmem:[%s9191_s18 + $0x10] sm:$0xff]  ;;  %v502_v37 = vld [vmem:[%s9191_s18 + $0x18] sm:$0xff] }
 0x4d1   : > { %v9561_v42 = vpop.eup %6232  ;;  %6236 = vpow2.f32 %v3228_v6  ;;  %4513 = vmatmul.f32.gmra.mxu2 %v501_v10  ;;  %4554 = vmatmul.f32.gmra.mxu3 %v502_v37 }
 0x4d2   : > { %6238 = vpow2.f32 %v3230_v50  ;;  %3585 = vadd.xlane.f32.xlu0 %v3584_v2  ;;  %v3626_v52 = vadd.f32 %v9561_v42, %v9557_v59  ;;  %v4330_v29 = vmul.f32 %v9212_v61, %v4115_v22  ;;  %v4331_v38 = vmul.f32 %v9218_v7, %v4115_v22  ;;  %4431 = vmatmul.f32.gmra.mxu0 %v501_v10 }
 0x4d3   : > { %6240 = vpow2.f32 %v3232_v43  ;;  %v4328_v48 = vmul.f32 %v9198_v23, %v4114_v36  ;;  %v4329_v47 = vmul.f32 %v9204_v0, %v4114_v36  ;;  %4472 = vmatmul.f32.gmra.mxu1 %v502_v37 }
 0x4d4   : > { %v6235_v8 = vpop.eup %6234  ;;  %6242 = vpow2.f32 %v3234_v27  ;;  %3627 = vadd.xlane.f32.xlu2 %v3626_v52  ;;  %v3472_v55 = vpop.xlane.xlu1 %3471  ;;  %4830 = vmatpush.xpose.msra.mxu2 %v4330_v29 }
 0x4d5   : > { %v3475_v41 = vpop.xlane.xlu2 %3474  ;;  %v3844_v26 = vmul.f32 %v6235_v8, %v3478_v60  ;;  %6244 = vrcp.f32 %v3472_v55  ;;  %4871 = vmatpush.xpose.msra.mxu3 %v4331_v38  ;;  %v2428_v12 = vpop.xlane.xlu0 %2427 }
 0x4d6   : > { %6246 = vrcp.f32 %v3475_v41  ;;  %v2704_v11 = vsub.f32 %v11215_v25, %v2428_v12  ;;  %v2705_v28 = vsub.f32 %v11214_v20, %v2428_v12 }
 0x4d7   : > { %v9569_v61 = vpop.eup %6236  ;;  %v3972_v7 = vsub.f32 2.0, %v3844_v26 }
 0x4d8   : > { %v9575_v6 = vpop.eup %6238  ;;  %v3172_v60 = vmul.f32 1.442695, %v2704_v11  ;;  %v3174_v50 = vmul.f32 1.442695, %v2705_v28  ;;  %4831 = vmatpush.xpose.msra.mxu2 %v4328_v48 }
 0x4d9   : > { %v9577_v43 = vpop.eup %6240  ;;  %v4100_v25 = vmul.f32 %v6235_v8, %v3972_v7  ;;  %4872 = vmatpush.xpose.msra.mxu3 %v4329_v47  ;;  %v3620_v20 = vadd.f32 %v9575_v6, %v9569_v61  ;;  %v503_v47 = vld [vmem:[%s9191_s18 + $0x20] sm:$0xff] }
 0x4da   : > { %v9581_v27 = vpop.eup %6242  ;;  %6248 = vpow2.f32 %v3172_v60  ;;  %4516 = vmatmul.f32.gmra.mxu2 %v503_v47  ;;  %4434 = vmatmul.f32.gmra.mxu0 %v503_v47 }
 0x4db   : > { %v6245_v23 = vpop.eup %6244  ;;  %6250 = vpow2.f32 %v3174_v50  ;;  %v3623_v0 = vadd.f32 %v9581_v27, %v9577_v43  ;;  %3621 = vadd.xlane.f32.xlu1 %v3620_v20  ;;  %v4300_v2 = vmul.f32 %v9233_v16, %v4100_v25  ;;  %v4301_v22 = vmul.f32 %v9239_v49, %v4100_v25 }
 0x4dc   : > { %v6247_v52 = vpop.eup %6246  ;;  %v3842_v36 = vmul.f32 %v6245_v23, %v3472_v55  ;;  %v2422_v29 = vpop.xlane.xlu1 %2421 }
 0x4dd   : > { %v2425_v38 = vpop.xlane.xlu2 %2424  ;;  %v3843_v8 = vmul.f32 %v6247_v52, %v3475_v41  ;;  %3624 = vadd.xlane.f32.xlu0 %v3623_v0  ;;  %v2700_v26 = vsub.f32 %v11224_v54, %v2422_v29  ;;  %v2701_v12 = vsub.f32 %v11223_v57, %v2422_v29  ;;  %v3517_v28 = vpop.xlane.xlu0 %3516  ;;  %4747 = vmatpush.xpose.msra.mxu0 %v4300_v2  ;;  %v504_v57 = vld [vmem:[%s9191_s18 + $0x28] sm:$0xff] }
 0x4de   : > { %v2702_v11 = vsub.f32 %v11226_v58, %v2425_v38  ;;  %v3970_v7 = vsub.f32 2.0, %v3842_v36  ;;  %v2703_v16 = vsub.f32 %v11225_v51, %v2425_v38  ;;  %4788 = vmatpush.xpose.msra.mxu1 %v4301_v22  ;;  %6252 = vrcp.f32 %v3517_v28  ;;  %4557 = vmatmul.f32.gmra.mxu3 %v504_v57  ;;  %v11347_v38 = vld [vmem:[#allocation61_spill] sm:$0xff] }
 0x4df   : > { %v3971_v49 = vsub.f32 2.0, %v3843_v8  ;;  %v3164_v55 = vmul.f32 1.442695, %v2700_v26  ;;  %v3166_v48 = vmul.f32 1.442695, %v2701_v12  ;;  %4475 = vmatmul.f32.gmra.mxu1 %v504_v57  ;;  %v505_v26 = vld [vmem:[%s9191_s18 + $0x30] sm:$0xff] }
 0x4e0   : > { %v9592_v41 = vpop.eup %6248  ;;  %v3168_v10 = vmul.f32 1.442695, %v2702_v11  ;;  %v3170_v54 = vmul.f32 1.442695, %v2703_v16  ;;  %v4098_v60 = vmul.f32 %v6245_v23, %v3970_v7  ;;  %v506_v12 = vld [vmem:[%s9191_s18 + $0x38] sm:$0xff] }
 0x4e1   : > { %v9595_v37 = vpop.eup %6250  ;;  %v4099_v58 = vmul.f32 %v6247_v52, %v3971_v49  ;;  %6254 = vpow2.f32 %v3164_v55 }
 0x4e2   : > { %6256 = vpow2.f32 %v3166_v48  ;;  %v3578_v51 = vadd.f32 %v9595_v37, %v9592_v41  ;;  %v4296_v29 = vmul.f32 %v9261_v34, %v4098_v60  ;;  %v4297_v8 = vmul.f32 %v11347_v38, %v4098_v60  ;;  %4519 = vmatmul.f32.gmra.mxu2 %v505_v26  ;;  %4437 = vmatmul.f32.gmra.mxu0 %v505_v26  ;;  %v11348_v48 = vld [vmem:[#allocation62_spill] sm:$0xff] }
 0x4e3   : > { %6258 = vpow2.f32 %v3168_v10  ;;  %v4298_v50 = vmul.f32 %v9242_v4, %v4099_v58  ;;  %v4299_v25 = vmul.f32 %v9247_v30, %v4099_v58  ;;  %v11349_v10 = vld [vmem:[#allocation52_spill] sm:$0xff]  ;;  %v11353_v38 = vld [vmem:[#allocation70_spill] sm:$0xff] }
 0x4e4   : > { %v6253_v20 = vpop.eup %6252  ;;  %6260 = vpow2.f32 %v3170_v54  ;;  %3579 = vadd.xlane.f32.xlu2 %v3578_v51  ;;  %v3511_v0 = vpop.xlane.xlu1 %3510 }
 0x4e5   : > { %v3514_v2 = vpop.xlane.xlu2 %3513  ;;  %v3857_v22 = vmul.f32 %v6253_v20, %v3517_v28  ;;  %6262 = vrcp.f32 %v3511_v0  ;;  %4748 = vmatpush.xpose.msra.mxu0 %v4298_v50  ;;  %4789 = vmatpush.xpose.msra.mxu1 %v4299_v25  ;;  %v2467_v52 = vpop.xlane.xlu0 %2466  ;;  %v11350_v25 = vld [vmem:[#allocation208_spill] sm:$0xff] }
 0x4e6   : > { %6264 = vrcp.f32 %v3514_v2  ;;  %v2730_v23 = vsub.f32 %v11239_v21, %v2467_v52  ;;  %v2731_v36 = vsub.f32 %v11238_v40, %v2467_v52  ;;  %4560 = vmatmul.f32.gmra.mxu3 %v506_v12 }
 0x4e7   : > { %v9603_v4 = vpop.eup %6254  ;;  %v3985_v30 = vsub.f32 2.0, %v3857_v22  ;;  %4478 = vmatmul.f32.gmra.mxu1 %v506_v12  ;;  %v11351_v22 = vld [vmem:[#allocation135_spill] sm:$0xff] }
 0x4e8   : > { %v9609_v11 = vpop.eup %6256  ;;  %v3224_v28 = vmul.f32 1.442695, %v2730_v23  ;;  %v3226_v7 = vmul.f32 1.442695, %v2731_v36  ;;  %v11352_v23 = vld [vmem:[#allocation126_spill] sm:$0xff] }
 0x4e9   : > { %v9611_v16 = vpop.eup %6258  ;;  %v4113_v49 = vmul.f32 %v6253_v20, %v3985_v30  ;;  %4749 = vmatpush.xpose.msra.mxu0 %v4296_v29  ;;  %4790 = vmatpush.xpose.msra.mxu1 %v4297_v8  ;;  %v3572_v40 = vadd.f32 %v9609_v11, %v9603_v4 }
 0x4ea   : > { %v9615_v21 = vpop.eup %6260  ;;  %6266 = vpow2.f32 %v3224_v28  ;;  %v507_v28 = vld [vmem:[%s9191_s18 + $0x40] sm:$0xff] }
 0x4eb   : > { %v6263_v34 = vpop.eup %6262  ;;  %6268 = vpow2.f32 %v3226_v7  ;;  %v3575_v55 = vadd.f32 %v9615_v21, %v9611_v16  ;;  %3573 = vadd.xlane.f32.xlu1 %v3572_v40  ;;  %v4326_v47 = vmul.f32 %v11348_v48, %v4113_v49  ;;  %v4327_v54 = vmul.f32 %v11349_v10, %v4113_v49  ;;  %4522 = vmatmul.f32.gmra.mxu2 %v507_v28  ;;  %v508_v40 = vld [vmem:[%s9191_s18 + $0x48] sm:$0xff] }
 0x4ec   : > { %v6265_v57 = vpop.eup %6264  ;;  %v3855_v58 = vmul.f32 %v6263_v34, %v3511_v0  ;;  %v2461_v51 = vpop.xlane.xlu1 %2460  ;;  %4440 = vmatmul.f32.gmra.mxu0 %v507_v28  ;;  %v509_v28 = vld [vmem:[%s9191_s18 + $0x50] sm:$0xff] }
 0x4ed   : > { %v2464_v60 = vpop.xlane.xlu2 %2463  ;;  %v3856_v50 = vmul.f32 %v6265_v57, %v3514_v2  ;;  %3576 = vadd.xlane.f32.xlu0 %v3575_v55  ;;  %v2726_v20 = vsub.f32 %v11350_v25, %v2461_v51  ;;  %v2727_v52 = vsub.f32 %v11351_v22, %v2461_v51  ;;  %v3469_v30 = vpop.xlane.xlu0 %3468  ;;  %4832 = vmatpush.xpose.msra.mxu2 %v4326_v47  ;;  %v11355_v51 = vld [vmem:[#allocation182_spill] sm:$0xff] }
 0x4ee   : > { %v2728_v36 = vsub.f32 %v11352_v23, %v2464_v60  ;;  %v3983_v29 = vsub.f32 2.0, %v3855_v58  ;;  %v2729_v8 = vsub.f32 %v11353_v38, %v2464_v60  ;;  %4873 = vmatpush.xpose.msra.mxu3 %v4327_v54  ;;  %6270 = vrcp.f32 %v3469_v30  ;;  %v11354_v54 = vld [vmem:[#allocation114_spill] sm:$0xff]  ;;  %v11357_v23 = vld [vmem:[#allocation184_spill] sm:$0xff] }
 0x4ef   : > { %v3984_v0 = vsub.f32 2.0, %v3856_v50  ;;  %v3216_v26 = vmul.f32 1.442695, %v2726_v20  ;;  %v3218_v12 = vmul.f32 1.442695, %v2727_v52  ;;  %4563 = vmatmul.f32.gmra.mxu3 %v508_v40  ;;  %4481 = vmatmul.f32.gmra.mxu1 %v508_v40 }
 0x4f0   : > { %v9626_v2 = vpop.eup %6266  ;;  %v3220_v7 = vmul.f32 1.442695, %v2728_v36  ;;  %v3222_v49 = vmul.f32 1.442695, %v2729_v8  ;;  %v4111_v10 = vmul.f32 %v6263_v34, %v3983_v29  ;;  %v11356_v34 = vld [vmem:[#allocation113_spill] sm:$0xff] }
 0x4f1   : > { %v9629_v55 = vpop.eup %6268  ;;  %v4112_v48 = vmul.f32 %v6265_v57, %v3984_v0  ;;  %6272 = vpow2.f32 %v3216_v26  ;;  %v11358_v8 = vld [vmem:[#allocation53_spill] sm:$0xff]  ;;  %v11359_v26 = vld [vmem:[#allocation119_spill] sm:$0xff] }
 0x4f2   : > { %6274 = vpow2.f32 %v3218_v12  ;;  %v3617_v47 = vadd.f32 %v9629_v55, %v9626_v2  ;;  %v4322_v0 = vmul.f32 %v11358_v8, %v4111_v10  ;;  %v4323_v12 = vmul.f32 %v11359_v26, %v4111_v10  ;;  %v11363_v8 = vld [vmem:[#allocation176_spill] sm:$0xff]  ;;  %v11364_v26 = vld [vmem:[#allocation177_spill] sm:$0xff] }
 0x4f3   : > { %6276 = vpow2.f32 %v3220_v7  ;;  %v4324_v58 = vmul.f32 %v11354_v54, %v4112_v48  ;;  %v4325_v60 = vmul.f32 %v11355_v51, %v4112_v48  ;;  %v510_v7 = vld [vmem:[%s9191_s18 + $0x58] sm:$0xff]  ;;  %4525 = vmatmul.f32.gmra.mxu2 %v509_v28 }
 0x4f4   : > { %v6271_v50 = vpop.eup %6270  ;;  %6278 = vpow2.f32 %v3222_v49  ;;  %3618 = vadd.xlane.f32.xlu2 %v3617_v47  ;;  %v3463_v57 = vpop.xlane.xlu1 %3462  ;;  %4443 = vmatmul.f32.gmra.mxu0 %v509_v28  ;;  %v11365_v28 = vld [vmem:[#allocation108_spill] sm:$0xff] }
 0x4f5   : > { %v3466_v25 = vpop.xlane.xlu2 %3465  ;;  %v3841_v20 = vmul.f32 %v6271_v50, %v3469_v30  ;;  %6280 = vrcp.f32 %v3463_v57  ;;  %4833 = vmatpush.xpose.msra.mxu2 %v4324_v58  ;;  %4874 = vmatpush.xpose.msra.mxu3 %v4325_v60  ;;  %v2419_v22 = vpop.xlane.xlu0 %2418  ;;  %v11361_v60 = vld [vmem:[#allocation183_spill] sm:$0xff] }
 0x4f6   : > { %6282 = vrcp.f32 %v3466_v25  ;;  %v2698_v52 = vsub.f32 %v11356_v34, %v2419_v22  ;;  %v2699_v36 = vsub.f32 %v11357_v23, %v2419_v22  ;;  %v11362_v22 = vld [vmem:[#allocation138_spill] sm:$0xff] }
 0x4f7   : > { %v9637_v29 = vpop.eup %6272  ;;  %v3969_v38 = vsub.f32 2.0, %v3841_v20  ;;  %4566 = vmatmul.f32.gmra.mxu3 %v510_v7  ;;  %4484 = vmatmul.f32.gmra.mxu1 %v510_v7 }
 0x4f8   : > { %v9643_v49 = vpop.eup %6274  ;;  %v3160_v30 = vmul.f32 1.442695, %v2698_v52  ;;  %v3162_v40 = vmul.f32 1.442695, %v2699_v36 }
 0x4f9   : > { %11360 = vst [vmem:[#allocation232_spill] sm:$0xff] %v9643_v49  ;;  %v9645_v48 = vpop.eup %6276  ;;  %v4097_v47 = vmul.f32 %v6271_v50, %v3969_v38  ;;  %4834 = vmatpush.xpose.msra.mxu2 %v4322_v0  ;;  %4875 = vmatpush.xpose.msra.mxu3 %v4323_v12  ;;  %v3611_v54 = vadd.f32 %v9643_v49, %v9637_v29 }
 0x4fa   : > { %v9649_v58 = vpop.eup %6278  ;;  %6284 = vpow2.f32 %v3160_v30 }
 0x4fb   : > { %v6281_v10 = vpop.eup %6280  ;;  %6286 = vpow2.f32 %v3162_v40  ;;  %v3614_v51 = vadd.f32 %v9649_v58, %v9645_v48  ;;  %3612 = vadd.xlane.f32.xlu1 %v3611_v54  ;;  %v4294_v20 = vmul.f32 %v11361_v60, %v4097_v47  ;;  %v4295_v50 = vmul.f32 %v11362_v22, %v4097_v47  ;;  %v11366_v60 = vld [vmem:[#allocation179_spill] sm:$0xff]  ;;  %v511_v22 = vld [vmem:[%s9191_s18 + $0x60] sm:$0xff] }
 0x4fc   : > { %v6283_v34 = vpop.eup %6282  ;;  %v3839_v52 = vmul.f32 %v6281_v10, %v3463_v57  ;;  %v2413_v23 = vpop.xlane.xlu1 %2412  ;;  %4528 = vmatmul.f32.gmra.mxu2 %v511_v22  ;;  %4446 = vmatmul.f32.gmra.mxu0 %v511_v22 }
 0x4fd   : > { %v2416_v36 = vpop.xlane.xlu2 %2415  ;;  %v3840_v38 = vmul.f32 %v6283_v34, %v3466_v25  ;;  %3615 = vadd.xlane.f32.xlu0 %v3614_v51  ;;  %v2694_v0 = vsub.f32 %v11363_v8, %v2413_v23  ;;  %v2695_v12 = vsub.f32 %v11364_v26, %v2413_v23  ;;  %v3508_v40 = vpop.xlane.xlu0 %3507  ;;  %4750 = vmatpush.xpose.msra.mxu0 %v4294_v20  ;;  %v512_v23 = vld [vmem:[%s9191_s18 + $0x68] sm:$0xff] }
 0x4fe   : > { %v2696_v30 = vsub.f32 %v11365_v28, %v2416_v36  ;;  %v3967_v54 = vsub.f32 2.0, %v3839_v52  ;;  %v2697_v49 = vsub.f32 %v11366_v60, %v2416_v36  ;;  %4791 = vmatpush.xpose.msra.mxu1 %v4295_v50  ;;  %6288 = vrcp.f32 %v3508_v40  ;;  %v11369_v52 = vld [vmem:[#allocation141_spill] sm:$0xff] }
 0x4ff   : > { %v3968_v57 = vsub.f32 2.0, %v3840_v38  ;;  %v3152_v7 = vmul.f32 1.442695, %v2694_v0  ;;  %v3154_v47 = vmul.f32 1.442695, %v2695_v12  ;;  %4569 = vmatmul.f32.gmra.mxu3 %v512_v23  ;;  %v11370_v38 = vld [vmem:[#allocation118_spill] sm:$0xff]  ;;  %4487 = vmatmul.f32.gmra.mxu1 %v512_v23 }
 0x500   : > { %v9660_v25 = vpop.eup %6284  ;;  %v3156_v51 = vmul.f32 1.442695, %v2696_v30  ;;  %v3158_v8 = vmul.f32 1.442695, %v2697_v49  ;;  %v4095_v50 = vmul.f32 %v6281_v10, %v3967_v54  ;;  %v11371_v10 = vld [vmem:[#allocation50_spill] sm:$0xff] }
 0x501   : > { %11367 = vst [vmem:[#allocation241_spill] sm:$0xff] %v9660_v25  ;;  %v9663_v26 = vpop.eup %6286  ;;  %v4096_v28 = vmul.f32 %v6283_v34, %v3968_v57  ;;  %6290 = vpow2.f32 %v3152_v7  ;;  %v11372_v57 = vld [vmem:[#allocation139_spill] sm:$0xff]  ;;  %v11375_v23 = vld [vmem:[#allocation110_spill] sm:$0xff] }
 0x502   : > { %11368 = vst [vmem:[#allocation242_spill] sm:$0xff] %v9663_v26  ;;  %6292 = vpow2.f32 %v3154_v47  ;;  %v3569_v20 = vadd.f32 %v9663_v26, %v9660_v25 }
 0x503   : > { %6294 = vpow2.f32 %v3156_v51  ;;  %v4292_v36 = vmul.f32 %v11369_v52, %v4096_v28  ;;  %v4293_v0 = vmul.f32 %v11370_v38, %v4096_v28  ;;  %v11374_v51 = vld [vmem:[#allocation48_spill] sm:$0xff]  ;;  %v4291_v28 = vmul.f32 %v11375_v23, %v4095_v50  ;;  %v514_v52 = vld [vmem:[%s9191_s18 + $0x78] sm:$0xff] }
 0x504   : > { %v6289_v49 = vpop.eup %6288  ;;  %6296 = vpow2.f32 %v3158_v8  ;;  %3570 = vadd.xlane.f32.xlu2 %v3569_v20  ;;  %v3502_v34 = vpop.xlane.xlu1 %3501  ;;  %v4290_v8 = vmul.f32 %v11374_v51, %v4095_v50  ;;  %v513_v20 = vld [vmem:[%s9191_s18 + $0x70] sm:$0xff] }
 0x505   : > { %v3505_v12 = vpop.xlane.xlu2 %3504  ;;  %v3854_v30 = vmul.f32 %v6289_v49, %v3508_v40  ;;  %6298 = vrcp.f32 %v3502_v34  ;;  %4751 = vmatpush.xpose.msra.mxu0 %v4292_v36  ;;  %4792 = vmatpush.xpose.msra.mxu1 %v4293_v0  ;;  %v2458_v60 = vpop.xlane.xlu0 %2457 }
 0x506   : > { %6300 = vrcp.f32 %v3505_v12  ;;  %v2724_v54 = vsub.f32 %v11371_v10, %v2458_v60  ;;  %v2725_v7 = vsub.f32 %v11372_v57, %v2458_v60  ;;  %4531 = vmatmul.f32.gmra.mxu2 %v513_v20  ;;  %4449 = vmatmul.f32.gmra.mxu0 %v513_v20 }
 0x507   : > { %v9671_v47 = vpop.eup %6290  ;;  %v3982_v22 = vsub.f32 2.0, %v3854_v30  ;;  %4572 = vmatmul.f32.gmra.mxu3 %v514_v52  ;;  %4490 = vmatmul.f32.gmra.mxu1 %v514_v52 }
 0x508   : > { %11373 = vst [vmem:[#allocation243_spill] sm:$0xff] %v9671_v47  ;;  %v9677_v38 = vpop.eup %6292  ;;  %v3212_v40 = vmul.f32 1.442695, %v2724_v54  ;;  %v3214_v36 = vmul.f32 1.442695, %v2725_v7  ;;  %v11379_v54 = vld [vmem:[#allocation133_spill] sm:$0xff] }
 0x509   : > { %11376 = vst [vmem:[#allocation103_spill] sm:$0xff] %v9677_v38  ;;  %v9679_v0 = vpop.eup %6294  ;;  %v4110_v26 = vmul.f32 %v6289_v49, %v3982_v22  ;;  %4752 = vmatpush.xpose.msra.mxu0 %v4290_v8  ;;  %4793 = vmatpush.xpose.msra.mxu1 %v4291_v28  ;;  %v3563_v60 = vadd.f32 %v9677_v38, %v9671_v47  ;;  %v11380_v7 = vld [vmem:[#allocation109_spill] sm:$0xff]  ;;  %v11382_v38 = vld [vmem:[#allocation72_spill] sm:$0xff] }
 0x50a   : > { %11377 = vst [vmem:[#allocation237_spill] sm:$0xff] %v9679_v0  ;;  %v9683_v30 = vpop.eup %6296  ;;  %6302 = vpow2.f32 %v3212_v40  ;;  %v11381_v40 = vld [vmem:[#allocation78_spill] sm:$0xff]  ;;  %v11383_v47 = vld [vmem:[#allocation68_spill] sm:$0xff] }
 0x50b   : > { %11378 = vst [vmem:[#allocation239_spill] sm:$0xff] %v9683_v30  ;;  %v6299_v50 = vpop.eup %6298  ;;  %6304 = vpow2.f32 %v3214_v36  ;;  %v3566_v10 = vadd.f32 %v9683_v30, %v9679_v0  ;;  %3564 = vadd.xlane.f32.xlu1 %v3563_v60  ;;  %v4320_v57 = vmul.f32 %v11379_v54, %v4110_v26  ;;  %v4321_v49 = vmul.f32 %v11380_v7, %v4110_v26  ;;  %v11384_v54 = vld [vmem:[#allocation258_spill] sm:$0xff] }
 0x50c   : > { %v6301_v22 = vpop.eup %6300  ;;  %v3852_v51 = vmul.f32 %v6299_v50, %v3502_v34  ;;  %v2452_v8 = vpop.xlane.xlu1 %2451  ;;  %v515_v7 = vld [vmem:[%s9191_s18 + $0x80] sm:$0xff] }
 0x50d   : > { %v2455_v23 = vpop.xlane.xlu2 %2454  ;;  %v3853_v28 = vmul.f32 %v6301_v22, %v3505_v12  ;;  %3567 = vadd.xlane.f32.xlu0 %v3566_v10  ;;  %v2720_v20 = vsub.f32 %v11381_v40, %v2452_v8  ;;  %v2721_v36 = vsub.f32 %v11382_v38, %v2452_v8  ;;  %v3460_v60 = vpop.xlane.xlu0 %3459  ;;  %4835 = vmatpush.xpose.msra.mxu2 %v4320_v57  ;;  %v516_v38 = vld [vmem:[%s9191_s18 + $0x88] sm:$0xff] }
 0x50e   : > { %v2722_v30 = vsub.f32 %v11383_v47, %v2455_v23  ;;  %v3980_v0 = vsub.f32 2.0, %v3852_v51  ;;  %v2723_v25 = vsub.f32 %v11384_v54, %v2455_v23  ;;  %4876 = vmatpush.xpose.msra.mxu3 %v4321_v49  ;;  %6306 = vrcp.f32 %v3460_v60  ;;  %4674 = vmatmul.f32.vlgmr.msrb.gmra.mxu2 %v515_v7  ;;  %v11385_v51 = vld [vmem:[#allocation218_spill] sm:$0xff] }
 0x50f   : > { %v3981_v26 = vsub.f32 2.0, %v3853_v28  ;;  %v3204_v34 = vmul.f32 1.442695, %v2720_v20  ;;  %v3206_v52 = vmul.f32 1.442695, %v2721_v36  ;;  %4715 = vmatmul.f32.vlgmr.msrb.gmra.mxu3 %v516_v38  ;;  %4592 = vmatmul.f32.vlgmr.msrb.gmra.mxu0 %v515_v7  ;;  %v11386_v28 = vld [vmem:[#allocation32_spill] sm:$0xff] }
 0x510   : > { %v9694_v12 = vpop.eup %6302  ;;  %v3208_v10 = vmul.f32 1.442695, %v2722_v30  ;;  %v3210_v40 = vmul.f32 1.442695, %v2723_v25  ;;  %v4108_v49 = vmul.f32 %v6299_v50, %v3980_v0  ;;  %4633 = vmatmul.f32.vlgmr.msrb.gmra.mxu1 %v516_v38  ;;  %v11388_v0 = vld [vmem:[#allocation172_spill] sm:$0xff] }
 0x511   : > { %v9697_v8 = vpop.eup %6304  ;;  %v4109_v47 = vmul.f32 %v6301_v22, %v3981_v26  ;;  %6308 = vpow2.f32 %v3204_v34  ;;  %v11387_v26 = vld [vmem:[#allocation91_spill] sm:$0xff] }
 0x512   : > { %6310 = vpow2.f32 %v3206_v52  ;;  %v3608_v57 = vadd.f32 %v9697_v8, %v9694_v12 }
 0x513   : > { %6312 = vpow2.f32 %v3208_v10  ;;  %v4318_v23 = vmul.f32 %v11385_v51, %v4109_v47  ;;  %v4319_v20 = vmul.f32 %v11386_v28, %v4109_v47  ;;  %v11390_v10 = vld [vmem:[#allocation44_spill] sm:$0xff]  ;;  %v11391_v47 = vld [vmem:[#allocation39_spill] sm:$0xff] }
 0x514   : > { %v6307_v25 = vpop.eup %6306  ;;  %6314 = vpow2.f32 %v3210_v40  ;;  %3609 = vadd.xlane.f32.xlu2 %v3608_v57  ;;  %v3454_v30 = vpop.xlane.xlu1 %3453  ;;  %v4316_v38 = vmul.f32 %v11390_v10, %v4108_v49  ;;  %v4317_v40 = vmul.f32 %v11391_v47, %v4108_v49 }
 0x515   : > { %v3457_v36 = vpop.xlane.xlu2 %3456  ;;  %v3838_v22 = vmul.f32 %v6307_v25, %v3460_v60  ;;  %6316 = vrcp.f32 %v3454_v30  ;;  %4836 = vmatpush.xpose.msra.mxu2 %v4318_v23  ;;  %4877 = vmatpush.xpose.msra.mxu3 %v4319_v20  ;;  %v2410_v54 = vpop.xlane.xlu0 %2409 }
 0x516   : > { %6318 = vrcp.f32 %v3457_v36  ;;  %v2692_v34 = vsub.f32 %v11387_v26, %v2410_v54  ;;  %v2693_v50 = vsub.f32 %v11388_v0, %v2410_v54  ;;  %v11393_v26 = vld [vmem:[#allocation130_spill] sm:$0xff] }
 0x517   : > { %v9705_v52 = vpop.eup %6308  ;;  %v3966_v7 = vsub.f32 2.0, %v3838_v22  ;;  %v11394_v0 = vld [vmem:[#allocation102_spill] sm:$0xff] }
 0x518   : > { %11389 = vst [vmem:[#allocation238_spill] sm:$0xff] %v9705_v52  ;;  %v9709_v57 = vpop.eup %6310  ;;  %v3148_v51 = vmul.f32 1.442695, %v2692_v34  ;;  %v3150_v60 = vmul.f32 1.442695, %v2693_v50 }
 0x519   : > { %11392 = vst [vmem:[#allocation240_spill] sm:$0xff] %v9709_v57  ;;  %v9711_v28 = vpop.eup %6312  ;;  %v4094_v23 = vmul.f32 %v6307_v25, %v3966_v7  ;;  %4837 = vmatpush.xpose.msra.mxu2 %v4316_v38  ;;  %4878 = vmatpush.xpose.msra.mxu3 %v4317_v40  ;;  %v3602_v20 = vadd.f32 %v9709_v57, %v9705_v52 }
 0x51a   : > { %v9715_v54 = vpop.eup %6314  ;;  %6320 = vpow2.f32 %v3148_v51 }
 0x51b   : > { %v6317_v22 = vpop.eup %6316  ;;  %6322 = vpow2.f32 %v3150_v60  ;;  %v3605_v49 = vadd.f32 %v9715_v54, %v9711_v28  ;;  %3603 = vadd.xlane.f32.xlu1 %v3602_v20  ;;  %v4288_v34 = vmul.f32 %v11393_v26, %v4094_v23  ;;  %v4289_v50 = vmul.f32 %v11394_v0, %v4094_v23 }
 0x51c   : > { %v6319_v10 = vpop.eup %6318  ;;  %v3836_v25 = vmul.f32 %v6317_v22, %v3454_v30  ;;  %v2404_v38 = vpop.xlane.xlu1 %2403 }
 0x51d   : > { %v3837_v7 = vmul.f32 %v6319_v10, %v3457_v36  ;;  %3606 = vadd.xlane.f32.xlu0 %v3605_v49  ;;  %4753 = vmatpush.xpose.msra.mxu0 %v4288_v34  ;;  %v3643_v47 = vpop.xlane.xlu0 %3642  ;;  %v2688_v40 = vsub.f32 %v11308_v44, %v2404_v38  ;;  %v2689_v51 = vsub.f32 %v11307_v1, %v2404_v38  ;;  %v2407_v60 = vpop.xlane.xlu2 %2406 }
 0x51e   : > { %4794 = vmatpush.xpose.msra.mxu1 %v4289_v50  ;;  %6324 = vrcp.f32 %v3643_v47  ;;  %v3964_v57 = vsub.f32 2.0, %v3836_v25  ;;  %v2690_v26 = vsub.f32 %v11312_v53, %v2407_v60  ;;  %v2691_v23 = vsub.f32 %v11311_v14, %v2407_v60  ;;  %v11395_v25 = vld [vmem:[#allocation36_spill] sm:$0xff] }
 0x51f   : > { %v3965_v20 = vsub.f32 2.0, %v3837_v7  ;;  %v3140_v30 = vmul.f32 1.442695, %v2688_v40  ;;  %v3142_v36 = vmul.f32 1.442695, %v2689_v51  ;;  %v11396_v53 = vld [vmem:[#allocation224_spill] sm:$0xff] }
 0x520   : > { %v9725_v0 = vpop.eup %6320  ;;  %v3144_v52 = vmul.f32 1.442695, %v2690_v26  ;;  %v3146_v44 = vmul.f32 1.442695, %v2691_v23  ;;  %v4092_v50 = vmul.f32 %v6317_v22, %v3964_v57  ;;  %v11397_v22 = vld [vmem:[#allocation225_spill] sm:$0xff] }
 0x521   : > { %v9727_v49 = vpop.eup %6322  ;;  %v4093_v34 = vmul.f32 %v6319_v10, %v3965_v20  ;;  %6326 = vpow2.f32 %v3140_v30  ;;  %v11398_v30 = vld [vmem:[#allocation220_spill] sm:$0xff] }
 0x522   : > { %v3560_v1 = vadd.f32 %v9727_v49, %v9725_v0  ;;  %6328 = vpow2.f32 %v3142_v36  ;;  %v4284_v23 = vmul.f32 %v11397_v22, %v4092_v50  ;;  %v4285_v36 = vmul.f32 %v11398_v30, %v4092_v50 }
 0x523   : > { %v4286_v7 = vmul.f32 %v11395_v25, %v4093_v34  ;;  %v4287_v38 = vmul.f32 %v11396_v53, %v4093_v34  ;;  %6330 = vpow2.f32 %v3144_v52  ;;  %v11400_v53 = vld [vmem:[#allocation223_spill] sm:$0xff] }
 0x524   : > { %v6325_v14 = vpop.eup %6324  ;;  %3561 = vadd.xlane.f32.xlu2 %v3560_v1  ;;  %6332 = vpow2.f32 %v3146_v44 }
 0x525   : > { %v3899_v40 = vmul.f32 %v6325_v14, %v3643_v47  ;;  %4754 = vmatpush.xpose.msra.mxu0 %v4286_v7  ;;  %4795 = vmatpush.xpose.msra.mxu1 %v4287_v38  ;;  %v2449_v10 = vpop.xlane.xlu0 %2448  ;;  %v3640_v51 = vpop.xlane.xlu2 %3639  ;;  %v11399_v7 = vld [vmem:[#allocation221_spill] sm:$0xff] }
 0x526   : > { %v2718_v60 = vsub.f32 %v11320_v46, %v2449_v10  ;;  %v2719_v20 = vsub.f32 %v11319_v33, %v2449_v10  ;;  %6334 = vrcp.f32 %v3640_v51 }
 0x527   : > { %v4027_v26 = vsub.f32 2.0, %v3899_v40  ;;  %v3637_v57 = vpop.xlane.xlu1 %3636  ;;  %v9737_v34 = vpop.eup %6326 }
 0x528   : > { %v3200_v52 = vmul.f32 1.442695, %v2718_v60  ;;  %v3202_v44 = vmul.f32 1.442695, %v2719_v20  ;;  %6336 = vrcp.f32 %v3637_v57  ;;  %v9739_v47 = vpop.eup %6328 }
 0x529   : > { %v4155_v1 = vmul.f32 %v6325_v14, %v4027_v26  ;;  %4755 = vmatpush.xpose.msra.mxu0 %v4284_v23  ;;  %4796 = vmatpush.xpose.msra.mxu1 %v4285_v36  ;;  %v9741_v46 = vpop.eup %6330  ;;  %v3554_v33 = vadd.f32 %v9739_v47, %v9737_v34 }
 0x52a   : > { %6338 = vpow2.f32 %v3200_v52  ;;  %v9745_v25 = vpop.eup %6332 }
 0x52b   : > { %v4410_v50 = vmul.f32 %v11399_v7, %v4155_v1  ;;  %v4411_v38 = vmul.f32 %v11400_v53, %v4155_v1  ;;  %6340 = vpow2.f32 %v3202_v44  ;;  %v3557_v40 = vadd.f32 %v9745_v25, %v9741_v46  ;;  %3555 = vadd.xlane.f32.xlu1 %v3554_v33 }
 0x52c   : > { %v6335_v14 = vpop.eup %6334 }
 0x52d   : > { %4986 = vmatpush.xpose.msrb.mxu2 %v4410_v50  ;;  %5027 = vmatpush.xpose.msrb.mxu3 %v4411_v38  ;;  %v3595_v10 = vpop.xlane.xlu0 %3594  ;;  %v3898_v20 = vmul.f32 %v6335_v14, %v3640_v51  ;;  %v2446_v26 = vpop.xlane.xlu2 %2445 }
 0x52e   : > { %v6337_v60 = vpop.eup %6336  ;;  %3558 = vadd.xlane.f32.xlu0 %v3557_v40  ;;  %6342 = vrcp.f32 %v3595_v10  ;;  %v2716_v23 = vsub.f32 %v11332_v13, %v2446_v26  ;;  %v2717_v30 = vsub.f32 %v11331_v32, %v2446_v26  ;;  %v517_v26 = vld [vmem:[%s9191_s18 + $0x90] sm:$0xff] }
 0x52f   : > { %v3897_v22 = vmul.f32 %v6337_v60, %v3637_v57  ;;  %v4026_v52 = vsub.f32 2.0, %v3898_v20  ;;  %v3634_v44 = vpop.xlane.xlu1 %3633  ;;  %4677 = vmatmul.f32.gmra.mxu2 %v517_v26  ;;  %4595 = vmatmul.f32.gmra.mxu0 %v517_v26 }
 0x530   : > { %v9753_v36 = vpop.eup %6338  ;;  %v3196_v7 = vmul.f32 1.442695, %v2716_v23  ;;  %v3198_v50 = vmul.f32 1.442695, %v2717_v30  ;;  %6344 = vrcp.f32 %v3634_v44 }
 0x531   : > { %v9755_v1 = vpop.eup %6340  ;;  %v4025_v33 = vsub.f32 2.0, %v3897_v22  ;;  %v4154_v51 = vmul.f32 %v6335_v14, %v4026_v52  ;;  %v518_v22 = vld [vmem:[%s9191_s18 + $0x98] sm:$0xff] }
 0x532   : > { %v3599_v57 = vadd.f32 %v9755_v1, %v9753_v36  ;;  %6346 = vpow2.f32 %v3196_v7  ;;  %4718 = vmatmul.f32.gmra.mxu3 %v518_v22  ;;  %4636 = vmatmul.f32.gmra.mxu1 %v518_v22  ;;  %v519_v22 = vld [vmem:[%s9191_s18 + $0xa0] sm:$0xff] }
 0x533   : > { %v4153_v53 = vmul.f32 %v6337_v60, %v4025_v33  ;;  %6348 = vpow2.f32 %v3198_v50  ;;  %v4408_v32 = vmul.f32 %v9463_v56, %v4154_v51  ;;  %v4409_v38 = vmul.f32 %v9470_v39, %v4154_v51  ;;  %v11401_v50 = vld [vmem:[#allocation87_spill] sm:$0xff] }
 0x534   : > { %v6343_v13 = vpop.eup %6342  ;;  %3600 = vadd.xlane.f32.xlu2 %v3599_v57 }
 0x535   : > { %v3883_v40 = vmul.f32 %v6343_v13, %v3595_v10  ;;  %v2401_v20 = vpop.xlane.xlu0 %2400  ;;  %v3592_v23 = vpop.xlane.xlu2 %3591  ;;  %4987 = vmatpush.xpose.msrb.mxu2 %v4408_v32  ;;  %5028 = vmatpush.xpose.msrb.mxu3 %v4409_v38  ;;  %v4406_v33 = vmul.f32 %v9475_v31, %v4153_v53  ;;  %v4407_v51 = vmul.f32 %v11401_v50, %v4153_v53  ;;  %v11402_v31 = vld [vmem:[#allocation95_spill] sm:$0xff]  ;;  %v11403_v38 = vld [vmem:[#allocation230_spill] sm:$0xff] }
 0x536   : > { %v2686_v14 = vsub.f32 %v11340_v3, %v2401_v20  ;;  %v2687_v30 = vsub.f32 %v11339_v24, %v2401_v20  ;;  %v6345_v60 = vpop.eup %6344  ;;  %6350 = vrcp.f32 %v3592_v23 }
 0x537   : > { %v4011_v52 = vsub.f32 2.0, %v3883_v40  ;;  %v3896_v56 = vmul.f32 %v6345_v60, %v3634_v44  ;;  %v3631_v7 = vpop.xlane.xlu1 %3630  ;;  %4680 = vmatmul.f32.gmra.mxu2 %v519_v22  ;;  %4598 = vmatmul.f32.gmra.mxu0 %v519_v22 }
 0x538   : > { %v3136_v39 = vmul.f32 1.442695, %v2686_v14  ;;  %v3138_v10 = vmul.f32 1.442695, %v2687_v30  ;;  %v9767_v57 = vpop.eup %6346  ;;  %6352 = vrcp.f32 %v3631_v7  ;;  %v520_v14 = vld [vmem:[%s9191_s18 + $0xa8] sm:$0xff] }
 0x539   : > { %v4139_v3 = vmul.f32 %v6343_v13, %v4011_v52  ;;  %v9769_v24 = vpop.eup %6348  ;;  %v4024_v32 = vsub.f32 2.0, %v3896_v56  ;;  %4988 = vmatpush.xpose.msrb.mxu2 %v4406_v33  ;;  %5029 = vmatpush.xpose.msrb.mxu3 %v4407_v51  ;;  %v11405_v51 = vld [vmem:[#allocation235_spill] sm:$0xff] }
 0x53a   : > { %6354 = vpow2.f32 %v3136_v39  ;;  %v3596_v53 = vadd.f32 %v9769_v24, %v9767_v57  ;;  %v11404_v39 = vld [vmem:[#allocation234_spill] sm:$0xff]  ;;  %4721 = vmatmul.f32.gmra.mxu3 %v520_v14  ;;  %4639 = vmatmul.f32.gmra.mxu1 %v520_v14 }
 0x53b   : > { %v4378_v44 = vmul.f32 %v11402_v31, %v4139_v3  ;;  %v4379_v40 = vmul.f32 %v11403_v38, %v4139_v3  ;;  %6356 = vpow2.f32 %v3138_v10  ;;  %v4152_v20 = vmul.f32 %v6345_v60, %v4024_v32 }
 0x53c   : > { %v6351_v26 = vpop.eup %6350  ;;  %3597 = vadd.xlane.f32.xlu0 %v3596_v53 }
 0x53d   : > { %4904 = vmatpush.xpose.msrb.mxu0 %v4378_v44  ;;  %v2398_v13 = vpop.xlane.xlu0 %2397  ;;  %v3882_v30 = vmul.f32 %v6351_v26, %v3592_v23  ;;  %v3589_v52 = vpop.xlane.xlu2 %3588  ;;  %4945 = vmatpush.xpose.msrb.mxu1 %v4379_v40  ;;  %v4404_v50 = vmul.f32 %v11404_v39, %v4152_v20  ;;  %v4405_v3 = vmul.f32 %v11405_v51, %v4152_v20 }
 0x53e   : > { %v2684_v33 = vsub.f32 %v11345_v15, %v2398_v13  ;;  %v2685_v56 = vsub.f32 %v11344_v35, %v2398_v13  ;;  %v6353_v10 = vpop.eup %6352  ;;  %6358 = vrcp.f32 %v3589_v52 }
 0x53f   : > { %v4010_v32 = vsub.f32 2.0, %v3882_v30  ;;  %v3895_v31 = vmul.f32 %v6353_v10, %v3631_v7  ;;  %v3583_v38 = vpop.xlane.xlu1 %3582  ;;  %4989 = vmatpush.xpose.msrb.mxu2 %v4404_v50  ;;  %5030 = vmatpush.xpose.msrb.mxu3 %v4405_v3  ;;  %v11407_v50 = vld [vmem:[#allocation247_spill] sm:$0xff] }
 0x540   : > { %v9781_v60 = vpop.eup %6354  ;;  %v3132_v44 = vmul.f32 1.442695, %v2684_v33  ;;  %v3134_v23 = vmul.f32 1.442695, %v2685_v56  ;;  %6360 = vrcp.f32 %v3583_v38  ;;  %v521_v33 = vld [vmem:[%s9191_s18 + $0xb0] sm:$0xff]  ;;  %v522_v56 = vld [vmem:[%s9191_s18 + $0xb8] sm:$0xff] }
 0x541   : > { %v9783_v15 = vpop.eup %6356  ;;  %v4138_v35 = vmul.f32 %v6351_v26, %v4010_v32  ;;  %v4023_v40 = vsub.f32 2.0, %v3895_v31  ;;  %v11406_v26 = vld [vmem:[#allocation22_spill] sm:$0xff]  ;;  %4683 = vmatmul.f32.gmra.mxu2 %v521_v33  ;;  %4601 = vmatmul.f32.gmra.mxu0 %v521_v33 }
 0x542   : > { %6362 = vpow2.f32 %v3132_v44  ;;  %v3551_v53 = vadd.f32 %v9783_v15, %v9781_v60  ;;  %4724 = vmatmul.f32.gmra.mxu3 %v522_v56  ;;  %4642 = vmatmul.f32.gmra.mxu1 %v522_v56 }
 0x543   : > { %6364 = vpow2.f32 %v3134_v23  ;;  %v4151_v7 = vmul.f32 %v6353_v10, %v4023_v40  ;;  %v4376_v20 = vmul.f32 %v9496_v19, %v4138_v35  ;;  %v4377_v13 = vmul.f32 %v9511_v63, %v4138_v35 }
 0x544   : > { %3552 = vadd.xlane.f32.xlu2 %v3551_v53  ;;  %v6359_v22 = vpop.eup %6358 }
 0x545   : > { %v3586_v30 = vpop.xlane.xlu0 %3585  ;;  %v3881_v39 = vmul.f32 %v6359_v22, %v3589_v52  ;;  %4905 = vmatpush.xpose.msrb.mxu0 %v4376_v20  ;;  %4946 = vmatpush.xpose.msrb.mxu1 %v4377_v13  ;;  %v4402_v14 = vmul.f32 %v11406_v26, %v4151_v7  ;;  %v4403_v51 = vmul.f32 %v11407_v50, %v4151_v7  ;;  %v523_v7 = vld [vmem:[%s9191_s18 + $0xc0] sm:$0xff]  ;;  %v524_v20 = vld [vmem:[%s9191_s18 + $0xc8] sm:$0xff] }
 0x546   : > { %6366 = vrcp.f32 %v3586_v30  ;;  %v6361_v3 = vpop.eup %6360 }
 0x547   : > { %v3628_v32 = vpop.xlane.xlu2 %3627  ;;  %v4009_v19 = vsub.f32 2.0, %v3881_v39  ;;  %4990 = vmatpush.xpose.msrb.mxu2 %v4402_v14  ;;  %5031 = vmatpush.xpose.msrb.mxu3 %v4403_v51  ;;  %v3879_v44 = vmul.f32 %v6361_v3, %v3583_v38 }
 0x548   : > { %v9793_v10 = vpop.eup %6362  ;;  %6368 = vrcp.f32 %v3628_v32 }
 0x549   : > { %v9795_v63 = vpop.eup %6364  ;;  %v4137_v52 = vmul.f32 %v6359_v22, %v4009_v19  ;;  %v4007_v33 = vsub.f32 2.0, %v3879_v44  ;;  %4686 = vmatmul.f32.gmra.mxu2 %v523_v7  ;;  %4604 = vmatmul.f32.gmra.mxu0 %v523_v7 }
 0x54a   : > { %v3548_v31 = vadd.f32 %v9795_v63, %v9793_v10  ;;  %4727 = vmatmul.f32.gmra.mxu3 %v524_v20  ;;  %4645 = vmatmul.f32.gmra.mxu1 %v524_v20 }
 0x54b   : > { %v4374_v35 = vmul.f32 %v9525_v62, %v4137_v52  ;;  %v4375_v40 = vmul.f32 %v9531_v9, %v4137_v52  ;;  %v4135_v9 = vmul.f32 %v6361_v3, %v4007_v33  ;;  %v525_v52 = vld [vmem:[%s9191_s18 + $0xd0] sm:$0xff] }
 0x54c   : > { %v6367_v23 = vpop.eup %6366  ;;  %3549 = vadd.xlane.f32.xlu1 %v3548_v31  ;;  %v526_v31 = vld [vmem:[%s9191_s18 + $0xd8] sm:$0xff] }
 0x54d   : > { %v3880_v53 = vmul.f32 %v6367_v23, %v3586_v30  ;;  %4906 = vmatpush.xpose.msrb.mxu0 %v4374_v35  ;;  %4947 = vmatpush.xpose.msrb.mxu1 %v4375_v40  ;;  %v4370_v3 = vmul.f32 %v9535_v5, %v4135_v9 }
 0x54e   : > { %v6369_v13 = vpop.eup %6368  ;;  %v3622_v39 = vpop.xlane.xlu1 %3621 }
 0x54f   : > { %v4008_v56 = vsub.f32 2.0, %v3880_v53  ;;  %v3894_v22 = vmul.f32 %v6369_v13, %v3628_v32  ;;  %6370 = vrcp.f32 %v3622_v39 }
 0x550   : > { %v3625_v38 = vpop.xlane.xlu0 %3624 }
 0x551   : > { %v4136_v26 = vmul.f32 %v6367_v23, %v4008_v56  ;;  %v4022_v62 = vsub.f32 2.0, %v3894_v22  ;;  %6372 = vrcp.f32 %v3625_v38  ;;  %4689 = vmatmul.f32.gmra.mxu2 %v525_v52  ;;  %4607 = vmatmul.f32.gmra.mxu0 %v525_v52 }
 0x552   : > { %4730 = vmatmul.f32.gmra.mxu3 %v526_v31  ;;  %4648 = vmatmul.f32.gmra.mxu1 %v526_v31 }
 0x553   : > { %v4150_v30 = vmul.f32 %v6369_v13, %v4022_v62  ;;  %v4372_v14 = vmul.f32 %v9547_v18, %v4136_v26  ;;  %v4373_v50 = vmul.f32 %v9551_v17, %v4136_v26  ;;  %v4371_v18 = vmul.f32 %v9538_v45, %v4135_v9  ;;  %v527_v13 = vld [vmem:[%s9191_s18 + $0xe0] sm:$0xff] }
 0x555   : > { %v6371_v51 = vpop.eup %6370  ;;  %4907 = vmatpush.xpose.msrb.mxu0 %v4372_v14  ;;  %4948 = vmatpush.xpose.msrb.mxu1 %v4373_v50  ;;  %v4400_v32 = vmul.f32 %v9557_v59, %v4150_v30  ;;  %v4401_v19 = vmul.f32 %v9561_v42, %v4150_v30  ;;  %v529_v14 = vld [vmem:[%s9191_s18 + $0xf0] sm:$0xff]  ;;  %v530_v50 = vld [vmem:[%s9191_s18 + $0xf8] sm:$0xff] }
 0x556   : > { %v3892_v44 = vmul.f32 %v6371_v51, %v3622_v39  ;;  %v528_v39 = vld [vmem:[%s9191_s18 + $0xe8] sm:$0xff] }
 0x557   : > { %v6373_v23 = vpop.eup %6372  ;;  %v3580_v35 = vpop.xlane.xlu2 %3579  ;;  %4991 = vmatpush.xpose.msrb.mxu2 %v4400_v32  ;;  %5032 = vmatpush.xpose.msrb.mxu3 %v4401_v19 }
 0x558   : > { %v3893_v40 = vmul.f32 %v6373_v23, %v3625_v38  ;;  %6374 = vrcp.f32 %v3580_v35  ;;  %v4020_v17 = vsub.f32 2.0, %v3892_v44 }
 0x559   : > { %4908 = vmatpush.xpose.msrb.mxu0 %v4370_v3  ;;  %4949 = vmatpush.xpose.msrb.mxu1 %v4371_v18  ;;  %v532_v3 = vld [vmem:[%s9191_s18 + $0x108] sm:$0xff] }
 0x55a   : > { %v4021_v59 = vsub.f32 2.0, %v3893_v40  ;;  %v4148_v7 = vmul.f32 %v6371_v51, %v4020_v17  ;;  %4692 = vmatmul.f32.gmra.mxu2 %v527_v13  ;;  %4733 = vmatmul.f32.gmra.mxu3 %v528_v39 }
 0x55b   : > { %4610 = vmatmul.f32.gmra.mxu0 %v527_v13  ;;  %4651 = vmatmul.f32.gmra.mxu1 %v528_v39 }
 0x55c   : > { %v4149_v42 = vmul.f32 %v6373_v23, %v4021_v59  ;;  %v4396_v38 = vmul.f32 %v9569_v61, %v4148_v7  ;;  %v4397_v26 = vmul.f32 %v9575_v6, %v4148_v7  ;;  %v4429_v59 = vpop.f32.mrf.mxu0 }
 0x55e   : > { %v6375_v53 = vpop.eup %6374  ;;  %v3574_v20 = vpop.xlane.xlu1 %3573  ;;  %v4398_v5 = vmul.f32 %v9577_v43, %v4149_v42  ;;  %v4399_v45 = vmul.f32 %v9581_v27, %v4149_v42 }
 0x55f   : > { %v3878_v33 = vmul.f32 %v6375_v53, %v3580_v35  ;;  %6376 = vrcp.f32 %v3574_v20  ;;  %v531_v35 = vld [vmem:[%s9191_s18 + $0x100] sm:$0xff]  ;;  %v4470_v42 = vpop.f32.mrf.mxu1 }
 0x560   : > { %4992 = vmatpush.xpose.msrb.mxu2 %v4398_v5  ;;  %5033 = vmatpush.xpose.msrb.mxu3 %v4399_v45  ;;  %v3577_v56 = vpop.xlane.xlu0 %3576  ;;  %v4471_v7 = vadd.f32 %v4470_v42, %v4429_v59 }
 0x561   : > { %v4006_v22 = vsub.f32 2.0, %v3878_v33  ;;  %6378 = vrcp.f32 %v3577_v56  ;;  %v533_v33 = vld [vmem:[%s9191_s18 + $0x110] sm:$0xff] }
 0x562   : > { %4695 = vmatmul.f32.gmra.mxu2 %v529_v14  ;;  %4736 = vmatmul.f32.gmra.mxu3 %v530_v50  ;;  %5068 = vst [vmem:[%s9828_s24] sm:$0xff] %v4471_v7 }
 0x563   : > { %v4134_v43 = vmul.f32 %v6375_v53, %v4006_v22  ;;  %4613 = vmatmul.f32.gmra.mxu0 %v529_v14  ;;  %4654 = vmatmul.f32.gmra.mxu1 %v530_v50 }
 0x564   : > { %4993 = vmatpush.xpose.msrb.mxu2 %v4396_v38  ;;  %5034 = vmatpush.xpose.msrb.mxu3 %v4397_v26 }
 0x565   : > { %v6377_v27 = vpop.eup %6376  ;;  %v4368_v62 = vmul.f32 %v9592_v41, %v4134_v43  ;;  %v4369_v9 = vmul.f32 %v9595_v37, %v4134_v43  ;;  %v4432_v43 = vpop.f32.mrf.mxu0 }
 0x566   : > { %v3876_v30 = vmul.f32 %v6377_v27, %v3574_v20  ;;  %v4552_v20 = vpop.f32.mrf.mxu3 }
 0x567   : > { %v6379_v51 = vpop.eup %6378  ;;  %v3619_v32 = vpop.xlane.xlu2 %3618  ;;  %4909 = vmatpush.xpose.msrb.mxu0 %v4368_v62  ;;  %4950 = vmatpush.xpose.msrb.mxu1 %v4369_v9 }
 0x568   : > { %v3877_v61 = vmul.f32 %v6379_v51, %v3577_v56  ;;  %6380 = vrcp.f32 %v3619_v32  ;;  %v4004_v6 = vsub.f32 2.0, %v3876_v30  ;;  %v534_v56 = vld [vmem:[%s9191_s18 + $0x118] sm:$0xff] }
 0x56a   : > { %v4005_v19 = vsub.f32 2.0, %v3877_v61  ;;  %v4132_v37 = vmul.f32 %v6377_v27, %v4004_v6  ;;  %4838 = vmatmul.f32.vlgmr.msra.gmra.mxu2 %v531_v35  ;;  %4879 = vmatmul.f32.vlgmr.msra.gmra.mxu3 %v532_v3  ;;  %v4473_v27 = vpop.f32.mrf.mxu1 }
 0x56b   : > { %4756 = vmatmul.f32.vlgmr.msra.gmra.mxu0 %v531_v35  ;;  %4797 = vmatmul.f32.vlgmr.msra.gmra.mxu1 %v532_v3 }
 0x56c   : > { %v4133_v41 = vmul.f32 %v6379_v51, %v4005_v19  ;;  %v4364_v53 = vmul.f32 %v9603_v4, %v4132_v37 }
 0x56e   : > { %v6381_v52 = vpop.eup %6380  ;;  %v3613_v31 = vpop.xlane.xlu1 %3612  ;;  %v4366_v44 = vmul.f32 %v9611_v16, %v4133_v41  ;;  %v4367_v23 = vmul.f32 %v9615_v21, %v4133_v41  ;;  %v4365_v16 = vmul.f32 %v9609_v11, %v4132_v37  ;;  %v535_v41 = vld [vmem:[%s9191_s18 + $0x120] sm:$0xff] }
 0x56f   : > { %v3891_v18 = vmul.f32 %v6381_v52, %v3619_v32  ;;  %6382 = vrcp.f32 %v3613_v31  ;;  %v4511_v21 = vpop.f32.mrf.mxu2  ;;  %v4555_v30 = vpop.f32.mrf.mxu3 }
 0x570   : > { %4910 = vmatpush.xpose.msrb.mxu0 %v4366_v44  ;;  %4951 = vmatpush.xpose.msrb.mxu1 %v4367_v23  ;;  %v3616_v40 = vpop.xlane.xlu0 %3615  ;;  %v4553_v45 = vadd.f32 %v4552_v20, %v4511_v21  ;;  %v4435_v23 = vpop.f32.mrf.mxu0  ;;  %v11410_v21 = vld [vmem:[#allocation242_spill] sm:$0xff] }
 0x571   : > { %v4019_v17 = vsub.f32 2.0, %v3891_v18  ;;  %6384 = vrcp.f32 %v3616_v40 }
 0x572   : > { %5069 = vst [vmem:[%s9828_s24 + $0x8] sm:$0xff] %v4553_v45  ;;  %4841 = vmatmul.f32.gmra.mxu2 %v533_v33  ;;  %4882 = vmatmul.f32.gmra.mxu3 %v534_v56  ;;  %v4476_v35 = vpop.f32.mrf.mxu1  ;;  %v538_v45 = vld [vmem:[%s9191_s18 + $0x138] sm:$0xff] }
 0x573   : > { %v4147_v5 = vmul.f32 %v6381_v52, %v4019_v17  ;;  %4759 = vmatmul.f32.gmra.mxu0 %v533_v33  ;;  %4800 = vmatmul.f32.gmra.mxu1 %v534_v56  ;;  %v536_v52 = vld [vmem:[%s9191_s18 + $0x128] sm:$0xff] }
 0x574   : > { %4911 = vmatpush.xpose.msrb.mxu0 %v4364_v53  ;;  %4952 = vmatpush.xpose.msrb.mxu1 %v4365_v16  ;;  %v11409_v16 = vld [vmem:[#allocation241_spill] sm:$0xff] }
 0x575   : > { %v6383_v13 = vpop.eup %6382  ;;  %v4394_v4 = vmul.f32 %v9626_v2, %v4147_v5  ;;  %v4395_v11 = vmul.f32 %v9629_v55, %v4147_v5  ;;  %v4474_v55 = vadd.f32 %v4473_v27, %v4432_v43  ;;  %v537_v5 = vld [vmem:[%s9191_s18 + $0x130] sm:$0xff] }
 0x576   : > { %v3889_v39 = vmul.f32 %v6383_v13, %v3613_v31 }
 0x577   : > { %v6385_v22 = vpop.eup %6384  ;;  %v3571_v38 = vpop.xlane.xlu2 %3570  ;;  %4994 = vmatpush.xpose.msrb.mxu2 %v4394_v4  ;;  %5035 = vmatpush.xpose.msrb.mxu3 %v4395_v11  ;;  %5070 = vst [vmem:[%s9828_s24 + $0x10] sm:$0xff] %v4474_v55 }
 0x578   : > { %v3890_v26 = vmul.f32 %v6385_v22, %v3616_v40  ;;  %6386 = vrcp.f32 %v3571_v38  ;;  %v4017_v62 = vsub.f32 2.0, %v3889_v39  ;;  %v4514_v9 = vpop.f32.mrf.mxu2  ;;  %v4558_v17 = vpop.f32.mrf.mxu3 }
 0x579   : > { %v4556_v14 = vadd.f32 %v4555_v30, %v4514_v9  ;;  %v4438_v39 = vpop.f32.mrf.mxu0  ;;  %v11411_v30 = vld [vmem:[#allocation237_spill] sm:$0xff] }
 0x57a   : > { %v4018_v2 = vsub.f32 2.0, %v3890_v26  ;;  %v4145_v32 = vmul.f32 %v6383_v13, %v4017_v62  ;;  %4844 = vmatmul.f32.gmra.mxu2 %v535_v41  ;;  %4885 = vmatmul.f32.gmra.mxu3 %v536_v52  ;;  %v4479_v33 = vpop.f32.mrf.mxu1 }
 0x57b   : > { %5071 = vst [vmem:[%s9828_s24 + $0x18] sm:$0xff] %v4556_v14  ;;  %4762 = vmatmul.f32.gmra.mxu0 %v535_v41  ;;  %4803 = vmatmul.f32.gmra.mxu1 %v536_v52 }
 0x57c   : > { %v4146_v50 = vmul.f32 %v6385_v22, %v4018_v2  ;;  %v4390_v3 = vmul.f32 %v9637_v29, %v4145_v32 }
 0x57e   : > { %v6387_v51 = vpop.eup %6386  ;;  %v3565_v61 = vpop.xlane.xlu1 %3564  ;;  %v4392_v6 = vmul.f32 %v9645_v48, %v4146_v50  ;;  %v4393_v19 = vmul.f32 %v9649_v58, %v4146_v50  ;;  %v11408_v48 = vld [vmem:[#allocation232_spill] sm:$0xff]  ;;  %v4477_v58 = vadd.f32 %v4476_v35, %v4435_v23  ;;  %v11412_v50 = vld [vmem:[#allocation239_spill] sm:$0xff] }
 0x57f   : > { %v3875_v37 = vmul.f32 %v6387_v51, %v3571_v38  ;;  %6388 = vrcp.f32 %v3565_v61  ;;  %v4391_v18 = vmul.f32 %v11408_v48, %v4145_v32  ;;  %v4480_v38 = vadd.f32 %v4479_v33, %v4438_v39  ;;  %v539_v32 = vld [vmem:[%s9191_s18 + $0x140] sm:$0xff]  ;;  %v11414_v23 = vld [vmem:[#allocation103_spill] sm:$0xff] }
 0x580   : > { %4995 = vmatpush.xpose.msrb.mxu2 %v4392_v6  ;;  %5036 = vmatpush.xpose.msrb.mxu3 %v4393_v19  ;;  %v3568_v31 = vpop.xlane.xlu0 %3567  ;;  %v4517_v40 = vpop.f32.mrf.mxu2  ;;  %5072 = vst [vmem:[%s9828_s24 + $0x20] sm:$0xff] %v4477_v58 }
 0x581   : > { %v4003_v44 = vsub.f32 2.0, %v3875_v37  ;;  %6390 = vrcp.f32 %v3568_v31  ;;  %v4559_v42 = vadd.f32 %v4558_v17, %v4517_v40  ;;  %v4561_v43 = vpop.f32.mrf.mxu3  ;;  %5074 = vst [vmem:[%s9828_s24 + $0x30] sm:$0xff] %v4480_v38  ;;  %v4441_v52 = vpop.f32.mrf.mxu0 }
 0x582   : > { %4847 = vmatmul.f32.gmra.mxu2 %v537_v5  ;;  %4888 = vmatmul.f32.gmra.mxu3 %v538_v45  ;;  %v4482_v37 = vpop.f32.mrf.mxu1 }
 0x583   : > { %v4131_v59 = vmul.f32 %v6387_v51, %v4003_v44  ;;  %5073 = vst [vmem:[%s9828_s24 + $0x28] sm:$0xff] %v4559_v42  ;;  %4765 = vmatmul.f32.gmra.mxu0 %v537_v5  ;;  %4806 = vmatmul.f32.gmra.mxu1 %v538_v45 }
 0x584   : > { %4996 = vmatpush.xpose.msrb.mxu2 %v4390_v3  ;;  %5037 = vmatpush.xpose.msrb.mxu3 %v4391_v18  ;;  %v4483_v3 = vadd.f32 %v4482_v37, %v4441_v52 }
 0x585   : > { %v6389_v53 = vpop.eup %6388  ;;  %v4362_v7 = vmul.f32 %v11409_v16, %v4131_v59  ;;  %v4363_v20 = vmul.f32 %v11410_v21, %v4131_v59  ;;  %v541_v16 = vld [vmem:[%s9191_s18 + $0x150] sm:$0xff] }
 0x586   : > { %v3873_v29 = vmul.f32 %v6389_v53, %v3565_v61  ;;  %v540_v61 = vld [vmem:[%s9191_s18 + $0x148] sm:$0xff]  ;;  %5076 = vst [vmem:[%s9828_s24 + $0x40] sm:$0xff] %v4483_v3 }
 0x587   : > { %v6391_v13 = vpop.eup %6390  ;;  %v3610_v4 = vpop.xlane.xlu2 %3609  ;;  %4912 = vmatpush.xpose.msrb.mxu0 %v4362_v7  ;;  %4953 = vmatpush.xpose.msrb.mxu1 %v4363_v20  ;;  %v542_v7 = vld [vmem:[%s9191_s18 + $0x158] sm:$0xff] }
 0x588   : > { %v3874_v11 = vmul.f32 %v6391_v13, %v3568_v31  ;;  %6392 = vrcp.f32 %v3610_v4  ;;  %v4001_v56 = vsub.f32 2.0, %v3873_v29  ;;  %v4520_v26 = vpop.f32.mrf.mxu2  ;;  %v11413_v31 = vld [vmem:[#allocation243_spill] sm:$0xff] }
 0x589   : > { %v4562_v27 = vadd.f32 %v4561_v43, %v4520_v26  ;;  %v4564_v18 = vpop.f32.mrf.mxu3  ;;  %v4444_v5 = vpop.f32.mrf.mxu0  ;;  %v543_v43 = vld [vmem:[%s9191_s18 + $0x160] sm:$0xff] }
 0x58a   : > { %v4002_v22 = vsub.f32 2.0, %v3874_v11  ;;  %v4129_v55 = vmul.f32 %v6389_v53, %v4001_v56  ;;  %4850 = vmatmul.f32.gmra.mxu2 %v539_v32  ;;  %4891 = vmatmul.f32.gmra.mxu3 %v540_v61  ;;  %v4485_v45 = vpop.f32.mrf.mxu1 }
 0x58b   : > { %5075 = vst [vmem:[%s9828_s24 + $0x38] sm:$0xff] %v4562_v27  ;;  %4768 = vmatmul.f32.gmra.mxu0 %v539_v32  ;;  %4809 = vmatmul.f32.gmra.mxu1 %v540_v61  ;;  %v544_v27 = vld [vmem:[%s9191_s18 + $0x168] sm:$0xff] }
 0x58c   : > { %v4130_v62 = vmul.f32 %v6391_v13, %v4002_v22  ;;  %v4358_v44 = vmul.f32 %v11413_v31, %v4129_v55  ;;  %v4359_v35 = vmul.f32 %v11414_v23, %v4129_v55  ;;  %v4486_v13 = vadd.f32 %v4485_v45, %v4444_v5  ;;  %v546_v23 = vld [vmem:[%s9191_s18 + $0x178] sm:$0xff] }
 0x58e   : > { %v6393_v2 = vpop.eup %6392  ;;  %v3604_v9 = vpop.xlane.xlu1 %3603  ;;  %v4360_v14 = vmul.f32 %v11411_v30, %v4130_v62  ;;  %v4361_v51 = vmul.f32 %v11412_v50, %v4130_v62  ;;  %5078 = vst [vmem:[%s9828_s24 + $0x50] sm:$0xff] %v4486_v13 }
 0x58f   : > { %v3888_v6 = vmul.f32 %v6393_v2, %v3610_v4  ;;  %6394 = vrcp.f32 %v3604_v9 }
 0x590   : > { %4913 = vmatpush.xpose.msrb.mxu0 %v4360_v14  ;;  %4954 = vmatpush.xpose.msrb.mxu1 %v4361_v51  ;;  %v3607_v19 = vpop.xlane.xlu0 %3606  ;;  %v4523_v48 = vpop.f32.mrf.mxu2  ;;  %v11415_v14 = vld [vmem:[#allocation238_spill] sm:$0xff]  ;;  %v11416_v51 = vld [vmem:[#allocation240_spill] sm:$0xff] }
 0x591   : > { %v4016_v41 = vsub.f32 2.0, %v3888_v6  ;;  %6396 = vrcp.f32 %v3607_v19  ;;  %v4565_v40 = vadd.f32 %v4564_v18, %v4523_v48  ;;  %v4567_v11 = vpop.f32.mrf.mxu3  ;;  %v4447_v30 = vpop.f32.mrf.mxu0 }
 0x592   : > { %4853 = vmatmul.f32.gmra.mxu2 %v541_v16  ;;  %4894 = vmatmul.f32.gmra.mxu3 %v542_v7 }
 0x593   : > { %v4144_v58 = vmul.f32 %v6393_v2, %v4016_v41  ;;  %5077 = vst [vmem:[%s9828_s24 + $0x48] sm:$0xff] %v4565_v40  ;;  %4771 = vmatmul.f32.gmra.mxu0 %v541_v16  ;;  %4812 = vmatmul.f32.gmra.mxu1 %v542_v7 }
 0x594   : > { %4914 = vmatpush.xpose.msrb.mxu0 %v4358_v44  ;;  %4955 = vmatpush.xpose.msrb.mxu1 %v4359_v35  ;;  %v545_v44 = vld [vmem:[%s9191_s18 + $0x170] sm:$0xff] }
 0x595   : > { %v6395_v17 = vpop.eup %6394  ;;  %v4388_v59 = vmul.f32 %v9694_v12, %v4144_v58  ;;  %v4389_v42 = vmul.f32 %v9697_v8, %v4144_v58 }
 0x596   : > { %v3886_v53 = vmul.f32 %v6395_v17, %v3604_v9 }
 0x597   : > { %v6397_v21 = vpop.eup %6396  ;;  %v3562_v20 = vpop.xlane.xlu2 %3561  ;;  %4997 = vmatpush.xpose.msrb.mxu2 %v4388_v59  ;;  %5038 = vmatpush.xpose.msrb.mxu3 %v4389_v42 }
 0x598   : > { %v3887_v29 = vmul.f32 %v6397_v21, %v3607_v19  ;;  %6398 = vrcp.f32 %v3562_v20  ;;  %v4014_v12 = vsub.f32 2.0, %v3886_v53  ;;  %v4526_v4 = vpop.f32.mrf.mxu2 }
 0x599   : > { %v4568_v39 = vadd.f32 %v4567_v11, %v4526_v4  ;;  %v4570_v19 = vpop.f32.mrf.mxu3  ;;  %v4450_v58 = vpop.f32.mrf.mxu0 }
 0x59a   : > { %v4015_v8 = vsub.f32 2.0, %v3887_v29  ;;  %v4142_v22 = vmul.f32 %v6395_v17, %v4014_v12  ;;  %4856 = vmatmul.f32.gmra.mxu2 %v543_v43  ;;  %4897 = vmatmul.f32.gmra.mxu3 %v544_v27 }
 0x59b   : > { %5079 = vst [vmem:[%s9828_s24 + $0x58] sm:$0xff] %v4568_v39  ;;  %4774 = vmatmul.f32.gmra.mxu0 %v543_v43  ;;  %4815 = vmatmul.f32.gmra.mxu1 %v544_v27 }
 0x59c   : > { %v4143_v33 = vmul.f32 %v6397_v21, %v4015_v8  ;;  %v4384_v50 = vmul.f32 %v11415_v14, %v4142_v22 }
 0x59e   : > { %v6399_v56 = vpop.eup %6398  ;;  %v4386_v38 = vmul.f32 %v9711_v28, %v4143_v33  ;;  %v4387_v26 = vmul.f32 %v9715_v54, %v4143_v33  ;;  %v3556_v2 = vpop.xlane.xlu1 %3555  ;;  %v4385_v28 = vmul.f32 %v11416_v51, %v4142_v22 }
 0x59f   : > { %v3872_v62 = vmul.f32 %v6399_v56, %v3562_v20  ;;  %6400 = vrcp.f32 %v3556_v2  ;;  %v4488_v54 = vpop.f32.mrf.mxu1 }
 0x5a0   : > { %4998 = vmatpush.xpose.msrb.mxu2 %v4386_v38  ;;  %5039 = vmatpush.xpose.msrb.mxu3 %v4387_v26  ;;  %v4529_v32 = vpop.f32.mrf.mxu2  ;;  %v4489_v6 = vadd.f32 %v4488_v54, %v4447_v30  ;;  %v547_v54 = vld [vmem:[%s9191_s18 + $0x180] sm:$0xff] }
 0x5a1   : > { %v4000_v55 = vsub.f32 2.0, %v3872_v62  ;;  %v3559_v9 = vpop.xlane.xlu0 %3558  ;;  %v4571_v41 = vadd.f32 %v4570_v19, %v4529_v32  ;;  %v4573_v42 = vpop.f32.mrf.mxu3  ;;  %v548_v32 = vld [vmem:[%s9191_s18 + $0x188] sm:$0xff] }
 0x5a2   : > { %6402 = vrcp.f32 %v3559_v9  ;;  %5080 = vst [vmem:[%s9828_s24 + $0x60] sm:$0xff] %v4489_v6  ;;  %4859 = vmatmul.f32.gmra.mxu2 %v545_v44  ;;  %4900 = vmatmul.f32.gmra.mxu3 %v546_v23  ;;  %v4593_v8 = vpop.f32.mrf.mxu0 }
 0x5a3   : > { %v4128_v61 = vmul.f32 %v6399_v56, %v4000_v55  ;;  %5081 = vst [vmem:[%s9828_s24 + $0x68] sm:$0xff] %v4571_v41  ;;  %4777 = vmatmul.f32.gmra.mxu0 %v545_v44  ;;  %4818 = vmatmul.f32.gmra.mxu1 %v546_v23 }
 0x5a4   : > { %4999 = vmatpush.xpose.msrb.mxu2 %v4384_v50  ;;  %5040 = vmatpush.xpose.msrb.mxu3 %v4385_v28 }
 0x5a5   : > { %v4356_v52 = vmul.f32 %v9725_v0, %v4128_v61  ;;  %v4357_v37 = vmul.f32 %v9727_v49, %v4128_v61  ;;  %v6401_v31 = vpop.eup %6400 }
 0x5a6   : > { %v3870_v35 = vmul.f32 %v6401_v31, %v3556_v2 }
 0x5a7   : > { %v3601_v3 = vpop.xlane.xlu2 %3600  ;;  %4915 = vmatpush.xpose.msrb.mxu0 %v4356_v52  ;;  %4956 = vmatpush.xpose.msrb.mxu1 %v4357_v37  ;;  %v4491_v0 = vpop.f32.mrf.mxu1 }
 0x5a8   : > { %v6403_v48 = vpop.eup %6402  ;;  %6404 = vrcp.f32 %v3601_v3  ;;  %v4532_v40 = vpop.f32.mrf.mxu2  ;;  %v3998_v49 = vsub.f32 2.0, %v3870_v35  ;;  %v4492_v59 = vadd.f32 %v4491_v0, %v4450_v58 }
 0x5a9   : > { %v3871_v18 = vmul.f32 %v6403_v48, %v3559_v9  ;;  %v4574_v53 = vadd.f32 %v4573_v42, %v4532_v40  ;;  %v4716_v22 = vpop.f32.mrf.mxu3 }
 0x5aa   : > { %5082 = vst [vmem:[%s9828_s24 + $0x70] sm:$0xff] %v4492_v59  ;;  %v4126_v21 = vmul.f32 %v6401_v31, %v3998_v49 }
 0x5ab   : > { %v3999_v17 = vsub.f32 2.0, %v3871_v18  ;;  %5083 = vst [vmem:[%s9828_s24 + $0x78] sm:$0xff] %v4574_v53  ;;  %v551_v53 = vld [vmem:[%s9191_s18 + $0x1a0] sm:$0xff] }
 0x5ac   : > { %v4352_v39 = vmul.f32 %v9737_v34, %v4126_v21  ;;  %v4353_v33 = vmul.f32 %v9739_v47, %v4126_v21  ;;  %v4596_v47 = vpop.f32.mrf.mxu0 }
 0x5ad   : > { %v4127_v16 = vmul.f32 %v6403_v48, %v3999_v17  ;;  %v550_v48 = vld [vmem:[%s9191_s18 + $0x198] sm:$0xff] }
 0x5ae   : > { %v6405_v7 = vpop.eup %6404 }
 0x5af   : > { %v3885_v20 = vmul.f32 %v6405_v7, %v3601_v3  ;;  %v4354_v29 = vmul.f32 %v9741_v46, %v4127_v16  ;;  %v4355_v5 = vmul.f32 %v9745_v25, %v4127_v16  ;;  %v3598_v45 = vpop.xlane.xlu0 %3597  ;;  %v4634_v13 = vpop.f32.mrf.mxu1  ;;  %v549_v3 = vld [vmem:[%s9191_s18 + $0x190] sm:$0xff]  ;;  %v552_v16 = vld [vmem:[%s9191_s18 + $0x1a8] sm:$0xff] }
 0x5b0   : > { %6406 = vrcp.f32 %v3598_v45  ;;  %v4675_v4 = vpop.f32.mrf.mxu2  ;;  %v4635_v56 = vadd.f32 %v4634_v13, %v4593_v8 }
 0x5b1   : > { %v4013_v12 = vsub.f32 2.0, %v3885_v20  ;;  %4916 = vmatpush.xpose.msrb.mxu0 %v4354_v29  ;;  %4957 = vmatpush.xpose.msrb.mxu1 %v4355_v5  ;;  %v4717_v46 = vadd.f32 %v4716_v22, %v4675_v4  ;;  %v553_v5 = vld [vmem:[%s9191_s18 + $0x1b0] sm:$0xff] }
 0x5b2   : > { %5084 = vst [vmem:[%s9828_s24 + $0x80] sm:$0xff] %v4635_v56  ;;  %v556_v56 = vld [vmem:[%s9191_s18 + $0x1c8] sm:$0xff] }
 0x5b3   : > { %v4141_v11 = vmul.f32 %v6405_v7, %v4013_v12  ;;  %5085 = vst [vmem:[%s9828_s24 + $0x88] sm:$0xff] %v4717_v46 }
 0x5b4   : > { %v4599_v6 = vpop.f32.mrf.mxu0 }
 0x5b5   : > { %4917 = vmatpush.xpose.msrb.mxu0 %v4352_v39  ;;  %4958 = vmatpush.xpose.msrb.mxu1 %v4353_v33  ;;  %v4382_v25 = vmul.f32 %v9753_v36, %v4141_v11  ;;  %v4383_v38 = vmul.f32 %v9755_v1, %v4141_v11  ;;  %v4719_v36 = vpop.f32.mrf.mxu3  ;;  %v555_v33 = vld [vmem:[%s9191_s18 + $0x1c0] sm:$0xff] }
 0x5b6   : > { %v6407_v26 = vpop.eup %6406 }
 0x5b7   : > { %v3553_v43 = vpop.xlane.xlu2 %3552  ;;  %5000 = vmatpush.xpose.msrb.mxu2 %v4382_v25  ;;  %5041 = vmatpush.xpose.msrb.mxu3 %v4383_v38  ;;  %v3884_v34 = vmul.f32 %v6407_v26, %v3598_v45  ;;  %v4637_v62 = vpop.f32.mrf.mxu1  ;;  %v554_v45 = vld [vmem:[%s9191_s18 + $0x1b8] sm:$0xff] }
 0x5b8   : > { %6408 = vrcp.f32 %v3553_v43  ;;  %v4678_v2 = vpop.f32.mrf.mxu2  ;;  %v4638_v55 = vadd.f32 %v4637_v62, %v4596_v47  ;;  %v558_v47 = vld [vmem:[%s9191_s18 + $0x1d8] sm:$0xff] }
 0x5b9   : > { %v4012_v27 = vsub.f32 2.0, %v3884_v34  ;;  %v4720_v1 = vadd.f32 %v4719_v36, %v4678_v2  ;;  %v557_v34 = vld [vmem:[%s9191_s18 + $0x1d0] sm:$0xff] }
 0x5ba   : > { %5086 = vst [vmem:[%s9828_s24 + $0x90] sm:$0xff] %v4638_v55 }
 0x5bb   : > { %v4140_v9 = vmul.f32 %v6407_v26, %v4012_v27  ;;  %5087 = vst [vmem:[%s9828_s24 + $0x98] sm:$0xff] %v4720_v1  ;;  %v559_v1 = vld [vmem:[%s9191_s18 + $0x1e0] sm:$0xff] }
 0x5bd   : > { %v4380_v14 = vmul.f32 %v9767_v57, %v4140_v9  ;;  %v4381_v50 = vmul.f32 %v9769_v24, %v4140_v9  ;;  %v4722_v24 = vpop.f32.mrf.mxu3 }
 0x5be   : > { %v6409_v30 = vpop.eup %6408  ;;  %v4602_v58 = vpop.f32.mrf.mxu0 }
 0x5bf   : > { %v3869_v51 = vmul.f32 %v6409_v30, %v3553_v43  ;;  %v3550_v28 = vpop.xlane.xlu1 %3549  ;;  %5001 = vmatpush.xpose.msrb.mxu2 %v4380_v14  ;;  %5042 = vmatpush.xpose.msrb.mxu3 %v4381_v50  ;;  %v4640_v19 = vpop.f32.mrf.mxu1 }
 0x5c0   : > { %6410 = vrcp.f32 %v3550_v28  ;;  %v4681_v41 = vpop.f32.mrf.mxu2  ;;  %v4641_v57 = vadd.f32 %v4640_v19, %v4599_v6  ;;  %v562_v6 = vld [vmem:[%s9191_s18 + $0x1f8] sm:$0xff] }
 0x5c1   : > { %v3997_v61 = vsub.f32 2.0, %v3869_v51  ;;  %v4723_v37 = vadd.f32 %v4722_v24, %v4681_v41 }
 0x5c2   : > { %5002 = vmatmul.f32.vlgmr.msrb.gmra.mxu2 %v547_v54  ;;  %5043 = vmatmul.f32.vlgmr.msrb.gmra.mxu3 %v548_v32  ;;  %5088 = vst [vmem:[%s9828_s24 + $0xa0] sm:$0xff] %v4641_v57 }
 0x5c3   : > { %v4125_v52 = vmul.f32 %v6409_v30, %v3997_v61  ;;  %5089 = vst [vmem:[%s9828_s24 + $0xa8] sm:$0xff] %v4723_v37  ;;  %v560_v30 = vld [vmem:[%s9191_s18 + $0x1e8] sm:$0xff]  ;;  %v561_v61 = vld [vmem:[%s9191_s18 + $0x1f0] sm:$0xff] }
 0x5c5   : > { %v4350_v31 = vmul.f32 %v9781_v60, %v4125_v52  ;;  %v4351_v44 = vmul.f32 %v9783_v15, %v4125_v52  ;;  %v4725_v15 = vpop.f32.mrf.mxu3 }
 0x5c6   : > { %v6411_v23 = vpop.eup %6410  ;;  %v4605_v7 = vpop.f32.mrf.mxu0 }
 0x5c7   : > { %v3868_v35 = vmul.f32 %v6411_v23, %v3550_v28  ;;  %4918 = vmatpush.xpose.msrb.mxu0 %v4350_v31  ;;  %4959 = vmatpush.xpose.msrb.mxu1 %v4351_v44  ;;  %v4643_v0 = vpop.f32.mrf.mxu1 }
 0x5c8   : > { %v4684_v40 = vpop.f32.mrf.mxu2  ;;  %v4644_v60 = vadd.f32 %v4643_v0, %v4602_v58 }
 0x5c9   : > { %v3996_v18 = vsub.f32 2.0, %v3868_v35  ;;  %v4726_v17 = vadd.f32 %v4725_v15, %v4684_v40 }
 0x5ca   : > { %5005 = vmatmul.f32.gmra.mxu2 %v549_v3  ;;  %5046 = vmatmul.f32.gmra.mxu3 %v550_v48  ;;  %5090 = vst [vmem:[%s9828_s24 + $0xb0] sm:$0xff] %v4644_v60 }
 0x5cb   : > { %v4124_v49 = vmul.f32 %v6411_v23, %v3996_v18  ;;  %5091 = vst [vmem:[%s9828_s24 + $0xb8] sm:$0xff] %v4726_v17 }
 0x5cd   : > { %v4348_v59 = vmul.f32 %v9793_v10, %v4124_v49  ;;  %v4349_v42 = vmul.f32 %v9795_v63, %v4124_v49  ;;  %v4728_v29 = vpop.f32.mrf.mxu3 }
 0x5ce   : > { %v4608_v12 = vpop.f32.mrf.mxu0 }
 0x5cf   : > { %4919 = vmatpush.xpose.msrb.mxu0 %v4348_v59  ;;  %4960 = vmatpush.xpose.msrb.mxu1 %v4349_v42  ;;  %v4646_v21 = vpop.f32.mrf.mxu1 }
 0x5d0   : > { %v4687_v20 = vpop.f32.mrf.mxu2  ;;  %v4647_v10 = vadd.f32 %v4646_v21, %v4605_v7 }
 0x5d1   : > { %v4729_v63 = vadd.f32 %v4728_v29, %v4687_v20 }
 0x5d2   : > { %4920 = vmatmul.f32.vlgmr.msrb.gmra.mxu0 %v547_v54  ;;  %4961 = vmatmul.f32.vlgmr.msrb.gmra.mxu1 %v548_v32  ;;  %5092 = vst [vmem:[%s9828_s24 + $0xc0] sm:$0xff] %v4647_v10 }
 0x5d3   : > { %5008 = vmatmul.f32.gmra.mxu2 %v551_v53  ;;  %5049 = vmatmul.f32.gmra.mxu3 %v552_v16  ;;  %5093 = vst [vmem:[%s9828_s24 + $0xc8] sm:$0xff] %v4729_v63 }
 0x5d5   : > { %v4731_v11 = vpop.f32.mrf.mxu3 }
 0x5d7   : > { %v4649_v8 = vpop.f32.mrf.mxu1 }
 0x5d8   : > { %v4650_v13 = vadd.f32 %v4649_v8, %v4608_v12  ;;  %v4690_v4 = vpop.f32.mrf.mxu2  ;;  %v4611_v22 = vpop.f32.mrf.mxu0 }
 0x5d9   : > { %v4732_v39 = vadd.f32 %v4731_v11, %v4690_v4 }
 0x5da   : > { %4923 = vmatmul.f32.gmra.mxu0 %v549_v3  ;;  %4964 = vmatmul.f32.gmra.mxu1 %v550_v48  ;;  %5094 = vst [vmem:[%s9828_s24 + $0xd0] sm:$0xff] %v4650_v13 }
 0x5db   : > { %5011 = vmatmul.f32.gmra.mxu2 %v553_v5  ;;  %5052 = vmatmul.f32.gmra.mxu3 %v554_v45  ;;  %5095 = vst [vmem:[%s9828_s24 + $0xd8] sm:$0xff] %v4732_v39 }
 0x5dd   : > { %v4734_v26 = vpop.f32.mrf.mxu3 }
 0x5df   : > { %v4652_v46 = vpop.f32.mrf.mxu1 }
 0x5e0   : > { %v4653_v25 = vadd.f32 %v4652_v46, %v4611_v22  ;;  %v4693_v38 = vpop.f32.mrf.mxu2  ;;  %v4614_v27 = vpop.f32.mrf.mxu0 }
 0x5e1   : > { %v4735_v43 = vadd.f32 %v4734_v26, %v4693_v38 }
 0x5e2   : > { %4926 = vmatmul.f32.gmra.mxu0 %v551_v53  ;;  %4967 = vmatmul.f32.gmra.mxu1 %v552_v16  ;;  %5096 = vst [vmem:[%s9828_s24 + $0xe0] sm:$0xff] %v4653_v25 }
 0x5e3   : > { %5014 = vmatmul.f32.gmra.mxu2 %v555_v33  ;;  %5055 = vmatmul.f32.gmra.mxu3 %v556_v56  ;;  %5097 = vst [vmem:[%s9828_s24 + $0xe8] sm:$0xff] %v4735_v43 }
 0x5e5   : > { %v4737_v36 = vpop.f32.mrf.mxu3 }
 0x5e7   : > { %v4655_v62 = vpop.f32.mrf.mxu1 }
 0x5e8   : > { %v4656_v2 = vadd.f32 %v4655_v62, %v4614_v27  ;;  %v4696_v55 = vpop.f32.mrf.mxu2  ;;  %v4757_v14 = vpop.f32.mrf.mxu0 }
 0x5e9   : > { %v4738_v9 = vadd.f32 %v4737_v36, %v4696_v55 }
 0x5ea   : > { %4929 = vmatmul.f32.gmra.mxu0 %v553_v5  ;;  %4970 = vmatmul.f32.gmra.mxu1 %v554_v45  ;;  %5098 = vst [vmem:[%s9828_s24 + $0xf0] sm:$0xff] %v4656_v2 }
 0x5eb   : > { %5017 = vmatmul.f32.gmra.mxu2 %v557_v34  ;;  %5058 = vmatmul.f32.gmra.mxu3 %v558_v47  ;;  %5099 = vst [vmem:[%s9828_s24 + $0xf8] sm:$0xff] %v4738_v9 }
 0x5ed   : > { %v4880_v54 = vpop.f32.mrf.mxu3 }
 0x5ef   : > { %v4798_v50 = vpop.f32.mrf.mxu1 }
 0x5f0   : > { %v4799_v51 = vadd.f32 %v4798_v50, %v4757_v14  ;;  %v4839_v28 = vpop.f32.mrf.mxu2  ;;  %v4760_v19 = vpop.f32.mrf.mxu0 }
 0x5f1   : > { %v4881_v32 = vadd.f32 %v4880_v54, %v4839_v28 }
 0x5f2   : > { %4932 = vmatmul.f32.gmra.mxu0 %v555_v33  ;;  %4973 = vmatmul.f32.gmra.mxu1 %v556_v56  ;;  %5100 = vst [vmem:[%s9828_s24 + $0x100] sm:$0xff] %v4799_v51 }
 0x5f3   : > { %5020 = vmatmul.f32.gmra.mxu2 %v559_v1  ;;  %5061 = vmatmul.f32.gmra.mxu3 %v560_v30  ;;  %5101 = vst [vmem:[%s9828_s24 + $0x108] sm:$0xff] %v4881_v32 }
 0x5f5   : > { %v4883_v24 = vpop.f32.mrf.mxu3 }
 0x5f7   : > { %v4801_v41 = vpop.f32.mrf.mxu1 }
 0x5f8   : > { %v4802_v52 = vadd.f32 %v4801_v41, %v4760_v19  ;;  %v4842_v57 = vpop.f32.mrf.mxu2  ;;  %v4763_v31 = vpop.f32.mrf.mxu0 }
 0x5f9   : > { %v4884_v37 = vadd.f32 %v4883_v24, %v4842_v57 }
 0x5fa   : > { %4935 = vmatmul.f32.gmra.mxu0 %v557_v34  ;;  %4976 = vmatmul.f32.gmra.mxu1 %v558_v47  ;;  %5102 = vst [vmem:[%s9828_s24 + $0x110] sm:$0xff] %v4802_v52 }
 0x5fb   : > { %5023 = vmatmul.f32.gmra.mxu2 %v561_v61  ;;  %5064 = vmatmul.f32.gmra.mxu3 %v562_v6  ;;  %5103 = vst [vmem:[%s9828_s24 + $0x118] sm:$0xff] %v4884_v37 }
 0x5fd   : > { %v4886_v3 = vpop.f32.mrf.mxu3 }
 0x5ff   : > { %v4804_v44 = vpop.f32.mrf.mxu1 }
 0x600   : > { %v4805_v23 = vadd.f32 %v4804_v44, %v4763_v31  ;;  %v4845_v35 = vpop.f32.mrf.mxu2  ;;  %v4766_v18 = vpop.f32.mrf.mxu0 }
 0x601   : > { %v4887_v48 = vadd.f32 %v4886_v3, %v4845_v35 }
 0x602   : > { %4938 = vmatmul.f32.gmra.mxu0 %v559_v1  ;;  %4979 = vmatmul.f32.gmra.mxu1 %v560_v30  ;;  %5104 = vst [vmem:[%s9828_s24 + $0x120] sm:$0xff] %v4805_v23 }
 0x603   : > { %5105 = vst [vmem:[%s9828_s24 + $0x128] sm:$0xff] %v4887_v48 }
 0x605   : > { %v4889_v49 = vpop.f32.mrf.mxu3 }
 0x607   : > { %v4807_v58 = vpop.f32.mrf.mxu1 }
 0x608   : > { %v4808_v0 = vadd.f32 %v4807_v58, %v4766_v18  ;;  %v4848_v40 = vpop.f32.mrf.mxu2  ;;  %v4769_v15 = vpop.f32.mrf.mxu0 }
 0x609   : > { %v4890_v60 = vadd.f32 %v4889_v49, %v4848_v40 }
 0x60a   : > { %4941 = vmatmul.f32.gmra.mxu0 %v561_v61  ;;  %4982 = vmatmul.f32.gmra.mxu1 %v562_v6  ;;  %5106 = vst [vmem:[%s9828_s24 + $0x130] sm:$0xff] %v4808_v0 }
 0x60b   : > { %5107 = vst [vmem:[%s9828_s24 + $0x138] sm:$0xff] %v4890_v60 }
 0x60d   : > { %v4892_v53 = vpop.f32.mrf.mxu3 }
 0x60f   : > { %v4810_v17 = vpop.f32.mrf.mxu1 }
 0x610   : > { %v4811_v59 = vadd.f32 %v4810_v17, %v4769_v15  ;;  %v4851_v42 = vpop.f32.mrf.mxu2  ;;  %v4772_v7 = vpop.f32.mrf.mxu0 }
 0x611   : > { %v4893_v16 = vadd.f32 %v4892_v53, %v4851_v42 }
 0x612   : > { %5108 = vst [vmem:[%s9828_s24 + $0x140] sm:$0xff] %v4811_v59 }
 0x613   : > { %5109 = vst [vmem:[%s9828_s24 + $0x148] sm:$0xff] %v4893_v16 }
 0x615   : > { %v4895_v29 = vpop.f32.mrf.mxu3 }
 0x617   : > { %v4813_v21 = vpop.f32.mrf.mxu1 }
 0x618   : > { %v4814_v20 = vadd.f32 %v4813_v21, %v4772_v7  ;;  %v4854_v10 = vpop.f32.mrf.mxu2  ;;  %v4775_v5 = vpop.f32.mrf.mxu0 }
 0x619   : > { %v4896_v63 = vadd.f32 %v4895_v29, %v4854_v10 }
 0x61a   : > { %5110 = vst [vmem:[%s9828_s24 + $0x150] sm:$0xff] %v4814_v20 }
 0x61b   : > { %5111 = vst [vmem:[%s9828_s24 + $0x158] sm:$0xff] %v4896_v63 }
 0x61d   : > { %v4898_v13 = vpop.f32.mrf.mxu3 }
 0x61f   : > { %v4816_v45 = vpop.f32.mrf.mxu1 }
 0x620   : > { %v4817_v12 = vadd.f32 %v4816_v45, %v4775_v5  ;;  %v4857_v8 = vpop.f32.mrf.mxu2  ;;  %v4778_v11 = vpop.f32.mrf.mxu0 }
 0x621   : > { %v4899_v4 = vadd.f32 %v4898_v13, %v4857_v8 }
 0x622   : > { %5112 = vst [vmem:[%s9828_s24 + $0x160] sm:$0xff] %v4817_v12 }
 0x623   : > { %5113 = vst [vmem:[%s9828_s24 + $0x168] sm:$0xff] %v4899_v4 }
 0x625   : > { %v4901_v22 = vpop.f32.mrf.mxu3 }
 0x627   : > { %v4819_v39 = vpop.f32.mrf.mxu1 }
 0x628   : > { %v4820_v33 = vadd.f32 %v4819_v39, %v4778_v11  ;;  %v4860_v56 = vpop.f32.mrf.mxu2 }
 0x629   : > { %v4902_v46 = vadd.f32 %v4901_v22, %v4860_v56 }
 0x62a   : > { %5114 = vst [vmem:[%s9828_s24 + $0x170] sm:$0xff] %v4820_v33 }
 0x62b   : > { %5115 = vst [vmem:[%s9828_s24 + $0x178] sm:$0xff] %v4902_v46 }
 0x645   : > { %v5003_v25 = vpop.f32.mrf.mxu2  ;;  %v5044_v38 = vpop.f32.mrf.mxu3 }
 0x646   : > { %v5045_v26 = vadd.f32 %v5044_v38, %v5003_v25 }
 0x648   : > { %5117 = vst [vmem:[%s9828_s24 + $0x188] sm:$0xff] %v5045_v26 }
 0x64d   : > { %v5006_v43 = vpop.f32.mrf.mxu2  ;;  %v5047_v34 = vpop.f32.mrf.mxu3 }
 0x64e   : > { %v5048_v62 = vadd.f32 %v5047_v34, %v5006_v43 }
 0x64f   : > { %v4921_v47 = vpop.f32.mrf.mxu0  ;;  %v4962_v27 = vpop.f32.mrf.mxu1 }
 0x650   : > { %v4963_v2 = vadd.f32 %v4962_v27, %v4921_v47  ;;  %5119 = vst [vmem:[%s9828_s24 + $0x198] sm:$0xff] %v5048_v62 }
 0x652   : > { %5116 = vst [vmem:[%s9828_s24 + $0x180] sm:$0xff] %v4963_v2 }
 0x656   : > { %v5009_v55 = vpop.f32.mrf.mxu2  ;;  %v5050_v36 = vpop.f32.mrf.mxu3 }
 0x657   : > { %v4924_v9 = vpop.f32.mrf.mxu0  ;;  %v4965_v1 = vpop.f32.mrf.mxu1  ;;  %v5051_v30 = vadd.f32 %v5050_v36, %v5009_v55 }
 0x658   : > { %v4966_v14 = vadd.f32 %v4965_v1, %v4924_v9 }
 0x659   : > { %5121 = vst [vmem:[%s9828_s24 + $0x1a8] sm:$0xff] %v5051_v30 }
 0x65a   : > { %5118 = vst [vmem:[%s9828_s24 + $0x190] sm:$0xff] %v4966_v14 }
 0x65e   : > { %v5012_v50 = vpop.f32.mrf.mxu2  ;;  %v5053_v51 = vpop.f32.mrf.mxu3 }
 0x65f   : > { %v4927_v28 = vpop.f32.mrf.mxu0  ;;  %v4968_v54 = vpop.f32.mrf.mxu1  ;;  %v5054_v32 = vadd.f32 %v5053_v51, %v5012_v50 }
 0x660   : > { %v4969_v61 = vadd.f32 %v4968_v54, %v4927_v28 }
 0x661   : > { %5123 = vst [vmem:[%s9828_s24 + $0x1b8] sm:$0xff] %v5054_v32 }
 0x662   : > { %5120 = vst [vmem:[%s9828_s24 + $0x1a0] sm:$0xff] %v4969_v61 }
 0x666   : > { %v5015_v6 = vpop.f32.mrf.mxu2  ;;  %v5056_v19 = vpop.f32.mrf.mxu3 }
 0x667   : > { %v4930_v41 = vpop.f32.mrf.mxu0  ;;  %v4971_v52 = vpop.f32.mrf.mxu1  ;;  %v5057_v57 = vadd.f32 %v5056_v19, %v5015_v6 }
 0x668   : > { %v4972_v24 = vadd.f32 %v4971_v52, %v4930_v41 }
 0x669   : > { %5125 = vst [vmem:[%s9828_s24 + $0x1c8] sm:$0xff] %v5057_v57 }
 0x66a   : > { %5122 = vst [vmem:[%s9828_s24 + $0x1b0] sm:$0xff] %v4972_v24 }
 0x66e   : > { %v5018_v37 = vpop.f32.mrf.mxu2  ;;  %v5059_v31 = vpop.f32.mrf.mxu3 }
 0x66f   : > { %v4933_v44 = vpop.f32.mrf.mxu0  ;;  %v4974_v23 = vpop.f32.mrf.mxu1  ;;  %v5060_v35 = vadd.f32 %v5059_v31, %v5018_v37 }
 0x670   : > { %v4975_v3 = vadd.f32 %v4974_v23, %v4933_v44 }
 0x671   : > { %5127 = vst [vmem:[%s9828_s24 + $0x1d8] sm:$0xff] %v5060_v35 }
 0x672   : > { %5124 = vst [vmem:[%s9828_s24 + $0x1c0] sm:$0xff] %v4975_v3 }
 0x676   : > { %v5021_v48 = vpop.f32.mrf.mxu2  ;;  %v5062_v18 = vpop.f32.mrf.mxu3 }
 0x677   : > { %v4936_v58 = vpop.f32.mrf.mxu0  ;;  %v4977_v0 = vpop.f32.mrf.mxu1  ;;  %v5063_v40 = vadd.f32 %v5062_v18, %v5021_v48 }
 0x678   : > { %v4978_v49 = vadd.f32 %v4977_v0, %v4936_v58 }
 0x679   : > { %5129 = vst [vmem:[%s9828_s24 + $0x1e8] sm:$0xff] %v5063_v40 }
 0x67a   : > { %5126 = vst [vmem:[%s9828_s24 + $0x1d0] sm:$0xff] %v4978_v49 }
 0x67e   : > { %v5024_v60 = vpop.f32.mrf.mxu2  ;;  %v5065_v15 = vpop.f32.mrf.mxu3 }
 0x67f   : > { %v4939_v17 = vpop.f32.mrf.mxu0  ;;  %v4980_v59 = vpop.f32.mrf.mxu1  ;;  %v5066_v42 = vadd.f32 %v5065_v15, %v5024_v60 }
 0x680   : > { %v4981_v53 = vadd.f32 %v4980_v59, %v4939_v17 }
 0x681   : > { %5131 = vst [vmem:[%s9828_s24 + $0x1f8] sm:$0xff] %v5066_v42 }
 0x682   : > { %5128 = vst [vmem:[%s9828_s24 + $0x1e0] sm:$0xff] %v4981_v53 }
 0x687   : > { %v4942_v16 = vpop.f32.mrf.mxu0  ;;  %v4983_v7 = vpop.f32.mrf.mxu1 }
 0x688   : > { %v4984_v21 = vadd.f32 %v4983_v7, %v4942_v16 }
 0x68a   : > { %5130 = vst [vmem:[%s9828_s24 + $0x1f0] sm:$0xff] %v4984_v21 }
 0x68b   : > { %6529 = shalt.err (!%p6526_p13)
}
 0x68c   : > { %s6592_s11 = smov 256   ;;  %s6593_s19 = smov 16  }
 0x68d   : > { %5573 = dma.vmem_to_hbm [thread:$0]  (%p6669_p9), %s5149_s21, 8192, %s5151_s22, %s5133_s15, %s6592_s11, %s6592_s11, %s6593_s19  }
 0x68e PF: > { %s11418_s1 = sld [smem:[#allocation14_spill]]  ;;  %s5165_s16 = sand.u32 1, %s6568_s12  }
 0x68f   : > { %p5586_p0 = pnand %p5292_p12, %p6676_p11  ;;  %s5166_s20 = scalar_lea.sflag [#allocation4], %s5165_s16 }
 0x691   : > { %p5587_p1 = pneg %p5586_p0 }
 0x693   : > { %6563 = dma.done.wait (%p5587_p1), %s5166_s20, 8192  }
 0x694   : > { %6565 = vsyncadd (%p5587_p1), %s5166_s20, 4294959104  ;;  %s22_s17 = sadd.s32 1, %s11418_s1   ;;  %s11419_s14 = sld [smem:[#allocation12_spill]] }
 0x695   : > { %p19_p2 = scmp.ge.s32.totalorder %s22_s17, 4   ;;  %s11420_s26 = sld [smem:[#allocation16_spill]] }
 0x696   : > { %s11421_s15 = sld [smem:[#allocation13_spill]]  ;;  %s11423_s12 = smov %s6572_s13 }
 0x697   : > { %s11422_s16 = sld [smem:[#allocation15_spill]]  ;;  %21 = sbr.rel (!%p19_p2) target bundleno = 10 (0xa), region = 101 }
 0x69a   : > { %s11424_s13 = smov %s11419_s14 }
 0x69b   : > { %s11425_s14 = smov %s11420_s26 }
 0x69c   :  { %5172 = vsyncpa [#allocation3], 1 }
 0x69d   :  { %5174 = vsyncpa [#allocation3 + $0x1], 1 }
 0x69e   :  { %5175 = vsyncpa [#allocation6], 1 }
 0x69f   :  { %5177 = vsyncpa [#allocation6 + $0x1], 1 }
 0x6a0   :  { %5178 = vsyncpa [#allocation4], 1 }
 0x6a1   :  { %5180 = vsyncpa [#allocation4 + $0x1], 1 }

</bundles_post_ra>
